<compile_context>
chip_gen: v7x
topology: tpu7x:2x2x1
jax: 0.10.0
libtpu: 0.0.40
codegen_flags: <defaults>
</compile_context>

<pallas_src>
import math

import jax
import jax.numpy as jnp
from jax.experimental import pallas as pl
from jax.experimental.pallas import tpu as pltpu

LANE = 128


def _round_up(x, m):
    return ((x + m - 1) // m) * m


# ---------------------------------------------------------------------------
# Fused ensemble kernel: every member's multi-layer LSTM + linear head + the
# ensemble mean / unbiased-std reduction, all in one Pallas kernel.
# ---------------------------------------------------------------------------
def _make_fused_ensemble_kernel(member_layer_counts, member_hp, seq_len, batch, out_len):
    M = len(member_layer_counts)

    def kernel(*refs):
        # refs layout:
        #   x_ref (T*B, D)  time-major flattened input
        #   per member: [w_ih_l (D_l,4*HP), w_hh_l (HP,4*HP), b_l (1,4*HP)] * nl,
        #               w_head (HP, P), b_head (1, P)
        #   mean_ref (B, P), std_ref (B, P)
        #   seq_ref  (T*B, HP_max) scratch for inter-layer activations
        idx = 0
        x_ref = refs[idx]
        idx += 1
        members = []
        for nl in member_layer_counts:
            layers = []
            for _ in range(nl):
                layers.append((refs[idx], refs[idx + 1], refs[idx + 2]))
                idx += 3
            w_head_ref = refs[idx]
            b_head_ref = refs[idx + 1]
            idx += 2
            members.append((layers, w_head_ref, b_head_ref))
        mean_ref = refs[idx]
        std_ref = refs[idx + 1]
        seq_ref = refs[idx + 2]

        B, T = batch, seq_len
        x_flat = x_ref[...].astype(jnp.float32)  # (T*B, D)

        preds = []
        for m, (layers, w_head_ref, b_head_ref) in enumerate(members):
            HP = member_hp[m]
            nl = len(layers)
            layer_in = x_flat  # (T*B, D_l)
            h = None
            for l, (w_ih_ref, w_hh_ref, b_ref) in enumerate(layers):
                w_ih = w_ih_ref[...]  # (D_l, 4*HP)
                w_hh = w_hh_ref[...]  # (HP, 4*HP)
                bias = b_ref[...]     # (1, 4*HP)

                # Hoisted input projection + bias: one matmul covering all T steps,
                # bias broadcast happens once (not per timestep).
                x_proj = (
                    jnp.dot(layer_in, w_ih, preferred_element_type=jnp.float32) + bias
                )  # (T*B, 4*HP)

                h = jnp.zeros((B, HP), jnp.float32)
                c = jnp.zeros((B, HP), jnp.float32)
                for t in range(T):
                    # single MXU push per step (the unavoidable recurrence)
                    gates = (
                        x_proj[t * B:(t + 1) * B, :]
                        + jnp.dot(h, w_hh, preferred_element_type=jnp.float32)
                    )  # (B, 4*HP); PyTorch gate order i, f, g, o; lane-aligned blocks
                    i_g = jax.nn.sigmoid(gates[:, 0 * HP:1 * HP])
                    f_g = jax.nn.sigmoid(gates[:, 1 * HP:2 * HP])
                    g_g = jnp.tanh(gates[:, 2 * HP:3 * HP])
                    o_g = jax.nn.sigmoid(gates[:, 3 * HP:4 * HP])
                    c = f_g * c + i_g * g_g
                    h = o_g * jnp.tanh(c)
                    if l < nl - 1:
                        # time-major 2-D store (no size-1 strided middle dim)
                        seq_ref[pl.ds(t * B, B), pl.ds(0, HP)] = h
                if l < nl - 1:
                    layer_in = seq_ref[pl.ds(0, T * B), pl.ds(0, HP)]  # (T*B, HP)

            pred = (
                jnp.dot(h, w_head_ref[...], preferred_element_type=jnp.float32)
                + b_head_ref[...]
            )  # (B, P)
            preds.append(pred)

        # Ensemble statistics fused in-kernel: mean + unbiased std (ddof=1, like torch).
        psum = preds[0]
        for p in preds[1:]:
            psum = psum + p
        mean = psum * (1.0 / M)
        mean_ref[...] = mean
        if M > 1:
            ss = jnp.zeros_like(mean)
            for p in preds:
                d = p - mean
                ss = ss + d * d
            std_ref[...] = jnp.sqrt(ss * (1.0 / (M - 1)))
        else:
            # torch.std over a single member is NaN (unbiased); emit zeros instead.
            std_ref[...] = jnp.zeros_like(mean)

    return kernel


# ---------------------------------------------------------------------------
# Wrapper-side parameter preparation: pad hidden -> multiple of 128 lanes so
# each gate block starts on a lane boundary.  Padded lanes stay exactly zero.
# ---------------------------------------------------------------------------
def _pad_gate_blocks(a, H, HP):
    """(..., 4*H) -> (..., 4*HP): each of the 4 gate blocks zero-padded to HP lanes."""
    if H == HP:
        return a
    lead = a.shape[:-1]
    a4 = a.reshape(lead + (4, H))
    pad = [(0, 0)] * len(lead) + [(0, 0), (0, HP - H)]
    return jnp.pad(a4, pad).reshape(lead + (4 * HP,))


def prepare_member_for_kernel(params):
    H = params["hidden"]
    HP = max(LANE, _round_up(H, LANE))
    nl = params["num_layers"]
    w_ih_p, w_hh_p, b_p = [], [], []
    for l in range(nl):
        w_ih = _pad_gate_blocks(params["w_ih"][l], H, HP)          # (D_l, 4*HP)
        if l > 0 and HP != H:
            # layer>0 input is the (padded) previous-layer hidden state
            w_ih = jnp.pad(w_ih, ((0, HP - H), (0, 0)))
        w_hh = _pad_gate_blocks(params["w_hh"][l], H, HP)
        if HP != H:
            w_hh = jnp.pad(w_hh, ((0, HP - H), (0, 0)))            # (HP, 4*HP)
        b = _pad_gate_blocks(params["b"][l], H, HP)                # (1, 4*HP)
        w_ih_p.append(w_ih)
        w_hh_p.append(w_hh)
        b_p.append(b)
    w_head = params["w_head"]
    if HP != H:
        w_head = jnp.pad(w_head, ((0, HP - H), (0, 0)))            # (HP, P)
    return {
        "hp": HP,
        "w_ih": w_ih_p,
        "w_hh": w_hh_p,
        "b": b_p,
        "w_head": w_head,
        "b_head": params["b_head"],
    }


def deep_ensemble_forward(x, members):
    """Returns (mean_prediction, epistemic_uncertainty), each squeezed like torch .squeeze().

    Requires >=2 members for a finite std (torch semantics would give NaN for 1 member).
    """
    B, T, D = x.shape
    P = members[0]["w_head"].shape[1]

    # time-major flatten so per-step rows of the hoisted projection are contiguous
    x_tm = jnp.transpose(x, (1, 0, 2)).reshape(T * B, D).astype(jnp.float32)

    member_layer_counts = []
    member_hp = []
    inputs = [x_tm]
    for p in members:
        pk = prepare_member_for_kernel(p)
        member_layer_counts.append(p["num_layers"])
        member_hp.append(pk["hp"])
        for l in range(p["num_layers"]):
            inputs += [pk["w_ih"][l], pk["w_hh"][l], pk["b"][l]]
        inputs += [pk["w_head"], pk["b_head"]]

    hp_max = max(member_hp)
    kernel = _make_fused_ensemble_kernel(member_layer_counts, member_hp, T, B, P)

    mean, std = pl.pallas_call(
        kernel,
        out_shape=(
            jax.ShapeDtypeStruct((B, P), jnp.float32),
            jax.ShapeDtypeStruct((B, P), jnp.float32),
        ),
        in_specs=[pl.BlockSpec(memory_space=pltpu.MemorySpace.VMEM)] * len(inputs),
        out_specs=(
            pl.BlockSpec(memory_space=pltpu.MemorySpace.VMEM),
            pl.BlockSpec(memory_space=pltpu.MemorySpace.VMEM),
        ),
        scratch_shapes=[pltpu.VMEM((T * B, hp_max), jnp.float32)],
    )(*inputs)

    # .squeeze() in torch: drop all size-1 dims
    return jnp.squeeze(mean), jnp.squeeze(std)


# ---------------------------------------------------------------------------
# Parameter construction (deterministic, mirrors PyTorch LSTM init scale)
# ---------------------------------------------------------------------------
def init_member_params(key, input_size, hidden, num_layers, out_len):
    stdv = 1.0 / math.sqrt(hidden)
    w_ih, w_hh, b = [], [], []
    for l in range(num_layers):
        d_in = input_size if l == 0 else hidden
        key, k1, k2, k3, k4 = jax.random.split(key, 5)
        # stored pre-transposed: (D_in, 4H) and (H, 4H)
        w_ih.append(jax.random.uniform(k1, (d_in, 4 * hidden), jnp.float32, -stdv, stdv))
        w_hh.append(jax.random.uniform(k2, (hidden, 4 * hidden), jnp.float32, -stdv, stdv))
        # b = b_ih + b_hh (two independent uniforms, like PyTorch), folded into one bias
        b_ih = jax.random.uniform(k3, (1, 4 * hidden), jnp.float32, -stdv, stdv)
        b_hh = jax.random.uniform(k4, (1, 4 * hidden), jnp.float32, -stdv, stdv)
        b.append(b_ih + b_hh)
    key, k5, k6 = jax.random.split(key, 3)
    w_head = jax.random.uniform(k5, (hidden, out_len), jnp.float32, -stdv, stdv)
    b_head = jax.random.uniform(k6, (1, out_len), jnp.float32, -stdv, stdv)
    return {
        "num_layers": num_layers,
        "hidden": hidden,
        "w_ih": w_ih,
        "w_hh": w_hh,
        "b": b,
        "w_head": w_head,
        "b_head": b_head,
    }


# ---------------------------------------------------------------------------
# Pure-JAX reference (unpadded) for correctness check
# ---------------------------------------------------------------------------
def _ref_member_forward(x, params):
    B, T, _ = x.shape
    H = params["hidden"]
    layer_in = x
    h = None
    for l in range(params["num_layers"]):
        w_ih, w_hh, bias = params["w_ih"][l], params["w_hh"][l], params["b"][l]
        h = jnp.zeros((B, H), jnp.float32)
        c = jnp.zeros((B, H), jnp.float32)
        hs = []
        for t in range(T):
            g = layer_in[:, t, :] @ w_ih + h @ w_hh + bias
            i_g = jax.nn.sigmoid(g[:, :H])
            f_g = jax.nn.sigmoid(g[:, H:2 * H])
            g_g = jnp.tanh(g[:, 2 * H:3 * H])
            o_g = jax.nn.sigmoid(g[:, 3 * H:])
            c = f_g * c + i_g * g_g
            h = o_g * jnp.tanh(c)
            hs.append(h)
        layer_in = jnp.stack(hs, axis=1)
    return h @ params["w_head"] + params["b_head"]


def _ref_forward(x, members):
    preds = jnp.stack([_ref_member_forward(x, p) for p in members], axis=0)  # (M,B,P)
    mean = preds.mean(axis=0)
    std = jnp.sqrt(((preds - mean[None]) ** 2).sum(axis=0) / (preds.shape[0] - 1))
    return jnp.squeeze(mean), jnp.squeeze(std)


if __name__ == "__main__":
    # Small, module-consistent shapes: self.input_size = input_size + latent_dim
    batch = 2
    seq_len = 8
    input_size = 15
    latent_dim = 1
    feat = input_size + latent_dim          # 16
    output_sequence_length = 12
    num_members = 3

    key = jax.random.PRNGKey(0)
    key, kx = jax.random.split(key)
    x = jax.random.normal(kx, (batch, seq_len, feat), jnp.float32)

    # Deterministic stand-ins for the np.random member configs in __init__.
    member_cfgs = [(1, 64), (2, 32), (1, 32)]  # (lstm_num_layers, lstm_hidden_size)
    members = []
    for (nl, hs) in member_cfgs:
        key, km = jax.random.split(key)
        members.append(init_member_params(km, feat, hs, nl, output_sequence_length))

    mean_pred, epistemic = deep_ensemble_forward(x, members)
    jax.block_until_ready((mean_pred, epistemic))

    assert mean_pred.shape == (batch, output_sequence_length)
    assert epistemic.shape == (batch, output_sequence_length)
    assert bool(jnp.all(jnp.isfinite(mean_pred))) and bool(jnp.all(jnp.isfinite(epistemic)))
    assert bool(jnp.all(epistemic >= 0.0))

    # Correctness vs. pure-JAX reference (loose tolerance for MXU f32 path differences).
    ref_mean, ref_std = _ref_forward(x, members)
    assert bool(jnp.allclose(mean_pred, ref_mean, rtol=1e-2, atol=1e-3)), "mean mismatch"
    assert bool(jnp.allclose(epistemic, ref_std, rtol=1e-2, atol=1e-3)), "std mismatch"

    print("KERNEL_OK")
</pallas_src>

<mosaic_0001>
module attributes {stable_mosaic.version = 11 : i64} {
  func.func @kernel(%arg0: memref<16x16xf32, #tpu.memory_space<vmem>>, %arg1: memref<16x512xf32, #tpu.memory_space<vmem>>, %arg2: memref<128x512xf32, #tpu.memory_space<vmem>>, %arg3: memref<1x512xf32, #tpu.memory_space<vmem>>, %arg4: memref<128x12xf32, #tpu.memory_space<vmem>>, %arg5: memref<1x12xf32, #tpu.memory_space<vmem>>, %arg6: memref<16x512xf32, #tpu.memory_space<vmem>>, %arg7: memref<128x512xf32, #tpu.memory_space<vmem>>, %arg8: memref<1x512xf32, #tpu.memory_space<vmem>>, %arg9: memref<128x512xf32, #tpu.memory_space<vmem>>, %arg10: memref<128x512xf32, #tpu.memory_space<vmem>>, %arg11: memref<1x512xf32, #tpu.memory_space<vmem>>, %arg12: memref<128x12xf32, #tpu.memory_space<vmem>>, %arg13: memref<1x12xf32, #tpu.memory_space<vmem>>, %arg14: memref<16x512xf32, #tpu.memory_space<vmem>>, %arg15: memref<128x512xf32, #tpu.memory_space<vmem>>, %arg16: memref<1x512xf32, #tpu.memory_space<vmem>>, %arg17: memref<128x12xf32, #tpu.memory_space<vmem>>, %arg18: memref<1x12xf32, #tpu.memory_space<vmem>>, %arg19: memref<2x12xf32, #tpu.memory_space<vmem>>, %arg20: memref<2x12xf32, #tpu.memory_space<vmem>>, %arg21: memref<16x128xf32, #tpu.memory_space<vmem>>) attributes {dimension_semantics = [], scalar_prefetch = 0 : i64, scratch_operands = 1 : i64, tpu.core_type = #tpu.core_type<tc>} {
    %c0 = arith.constant 0 : index
    %c0_0 = arith.constant 0 : index
    %0 = vector.load %arg0[%c0, %c0_0] : memref<16x16xf32, #tpu.memory_space<vmem>>, vector<16x16xf32>
    %c0_1 = arith.constant 0 : index
    %c0_2 = arith.constant 0 : index
    %1 = vector.load %arg1[%c0_1, %c0_2] : memref<16x512xf32, #tpu.memory_space<vmem>>, vector<16x512xf32>
    %c0_3 = arith.constant 0 : index
    %c0_4 = arith.constant 0 : index
    %2 = vector.load %arg2[%c0_3, %c0_4] : memref<128x512xf32, #tpu.memory_space<vmem>>, vector<128x512xf32>
    %c0_5 = arith.constant 0 : index
    %c0_6 = arith.constant 0 : index
    %3 = vector.load %arg3[%c0_5, %c0_6] : memref<1x512xf32, #tpu.memory_space<vmem>>, vector<1x512xf32>
    %cst = arith.constant dense<0.000000e+00> : vector<16x512xf32>
    %4 = tpu.matmul %0, %1, %cst {dimension_numbers = #tpu.dot_dimension_numbers<[1], [0], [0], [1], [0, 0, 1, 1], [], []>} : vector<16x16xf32>, vector<16x512xf32>, vector<16x512xf32> -> vector<16x512xf32>
    %5 = vector.broadcast %3 : vector<1x512xf32> to vector<16x512xf32>
    %6 = arith.addf %4, %5 : vector<16x512xf32>
    %cst_7 = arith.constant 0.000000e+00 : f32
    %7 = vector.broadcast %cst_7 : f32 to vector<2x128xf32>
    %cst_8 = arith.constant 0.000000e+00 : f32
    %8 = vector.broadcast %cst_8 : f32 to vector<2x128xf32>
    %9 = vector.extract_strided_slice %6 {offsets = [0, 0], sizes = [2, 512], strides = [1, 1]} : vector<16x512xf32> to vector<2x512xf32>
    %cst_9 = arith.constant dense<0.000000e+00> : vector<2x512xf32>
    %10 = tpu.matmul %7, %2, %cst_9 {dimension_numbers = #tpu.dot_dimension_numbers<[1], [0], [0], [1], [0, 0, 1, 1], [], []>} : vector<2x128xf32>, vector<128x512xf32>, vector<2x512xf32> -> vector<2x512xf32>
    %11 = arith.addf %9, %10 : vector<2x512xf32>
    %12 = vector.extract_strided_slice %11 {offsets = [0, 0], sizes = [2, 128], strides = [1, 1]} : vector<2x512xf32> to vector<2x128xf32>
    %13 = arith.negf %12 : vector<2x128xf32>
    %14 = math.exp %13 : vector<2x128xf32>
    %cst_10 = arith.constant 1.000000e+00 : f32
    %15 = vector.broadcast %cst_10 : f32 to vector<2x128xf32>
    %16 = arith.addf %15, %14 : vector<2x128xf32>
    %17 = arith.divf %15, %16 : vector<2x128xf32>
    %18 = vector.extract_strided_slice %11 {offsets = [0, 128], sizes = [2, 128], strides = [1, 1]} : vector<2x512xf32> to vector<2x128xf32>
    %19 = arith.negf %18 : vector<2x128xf32>
    %20 = math.exp %19 : vector<2x128xf32>
    %cst_11 = arith.constant 1.000000e+00 : f32
    %21 = vector.broadcast %cst_11 : f32 to vector<2x128xf32>
    %22 = arith.addf %21, %20 : vector<2x128xf32>
    %23 = arith.divf %21, %22 : vector<2x128xf32>
    %24 = vector.extract_strided_slice %11 {offsets = [0, 256], sizes = [2, 128], strides = [1, 1]} : vector<2x512xf32> to vector<2x128xf32>
    %25 = math.tanh %24 : vector<2x128xf32>
    %26 = vector.extract_strided_slice %11 {offsets = [0, 384], sizes = [2, 128], strides = [1, 1]} : vector<2x512xf32> to vector<2x128xf32>
    %27 = arith.negf %26 : vector<2x128xf32>
    %28 = math.exp %27 : vector<2x128xf32>
    %cst_12 = arith.constant 1.000000e+00 : f32
    %29 = vector.broadcast %cst_12 : f32 to vector<2x128xf32>
    %30 = arith.addf %29, %28 : vector<2x128xf32>
    %31 = arith.divf %29, %30 : vector<2x128xf32>
    %32 = arith.mulf %23, %8 : vector<2x128xf32>
    %33 = arith.mulf %17, %25 : vector<2x128xf32>
    %34 = arith.addf %32, %33 : vector<2x128xf32>
    %35 = math.tanh %34 : vector<2x128xf32>
    %36 = arith.mulf %31, %35 : vector<2x128xf32>
    %37 = vector.extract_strided_slice %6 {offsets = [2, 0], sizes = [2, 512], strides = [1, 1]} : vector<16x512xf32> to vector<2x512xf32>
    %cst_13 = arith.constant dense<0.000000e+00> : vector<2x512xf32>
    %38 = tpu.matmul %36, %2, %cst_13 {dimension_numbers = #tpu.dot_dimension_numbers<[1], [0], [0], [1], [0, 0, 1, 1], [], []>} : vector<2x128xf32>, vector<128x512xf32>, vector<2x512xf32> -> vector<2x512xf32>
    %39 = arith.addf %37, %38 : vector<2x512xf32>
    %40 = vector.extract_strided_slice %39 {offsets = [0, 0], sizes = [2, 128], strides = [1, 1]} : vector<2x512xf32> to vector<2x128xf32>
    %41 = arith.negf %40 : vector<2x128xf32>
    %42 = math.exp %41 : vector<2x128xf32>
    %cst_14 = arith.constant 1.000000e+00 : f32
    %43 = vector.broadcast %cst_14 : f32 to vector<2x128xf32>
    %44 = arith.addf %43, %42 : vector<2x128xf32>
    %45 = arith.divf %43, %44 : vector<2x128xf32>
    %46 = vector.extract_strided_slice %39 {offsets = [0, 128], sizes = [2, 128], strides = [1, 1]} : vector<2x512xf32> to vector<2x128xf32>
    %47 = arith.negf %46 : vector<2x128xf32>
    %48 = math.exp %47 : vector<2x128xf32>
    %cst_15 = arith.constant 1.000000e+00 : f32
    %49 = vector.broadcast %cst_15 : f32 to vector<2x128xf32>
    %50 = arith.addf %49, %48 : vector<2x128xf32>
    %51 = arith.divf %49, %50 : vector<2x128xf32>
    %52 = vector.extract_strided_slice %39 {offsets = [0, 256], sizes = [2, 128], strides = [1, 1]} : vector<2x512xf32> to vector<2x128xf32>
    %53 = math.tanh %52 : vector<2x128xf32>
    %54 = vector.extract_strided_slice %39 {offsets = [0, 384], sizes = [2, 128], strides = [1, 1]} : vector<2x512xf32> to vector<2x128xf32>
    %55 = arith.negf %54 : vector<2x128xf32>
    %56 = math.exp %55 : vector<2x128xf32>
    %cst_16 = arith.constant 1.000000e+00 : f32
    %57 = vector.broadcast %cst_16 : f32 to vector<2x128xf32>
    %58 = arith.addf %57, %56 : vector<2x128xf32>
    %59 = arith.divf %57, %58 : vector<2x128xf32>
    %60 = arith.mulf %51, %34 : vector<2x128xf32>
    %61 = arith.mulf %45, %53 : vector<2x128xf32>
    %62 = arith.addf %60, %61 : vector<2x128xf32>
    %63 = math.tanh %62 : vector<2x128xf32>
    %64 = arith.mulf %59, %63 : vector<2x128xf32>
    %65 = vector.extract_strided_slice %6 {offsets = [4, 0], sizes = [2, 512], strides = [1, 1]} : vector<16x512xf32> to vector<2x512xf32>
    %cst_17 = arith.constant dense<0.000000e+00> : vector<2x512xf32>
    %66 = tpu.matmul %64, %2, %cst_17 {dimension_numbers = #tpu.dot_dimension_numbers<[1], [0], [0], [1], [0, 0, 1, 1], [], []>} : vector<2x128xf32>, vector<128x512xf32>, vector<2x512xf32> -> vector<2x512xf32>
    %67 = arith.addf %65, %66 : vector<2x512xf32>
    %68 = vector.extract_strided_slice %67 {offsets = [0, 0], sizes = [2, 128], strides = [1, 1]} : vector<2x512xf32> to vector<2x128xf32>
    %69 = arith.negf %68 : vector<2x128xf32>
    %70 = math.exp %69 : vector<2x128xf32>
    %cst_18 = arith.constant 1.000000e+00 : f32
    %71 = vector.broadcast %cst_18 : f32 to vector<2x128xf32>
    %72 = arith.addf %71, %70 : vector<2x128xf32>
    %73 = arith.divf %71, %72 : vector<2x128xf32>
    %74 = vector.extract_strided_slice %67 {offsets = [0, 128], sizes = [2, 128], strides = [1, 1]} : vector<2x512xf32> to vector<2x128xf32>
    %75 = arith.negf %74 : vector<2x128xf32>
    %76 = math.exp %75 : vector<2x128xf32>
    %cst_19 = arith.constant 1.000000e+00 : f32
    %77 = vector.broadcast %cst_19 : f32 to vector<2x128xf32>
    %78 = arith.addf %77, %76 : vector<2x128xf32>
    %79 = arith.divf %77, %78 : vector<2x128xf32>
    %80 = vector.extract_strided_slice %67 {offsets = [0, 256], sizes = [2, 128], strides = [1, 1]} : vector<2x512xf32> to vector<2x128xf32>
    %81 = math.tanh %80 : vector<2x128xf32>
    %82 = vector.extract_strided_slice %67 {offsets = [0, 384], sizes = [2, 128], strides = [1, 1]} : vector<2x512xf32> to vector<2x128xf32>
    %83 = arith.negf %82 : vector<2x128xf32>
    %84 = math.exp %83 : vector<2x128xf32>
    %cst_20 = arith.constant 1.000000e+00 : f32
    %85 = vector.broadcast %cst_20 : f32 to vector<2x128xf32>
    %86 = arith.addf %85, %84 : vector<2x128xf32>
    %87 = arith.divf %85, %86 : vector<2x128xf32>
    %88 = arith.mulf %79, %62 : vector<2x128xf32>
    %89 = arith.mulf %73, %81 : vector<2x128xf32>
    %90 = arith.addf %88, %89 : vector<2x128xf32>
    %91 = math.tanh %90 : vector<2x128xf32>
    %92 = arith.mulf %87, %91 : vector<2x128xf32>
    %93 = vector.extract_strided_slice %6 {offsets = [6, 0], sizes = [2, 512], strides = [1, 1]} : vector<16x512xf32> to vector<2x512xf32>
    %cst_21 = arith.constant dense<0.000000e+00> : vector<2x512xf32>
    %94 = tpu.matmul %92, %2, %cst_21 {dimension_numbers = #tpu.dot_dimension_numbers<[1], [0], [0], [1], [0, 0, 1, 1], [], []>} : vector<2x128xf32>, vector<128x512xf32>, vector<2x512xf32> -> vector<2x512xf32>
    %95 = arith.addf %93, %94 : vector<2x512xf32>
    %96 = vector.extract_strided_slice %95 {offsets = [0, 0], sizes = [2, 128], strides = [1, 1]} : vector<2x512xf32> to vector<2x128xf32>
    %97 = arith.negf %96 : vector<2x128xf32>
    %98 = math.exp %97 : vector<2x128xf32>
    %cst_22 = arith.constant 1.000000e+00 : f32
    %99 = vector.broadcast %cst_22 : f32 to vector<2x128xf32>
    %100 = arith.addf %99, %98 : vector<2x128xf32>
    %101 = arith.divf %99, %100 : vector<2x128xf32>
    %102 = vector.extract_strided_slice %95 {offsets = [0, 128], sizes = [2, 128], strides = [1, 1]} : vector<2x512xf32> to vector<2x128xf32>
    %103 = arith.negf %102 : vector<2x128xf32>
    %104 = math.exp %103 : vector<2x128xf32>
    %cst_23 = arith.constant 1.000000e+00 : f32
    %105 = vector.broadcast %cst_23 : f32 to vector<2x128xf32>
    %106 = arith.addf %105, %104 : vector<2x128xf32>
    %107 = arith.divf %105, %106 : vector<2x128xf32>
    %108 = vector.extract_strided_slice %95 {offsets = [0, 256], sizes = [2, 128], strides = [1, 1]} : vector<2x512xf32> to vector<2x128xf32>
    %109 = math.tanh %108 : vector<2x128xf32>
    %110 = vector.extract_strided_slice %95 {offsets = [0, 384], sizes = [2, 128], strides = [1, 1]} : vector<2x512xf32> to vector<2x128xf32>
    %111 = arith.negf %110 : vector<2x128xf32>
    %112 = math.exp %111 : vector<2x128xf32>
    %cst_24 = arith.constant 1.000000e+00 : f32
    %113 = vector.broadcast %cst_24 : f32 to vector<2x128xf32>
    %114 = arith.addf %113, %112 : vector<2x128xf32>
    %115 = arith.divf %113, %114 : vector<2x128xf32>
    %116 = arith.mulf %107, %90 : vector<2x128xf32>
    %117 = arith.mulf %101, %109 : vector<2x128xf32>
    %118 = arith.addf %116, %117 : vector<2x128xf32>
    %119 = math.tanh %118 : vector<2x128xf32>
    %120 = arith.mulf %115, %119 : vector<2x128xf32>
    %121 = vector.extract_strided_slice %6 {offsets = [8, 0], sizes = [2, 512], strides = [1, 1]} : vector<16x512xf32> to vector<2x512xf32>
    %cst_25 = arith.constant dense<0.000000e+00> : vector<2x512xf32>
    %122 = tpu.matmul %120, %2, %cst_25 {dimension_numbers = #tpu.dot_dimension_numbers<[1], [0], [0], [1], [0, 0, 1, 1], [], []>} : vector<2x128xf32>, vector<128x512xf32>, vector<2x512xf32> -> vector<2x512xf32>
    %123 = arith.addf %121, %122 : vector<2x512xf32>
    %124 = vector.extract_strided_slice %123 {offsets = [0, 0], sizes = [2, 128], strides = [1, 1]} : vector<2x512xf32> to vector<2x128xf32>
    %125 = arith.negf %124 : vector<2x128xf32>
    %126 = math.exp %125 : vector<2x128xf32>
    %cst_26 = arith.constant 1.000000e+00 : f32
    %127 = vector.broadcast %cst_26 : f32 to vector<2x128xf32>
    %128 = arith.addf %127, %126 : vector<2x128xf32>
    %129 = arith.divf %127, %128 : vector<2x128xf32>
    %130 = vector.extract_strided_slice %123 {offsets = [0, 128], sizes = [2, 128], strides = [1, 1]} : vector<2x512xf32> to vector<2x128xf32>
    %131 = arith.negf %130 : vector<2x128xf32>
    %132 = math.exp %131 : vector<2x128xf32>
    %cst_27 = arith.constant 1.000000e+00 : f32
    %133 = vector.broadcast %cst_27 : f32 to vector<2x128xf32>
    %134 = arith.addf %133, %132 : vector<2x128xf32>
    %135 = arith.divf %133, %134 : vector<2x128xf32>
    %136 = vector.extract_strided_slice %123 {offsets = [0, 256], sizes = [2, 128], strides = [1, 1]} : vector<2x512xf32> to vector<2x128xf32>
    %137 = math.tanh %136 : vector<2x128xf32>
    %138 = vector.extract_strided_slice %123 {offsets = [0, 384], sizes = [2, 128], strides = [1, 1]} : vector<2x512xf32> to vector<2x128xf32>
    %139 = arith.negf %138 : vector<2x128xf32>
    %140 = math.exp %139 : vector<2x128xf32>
    %cst_28 = arith.constant 1.000000e+00 : f32
    %141 = vector.broadcast %cst_28 : f32 to vector<2x128xf32>
    %142 = arith.addf %141, %140 : vector<2x128xf32>
    %143 = arith.divf %141, %142 : vector<2x128xf32>
    %144 = arith.mulf %135, %118 : vector<2x128xf32>
    %145 = arith.mulf %129, %137 : vector<2x128xf32>
    %146 = arith.addf %144, %145 : vector<2x128xf32>
    %147 = math.tanh %146 : vector<2x128xf32>
    %148 = arith.mulf %143, %147 : vector<2x128xf32>
    %149 = vector.extract_strided_slice %6 {offsets = [10, 0], sizes = [2, 512], strides = [1, 1]} : vector<16x512xf32> to vector<2x512xf32>
    %cst_29 = arith.constant dense<0.000000e+00> : vector<2x512xf32>
    %150 = tpu.matmul %148, %2, %cst_29 {dimension_numbers = #tpu.dot_dimension_numbers<[1], [0], [0], [1], [0, 0, 1, 1], [], []>} : vector<2x128xf32>, vector<128x512xf32>, vector<2x512xf32> -> vector<2x512xf32>
    %151 = arith.addf %149, %150 : vector<2x512xf32>
    %152 = vector.extract_strided_slice %151 {offsets = [0, 0], sizes = [2, 128], strides = [1, 1]} : vector<2x512xf32> to vector<2x128xf32>
    %153 = arith.negf %152 : vector<2x128xf32>
    %154 = math.exp %153 : vector<2x128xf32>
    %cst_30 = arith.constant 1.000000e+00 : f32
    %155 = vector.broadcast %cst_30 : f32 to vector<2x128xf32>
    %156 = arith.addf %155, %154 : vector<2x128xf32>
    %157 = arith.divf %155, %156 : vector<2x128xf32>
    %158 = vector.extract_strided_slice %151 {offsets = [0, 128], sizes = [2, 128], strides = [1, 1]} : vector<2x512xf32> to vector<2x128xf32>
    %159 = arith.negf %158 : vector<2x128xf32>
    %160 = math.exp %159 : vector<2x128xf32>
    %cst_31 = arith.constant 1.000000e+00 : f32
    %161 = vector.broadcast %cst_31 : f32 to vector<2x128xf32>
    %162 = arith.addf %161, %160 : vector<2x128xf32>
    %163 = arith.divf %161, %162 : vector<2x128xf32>
    %164 = vector.extract_strided_slice %151 {offsets = [0, 256], sizes = [2, 128], strides = [1, 1]} : vector<2x512xf32> to vector<2x128xf32>
    %165 = math.tanh %164 : vector<2x128xf32>
    %166 = vector.extract_strided_slice %151 {offsets = [0, 384], sizes = [2, 128], strides = [1, 1]} : vector<2x512xf32> to vector<2x128xf32>
    %167 = arith.negf %166 : vector<2x128xf32>
    %168 = math.exp %167 : vector<2x128xf32>
    %cst_32 = arith.constant 1.000000e+00 : f32
    %169 = vector.broadcast %cst_32 : f32 to vector<2x128xf32>
    %170 = arith.addf %169, %168 : vector<2x128xf32>
    %171 = arith.divf %169, %170 : vector<2x128xf32>
    %172 = arith.mulf %163, %146 : vector<2x128xf32>
    %173 = arith.mulf %157, %165 : vector<2x128xf32>
    %174 = arith.addf %172, %173 : vector<2x128xf32>
    %175 = math.tanh %174 : vector<2x128xf32>
    %176 = arith.mulf %171, %175 : vector<2x128xf32>
    %177 = vector.extract_strided_slice %6 {offsets = [12, 0], sizes = [2, 512], strides = [1, 1]} : vector<16x512xf32> to vector<2x512xf32>
    %cst_33 = arith.constant dense<0.000000e+00> : vector<2x512xf32>
    %178 = tpu.matmul %176, %2, %cst_33 {dimension_numbers = #tpu.dot_dimension_numbers<[1], [0], [0], [1], [0, 0, 1, 1], [], []>} : vector<2x128xf32>, vector<128x512xf32>, vector<2x512xf32> -> vector<2x512xf32>
    %179 = arith.addf %177, %178 : vector<2x512xf32>
    %180 = vector.extract_strided_slice %179 {offsets = [0, 0], sizes = [2, 128], strides = [1, 1]} : vector<2x512xf32> to vector<2x128xf32>
    %181 = arith.negf %180 : vector<2x128xf32>
    %182 = math.exp %181 : vector<2x128xf32>
    %cst_34 = arith.constant 1.000000e+00 : f32
    %183 = vector.broadcast %cst_34 : f32 to vector<2x128xf32>
    %184 = arith.addf %183, %182 : vector<2x128xf32>
    %185 = arith.divf %183, %184 : vector<2x128xf32>
    %186 = vector.extract_strided_slice %179 {offsets = [0, 128], sizes = [2, 128], strides = [1, 1]} : vector<2x512xf32> to vector<2x128xf32>
    %187 = arith.negf %186 : vector<2x128xf32>
    %188 = math.exp %187 : vector<2x128xf32>
    %cst_35 = arith.constant 1.000000e+00 : f32
    %189 = vector.broadcast %cst_35 : f32 to vector<2x128xf32>
    %190 = arith.addf %189, %188 : vector<2x128xf32>
    %191 = arith.divf %189, %190 : vector<2x128xf32>
    %192 = vector.extract_strided_slice %179 {offsets = [0, 256], sizes = [2, 128], strides = [1, 1]} : vector<2x512xf32> to vector<2x128xf32>
    %193 = math.tanh %192 : vector<2x128xf32>
    %194 = vector.extract_strided_slice %179 {offsets = [0, 384], sizes = [2, 128], strides = [1, 1]} : vector<2x512xf32> to vector<2x128xf32>
    %195 = arith.negf %194 : vector<2x128xf32>
    %196 = math.exp %195 : vector<2x128xf32>
    %cst_36 = arith.constant 1.000000e+00 : f32
    %197 = vector.broadcast %cst_36 : f32 to vector<2x128xf32>
    %198 = arith.addf %197, %196 : vector<2x128xf32>
    %199 = arith.divf %197, %198 : vector<2x128xf32>
    %200 = arith.mulf %191, %174 : vector<2x128xf32>
    %201 = arith.mulf %185, %193 : vector<2x128xf32>
    %202 = arith.addf %200, %201 : vector<2x128xf32>
    %203 = math.tanh %202 : vector<2x128xf32>
    %204 = arith.mulf %199, %203 : vector<2x128xf32>
    %205 = vector.extract_strided_slice %6 {offsets = [14, 0], sizes = [2, 512], strides = [1, 1]} : vector<16x512xf32> to vector<2x512xf32>
    %cst_37 = arith.constant dense<0.000000e+00> : vector<2x512xf32>
    %206 = tpu.matmul %204, %2, %cst_37 {dimension_numbers = #tpu.dot_dimension_numbers<[1], [0], [0], [1], [0, 0, 1, 1], [], []>} : vector<2x128xf32>, vector<128x512xf32>, vector<2x512xf32> -> vector<2x512xf32>
    %207 = arith.addf %205, %206 : vector<2x512xf32>
    %208 = vector.extract_strided_slice %207 {offsets = [0, 0], sizes = [2, 128], strides = [1, 1]} : vector<2x512xf32> to vector<2x128xf32>
    %209 = arith.negf %208 : vector<2x128xf32>
    %210 = math.exp %209 : vector<2x128xf32>
    %cst_38 = arith.constant 1.000000e+00 : f32
    %211 = vector.broadcast %cst_38 : f32 to vector<2x128xf32>
    %212 = arith.addf %211, %210 : vector<2x128xf32>
    %213 = arith.divf %211, %212 : vector<2x128xf32>
    %214 = vector.extract_strided_slice %207 {offsets = [0, 128], sizes = [2, 128], strides = [1, 1]} : vector<2x512xf32> to vector<2x128xf32>
    %215 = arith.negf %214 : vector<2x128xf32>
    %216 = math.exp %215 : vector<2x128xf32>
    %cst_39 = arith.constant 1.000000e+00 : f32
    %217 = vector.broadcast %cst_39 : f32 to vector<2x128xf32>
    %218 = arith.addf %217, %216 : vector<2x128xf32>
    %219 = arith.divf %217, %218 : vector<2x128xf32>
    %220 = vector.extract_strided_slice %207 {offsets = [0, 256], sizes = [2, 128], strides = [1, 1]} : vector<2x512xf32> to vector<2x128xf32>
    %221 = math.tanh %220 : vector<2x128xf32>
    %222 = vector.extract_strided_slice %207 {offsets = [0, 384], sizes = [2, 128], strides = [1, 1]} : vector<2x512xf32> to vector<2x128xf32>
    %223 = arith.negf %222 : vector<2x128xf32>
    %224 = math.exp %223 : vector<2x128xf32>
    %cst_40 = arith.constant 1.000000e+00 : f32
    %225 = vector.broadcast %cst_40 : f32 to vector<2x128xf32>
    %226 = arith.addf %225, %224 : vector<2x128xf32>
    %227 = arith.divf %225, %226 : vector<2x128xf32>
    %228 = arith.mulf %219, %202 : vector<2x128xf32>
    %229 = arith.mulf %213, %221 : vector<2x128xf32>
    %230 = arith.addf %228, %229 : vector<2x128xf32>
    %231 = math.tanh %230 : vector<2x128xf32>
    %232 = arith.mulf %227, %231 : vector<2x128xf32>
    %c0_41 = arith.constant 0 : index
    %c0_42 = arith.constant 0 : index
    %233 = vector.load %arg4[%c0_41, %c0_42] : memref<128x12xf32, #tpu.memory_space<vmem>>, vector<128x12xf32>
    %cst_43 = arith.constant dense<0.000000e+00> : vector<2x12xf32>
    %234 = tpu.matmul %232, %233, %cst_43 {dimension_numbers = #tpu.dot_dimension_numbers<[1], [0], [0], [1], [0, 0, 1, 1], [], []>} : vector<2x128xf32>, vector<128x12xf32>, vector<2x12xf32> -> vector<2x12xf32>
    %c0_44 = arith.constant 0 : index
    %c0_45 = arith.constant 0 : index
    %235 = vector.load %arg5[%c0_44, %c0_45] : memref<1x12xf32, #tpu.memory_space<vmem>>, vector<1x12xf32>
    %236 = vector.broadcast %235 : vector<1x12xf32> to vector<2x12xf32>
    %237 = arith.addf %234, %236 : vector<2x12xf32>
    %c0_46 = arith.constant 0 : index
    %c0_47 = arith.constant 0 : index
    %238 = vector.load %arg6[%c0_46, %c0_47] : memref<16x512xf32, #tpu.memory_space<vmem>>, vector<16x512xf32>
    %c0_48 = arith.constant 0 : index
    %c0_49 = arith.constant 0 : index
    %239 = vector.load %arg7[%c0_48, %c0_49] : memref<128x512xf32, #tpu.memory_space<vmem>>, vector<128x512xf32>
    %c0_50 = arith.constant 0 : index
    %c0_51 = arith.constant 0 : index
    %240 = vector.load %arg8[%c0_50, %c0_51] : memref<1x512xf32, #tpu.memory_space<vmem>>, vector<1x512xf32>
    %cst_52 = arith.constant dense<0.000000e+00> : vector<16x512xf32>
    %241 = tpu.matmul %0, %238, %cst_52 {dimension_numbers = #tpu.dot_dimension_numbers<[1], [0], [0], [1], [0, 0, 1, 1], [], []>} : vector<16x16xf32>, vector<16x512xf32>, vector<16x512xf32> -> vector<16x512xf32>
    %242 = vector.broadcast %240 : vector<1x512xf32> to vector<16x512xf32>
    %243 = arith.addf %241, %242 : vector<16x512xf32>
    %cst_53 = arith.constant 0.000000e+00 : f32
    %244 = vector.broadcast %cst_53 : f32 to vector<2x128xf32>
    %cst_54 = arith.constant 0.000000e+00 : f32
    %245 = vector.broadcast %cst_54 : f32 to vector<2x128xf32>
    %246 = vector.extract_strided_slice %243 {offsets = [0, 0], sizes = [2, 512], strides = [1, 1]} : vector<16x512xf32> to vector<2x512xf32>
    %cst_55 = arith.constant dense<0.000000e+00> : vector<2x512xf32>
    %247 = tpu.matmul %244, %239, %cst_55 {dimension_numbers = #tpu.dot_dimension_numbers<[1], [0], [0], [1], [0, 0, 1, 1], [], []>} : vector<2x128xf32>, vector<128x512xf32>, vector<2x512xf32> -> vector<2x512xf32>
    %248 = arith.addf %246, %247 : vector<2x512xf32>
    %249 = vector.extract_strided_slice %248 {offsets = [0, 0], sizes = [2, 128], strides = [1, 1]} : vector<2x512xf32> to vector<2x128xf32>
    %250 = arith.negf %249 : vector<2x128xf32>
    %251 = math.exp %250 : vector<2x128xf32>
    %cst_56 = arith.constant 1.000000e+00 : f32
    %252 = vector.broadcast %cst_56 : f32 to vector<2x128xf32>
    %253 = arith.addf %252, %251 : vector<2x128xf32>
    %254 = arith.divf %252, %253 : vector<2x128xf32>
    %255 = vector.extract_strided_slice %248 {offsets = [0, 128], sizes = [2, 128], strides = [1, 1]} : vector<2x512xf32> to vector<2x128xf32>
    %256 = arith.negf %255 : vector<2x128xf32>
    %257 = math.exp %256 : vector<2x128xf32>
    %cst_57 = arith.constant 1.000000e+00 : f32
    %258 = vector.broadcast %cst_57 : f32 to vector<2x128xf32>
    %259 = arith.addf %258, %257 : vector<2x128xf32>
    %260 = arith.divf %258, %259 : vector<2x128xf32>
    %261 = vector.extract_strided_slice %248 {offsets = [0, 256], sizes = [2, 128], strides = [1, 1]} : vector<2x512xf32> to vector<2x128xf32>
    %262 = math.tanh %261 : vector<2x128xf32>
    %263 = vector.extract_strided_slice %248 {offsets = [0, 384], sizes = [2, 128], strides = [1, 1]} : vector<2x512xf32> to vector<2x128xf32>
    %264 = arith.negf %263 : vector<2x128xf32>
    %265 = math.exp %264 : vector<2x128xf32>
    %cst_58 = arith.constant 1.000000e+00 : f32
    %266 = vector.broadcast %cst_58 : f32 to vector<2x128xf32>
    %267 = arith.addf %266, %265 : vector<2x128xf32>
    %268 = arith.divf %266, %267 : vector<2x128xf32>
    %269 = arith.mulf %260, %245 : vector<2x128xf32>
    %270 = arith.mulf %254, %262 : vector<2x128xf32>
    %271 = arith.addf %269, %270 : vector<2x128xf32>
    %272 = math.tanh %271 : vector<2x128xf32>
    %273 = arith.mulf %268, %272 : vector<2x128xf32>
    %c0_59 = arith.constant 0 : index
    %c0_60 = arith.constant 0 : index
    %274 = vector.load %arg21[%c0_59, %c0_60] : memref<16x128xf32, #tpu.memory_space<vmem>>, vector<2x128xf32>
    tpu.vector_store %arg21[%c0_59, %c0_60], %273 {strides = array<i32>} : memref<16x128xf32, #tpu.memory_space<vmem>>, vector<2x128xf32>,
    %275 = vector.extract_strided_slice %243 {offsets = [2, 0], sizes = [2, 512], strides = [1, 1]} : vector<16x512xf32> to vector<2x512xf32>
    %cst_61 = arith.constant dense<0.000000e+00> : vector<2x512xf32>
    %276 = tpu.matmul %273, %239, %cst_61 {dimension_numbers = #tpu.dot_dimension_numbers<[1], [0], [0], [1], [0, 0, 1, 1], [], []>} : vector<2x128xf32>, vector<128x512xf32>, vector<2x512xf32> -> vector<2x512xf32>
    %277 = arith.addf %275, %276 : vector<2x512xf32>
    %278 = vector.extract_strided_slice %277 {offsets = [0, 0], sizes = [2, 128], strides = [1, 1]} : vector<2x512xf32> to vector<2x128xf32>
    %279 = arith.negf %278 : vector<2x128xf32>
    %280 = math.exp %279 : vector<2x128xf32>
    %cst_62 = arith.constant 1.000000e+00 : f32
    %281 = vector.broadcast %cst_62 : f32 to vector<2x128xf32>
    %282 = arith.addf %281, %280 : vector<2x128xf32>
    %283 = arith.divf %281, %282 : vector<2x128xf32>
    %284 = vector.extract_strided_slice %277 {offsets = [0, 128], sizes = [2, 128], strides = [1, 1]} : vector<2x512xf32> to vector<2x128xf32>
    %285 = arith.negf %284 : vector<2x128xf32>
    %286 = math.exp %285 : vector<2x128xf32>
    %cst_63 = arith.constant 1.000000e+00 : f32
    %287 = vector.broadcast %cst_63 : f32 to vector<2x128xf32>
    %288 = arith.addf %287, %286 : vector<2x128xf32>
    %289 = arith.divf %287, %288 : vector<2x128xf32>
    %290 = vector.extract_strided_slice %277 {offsets = [0, 256], sizes = [2, 128], strides = [1, 1]} : vector<2x512xf32> to vector<2x128xf32>
    %291 = math.tanh %290 : vector<2x128xf32>
    %292 = vector.extract_strided_slice %277 {offsets = [0, 384], sizes = [2, 128], strides = [1, 1]} : vector<2x512xf32> to vector<2x128xf32>
    %293 = arith.negf %292 : vector<2x128xf32>
    %294 = math.exp %293 : vector<2x128xf32>
    %cst_64 = arith.constant 1.000000e+00 : f32
    %295 = vector.broadcast %cst_64 : f32 to vector<2x128xf32>
    %296 = arith.addf %295, %294 : vector<2x128xf32>
    %297 = arith.divf %295, %296 : vector<2x128xf32>
    %298 = arith.mulf %289, %271 : vector<2x128xf32>
    %299 = arith.mulf %283, %291 : vector<2x128xf32>
    %300 = arith.addf %298, %299 : vector<2x128xf32>
    %301 = math.tanh %300 : vector<2x128xf32>
    %302 = arith.mulf %297, %301 : vector<2x128xf32>
    %c2 = arith.constant 2 : index
    %c0_65 = arith.constant 0 : index
    %303 = vector.load %arg21[%c2, %c0_65] : memref<16x128xf32, #tpu.memory_space<vmem>>, vector<2x128xf32>
    tpu.vector_store %arg21[%c2, %c0_65], %302 {strides = array<i32>} : memref<16x128xf32, #tpu.memory_space<vmem>>, vector<2x128xf32>,
    %304 = vector.extract_strided_slice %243 {offsets = [4, 0], sizes = [2, 512], strides = [1, 1]} : vector<16x512xf32> to vector<2x512xf32>
    %cst_66 = arith.constant dense<0.000000e+00> : vector<2x512xf32>
    %305 = tpu.matmul %302, %239, %cst_66 {dimension_numbers = #tpu.dot_dimension_numbers<[1], [0], [0], [1], [0, 0, 1, 1], [], []>} : vector<2x128xf32>, vector<128x512xf32>, vector<2x512xf32> -> vector<2x512xf32>
    %306 = arith.addf %304, %305 : vector<2x512xf32>
    %307 = vector.extract_strided_slice %306 {offsets = [0, 0], sizes = [2, 128], strides = [1, 1]} : vector<2x512xf32> to vector<2x128xf32>
    %308 = arith.negf %307 : vector<2x128xf32>
    %309 = math.exp %308 : vector<2x128xf32>
    %cst_67 = arith.constant 1.000000e+00 : f32
    %310 = vector.broadcast %cst_67 : f32 to vector<2x128xf32>
    %311 = arith.addf %310, %309 : vector<2x128xf32>
    %312 = arith.divf %310, %311 : vector<2x128xf32>
    %313 = vector.extract_strided_slice %306 {offsets = [0, 128], sizes = [2, 128], strides = [1, 1]} : vector<2x512xf32> to vector<2x128xf32>
    %314 = arith.negf %313 : vector<2x128xf32>
    %315 = math.exp %314 : vector<2x128xf32>
    %cst_68 = arith.constant 1.000000e+00 : f32
    %316 = vector.broadcast %cst_68 : f32 to vector<2x128xf32>
    %317 = arith.addf %316, %315 : vector<2x128xf32>
    %318 = arith.divf %316, %317 : vector<2x128xf32>
    %319 = vector.extract_strided_slice %306 {offsets = [0, 256], sizes = [2, 128], strides = [1, 1]} : vector<2x512xf32> to vector<2x128xf32>
    %320 = math.tanh %319 : vector<2x128xf32>
    %321 = vector.extract_strided_slice %306 {offsets = [0, 384], sizes = [2, 128], strides = [1, 1]} : vector<2x512xf32> to vector<2x128xf32>
    %322 = arith.negf %321 : vector<2x128xf32>
    %323 = math.exp %322 : vector<2x128xf32>
    %cst_69 = arith.constant 1.000000e+00 : f32
    %324 = vector.broadcast %cst_69 : f32 to vector<2x128xf32>
    %325 = arith.addf %324, %323 : vector<2x128xf32>
    %326 = arith.divf %324, %325 : vector<2x128xf32>
    %327 = arith.mulf %318, %300 : vector<2x128xf32>
    %328 = arith.mulf %312, %320 : vector<2x128xf32>
    %329 = arith.addf %327, %328 : vector<2x128xf32>
    %330 = math.tanh %329 : vector<2x128xf32>
    %331 = arith.mulf %326, %330 : vector<2x128xf32>
    %c4 = arith.constant 4 : index
    %c0_70 = arith.constant 0 : index
    %332 = vector.load %arg21[%c4, %c0_70] : memref<16x128xf32, #tpu.memory_space<vmem>>, vector<2x128xf32>
    tpu.vector_store %arg21[%c4, %c0_70], %331 {strides = array<i32>} : memref<16x128xf32, #tpu.memory_space<vmem>>, vector<2x128xf32>,
    %333 = vector.extract_strided_slice %243 {offsets = [6, 0], sizes = [2, 512], strides = [1, 1]} : vector<16x512xf32> to vector<2x512xf32>
    %cst_71 = arith.constant dense<0.000000e+00> : vector<2x512xf32>
    %334 = tpu.matmul %331, %239, %cst_71 {dimension_numbers = #tpu.dot_dimension_numbers<[1], [0], [0], [1], [0, 0, 1, 1], [], []>} : vector<2x128xf32>, vector<128x512xf32>, vector<2x512xf32> -> vector<2x512xf32>
    %335 = arith.addf %333, %334 : vector<2x512xf32>
    %336 = vector.extract_strided_slice %335 {offsets = [0, 0], sizes = [2, 128], strides = [1, 1]} : vector<2x512xf32> to vector<2x128xf32>
    %337 = arith.negf %336 : vector<2x128xf32>
    %338 = math.exp %337 : vector<2x128xf32>
    %cst_72 = arith.constant 1.000000e+00 : f32
    %339 = vector.broadcast %cst_72 : f32 to vector<2x128xf32>
    %340 = arith.addf %339, %338 : vector<2x128xf32>
    %341 = arith.divf %339, %340 : vector<2x128xf32>
    %342 = vector.extract_strided_slice %335 {offsets = [0, 128], sizes = [2, 128], strides = [1, 1]} : vector<2x512xf32> to vector<2x128xf32>
    %343 = arith.negf %342 : vector<2x128xf32>
    %344 = math.exp %343 : vector<2x128xf32>
    %cst_73 = arith.constant 1.000000e+00 : f32
    %345 = vector.broadcast %cst_73 : f32 to vector<2x128xf32>
    %346 = arith.addf %345, %344 : vector<2x128xf32>
    %347 = arith.divf %345, %346 : vector<2x128xf32>
    %348 = vector.extract_strided_slice %335 {offsets = [0, 256], sizes = [2, 128], strides = [1, 1]} : vector<2x512xf32> to vector<2x128xf32>
    %349 = math.tanh %348 : vector<2x128xf32>
    %350 = vector.extract_strided_slice %335 {offsets = [0, 384], sizes = [2, 128], strides = [1, 1]} : vector<2x512xf32> to vector<2x128xf32>
    %351 = arith.negf %350 : vector<2x128xf32>
    %352 = math.exp %351 : vector<2x128xf32>
    %cst_74 = arith.constant 1.000000e+00 : f32
    %353 = vector.broadcast %cst_74 : f32 to vector<2x128xf32>
    %354 = arith.addf %353, %352 : vector<2x128xf32>
    %355 = arith.divf %353, %354 : vector<2x128xf32>
    %356 = arith.mulf %347, %329 : vector<2x128xf32>
    %357 = arith.mulf %341, %349 : vector<2x128xf32>
    %358 = arith.addf %356, %357 : vector<2x128xf32>
    %359 = math.tanh %358 : vector<2x128xf32>
    %360 = arith.mulf %355, %359 : vector<2x128xf32>
    %c6 = arith.constant 6 : index
    %c0_75 = arith.constant 0 : index
    %361 = vector.load %arg21[%c6, %c0_75] : memref<16x128xf32, #tpu.memory_space<vmem>>, vector<2x128xf32>
    tpu.vector_store %arg21[%c6, %c0_75], %360 {strides = array<i32>} : memref<16x128xf32, #tpu.memory_space<vmem>>, vector<2x128xf32>,
    %362 = vector.extract_strided_slice %243 {offsets = [8, 0], sizes = [2, 512], strides = [1, 1]} : vector<16x512xf32> to vector<2x512xf32>
    %cst_76 = arith.constant dense<0.000000e+00> : vector<2x512xf32>
    %363 = tpu.matmul %360, %239, %cst_76 {dimension_numbers = #tpu.dot_dimension_numbers<[1], [0], [0], [1], [0, 0, 1, 1], [], []>} : vector<2x128xf32>, vector<128x512xf32>, vector<2x512xf32> -> vector<2x512xf32>
    %364 = arith.addf %362, %363 : vector<2x512xf32>
    %365 = vector.extract_strided_slice %364 {offsets = [0, 0], sizes = [2, 128], strides = [1, 1]} : vector<2x512xf32> to vector<2x128xf32>
    %366 = arith.negf %365 : vector<2x128xf32>
    %367 = math.exp %366 : vector<2x128xf32>
    %cst_77 = arith.constant 1.000000e+00 : f32
    %368 = vector.broadcast %cst_77 : f32 to vector<2x128xf32>
    %369 = arith.addf %368, %367 : vector<2x128xf32>
    %370 = arith.divf %368, %369 : vector<2x128xf32>
    %371 = vector.extract_strided_slice %364 {offsets = [0, 128], sizes = [2, 128], strides = [1, 1]} : vector<2x512xf32> to vector<2x128xf32>
    %372 = arith.negf %371 : vector<2x128xf32>
    %373 = math.exp %372 : vector<2x128xf32>
    %cst_78 = arith.constant 1.000000e+00 : f32
    %374 = vector.broadcast %cst_78 : f32 to vector<2x128xf32>
    %375 = arith.addf %374, %373 : vector<2x128xf32>
    %376 = arith.divf %374, %375 : vector<2x128xf32>
    %377 = vector.extract_strided_slice %364 {offsets = [0, 256], sizes = [2, 128], strides = [1, 1]} : vector<2x512xf32> to vector<2x128xf32>
    %378 = math.tanh %377 : vector<2x128xf32>
    %379 = vector.extract_strided_slice %364 {offsets = [0, 384], sizes = [2, 128], strides = [1, 1]} : vector<2x512xf32> to vector<2x128xf32>
    %380 = arith.negf %379 : vector<2x128xf32>
    %381 = math.exp %380 : vector<2x128xf32>
    %cst_79 = arith.constant 1.000000e+00 : f32
    %382 = vector.broadcast %cst_79 : f32 to vector<2x128xf32>
    %383 = arith.addf %382, %381 : vector<2x128xf32>
    %384 = arith.divf %382, %383 : vector<2x128xf32>
    %385 = arith.mulf %376, %358 : vector<2x128xf32>
    %386 = arith.mulf %370, %378 : vector<2x128xf32>
    %387 = arith.addf %385, %386 : vector<2x128xf32>
    %388 = math.tanh %387 : vector<2x128xf32>
    %389 = arith.mulf %384, %388 : vector<2x128xf32>
    %c8 = arith.constant 8 : index
    %c0_80 = arith.constant 0 : index
    %390 = vector.load %arg21[%c8, %c0_80] : memref<16x128xf32, #tpu.memory_space<vmem>>, vector<2x128xf32>
    tpu.vector_store %arg21[%c8, %c0_80], %389 {strides = array<i32>} : memref<16x128xf32, #tpu.memory_space<vmem>>, vector<2x128xf32>,
    %391 = vector.extract_strided_slice %243 {offsets = [10, 0], sizes = [2, 512], strides = [1, 1]} : vector<16x512xf32> to vector<2x512xf32>
    %cst_81 = arith.constant dense<0.000000e+00> : vector<2x512xf32>
    %392 = tpu.matmul %389, %239, %cst_81 {dimension_numbers = #tpu.dot_dimension_numbers<[1], [0], [0], [1], [0, 0, 1, 1], [], []>} : vector<2x128xf32>, vector<128x512xf32>, vector<2x512xf32> -> vector<2x512xf32>
    %393 = arith.addf %391, %392 : vector<2x512xf32>
    %394 = vector.extract_strided_slice %393 {offsets = [0, 0], sizes = [2, 128], strides = [1, 1]} : vector<2x512xf32> to vector<2x128xf32>
    %395 = arith.negf %394 : vector<2x128xf32>
    %396 = math.exp %395 : vector<2x128xf32>
    %cst_82 = arith.constant 1.000000e+00 : f32
    %397 = vector.broadcast %cst_82 : f32 to vector<2x128xf32>
    %398 = arith.addf %397, %396 : vector<2x128xf32>
    %399 = arith.divf %397, %398 : vector<2x128xf32>
    %400 = vector.extract_strided_slice %393 {offsets = [0, 128], sizes = [2, 128], strides = [1, 1]} : vector<2x512xf32> to vector<2x128xf32>
    %401 = arith.negf %400 : vector<2x128xf32>
    %402 = math.exp %401 : vector<2x128xf32>
    %cst_83 = arith.constant 1.000000e+00 : f32
    %403 = vector.broadcast %cst_83 : f32 to vector<2x128xf32>
    %404 = arith.addf %403, %402 : vector<2x128xf32>
    %405 = arith.divf %403, %404 : vector<2x128xf32>
    %406 = vector.extract_strided_slice %393 {offsets = [0, 256], sizes = [2, 128], strides = [1, 1]} : vector<2x512xf32> to vector<2x128xf32>
    %407 = math.tanh %406 : vector<2x128xf32>
    %408 = vector.extract_strided_slice %393 {offsets = [0, 384], sizes = [2, 128], strides = [1, 1]} : vector<2x512xf32> to vector<2x128xf32>
    %409 = arith.negf %408 : vector<2x128xf32>
    %410 = math.exp %409 : vector<2x128xf32>
    %cst_84 = arith.constant 1.000000e+00 : f32
    %411 = vector.broadcast %cst_84 : f32 to vector<2x128xf32>
    %412 = arith.addf %411, %410 : vector<2x128xf32>
    %413 = arith.divf %411, %412 : vector<2x128xf32>
    %414 = arith.mulf %405, %387 : vector<2x128xf32>
    %415 = arith.mulf %399, %407 : vector<2x128xf32>
    %416 = arith.addf %414, %415 : vector<2x128xf32>
    %417 = math.tanh %416 : vector<2x128xf32>
    %418 = arith.mulf %413, %417 : vector<2x128xf32>
    %c10 = arith.constant 10 : index
    %c0_85 = arith.constant 0 : index
    %419 = vector.load %arg21[%c10, %c0_85] : memref<16x128xf32, #tpu.memory_space<vmem>>, vector<2x128xf32>
    tpu.vector_store %arg21[%c10, %c0_85], %418 {strides = array<i32>} : memref<16x128xf32, #tpu.memory_space<vmem>>, vector<2x128xf32>,
    %420 = vector.extract_strided_slice %243 {offsets = [12, 0], sizes = [2, 512], strides = [1, 1]} : vector<16x512xf32> to vector<2x512xf32>
    %cst_86 = arith.constant dense<0.000000e+00> : vector<2x512xf32>
    %421 = tpu.matmul %418, %239, %cst_86 {dimension_numbers = #tpu.dot_dimension_numbers<[1], [0], [0], [1], [0, 0, 1, 1], [], []>} : vector<2x128xf32>, vector<128x512xf32>, vector<2x512xf32> -> vector<2x512xf32>
    %422 = arith.addf %420, %421 : vector<2x512xf32>
    %423 = vector.extract_strided_slice %422 {offsets = [0, 0], sizes = [2, 128], strides = [1, 1]} : vector<2x512xf32> to vector<2x128xf32>
    %424 = arith.negf %423 : vector<2x128xf32>
    %425 = math.exp %424 : vector<2x128xf32>
    %cst_87 = arith.constant 1.000000e+00 : f32
    %426 = vector.broadcast %cst_87 : f32 to vector<2x128xf32>
    %427 = arith.addf %426, %425 : vector<2x128xf32>
    %428 = arith.divf %426, %427 : vector<2x128xf32>
    %429 = vector.extract_strided_slice %422 {offsets = [0, 128], sizes = [2, 128], strides = [1, 1]} : vector<2x512xf32> to vector<2x128xf32>
    %430 = arith.negf %429 : vector<2x128xf32>
    %431 = math.exp %430 : vector<2x128xf32>
    %cst_88 = arith.constant 1.000000e+00 : f32
    %432 = vector.broadcast %cst_88 : f32 to vector<2x128xf32>
    %433 = arith.addf %432, %431 : vector<2x128xf32>
    %434 = arith.divf %432, %433 : vector<2x128xf32>
    %435 = vector.extract_strided_slice %422 {offsets = [0, 256], sizes = [2, 128], strides = [1, 1]} : vector<2x512xf32> to vector<2x128xf32>
    %436 = math.tanh %435 : vector<2x128xf32>
    %437 = vector.extract_strided_slice %422 {offsets = [0, 384], sizes = [2, 128], strides = [1, 1]} : vector<2x512xf32> to vector<2x128xf32>
    %438 = arith.negf %437 : vector<2x128xf32>
    %439 = math.exp %438 : vector<2x128xf32>
    %cst_89 = arith.constant 1.000000e+00 : f32
    %440 = vector.broadcast %cst_89 : f32 to vector<2x128xf32>
    %441 = arith.addf %440, %439 : vector<2x128xf32>
    %442 = arith.divf %440, %441 : vector<2x128xf32>
    %443 = arith.mulf %434, %416 : vector<2x128xf32>
    %444 = arith.mulf %428, %436 : vector<2x128xf32>
    %445 = arith.addf %443, %444 : vector<2x128xf32>
    %446 = math.tanh %445 : vector<2x128xf32>
    %447 = arith.mulf %442, %446 : vector<2x128xf32>
    %c12 = arith.constant 12 : index
    %c0_90 = arith.constant 0 : index
    %448 = vector.load %arg21[%c12, %c0_90] : memref<16x128xf32, #tpu.memory_space<vmem>>, vector<2x128xf32>
    tpu.vector_store %arg21[%c12, %c0_90], %447 {strides = array<i32>} : memref<16x128xf32, #tpu.memory_space<vmem>>, vector<2x128xf32>,
    %449 = vector.extract_strided_slice %243 {offsets = [14, 0], sizes = [2, 512], strides = [1, 1]} : vector<16x512xf32> to vector<2x512xf32>
    %cst_91 = arith.constant dense<0.000000e+00> : vector<2x512xf32>
    %450 = tpu.matmul %447, %239, %cst_91 {dimension_numbers = #tpu.dot_dimension_numbers<[1], [0], [0], [1], [0, 0, 1, 1], [], []>} : vector<2x128xf32>, vector<128x512xf32>, vector<2x512xf32> -> vector<2x512xf32>
    %451 = arith.addf %449, %450 : vector<2x512xf32>
    %452 = vector.extract_strided_slice %451 {offsets = [0, 0], sizes = [2, 128], strides = [1, 1]} : vector<2x512xf32> to vector<2x128xf32>
    %453 = arith.negf %452 : vector<2x128xf32>
    %454 = math.exp %453 : vector<2x128xf32>
    %cst_92 = arith.constant 1.000000e+00 : f32
    %455 = vector.broadcast %cst_92 : f32 to vector<2x128xf32>
    %456 = arith.addf %455, %454 : vector<2x128xf32>
    %457 = arith.divf %455, %456 : vector<2x128xf32>
    %458 = vector.extract_strided_slice %451 {offsets = [0, 128], sizes = [2, 128], strides = [1, 1]} : vector<2x512xf32> to vector<2x128xf32>
    %459 = arith.negf %458 : vector<2x128xf32>
    %460 = math.exp %459 : vector<2x128xf32>
    %cst_93 = arith.constant 1.000000e+00 : f32
    %461 = vector.broadcast %cst_93 : f32 to vector<2x128xf32>
    %462 = arith.addf %461, %460 : vector<2x128xf32>
    %463 = arith.divf %461, %462 : vector<2x128xf32>
    %464 = vector.extract_strided_slice %451 {offsets = [0, 256], sizes = [2, 128], strides = [1, 1]} : vector<2x512xf32> to vector<2x128xf32>
    %465 = math.tanh %464 : vector<2x128xf32>
    %466 = vector.extract_strided_slice %451 {offsets = [0, 384], sizes = [2, 128], strides = [1, 1]} : vector<2x512xf32> to vector<2x128xf32>
    %467 = arith.negf %466 : vector<2x128xf32>
    %468 = math.exp %467 : vector<2x128xf32>
    %cst_94 = arith.constant 1.000000e+00 : f32
    %469 = vector.broadcast %cst_94 : f32 to vector<2x128xf32>
    %470 = arith.addf %469, %468 : vector<2x128xf32>
    %471 = arith.divf %469, %470 : vector<2x128xf32>
    %472 = arith.mulf %463, %445 : vector<2x128xf32>
    %473 = arith.mulf %457, %465 : vector<2x128xf32>
    %474 = arith.addf %472, %473 : vector<2x128xf32>
    %475 = math.tanh %474 : vector<2x128xf32>
    %476 = arith.mulf %471, %475 : vector<2x128xf32>
    %c14 = arith.constant 14 : index
    %c0_95 = arith.constant 0 : index
    %477 = vector.load %arg21[%c14, %c0_95] : memref<16x128xf32, #tpu.memory_space<vmem>>, vector<2x128xf32>
    tpu.vector_store %arg21[%c14, %c0_95], %476 {strides = array<i32>} : memref<16x128xf32, #tpu.memory_space<vmem>>, vector<2x128xf32>,
    %c0_96 = arith.constant 0 : index
    %c0_97 = arith.constant 0 : index
    %478 = vector.load %arg21[%c0_96, %c0_97] : memref<16x128xf32, #tpu.memory_space<vmem>>, vector<16x128xf32>
    %c0_98 = arith.constant 0 : index
    %c0_99 = arith.constant 0 : index
    %479 = vector.load %arg9[%c0_98, %c0_99] : memref<128x512xf32, #tpu.memory_space<vmem>>, vector<128x512xf32>
    %c0_100 = arith.constant 0 : index
    %c0_101 = arith.constant 0 : index
    %480 = vector.load %arg10[%c0_100, %c0_101] : memref<128x512xf32, #tpu.memory_space<vmem>>, vector<128x512xf32>
    %c0_102 = arith.constant 0 : index
    %c0_103 = arith.constant 0 : index
    %481 = vector.load %arg11[%c0_102, %c0_103] : memref<1x512xf32, #tpu.memory_space<vmem>>, vector<1x512xf32>
    %cst_104 = arith.constant dense<0.000000e+00> : vector<16x512xf32>
    %482 = tpu.matmul %478, %479, %cst_104 {dimension_numbers = #tpu.dot_dimension_numbers<[1], [0], [0], [1], [0, 0, 1, 1], [], []>} : vector<16x128xf32>, vector<128x512xf32>, vector<16x512xf32> -> vector<16x512xf32>
    %483 = vector.broadcast %481 : vector<1x512xf32> to vector<16x512xf32>
    %484 = arith.addf %482, %483 : vector<16x512xf32>
    %cst_105 = arith.constant 0.000000e+00 : f32
    %485 = vector.broadcast %cst_105 : f32 to vector<2x128xf32>
    %cst_106 = arith.constant 0.000000e+00 : f32
    %486 = vector.broadcast %cst_106 : f32 to vector<2x128xf32>
    %487 = vector.extract_strided_slice %484 {offsets = [0, 0], sizes = [2, 512], strides = [1, 1]} : vector<16x512xf32> to vector<2x512xf32>
    %cst_107 = arith.constant dense<0.000000e+00> : vector<2x512xf32>
    %488 = tpu.matmul %485, %480, %cst_107 {dimension_numbers = #tpu.dot_dimension_numbers<[1], [0], [0], [1], [0, 0, 1, 1], [], []>} : vector<2x128xf32>, vector<128x512xf32>, vector<2x512xf32> -> vector<2x512xf32>
    %489 = arith.addf %487, %488 : vector<2x512xf32>
    %490 = vector.extract_strided_slice %489 {offsets = [0, 0], sizes = [2, 128], strides = [1, 1]} : vector<2x512xf32> to vector<2x128xf32>
    %491 = arith.negf %490 : vector<2x128xf32>
    %492 = math.exp %491 : vector<2x128xf32>
    %cst_108 = arith.constant 1.000000e+00 : f32
    %493 = vector.broadcast %cst_108 : f32 to vector<2x128xf32>
    %494 = arith.addf %493, %492 : vector<2x128xf32>
    %495 = arith.divf %493, %494 : vector<2x128xf32>
    %496 = vector.extract_strided_slice %489 {offsets = [0, 128], sizes = [2, 128], strides = [1, 1]} : vector<2x512xf32> to vector<2x128xf32>
    %497 = arith.negf %496 : vector<2x128xf32>
    %498 = math.exp %497 : vector<2x128xf32>
    %cst_109 = arith.constant 1.000000e+00 : f32
    %499 = vector.broadcast %cst_109 : f32 to vector<2x128xf32>
    %500 = arith.addf %499, %498 : vector<2x128xf32>
    %501 = arith.divf %499, %500 : vector<2x128xf32>
    %502 = vector.extract_strided_slice %489 {offsets = [0, 256], sizes = [2, 128], strides = [1, 1]} : vector<2x512xf32> to vector<2x128xf32>
    %503 = math.tanh %502 : vector<2x128xf32>
    %504 = vector.extract_strided_slice %489 {offsets = [0, 384], sizes = [2, 128], strides = [1, 1]} : vector<2x512xf32> to vector<2x128xf32>
    %505 = arith.negf %504 : vector<2x128xf32>
    %506 = math.exp %505 : vector<2x128xf32>
    %cst_110 = arith.constant 1.000000e+00 : f32
    %507 = vector.broadcast %cst_110 : f32 to vector<2x128xf32>
    %508 = arith.addf %507, %506 : vector<2x128xf32>
    %509 = arith.divf %507, %508 : vector<2x128xf32>
    %510 = arith.mulf %501, %486 : vector<2x128xf32>
    %511 = arith.mulf %495, %503 : vector<2x128xf32>
    %512 = arith.addf %510, %511 : vector<2x128xf32>
    %513 = math.tanh %512 : vector<2x128xf32>
    %514 = arith.mulf %509, %513 : vector<2x128xf32>
    %515 = vector.extract_strided_slice %484 {offsets = [2, 0], sizes = [2, 512], strides = [1, 1]} : vector<16x512xf32> to vector<2x512xf32>
    %cst_111 = arith.constant dense<0.000000e+00> : vector<2x512xf32>
    %516 = tpu.matmul %514, %480, %cst_111 {dimension_numbers = #tpu.dot_dimension_numbers<[1], [0], [0], [1], [0, 0, 1, 1], [], []>} : vector<2x128xf32>, vector<128x512xf32>, vector<2x512xf32> -> vector<2x512xf32>
    %517 = arith.addf %515, %516 : vector<2x512xf32>
    %518 = vector.extract_strided_slice %517 {offsets = [0, 0], sizes = [2, 128], strides = [1, 1]} : vector<2x512xf32> to vector<2x128xf32>
    %519 = arith.negf %518 : vector<2x128xf32>
    %520 = math.exp %519 : vector<2x128xf32>
    %cst_112 = arith.constant 1.000000e+00 : f32
    %521 = vector.broadcast %cst_112 : f32 to vector<2x128xf32>
    %522 = arith.addf %521, %520 : vector<2x128xf32>
    %523 = arith.divf %521, %522 : vector<2x128xf32>
    %524 = vector.extract_strided_slice %517 {offsets = [0, 128], sizes = [2, 128], strides = [1, 1]} : vector<2x512xf32> to vector<2x128xf32>
    %525 = arith.negf %524 : vector<2x128xf32>
    %526 = math.exp %525 : vector<2x128xf32>
    %cst_113 = arith.constant 1.000000e+00 : f32
    %527 = vector.broadcast %cst_113 : f32 to vector<2x128xf32>
    %528 = arith.addf %527, %526 : vector<2x128xf32>
    %529 = arith.divf %527, %528 : vector<2x128xf32>
    %530 = vector.extract_strided_slice %517 {offsets = [0, 256], sizes = [2, 128], strides = [1, 1]} : vector<2x512xf32> to vector<2x128xf32>
    %531 = math.tanh %530 : vector<2x128xf32>
    %532 = vector.extract_strided_slice %517 {offsets = [0, 384], sizes = [2, 128], strides = [1, 1]} : vector<2x512xf32> to vector<2x128xf32>
    %533 = arith.negf %532 : vector<2x128xf32>
    %534 = math.exp %533 : vector<2x128xf32>
    %cst_114 = arith.constant 1.000000e+00 : f32
    %535 = vector.broadcast %cst_114 : f32 to vector<2x128xf32>
    %536 = arith.addf %535, %534 : vector<2x128xf32>
    %537 = arith.divf %535, %536 : vector<2x128xf32>
    %538 = arith.mulf %529, %512 : vector<2x128xf32>
    %539 = arith.mulf %523, %531 : vector<2x128xf32>
    %540 = arith.addf %538, %539 : vector<2x128xf32>
    %541 = math.tanh %540 : vector<2x128xf32>
    %542 = arith.mulf %537, %541 : vector<2x128xf32>
    %543 = vector.extract_strided_slice %484 {offsets = [4, 0], sizes = [2, 512], strides = [1, 1]} : vector<16x512xf32> to vector<2x512xf32>
    %cst_115 = arith.constant dense<0.000000e+00> : vector<2x512xf32>
    %544 = tpu.matmul %542, %480, %cst_115 {dimension_numbers = #tpu.dot_dimension_numbers<[1], [0], [0], [1], [0, 0, 1, 1], [], []>} : vector<2x128xf32>, vector<128x512xf32>, vector<2x512xf32> -> vector<2x512xf32>
    %545 = arith.addf %543, %544 : vector<2x512xf32>
    %546 = vector.extract_strided_slice %545 {offsets = [0, 0], sizes = [2, 128], strides = [1, 1]} : vector<2x512xf32> to vector<2x128xf32>
    %547 = arith.negf %546 : vector<2x128xf32>
    %548 = math.exp %547 : vector<2x128xf32>
    %cst_116 = arith.constant 1.000000e+00 : f32
    %549 = vector.broadcast %cst_116 : f32 to vector<2x128xf32>
    %550 = arith.addf %549, %548 : vector<2x128xf32>
    %551 = arith.divf %549, %550 : vector<2x128xf32>
    %552 = vector.extract_strided_slice %545 {offsets = [0, 128], sizes = [2, 128], strides = [1, 1]} : vector<2x512xf32> to vector<2x128xf32>
    %553 = arith.negf %552 : vector<2x128xf32>
    %554 = math.exp %553 : vector<2x128xf32>
    %cst_117 = arith.constant 1.000000e+00 : f32
    %555 = vector.broadcast %cst_117 : f32 to vector<2x128xf32>
    %556 = arith.addf %555, %554 : vector<2x128xf32>
    %557 = arith.divf %555, %556 : vector<2x128xf32>
    %558 = vector.extract_strided_slice %545 {offsets = [0, 256], sizes = [2, 128], strides = [1, 1]} : vector<2x512xf32> to vector<2x128xf32>
    %559 = math.tanh %558 : vector<2x128xf32>
    %560 = vector.extract_strided_slice %545 {offsets = [0, 384], sizes = [2, 128], strides = [1, 1]} : vector<2x512xf32> to vector<2x128xf32>
    %561 = arith.negf %560 : vector<2x128xf32>
    %562 = math.exp %561 : vector<2x128xf32>
    %cst_118 = arith.constant 1.000000e+00 : f32
    %563 = vector.broadcast %cst_118 : f32 to vector<2x128xf32>
    %564 = arith.addf %563, %562 : vector<2x128xf32>
    %565 = arith.divf %563, %564 : vector<2x128xf32>
    %566 = arith.mulf %557, %540 : vector<2x128xf32>
    %567 = arith.mulf %551, %559 : vector<2x128xf32>
    %568 = arith.addf %566, %567 : vector<2x128xf32>
    %569 = math.tanh %568 : vector<2x128xf32>
    %570 = arith.mulf %565, %569 : vector<2x128xf32>
    %571 = vector.extract_strided_slice %484 {offsets = [6, 0], sizes = [2, 512], strides = [1, 1]} : vector<16x512xf32> to vector<2x512xf32>
    %cst_119 = arith.constant dense<0.000000e+00> : vector<2x512xf32>
    %572 = tpu.matmul %570, %480, %cst_119 {dimension_numbers = #tpu.dot_dimension_numbers<[1], [0], [0], [1], [0, 0, 1, 1], [], []>} : vector<2x128xf32>, vector<128x512xf32>, vector<2x512xf32> -> vector<2x512xf32>
    %573 = arith.addf %571, %572 : vector<2x512xf32>
    %574 = vector.extract_strided_slice %573 {offsets = [0, 0], sizes = [2, 128], strides = [1, 1]} : vector<2x512xf32> to vector<2x128xf32>
    %575 = arith.negf %574 : vector<2x128xf32>
    %576 = math.exp %575 : vector<2x128xf32>
    %cst_120 = arith.constant 1.000000e+00 : f32
    %577 = vector.broadcast %cst_120 : f32 to vector<2x128xf32>
    %578 = arith.addf %577, %576 : vector<2x128xf32>
    %579 = arith.divf %577, %578 : vector<2x128xf32>
    %580 = vector.extract_strided_slice %573 {offsets = [0, 128], sizes = [2, 128], strides = [1, 1]} : vector<2x512xf32> to vector<2x128xf32>
    %581 = arith.negf %580 : vector<2x128xf32>
    %582 = math.exp %581 : vector<2x128xf32>
    %cst_121 = arith.constant 1.000000e+00 : f32
    %583 = vector.broadcast %cst_121 : f32 to vector<2x128xf32>
    %584 = arith.addf %583, %582 : vector<2x128xf32>
    %585 = arith.divf %583, %584 : vector<2x128xf32>
    %586 = vector.extract_strided_slice %573 {offsets = [0, 256], sizes = [2, 128], strides = [1, 1]} : vector<2x512xf32> to vector<2x128xf32>
    %587 = math.tanh %586 : vector<2x128xf32>
    %588 = vector.extract_strided_slice %573 {offsets = [0, 384], sizes = [2, 128], strides = [1, 1]} : vector<2x512xf32> to vector<2x128xf32>
    %589 = arith.negf %588 : vector<2x128xf32>
    %590 = math.exp %589 : vector<2x128xf32>
    %cst_122 = arith.constant 1.000000e+00 : f32
    %591 = vector.broadcast %cst_122 : f32 to vector<2x128xf32>
    %592 = arith.addf %591, %590 : vector<2x128xf32>
    %593 = arith.divf %591, %592 : vector<2x128xf32>
    %594 = arith.mulf %585, %568 : vector<2x128xf32>
    %595 = arith.mulf %579, %587 : vector<2x128xf32>
    %596 = arith.addf %594, %595 : vector<2x128xf32>
    %597 = math.tanh %596 : vector<2x128xf32>
    %598 = arith.mulf %593, %597 : vector<2x128xf32>
    %599 = vector.extract_strided_slice %484 {offsets = [8, 0], sizes = [2, 512], strides = [1, 1]} : vector<16x512xf32> to vector<2x512xf32>
    %cst_123 = arith.constant dense<0.000000e+00> : vector<2x512xf32>
    %600 = tpu.matmul %598, %480, %cst_123 {dimension_numbers = #tpu.dot_dimension_numbers<[1], [0], [0], [1], [0, 0, 1, 1], [], []>} : vector<2x128xf32>, vector<128x512xf32>, vector<2x512xf32> -> vector<2x512xf32>
    %601 = arith.addf %599, %600 : vector<2x512xf32>
    %602 = vector.extract_strided_slice %601 {offsets = [0, 0], sizes = [2, 128], strides = [1, 1]} : vector<2x512xf32> to vector<2x128xf32>
    %603 = arith.negf %602 : vector<2x128xf32>
    %604 = math.exp %603 : vector<2x128xf32>
    %cst_124 = arith.constant 1.000000e+00 : f32
    %605 = vector.broadcast %cst_124 : f32 to vector<2x128xf32>
    %606 = arith.addf %605, %604 : vector<2x128xf32>
    %607 = arith.divf %605, %606 : vector<2x128xf32>
    %608 = vector.extract_strided_slice %601 {offsets = [0, 128], sizes = [2, 128], strides = [1, 1]} : vector<2x512xf32> to vector<2x128xf32>
    %609 = arith.negf %608 : vector<2x128xf32>
    %610 = math.exp %609 : vector<2x128xf32>
    %cst_125 = arith.constant 1.000000e+00 : f32
    %611 = vector.broadcast %cst_125 : f32 to vector<2x128xf32>
    %612 = arith.addf %611, %610 : vector<2x128xf32>
    %613 = arith.divf %611, %612 : vector<2x128xf32>
    %614 = vector.extract_strided_slice %601 {offsets = [0, 256], sizes = [2, 128], strides = [1, 1]} : vector<2x512xf32> to vector<2x128xf32>
    %615 = math.tanh %614 : vector<2x128xf32>
    %616 = vector.extract_strided_slice %601 {offsets = [0, 384], sizes = [2, 128], strides = [1, 1]} : vector<2x512xf32> to vector<2x128xf32>
    %617 = arith.negf %616 : vector<2x128xf32>
    %618 = math.exp %617 : vector<2x128xf32>
    %cst_126 = arith.constant 1.000000e+00 : f32
    %619 = vector.broadcast %cst_126 : f32 to vector<2x128xf32>
    %620 = arith.addf %619, %618 : vector<2x128xf32>
    %621 = arith.divf %619, %620 : vector<2x128xf32>
    %622 = arith.mulf %613, %596 : vector<2x128xf32>
    %623 = arith.mulf %607, %615 : vector<2x128xf32>
    %624 = arith.addf %622, %623 : vector<2x128xf32>
    %625 = math.tanh %624 : vector<2x128xf32>
    %626 = arith.mulf %621, %625 : vector<2x128xf32>
    %627 = vector.extract_strided_slice %484 {offsets = [10, 0], sizes = [2, 512], strides = [1, 1]} : vector<16x512xf32> to vector<2x512xf32>
    %cst_127 = arith.constant dense<0.000000e+00> : vector<2x512xf32>
    %628 = tpu.matmul %626, %480, %cst_127 {dimension_numbers = #tpu.dot_dimension_numbers<[1], [0], [0], [1], [0, 0, 1, 1], [], []>} : vector<2x128xf32>, vector<128x512xf32>, vector<2x512xf32> -> vector<2x512xf32>
    %629 = arith.addf %627, %628 : vector<2x512xf32>
    %630 = vector.extract_strided_slice %629 {offsets = [0, 0], sizes = [2, 128], strides = [1, 1]} : vector<2x512xf32> to vector<2x128xf32>
    %631 = arith.negf %630 : vector<2x128xf32>
    %632 = math.exp %631 : vector<2x128xf32>
    %cst_128 = arith.constant 1.000000e+00 : f32
    %633 = vector.broadcast %cst_128 : f32 to vector<2x128xf32>
    %634 = arith.addf %633, %632 : vector<2x128xf32>
    %635 = arith.divf %633, %634 : vector<2x128xf32>
    %636 = vector.extract_strided_slice %629 {offsets = [0, 128], sizes = [2, 128], strides = [1, 1]} : vector<2x512xf32> to vector<2x128xf32>
    %637 = arith.negf %636 : vector<2x128xf32>
    %638 = math.exp %637 : vector<2x128xf32>
    %cst_129 = arith.constant 1.000000e+00 : f32
    %639 = vector.broadcast %cst_129 : f32 to vector<2x128xf32>
    %640 = arith.addf %639, %638 : vector<2x128xf32>
    %641 = arith.divf %639, %640 : vector<2x128xf32>
    %642 = vector.extract_strided_slice %629 {offsets = [0, 256], sizes = [2, 128], strides = [1, 1]} : vector<2x512xf32> to vector<2x128xf32>
    %643 = math.tanh %642 : vector<2x128xf32>
    %644 = vector.extract_strided_slice %629 {offsets = [0, 384], sizes = [2, 128], strides = [1, 1]} : vector<2x512xf32> to vector<2x128xf32>
    %645 = arith.negf %644 : vector<2x128xf32>
    %646 = math.exp %645 : vector<2x128xf32>
    %cst_130 = arith.constant 1.000000e+00 : f32
    %647 = vector.broadcast %cst_130 : f32 to vector<2x128xf32>
    %648 = arith.addf %647, %646 : vector<2x128xf32>
    %649 = arith.divf %647, %648 : vector<2x128xf32>
    %650 = arith.mulf %641, %624 : vector<2x128xf32>
    %651 = arith.mulf %635, %643 : vector<2x128xf32>
    %652 = arith.addf %650, %651 : vector<2x128xf32>
    %653 = math.tanh %652 : vector<2x128xf32>
    %654 = arith.mulf %649, %653 : vector<2x128xf32>
    %655 = vector.extract_strided_slice %484 {offsets = [12, 0], sizes = [2, 512], strides = [1, 1]} : vector<16x512xf32> to vector<2x512xf32>
    %cst_131 = arith.constant dense<0.000000e+00> : vector<2x512xf32>
    %656 = tpu.matmul %654, %480, %cst_131 {dimension_numbers = #tpu.dot_dimension_numbers<[1], [0], [0], [1], [0, 0, 1, 1], [], []>} : vector<2x128xf32>, vector<128x512xf32>, vector<2x512xf32> -> vector<2x512xf32>
    %657 = arith.addf %655, %656 : vector<2x512xf32>
    %658 = vector.extract_strided_slice %657 {offsets = [0, 0], sizes = [2, 128], strides = [1, 1]} : vector<2x512xf32> to vector<2x128xf32>
    %659 = arith.negf %658 : vector<2x128xf32>
    %660 = math.exp %659 : vector<2x128xf32>
    %cst_132 = arith.constant 1.000000e+00 : f32
    %661 = vector.broadcast %cst_132 : f32 to vector<2x128xf32>
    %662 = arith.addf %661, %660 : vector<2x128xf32>
    %663 = arith.divf %661, %662 : vector<2x128xf32>
    %664 = vector.extract_strided_slice %657 {offsets = [0, 128], sizes = [2, 128], strides = [1, 1]} : vector<2x512xf32> to vector<2x128xf32>
    %665 = arith.negf %664 : vector<2x128xf32>
    %666 = math.exp %665 : vector<2x128xf32>
    %cst_133 = arith.constant 1.000000e+00 : f32
    %667 = vector.broadcast %cst_133 : f32 to vector<2x128xf32>
    %668 = arith.addf %667, %666 : vector<2x128xf32>
    %669 = arith.divf %667, %668 : vector<2x128xf32>
    %670 = vector.extract_strided_slice %657 {offsets = [0, 256], sizes = [2, 128], strides = [1, 1]} : vector<2x512xf32> to vector<2x128xf32>
    %671 = math.tanh %670 : vector<2x128xf32>
    %672 = vector.extract_strided_slice %657 {offsets = [0, 384], sizes = [2, 128], strides = [1, 1]} : vector<2x512xf32> to vector<2x128xf32>
    %673 = arith.negf %672 : vector<2x128xf32>
    %674 = math.exp %673 : vector<2x128xf32>
    %cst_134 = arith.constant 1.000000e+00 : f32
    %675 = vector.broadcast %cst_134 : f32 to vector<2x128xf32>
    %676 = arith.addf %675, %674 : vector<2x128xf32>
    %677 = arith.divf %675, %676 : vector<2x128xf32>
    %678 = arith.mulf %669, %652 : vector<2x128xf32>
    %679 = arith.mulf %663, %671 : vector<2x128xf32>
    %680 = arith.addf %678, %679 : vector<2x128xf32>
    %681 = math.tanh %680 : vector<2x128xf32>
    %682 = arith.mulf %677, %681 : vector<2x128xf32>
    %683 = vector.extract_strided_slice %484 {offsets = [14, 0], sizes = [2, 512], strides = [1, 1]} : vector<16x512xf32> to vector<2x512xf32>
    %cst_135 = arith.constant dense<0.000000e+00> : vector<2x512xf32>
    %684 = tpu.matmul %682, %480, %cst_135 {dimension_numbers = #tpu.dot_dimension_numbers<[1], [0], [0], [1], [0, 0, 1, 1], [], []>} : vector<2x128xf32>, vector<128x512xf32>, vector<2x512xf32> -> vector<2x512xf32>
    %685 = arith.addf %683, %684 : vector<2x512xf32>
    %686 = vector.extract_strided_slice %685 {offsets = [0, 0], sizes = [2, 128], strides = [1, 1]} : vector<2x512xf32> to vector<2x128xf32>
    %687 = arith.negf %686 : vector<2x128xf32>
    %688 = math.exp %687 : vector<2x128xf32>
    %cst_136 = arith.constant 1.000000e+00 : f32
    %689 = vector.broadcast %cst_136 : f32 to vector<2x128xf32>
    %690 = arith.addf %689, %688 : vector<2x128xf32>
    %691 = arith.divf %689, %690 : vector<2x128xf32>
    %692 = vector.extract_strided_slice %685 {offsets = [0, 128], sizes = [2, 128], strides = [1, 1]} : vector<2x512xf32> to vector<2x128xf32>
    %693 = arith.negf %692 : vector<2x128xf32>
    %694 = math.exp %693 : vector<2x128xf32>
    %cst_137 = arith.constant 1.000000e+00 : f32
    %695 = vector.broadcast %cst_137 : f32 to vector<2x128xf32>
    %696 = arith.addf %695, %694 : vector<2x128xf32>
    %697 = arith.divf %695, %696 : vector<2x128xf32>
    %698 = vector.extract_strided_slice %685 {offsets = [0, 256], sizes = [2, 128], strides = [1, 1]} : vector<2x512xf32> to vector<2x128xf32>
    %699 = math.tanh %698 : vector<2x128xf32>
    %700 = vector.extract_strided_slice %685 {offsets = [0, 384], sizes = [2, 128], strides = [1, 1]} : vector<2x512xf32> to vector<2x128xf32>
    %701 = arith.negf %700 : vector<2x128xf32>
    %702 = math.exp %701 : vector<2x128xf32>
    %cst_138 = arith.constant 1.000000e+00 : f32
    %703 = vector.broadcast %cst_138 : f32 to vector<2x128xf32>
    %704 = arith.addf %703, %702 : vector<2x128xf32>
    %705 = arith.divf %703, %704 : vector<2x128xf32>
    %706 = arith.mulf %697, %680 : vector<2x128xf32>
    %707 = arith.mulf %691, %699 : vector<2x128xf32>
    %708 = arith.addf %706, %707 : vector<2x128xf32>
    %709 = math.tanh %708 : vector<2x128xf32>
    %710 = arith.mulf %705, %709 : vector<2x128xf32>
    %c0_139 = arith.constant 0 : index
    %c0_140 = arith.constant 0 : index
    %711 = vector.load %arg12[%c0_139, %c0_140] : memref<128x12xf32, #tpu.memory_space<vmem>>, vector<128x12xf32>
    %cst_141 = arith.constant dense<0.000000e+00> : vector<2x12xf32>
    %712 = tpu.matmul %710, %711, %cst_141 {dimension_numbers = #tpu.dot_dimension_numbers<[1], [0], [0], [1], [0, 0, 1, 1], [], []>} : vector<2x128xf32>, vector<128x12xf32>, vector<2x12xf32> -> vector<2x12xf32>
    %c0_142 = arith.constant 0 : index
    %c0_143 = arith.constant 0 : index
    %713 = vector.load %arg13[%c0_142, %c0_143] : memref<1x12xf32, #tpu.memory_space<vmem>>, vector<1x12xf32>
    %714 = vector.broadcast %713 : vector<1x12xf32> to vector<2x12xf32>
    %715 = arith.addf %712, %714 : vector<2x12xf32>
    %c0_144 = arith.constant 0 : index
    %c0_145 = arith.constant 0 : index
    %716 = vector.load %arg14[%c0_144, %c0_145] : memref<16x512xf32, #tpu.memory_space<vmem>>, vector<16x512xf32>
    %c0_146 = arith.constant 0 : index
    %c0_147 = arith.constant 0 : index
    %717 = vector.load %arg15[%c0_146, %c0_147] : memref<128x512xf32, #tpu.memory_space<vmem>>, vector<128x512xf32>
    %c0_148 = arith.constant 0 : index
    %c0_149 = arith.constant 0 : index
    %718 = vector.load %arg16[%c0_148, %c0_149] : memref<1x512xf32, #tpu.memory_space<vmem>>, vector<1x512xf32>
    %cst_150 = arith.constant dense<0.000000e+00> : vector<16x512xf32>
    %719 = tpu.matmul %0, %716, %cst_150 {dimension_numbers = #tpu.dot_dimension_numbers<[1], [0], [0], [1], [0, 0, 1, 1], [], []>} : vector<16x16xf32>, vector<16x512xf32>, vector<16x512xf32> -> vector<16x512xf32>
    %720 = vector.broadcast %718 : vector<1x512xf32> to vector<16x512xf32>
    %721 = arith.addf %719, %720 : vector<16x512xf32>
    %cst_151 = arith.constant 0.000000e+00 : f32
    %722 = vector.broadcast %cst_151 : f32 to vector<2x128xf32>
    %cst_152 = arith.constant 0.000000e+00 : f32
    %723 = vector.broadcast %cst_152 : f32 to vector<2x128xf32>
    %724 = vector.extract_strided_slice %721 {offsets = [0, 0], sizes = [2, 512], strides = [1, 1]} : vector<16x512xf32> to vector<2x512xf32>
    %cst_153 = arith.constant dense<0.000000e+00> : vector<2x512xf32>
    %725 = tpu.matmul %722, %717, %cst_153 {dimension_numbers = #tpu.dot_dimension_numbers<[1], [0], [0], [1], [0, 0, 1, 1], [], []>} : vector<2x128xf32>, vector<128x512xf32>, vector<2x512xf32> -> vector<2x512xf32>
    %726 = arith.addf %724, %725 : vector<2x512xf32>
    %727 = vector.extract_strided_slice %726 {offsets = [0, 0], sizes = [2, 128], strides = [1, 1]} : vector<2x512xf32> to vector<2x128xf32>
    %728 = arith.negf %727 : vector<2x128xf32>
    %729 = math.exp %728 : vector<2x128xf32>
    %cst_154 = arith.constant 1.000000e+00 : f32
    %730 = vector.broadcast %cst_154 : f32 to vector<2x128xf32>
    %731 = arith.addf %730, %729 : vector<2x128xf32>
    %732 = arith.divf %730, %731 : vector<2x128xf32>
    %733 = vector.extract_strided_slice %726 {offsets = [0, 128], sizes = [2, 128], strides = [1, 1]} : vector<2x512xf32> to vector<2x128xf32>
    %734 = arith.negf %733 : vector<2x128xf32>
    %735 = math.exp %734 : vector<2x128xf32>
    %cst_155 = arith.constant 1.000000e+00 : f32
    %736 = vector.broadcast %cst_155 : f32 to vector<2x128xf32>
    %737 = arith.addf %736, %735 : vector<2x128xf32>
    %738 = arith.divf %736, %737 : vector<2x128xf32>
    %739 = vector.extract_strided_slice %726 {offsets = [0, 256], sizes = [2, 128], strides = [1, 1]} : vector<2x512xf32> to vector<2x128xf32>
    %740 = math.tanh %739 : vector<2x128xf32>
    %741 = vector.extract_strided_slice %726 {offsets = [0, 384], sizes = [2, 128], strides = [1, 1]} : vector<2x512xf32> to vector<2x128xf32>
    %742 = arith.negf %741 : vector<2x128xf32>
    %743 = math.exp %742 : vector<2x128xf32>
    %cst_156 = arith.constant 1.000000e+00 : f32
    %744 = vector.broadcast %cst_156 : f32 to vector<2x128xf32>
    %745 = arith.addf %744, %743 : vector<2x128xf32>
    %746 = arith.divf %744, %745 : vector<2x128xf32>
    %747 = arith.mulf %738, %723 : vector<2x128xf32>
    %748 = arith.mulf %732, %740 : vector<2x128xf32>
    %749 = arith.addf %747, %748 : vector<2x128xf32>
    %750 = math.tanh %749 : vector<2x128xf32>
    %751 = arith.mulf %746, %750 : vector<2x128xf32>
    %752 = vector.extract_strided_slice %721 {offsets = [2, 0], sizes = [2, 512], strides = [1, 1]} : vector<16x512xf32> to vector<2x512xf32>
    %cst_157 = arith.constant dense<0.000000e+00> : vector<2x512xf32>
    %753 = tpu.matmul %751, %717, %cst_157 {dimension_numbers = #tpu.dot_dimension_numbers<[1], [0], [0], [1], [0, 0, 1, 1], [], []>} : vector<2x128xf32>, vector<128x512xf32>, vector<2x512xf32> -> vector<2x512xf32>
    %754 = arith.addf %752, %753 : vector<2x512xf32>
    %755 = vector.extract_strided_slice %754 {offsets = [0, 0], sizes = [2, 128], strides = [1, 1]} : vector<2x512xf32> to vector<2x128xf32>
    %756 = arith.negf %755 : vector<2x128xf32>
    %757 = math.exp %756 : vector<2x128xf32>
    %cst_158 = arith.constant 1.000000e+00 : f32
    %758 = vector.broadcast %cst_158 : f32 to vector<2x128xf32>
    %759 = arith.addf %758, %757 : vector<2x128xf32>
    %760 = arith.divf %758, %759 : vector<2x128xf32>
    %761 = vector.extract_strided_slice %754 {offsets = [0, 128], sizes = [2, 128], strides = [1, 1]} : vector<2x512xf32> to vector<2x128xf32>
    %762 = arith.negf %761 : vector<2x128xf32>
    %763 = math.exp %762 : vector<2x128xf32>
    %cst_159 = arith.constant 1.000000e+00 : f32
    %764 = vector.broadcast %cst_159 : f32 to vector<2x128xf32>
    %765 = arith.addf %764, %763 : vector<2x128xf32>
    %766 = arith.divf %764, %765 : vector<2x128xf32>
    %767 = vector.extract_strided_slice %754 {offsets = [0, 256], sizes = [2, 128], strides = [1, 1]} : vector<2x512xf32> to vector<2x128xf32>
    %768 = math.tanh %767 : vector<2x128xf32>
    %769 = vector.extract_strided_slice %754 {offsets = [0, 384], sizes = [2, 128], strides = [1, 1]} : vector<2x512xf32> to vector<2x128xf32>
    %770 = arith.negf %769 : vector<2x128xf32>
    %771 = math.exp %770 : vector<2x128xf32>
    %cst_160 = arith.constant 1.000000e+00 : f32
    %772 = vector.broadcast %cst_160 : f32 to vector<2x128xf32>
    %773 = arith.addf %772, %771 : vector<2x128xf32>
    %774 = arith.divf %772, %773 : vector<2x128xf32>
    %775 = arith.mulf %766, %749 : vector<2x128xf32>
    %776 = arith.mulf %760, %768 : vector<2x128xf32>
    %777 = arith.addf %775, %776 : vector<2x128xf32>
    %778 = math.tanh %777 : vector<2x128xf32>
    %779 = arith.mulf %774, %778 : vector<2x128xf32>
    %780 = vector.extract_strided_slice %721 {offsets = [4, 0], sizes = [2, 512], strides = [1, 1]} : vector<16x512xf32> to vector<2x512xf32>
    %cst_161 = arith.constant dense<0.000000e+00> : vector<2x512xf32>
    %781 = tpu.matmul %779, %717, %cst_161 {dimension_numbers = #tpu.dot_dimension_numbers<[1], [0], [0], [1], [0, 0, 1, 1], [], []>} : vector<2x128xf32>, vector<128x512xf32>, vector<2x512xf32> -> vector<2x512xf32>
    %782 = arith.addf %780, %781 : vector<2x512xf32>
    %783 = vector.extract_strided_slice %782 {offsets = [0, 0], sizes = [2, 128], strides = [1, 1]} : vector<2x512xf32> to vector<2x128xf32>
    %784 = arith.negf %783 : vector<2x128xf32>
    %785 = math.exp %784 : vector<2x128xf32>
    %cst_162 = arith.constant 1.000000e+00 : f32
    %786 = vector.broadcast %cst_162 : f32 to vector<2x128xf32>
    %787 = arith.addf %786, %785 : vector<2x128xf32>
    %788 = arith.divf %786, %787 : vector<2x128xf32>
    %789 = vector.extract_strided_slice %782 {offsets = [0, 128], sizes = [2, 128], strides = [1, 1]} : vector<2x512xf32> to vector<2x128xf32>
    %790 = arith.negf %789 : vector<2x128xf32>
    %791 = math.exp %790 : vector<2x128xf32>
    %cst_163 = arith.constant 1.000000e+00 : f32
    %792 = vector.broadcast %cst_163 : f32 to vector<2x128xf32>
    %793 = arith.addf %792, %791 : vector<2x128xf32>
    %794 = arith.divf %792, %793 : vector<2x128xf32>
    %795 = vector.extract_strided_slice %782 {offsets = [0, 256], sizes = [2, 128], strides = [1, 1]} : vector<2x512xf32> to vector<2x128xf32>
    %796 = math.tanh %795 : vector<2x128xf32>
    %797 = vector.extract_strided_slice %782 {offsets = [0, 384], sizes = [2, 128], strides = [1, 1]} : vector<2x512xf32> to vector<2x128xf32>
    %798 = arith.negf %797 : vector<2x128xf32>
    %799 = math.exp %798 : vector<2x128xf32>
    %cst_164 = arith.constant 1.000000e+00 : f32
    %800 = vector.broadcast %cst_164 : f32 to vector<2x128xf32>
    %801 = arith.addf %800, %799 : vector<2x128xf32>
    %802 = arith.divf %800, %801 : vector<2x128xf32>
    %803 = arith.mulf %794, %777 : vector<2x128xf32>
    %804 = arith.mulf %788, %796 : vector<2x128xf32>
    %805 = arith.addf %803, %804 : vector<2x128xf32>
    %806 = math.tanh %805 : vector<2x128xf32>
    %807 = arith.mulf %802, %806 : vector<2x128xf32>
    %808 = vector.extract_strided_slice %721 {offsets = [6, 0], sizes = [2, 512], strides = [1, 1]} : vector<16x512xf32> to vector<2x512xf32>
    %cst_165 = arith.constant dense<0.000000e+00> : vector<2x512xf32>
    %809 = tpu.matmul %807, %717, %cst_165 {dimension_numbers = #tpu.dot_dimension_numbers<[1], [0], [0], [1], [0, 0, 1, 1], [], []>} : vector<2x128xf32>, vector<128x512xf32>, vector<2x512xf32> -> vector<2x512xf32>
    %810 = arith.addf %808, %809 : vector<2x512xf32>
    %811 = vector.extract_strided_slice %810 {offsets = [0, 0], sizes = [2, 128], strides = [1, 1]} : vector<2x512xf32> to vector<2x128xf32>
    %812 = arith.negf %811 : vector<2x128xf32>
    %813 = math.exp %812 : vector<2x128xf32>
    %cst_166 = arith.constant 1.000000e+00 : f32
    %814 = vector.broadcast %cst_166 : f32 to vector<2x128xf32>
    %815 = arith.addf %814, %813 : vector<2x128xf32>
    %816 = arith.divf %814, %815 : vector<2x128xf32>
    %817 = vector.extract_strided_slice %810 {offsets = [0, 128], sizes = [2, 128], strides = [1, 1]} : vector<2x512xf32> to vector<2x128xf32>
    %818 = arith.negf %817 : vector<2x128xf32>
    %819 = math.exp %818 : vector<2x128xf32>
    %cst_167 = arith.constant 1.000000e+00 : f32
    %820 = vector.broadcast %cst_167 : f32 to vector<2x128xf32>
    %821 = arith.addf %820, %819 : vector<2x128xf32>
    %822 = arith.divf %820, %821 : vector<2x128xf32>
    %823 = vector.extract_strided_slice %810 {offsets = [0, 256], sizes = [2, 128], strides = [1, 1]} : vector<2x512xf32> to vector<2x128xf32>
    %824 = math.tanh %823 : vector<2x128xf32>
    %825 = vector.extract_strided_slice %810 {offsets = [0, 384], sizes = [2, 128], strides = [1, 1]} : vector<2x512xf32> to vector<2x128xf32>
    %826 = arith.negf %825 : vector<2x128xf32>
    %827 = math.exp %826 : vector<2x128xf32>
    %cst_168 = arith.constant 1.000000e+00 : f32
    %828 = vector.broadcast %cst_168 : f32 to vector<2x128xf32>
    %829 = arith.addf %828, %827 : vector<2x128xf32>
    %830 = arith.divf %828, %829 : vector<2x128xf32>
    %831 = arith.mulf %822, %805 : vector<2x128xf32>
    %832 = arith.mulf %816, %824 : vector<2x128xf32>
    %833 = arith.addf %831, %832 : vector<2x128xf32>
    %834 = math.tanh %833 : vector<2x128xf32>
    %835 = arith.mulf %830, %834 : vector<2x128xf32>
    %836 = vector.extract_strided_slice %721 {offsets = [8, 0], sizes = [2, 512], strides = [1, 1]} : vector<16x512xf32> to vector<2x512xf32>
    %cst_169 = arith.constant dense<0.000000e+00> : vector<2x512xf32>
    %837 = tpu.matmul %835, %717, %cst_169 {dimension_numbers = #tpu.dot_dimension_numbers<[1], [0], [0], [1], [0, 0, 1, 1], [], []>} : vector<2x128xf32>, vector<128x512xf32>, vector<2x512xf32> -> vector<2x512xf32>
    %838 = arith.addf %836, %837 : vector<2x512xf32>
    %839 = vector.extract_strided_slice %838 {offsets = [0, 0], sizes = [2, 128], strides = [1, 1]} : vector<2x512xf32> to vector<2x128xf32>
    %840 = arith.negf %839 : vector<2x128xf32>
    %841 = math.exp %840 : vector<2x128xf32>
    %cst_170 = arith.constant 1.000000e+00 : f32
    %842 = vector.broadcast %cst_170 : f32 to vector<2x128xf32>
    %843 = arith.addf %842, %841 : vector<2x128xf32>
    %844 = arith.divf %842, %843 : vector<2x128xf32>
    %845 = vector.extract_strided_slice %838 {offsets = [0, 128], sizes = [2, 128], strides = [1, 1]} : vector<2x512xf32> to vector<2x128xf32>
    %846 = arith.negf %845 : vector<2x128xf32>
    %847 = math.exp %846 : vector<2x128xf32>
    %cst_171 = arith.constant 1.000000e+00 : f32
    %848 = vector.broadcast %cst_171 : f32 to vector<2x128xf32>
    %849 = arith.addf %848, %847 : vector<2x128xf32>
    %850 = arith.divf %848, %849 : vector<2x128xf32>
    %851 = vector.extract_strided_slice %838 {offsets = [0, 256], sizes = [2, 128], strides = [1, 1]} : vector<2x512xf32> to vector<2x128xf32>
    %852 = math.tanh %851 : vector<2x128xf32>
    %853 = vector.extract_strided_slice %838 {offsets = [0, 384], sizes = [2, 128], strides = [1, 1]} : vector<2x512xf32> to vector<2x128xf32>
    %854 = arith.negf %853 : vector<2x128xf32>
    %855 = math.exp %854 : vector<2x128xf32>
    %cst_172 = arith.constant 1.000000e+00 : f32
    %856 = vector.broadcast %cst_172 : f32 to vector<2x128xf32>
    %857 = arith.addf %856, %855 : vector<2x128xf32>
    %858 = arith.divf %856, %857 : vector<2x128xf32>
    %859 = arith.mulf %850, %833 : vector<2x128xf32>
    %860 = arith.mulf %844, %852 : vector<2x128xf32>
    %861 = arith.addf %859, %860 : vector<2x128xf32>
    %862 = math.tanh %861 : vector<2x128xf32>
    %863 = arith.mulf %858, %862 : vector<2x128xf32>
    %864 = vector.extract_strided_slice %721 {offsets = [10, 0], sizes = [2, 512], strides = [1, 1]} : vector<16x512xf32> to vector<2x512xf32>
    %cst_173 = arith.constant dense<0.000000e+00> : vector<2x512xf32>
    %865 = tpu.matmul %863, %717, %cst_173 {dimension_numbers = #tpu.dot_dimension_numbers<[1], [0], [0], [1], [0, 0, 1, 1], [], []>} : vector<2x128xf32>, vector<128x512xf32>, vector<2x512xf32> -> vector<2x512xf32>
    %866 = arith.addf %864, %865 : vector<2x512xf32>
    %867 = vector.extract_strided_slice %866 {offsets = [0, 0], sizes = [2, 128], strides = [1, 1]} : vector<2x512xf32> to vector<2x128xf32>
    %868 = arith.negf %867 : vector<2x128xf32>
    %869 = math.exp %868 : vector<2x128xf32>
    %cst_174 = arith.constant 1.000000e+00 : f32
    %870 = vector.broadcast %cst_174 : f32 to vector<2x128xf32>
    %871 = arith.addf %870, %869 : vector<2x128xf32>
    %872 = arith.divf %870, %871 : vector<2x128xf32>
    %873 = vector.extract_strided_slice %866 {offsets = [0, 128], sizes = [2, 128], strides = [1, 1]} : vector<2x512xf32> to vector<2x128xf32>
    %874 = arith.negf %873 : vector<2x128xf32>
    %875 = math.exp %874 : vector<2x128xf32>
    %cst_175 = arith.constant 1.000000e+00 : f32
    %876 = vector.broadcast %cst_175 : f32 to vector<2x128xf32>
    %877 = arith.addf %876, %875 : vector<2x128xf32>
    %878 = arith.divf %876, %877 : vector<2x128xf32>
    %879 = vector.extract_strided_slice %866 {offsets = [0, 256], sizes = [2, 128], strides = [1, 1]} : vector<2x512xf32> to vector<2x128xf32>
    %880 = math.tanh %879 : vector<2x128xf32>
    %881 = vector.extract_strided_slice %866 {offsets = [0, 384], sizes = [2, 128], strides = [1, 1]} : vector<2x512xf32> to vector<2x128xf32>
    %882 = arith.negf %881 : vector<2x128xf32>
    %883 = math.exp %882 : vector<2x128xf32>
    %cst_176 = arith.constant 1.000000e+00 : f32
    %884 = vector.broadcast %cst_176 : f32 to vector<2x128xf32>
    %885 = arith.addf %884, %883 : vector<2x128xf32>
    %886 = arith.divf %884, %885 : vector<2x128xf32>
    %887 = arith.mulf %878, %861 : vector<2x128xf32>
    %888 = arith.mulf %872, %880 : vector<2x128xf32>
    %889 = arith.addf %887, %888 : vector<2x128xf32>
    %890 = math.tanh %889 : vector<2x128xf32>
    %891 = arith.mulf %886, %890 : vector<2x128xf32>
    %892 = vector.extract_strided_slice %721 {offsets = [12, 0], sizes = [2, 512], strides = [1, 1]} : vector<16x512xf32> to vector<2x512xf32>
    %cst_177 = arith.constant dense<0.000000e+00> : vector<2x512xf32>
    %893 = tpu.matmul %891, %717, %cst_177 {dimension_numbers = #tpu.dot_dimension_numbers<[1], [0], [0], [1], [0, 0, 1, 1], [], []>} : vector<2x128xf32>, vector<128x512xf32>, vector<2x512xf32> -> vector<2x512xf32>
    %894 = arith.addf %892, %893 : vector<2x512xf32>
    %895 = vector.extract_strided_slice %894 {offsets = [0, 0], sizes = [2, 128], strides = [1, 1]} : vector<2x512xf32> to vector<2x128xf32>
    %896 = arith.negf %895 : vector<2x128xf32>
    %897 = math.exp %896 : vector<2x128xf32>
    %cst_178 = arith.constant 1.000000e+00 : f32
    %898 = vector.broadcast %cst_178 : f32 to vector<2x128xf32>
    %899 = arith.addf %898, %897 : vector<2x128xf32>
    %900 = arith.divf %898, %899 : vector<2x128xf32>
    %901 = vector.extract_strided_slice %894 {offsets = [0, 128], sizes = [2, 128], strides = [1, 1]} : vector<2x512xf32> to vector<2x128xf32>
    %902 = arith.negf %901 : vector<2x128xf32>
    %903 = math.exp %902 : vector<2x128xf32>
    %cst_179 = arith.constant 1.000000e+00 : f32
    %904 = vector.broadcast %cst_179 : f32 to vector<2x128xf32>
    %905 = arith.addf %904, %903 : vector<2x128xf32>
    %906 = arith.divf %904, %905 : vector<2x128xf32>
    %907 = vector.extract_strided_slice %894 {offsets = [0, 256], sizes = [2, 128], strides = [1, 1]} : vector<2x512xf32> to vector<2x128xf32>
    %908 = math.tanh %907 : vector<2x128xf32>
    %909 = vector.extract_strided_slice %894 {offsets = [0, 384], sizes = [2, 128], strides = [1, 1]} : vector<2x512xf32> to vector<2x128xf32>
    %910 = arith.negf %909 : vector<2x128xf32>
    %911 = math.exp %910 : vector<2x128xf32>
    %cst_180 = arith.constant 1.000000e+00 : f32
    %912 = vector.broadcast %cst_180 : f32 to vector<2x128xf32>
    %913 = arith.addf %912, %911 : vector<2x128xf32>
    %914 = arith.divf %912, %913 : vector<2x128xf32>
    %915 = arith.mulf %906, %889 : vector<2x128xf32>
    %916 = arith.mulf %900, %908 : vector<2x128xf32>
    %917 = arith.addf %915, %916 : vector<2x128xf32>
    %918 = math.tanh %917 : vector<2x128xf32>
    %919 = arith.mulf %914, %918 : vector<2x128xf32>
    %920 = vector.extract_strided_slice %721 {offsets = [14, 0], sizes = [2, 512], strides = [1, 1]} : vector<16x512xf32> to vector<2x512xf32>
    %cst_181 = arith.constant dense<0.000000e+00> : vector<2x512xf32>
    %921 = tpu.matmul %919, %717, %cst_181 {dimension_numbers = #tpu.dot_dimension_numbers<[1], [0], [0], [1], [0, 0, 1, 1], [], []>} : vector<2x128xf32>, vector<128x512xf32>, vector<2x512xf32> -> vector<2x512xf32>
    %922 = arith.addf %920, %921 : vector<2x512xf32>
    %923 = vector.extract_strided_slice %922 {offsets = [0, 0], sizes = [2, 128], strides = [1, 1]} : vector<2x512xf32> to vector<2x128xf32>
    %924 = arith.negf %923 : vector<2x128xf32>
    %925 = math.exp %924 : vector<2x128xf32>
    %cst_182 = arith.constant 1.000000e+00 : f32
    %926 = vector.broadcast %cst_182 : f32 to vector<2x128xf32>
    %927 = arith.addf %926, %925 : vector<2x128xf32>
    %928 = arith.divf %926, %927 : vector<2x128xf32>
    %929 = vector.extract_strided_slice %922 {offsets = [0, 128], sizes = [2, 128], strides = [1, 1]} : vector<2x512xf32> to vector<2x128xf32>
    %930 = arith.negf %929 : vector<2x128xf32>
    %931 = math.exp %930 : vector<2x128xf32>
    %cst_183 = arith.constant 1.000000e+00 : f32
    %932 = vector.broadcast %cst_183 : f32 to vector<2x128xf32>
    %933 = arith.addf %932, %931 : vector<2x128xf32>
    %934 = arith.divf %932, %933 : vector<2x128xf32>
    %935 = vector.extract_strided_slice %922 {offsets = [0, 256], sizes = [2, 128], strides = [1, 1]} : vector<2x512xf32> to vector<2x128xf32>
    %936 = math.tanh %935 : vector<2x128xf32>
    %937 = vector.extract_strided_slice %922 {offsets = [0, 384], sizes = [2, 128], strides = [1, 1]} : vector<2x512xf32> to vector<2x128xf32>
    %938 = arith.negf %937 : vector<2x128xf32>
    %939 = math.exp %938 : vector<2x128xf32>
    %cst_184 = arith.constant 1.000000e+00 : f32
    %940 = vector.broadcast %cst_184 : f32 to vector<2x128xf32>
    %941 = arith.addf %940, %939 : vector<2x128xf32>
    %942 = arith.divf %940, %941 : vector<2x128xf32>
    %943 = arith.mulf %934, %917 : vector<2x128xf32>
    %944 = arith.mulf %928, %936 : vector<2x128xf32>
    %945 = arith.addf %943, %944 : vector<2x128xf32>
    %946 = math.tanh %945 : vector<2x128xf32>
    %947 = arith.mulf %942, %946 : vector<2x128xf32>
    %c0_185 = arith.constant 0 : index
    %c0_186 = arith.constant 0 : index
    %948 = vector.load %arg17[%c0_185, %c0_186] : memref<128x12xf32, #tpu.memory_space<vmem>>, vector<128x12xf32>
    %cst_187 = arith.constant dense<0.000000e+00> : vector<2x12xf32>
    %949 = tpu.matmul %947, %948, %cst_187 {dimension_numbers = #tpu.dot_dimension_numbers<[1], [0], [0], [1], [0, 0, 1, 1], [], []>} : vector<2x128xf32>, vector<128x12xf32>, vector<2x12xf32> -> vector<2x12xf32>
    %c0_188 = arith.constant 0 : index
    %c0_189 = arith.constant 0 : index
    %950 = vector.load %arg18[%c0_188, %c0_189] : memref<1x12xf32, #tpu.memory_space<vmem>>, vector<1x12xf32>
    %951 = vector.broadcast %950 : vector<1x12xf32> to vector<2x12xf32>
    %952 = arith.addf %949, %951 : vector<2x12xf32>
    %953 = arith.addf %237, %715 : vector<2x12xf32>
    %954 = arith.addf %953, %952 : vector<2x12xf32>
    %cst_190 = arith.constant 0.333333343 : f32
    %955 = vector.broadcast %cst_190 : f32 to vector<2x12xf32>
    %956 = arith.mulf %954, %955 : vector<2x12xf32>
    %c0_191 = arith.constant 0 : index
    %c0_192 = arith.constant 0 : index
    %957 = vector.load %arg19[%c0_191, %c0_192] : memref<2x12xf32, #tpu.memory_space<vmem>>, vector<2x12xf32>
    tpu.vector_store %arg19[%c0_191, %c0_192], %956 {strides = array<i32>} : memref<2x12xf32, #tpu.memory_space<vmem>>, vector<2x12xf32>,
    %cst_193 = arith.constant 0.000000e+00 : f32
    %958 = vector.broadcast %cst_193 : f32 to vector<2x12xf32>
    %959 = arith.subf %237, %956 : vector<2x12xf32>
    %960 = arith.mulf %959, %959 : vector<2x12xf32>
    %961 = arith.addf %958, %960 : vector<2x12xf32>
    %962 = arith.subf %715, %956 : vector<2x12xf32>
    %963 = arith.mulf %962, %962 : vector<2x12xf32>
    %964 = arith.addf %961, %963 : vector<2x12xf32>
    %965 = arith.subf %952, %956 : vector<2x12xf32>
    %966 = arith.mulf %965, %965 : vector<2x12xf32>
    %967 = arith.addf %964, %966 : vector<2x12xf32>
    %cst_194 = arith.constant 5.000000e-01 : f32
    %968 = vector.broadcast %cst_194 : f32 to vector<2x12xf32>
    %969 = arith.mulf %967, %968 : vector<2x12xf32>
    %970 = math.sqrt %969 : vector<2x12xf32>
    %c0_195 = arith.constant 0 : index
    %c0_196 = arith.constant 0 : index
    %971 = vector.load %arg20[%c0_195, %c0_196] : memref<2x12xf32, #tpu.memory_space<vmem>>, vector<2x12xf32>
    tpu.vector_store %arg20[%c0_195, %c0_196], %970 {strides = array<i32>} : memref<2x12xf32, #tpu.memory_space<vmem>>, vector<2x12xf32>,
    return
  }
}

</mosaic_0001>

<bundles_post_ra>
// kernel: tpu_custom_call.1
= control target key start
LH: loop header
LB: loop body
LE: loop exit
PB: predicated region body
PF: predicated region fallthrough
CT: control target
= control target key end

     0   :  { %s12893_s0 = inlined_call_operand.vmem [shape: f32[16,16], index: 0, kind: input, shape index: {}]   ;;  %s12894_s1 = inlined_call_operand.vmem [shape: f32[16,512], index: 1, kind: input, shape index: {}]   ;;  %s12895_s2 = inlined_call_operand.hbm [shape: f32[128,512], index: 2, kind: input, shape index: {}]   ;;  %s12896_s3 = inlined_call_operand.vmem [shape: f32[1,512], index: 3, kind: input, shape index: {}]   ;;  %s12897_s4 = inlined_call_operand.vmem [shape: f32[128,12], index: 4, kind: input, shape index: {}]   ;;  %s12898_s5 = inlined_call_operand.vmem [shape: f32[1,12], index: 5, kind: input, shape index: {}]   ;;  %s12899_s6 = inlined_call_operand.vmem [shape: f32[16,512], index: 6, kind: input, shape index: {}]   ;;  %s12900_s7 = inlined_call_operand.hbm [shape: f32[128,512], index: 7, kind: input, shape index: {}]   ;;  %s12901_s8 = inlined_call_operand.vmem [shape: f32[1,512], index: 8, kind: input, shape index: {}]   ;;  %s12902_s9 = inlined_call_operand.hbm [shape: f32[128,512], index: 9, kind: input, shape index: {}]   ;;  %s12903_s10 = inlined_call_operand.hbm [shape: f32[128,512], index: 10, kind: input, shape index: {}]   ;;  %s12904_s11 = inlined_call_operand.vmem [shape: f32[1,512], index: 11, kind: input, shape index: {}]   ;;  %s12905_s12 = inlined_call_operand.vmem [shape: f32[128,12], index: 12, kind: input, shape index: {}]   ;;  %s12906_s13 = inlined_call_operand.vmem [shape: f32[1,12], index: 13, kind: input, shape index: {}]   ;;  %s12907_s14 = inlined_call_operand.vmem [shape: f32[16,512], index: 14, kind: input, shape index: {}]   ;;  %s12908_s15 = inlined_call_operand.hbm [shape: f32[128,512], index: 15, kind: input, shape index: {}]   ;;  %s12909_s16 = inlined_call_operand.vmem [shape: f32[1,512], index: 16, kind: input, shape index: {}]   ;;  %s12910_s17 = inlined_call_operand.vmem [shape: f32[128,12], index: 17, kind: input, shape index: {}]   ;;  %s12911_s18 = inlined_call_operand.vmem [shape: f32[1,12], index: 18, kind: input, shape index: {}]   ;;  %s12912_s19 = inlined_call_operand.hbm [shape: f32[2,12], index: 19, kind: output, shape index: {0}]   ;;  %s12913_s20 = inlined_call_operand.hbm [shape: f32[2,12], index: 20, kind: output, shape index: {1}]  }
   0x1   :  { %12926 = sst [smem:[#allocation24_spill]] %s12893_s0 }
   0x2   :  { %12927 = sst [smem:[#allocation25_spill]] %s12894_s1 }
   0x3   :  { %12928 = sst [smem:[#allocation26_spill]] %s12895_s2 }
   0x4   :  { %12929 = sst [smem:[#allocation27_spill]] %s12896_s3 }
   0x5   :  { %12930 = sst [smem:[#allocation28_spill]] %s12897_s4 }
   0x6   :  { %12931 = sst [smem:[#allocation29_spill]] %s12913_s20 }
   0x7   :  { %26 = vsyncpa [#allocation4], 0 }
   0x8   :  { %27 = vsyncpa [#allocation7], 0 }
   0x9   :  { %28 = vsyncpa [#allocation10], 0 }
   0xa   :  { %29 = vsyncpa [#allocation5], 0 }
   0xb   :  { %30 = vsyncpa [#allocation14], 0  ;;  %s10584_s1 = smov [#allocation6]   ;;  %s10585_s23 = smov [#allocation9]  }
   0xc   :  { %s60_s22 = sshll.u32 %s10584_s1, 4  ;;  %s86_s24 = sshll.u32 %s10585_s23, 4  ;;  %s61_s22 = int_to_ptr.vmem [resolvable:$true] %s60_s22  ;;  %s10701_s24 = int_to_ptr.vmem [resolvable:$true] %s86_s24 }
   0xd   :  { %s10420_s3 = scalar_lea.hbm %s12900_s7, 8192 }
   0xe   :  { %p10421_p0 = scmp.ne.s32.totalorder %s12900_s7, %s10420_s3  ;;  %p10424_p1 = scmp.lt.u32.totalorder %s10420_s3, %s12900_s7 }
  0x10   :  { %p10426_p2 = pnand %p10424_p1, %p10421_p0 }
  0x12   :  { %10429 = shalt.err (!%p10426_p2)
}
  0x13   :  { %s10430_s29 = scalar_lea.vmem %s61_s22, 8192  ;;  %p10435_p4 = scmp.lt.s32.totalorder %s61_s22, %s61_s22 }
  0x14   :  { %p10431_p3 = scmp.ne.s32.totalorder %s61_s22, %s10430_s29  ;;  %p10436_p5 = scmp.lt.s32.totalorder %s10430_s29, %s10430_s29 }
  0x16   :  { %p10437_p6 = por %p10436_p5, %p10435_p4 }
  0x18   :  { %p10438_p7 = pnand %p10437_p6, %p10431_p3 }
  0x1a   :  { %10441 = shalt.err (!%p10438_p7)
}
  0x1b   :  { %s10586_s30 = smov 512   ;;  %s10587_s0 = smov 32  }
  0x1c   :  { %66 = dma.hbm_to_vmem [thread:$0]  %s12900_s7, 8192, %s61_s22, [#allocation7], %s10586_s30, %s10586_s30, %s10587_s0  }
  0x1d   :  { %s10442_s25 = scalar_lea.hbm %s12903_s10, 8192 }
  0x1e   :  { %p10443_p8 = scmp.ne.s32.totalorder %s12903_s10, %s10442_s25  ;;  %p10446_p9 = scmp.lt.u32.totalorder %s10442_s25, %s12903_s10 }
  0x20   :  { %p10448_p10 = pnand %p10446_p9, %p10443_p8 }
  0x22   :  { %10451 = shalt.err (!%p10448_p10)
}
  0x23   :  { %s10452_s4 = scalar_lea.vmem %s10701_s24, 8192  ;;  %p10457_p12 = scmp.lt.s32.totalorder %s10701_s24, %s10701_s24 }
  0x24   :  { %p10453_p11 = scmp.ne.s32.totalorder %s10701_s24, %s10452_s4  ;;  %p10458_p13 = scmp.lt.s32.totalorder %s10452_s4, %s10452_s4 }
  0x26   :  { %p10459_p0 = por %p10458_p13, %p10457_p12 }
  0x28   :  { %p10460_p1 = pnand %p10459_p0, %p10453_p11 }
  0x2a   :  { %10463 = shalt.err (!%p10460_p1)
}
  0x2b   :  { %92 = dma.hbm_to_vmem [thread:$0]  %s12903_s10, 8192, %s10701_s24, [#allocation10], %s10586_s30, %s10586_s30, %s10587_s0  }
  0x2c   :  { %s10588_s29 = smov [#allocation3]   ;;  %s10589_s1 = smov [#allocation8]  }
  0x2d   :  { %s40_s21 = sshll.u32 %s10588_s29, 4  ;;  %s74_s23 = sshll.u32 %s10589_s1, 4  ;;  %s41_s21 = int_to_ptr.vmem [resolvable:$true] %s40_s21  ;;  %s10738_s23 = int_to_ptr.vmem [resolvable:$true] %s74_s23 }
  0x2e   :  { %s12932_s3 = sld [smem:[#allocation26_spill]] }
  0x34   :  { %s10464_s26 = scalar_lea.hbm %s12932_s3, 8192 }
  0x35   :  { %p10465_p2 = scmp.ne.s32.totalorder %s12932_s3, %s10464_s26  ;;  %p10468_p3 = scmp.lt.u32.totalorder %s10464_s26, %s12932_s3 }
  0x37   :  { %p10470_p4 = pnand %p10468_p3, %p10465_p2 }
  0x39   :  { %10473 = shalt.err (!%p10470_p4)
}
  0x3a   :  { %s10474_s10 = scalar_lea.vmem %s41_s21, 8192  ;;  %p10479_p6 = scmp.lt.s32.totalorder %s41_s21, %s41_s21 }
  0x3b   :  { %p10475_p5 = scmp.ne.s32.totalorder %s41_s21, %s10474_s10  ;;  %p10480_p7 = scmp.lt.s32.totalorder %s10474_s10, %s10474_s10 }
  0x3d   :  { %p10481_p8 = por %p10480_p7, %p10479_p6 }
  0x3f   :  { %p10482_p9 = pnand %p10481_p8, %p10475_p5 }
  0x41   :  { %10485 = shalt.err (!%p10482_p9)
}
  0x42   :  { %46 = dma.hbm_to_vmem [thread:$0]  %s12932_s3, 8192, %s41_s21, [#allocation4], %s10586_s30, %s10586_s30, %s10587_s0  }
  0x43   :  { %s10486_s20 = scalar_lea.hbm %s12902_s9, 8192 }
  0x44   :  { %p10487_p10 = scmp.ne.s32.totalorder %s12902_s9, %s10486_s20  ;;  %p10490_p11 = scmp.lt.u32.totalorder %s10486_s20, %s12902_s9 }
  0x46   :  { %p10492_p12 = pnand %p10490_p11, %p10487_p10 }
  0x48   :  { %10495 = shalt.err (!%p10492_p12)
}
  0x49   :  { %s10496_s27 = scalar_lea.vmem %s10738_s23, 8192  ;;  %p10501_p0 = scmp.lt.s32.totalorder %s10738_s23, %s10738_s23 }
  0x4a   :  { %p10497_p13 = scmp.ne.s32.totalorder %s10738_s23, %s10496_s27  ;;  %p10502_p1 = scmp.lt.s32.totalorder %s10496_s27, %s10496_s27 }
  0x4c   :  { %p10503_p2 = por %p10502_p1, %p10501_p0 }
  0x4e   :  { %p10504_p3 = pnand %p10503_p2, %p10497_p13 }
  0x50   :  { %10507 = shalt.err (!%p10504_p3)
}
  0x51   :  { %80 = dma.hbm_to_vmem [thread:$0]  %s12902_s9, 8192, %s10738_s23, [#allocation7], %s10586_s30, %s10586_s30, %s10587_s0  }
  0x52   :  { %s10590_s28 = smov [#allocation11]   ;;  %s10508_s7 = scalar_lea.hbm %s12908_s15, 8192 }
  0x53   :  { %s106_s4 = sshll.u32 %s10590_s28, 4  ;;  %p10509_p4 = scmp.ne.s32.totalorder %s12908_s15, %s10508_s7  ;;  %s107_s4 = int_to_ptr.vmem [resolvable:$true] %s106_s4 }
  0x54   :  { %p10512_p5 = scmp.lt.u32.totalorder %s10508_s7, %s12908_s15 }
  0x56   :  { %p10514_p6 = pnand %p10512_p5, %p10509_p4 }
  0x58   :  { %10517 = shalt.err (!%p10514_p6)
}
  0x59   :  { %s10518_s2 = scalar_lea.vmem %s107_s4, 8192  ;;  %p10523_p8 = scmp.lt.s32.totalorder %s107_s4, %s107_s4 }
  0x5a   :  { %p10519_p7 = scmp.ne.s32.totalorder %s107_s4, %s10518_s2  ;;  %p10524_p9 = scmp.lt.s32.totalorder %s10518_s2, %s10518_s2 }
  0x5c   :  { %p10525_p10 = por %p10524_p9, %p10523_p8 }
  0x5e   :  { %p10526_p11 = pnand %p10525_p10, %p10519_p7 }
  0x60   :  { %10529 = shalt.err (!%p10526_p11)
}
  0x61   :  { %112 = dma.hbm_to_vmem [thread:$0]  %s12908_s15, 8192, %s107_s4, [#allocation10], %s10586_s30, %s10586_s30, %s10587_s0  }
  0x62   :  { %10574 = dma.done.wait [#allocation4], 8192  }
  0x63   :  { %10575 = vsyncadd [#allocation4], 4294959104 }
  0x64   :  { %10576 = dma.done.wait [#allocation7], 16384  }
  0x65   :  { %10577 = vsyncadd [#allocation7], 4294950912 }
  0x66   :  { %10578 = dma.done.wait [#allocation10], 16384  }
  0x67   :  { %10579 = vsyncadd [#allocation10], 4294950912  ;;  %v12921_v0 = vmov 0.0   ;;  %s12933_s27 = sld [smem:[#allocation25_spill]]  ;;  %v145_v3 = vld [vmem:[#allocation3 + $0x8] sm:$0xff]  ;;  %v144_v10 = vld [vmem:[#allocation3] sm:$0xff] }
  0x68   :  { %301 = vmatprep.mubr.f32.mxu1 %v12921_v0  ;;  %455 = vmatprep.mubr.f32.mxu0 %v12921_v0  ;;  %v149_v5 = vld [vmem:[#allocation3 + $0x28] sm:$0xff]  ;;  %v148_v11 = vld [vmem:[#allocation3 + $0x20] sm:$0xff]  ;;  %s12934_s24 = sld [smem:[#allocation24_spill]]  ;;  %vm230_vm0 = vcmask 130048   ;;  %v147_v31 = vld [vmem:[#allocation3 + $0x18] sm:$0xff]  ;;  %s12936_s3 = sld [smem:[#allocation27_spill]] }
  0x69   :  { %v10804_v8 = vpack.c.bf16 %v149_v5, %v145_v3  ;;  %v10809_v13 = vpack.c.bf16 %v148_v11, %v144_v10  ;;  %v153_v14 = vld [vmem:[#allocation3 + $0x48] sm:$0xff]  ;;  %v152_v16 = vld [vmem:[#allocation3 + $0x40] sm:$0xff]  ;;  %v151_v32 = vld [vmem:[#allocation3 + $0x38] sm:$0xff]  ;;  %s12939_s0 = sld [smem:[#allocation28_spill]]  ;;  %vm10593_vm1 = vmmov 0   ;;  %s10594_s29 = smov [#allocation12]  }
  0x6a   :  { %v157_v15 = vld [vmem:[#allocation3 + $0x68] sm:$0xff]  ;;  %v156_v18 = vld [vmem:[#allocation3 + $0x60] sm:$0xff]  ;;  %v10837_v34 = vpack.c.bf16 %v151_v32, %v147_v31  ;;  %v146_v38 = vld [vmem:[#allocation3 + $0x10] sm:$0xff]  ;;  %s7390_s20 = sshll.u32 %s10594_s29, 4  ;;  %vm7364_vm2 = vcmask 91136   ;;  %s7391_s20 = int_to_ptr.vmem [resolvable:$true] %s7390_s20 }
  0x6b   :  { %7691 = vmatprep.subr.bf16.mxu0 %v10804_v8  ;;  %v10812_v17 = vpack.c.bf16 %v157_v15, %v153_v14  ;;  %v10821_v21 = vpack.c.bf16 %v156_v18, %v152_v16  ;;  %v161_v26 = vld [vmem:[#allocation3 + $0x88] sm:$0xff]  ;;  %v160_v28 = vld [vmem:[#allocation3 + $0x80] sm:$0xff]  ;;  %v150_v39 = vld [vmem:[#allocation3 + $0x30] sm:$0xff]  ;;  %s10530_s1 = scalar_lea.vmem %s7391_s20, 32  ;;  %p10535_p13 = scmp.lt.s32.totalorder %s7391_s20, %s7391_s20 }
  0x6c   :  { %7693 = vmatpush1.bf16.msra.mxu0 %v10809_v13  ;;  %v165_v27 = vld [vmem:[#allocation3 + $0xa8] sm:$0xff]  ;;  %v164_v30 = vld [vmem:[#allocation3 + $0xa0] sm:$0xff]  ;;  %v155_v43 = vld [vmem:[#allocation3 + $0x58] sm:$0xff]  ;;  %v10848_v47 = vpack.c.bf16 %v150_v39, %v146_v38  ;;  %p10531_p12 = scmp.ne.s32.totalorder %s7391_s20, %s10530_s1  ;;  %p10536_p0 = scmp.lt.s32.totalorder %s10530_s1, %s10530_s1 }
  0x6d   :  { %v137_v1 = vld [vmem:[%s12933_s27 + $0x8] sm:$0xff]  ;;  %v136_v6 = vld [vmem:[%s12933_s27] sm:$0xff]  ;;  %v139_v19 = vld [vmem:[%s12933_s27 + $0x18] sm:$0xff]  ;;  %7695 = vmatprep.subr.bf16.mxu0 %v10812_v17  ;;  %v10831_v29 = vpack.c.bf16 %v165_v27, %v161_v26  ;;  %v10840_v37 = vpack.c.bf16 %v164_v30, %v160_v28 }
  0x6e   :  { %v141_v2 = vld [vmem:[%s12933_s27 + $0x28] sm:$0xff]  ;;  %v140_v7 = vld [vmem:[%s12933_s27 + $0x20] sm:$0xff]  ;;  %v143_v20 = vld [vmem:[%s12933_s27 + $0x38] sm:$0xff]  ;;  %p10537_p1 = por %p10536_p0, %p10535_p13 }
  0x6f   :  { %v7682_v4 = vpack.c.bf16 %v141_v2, %v137_v1  ;;  %v7684_v9 = vpack.c.bf16 %v140_v7, %v136_v6  ;;  %v134_v12 = vld [vmem:[%s12934_s24] sm:$0xff]  ;;  %v7686_v22 = vpack.c.bf16 %v143_v20, %v139_v19  ;;  %v138_v23 = vld [vmem:[%s12933_s27 + $0x10] sm:$0xff]  ;;  %v135_v33 = vld [vmem:[%s12934_s24 + $0x8] sm:$0xff] }
  0x70   :  { %v142_v24 = vld [vmem:[%s12933_s27 + $0x30] sm:$0xff]  ;;  %v169_v35 = vld [vmem:[#allocation3 + $0xc8] sm:$0xff]  ;;  %7697 = vmatpush1.bf16.msra.mxu0 %v10821_v21  ;;  %v159_v44 = vld [vmem:[#allocation3 + $0x78] sm:$0xff]  ;;  %p10538_p2 = pnand %p10537_p1, %p10531_p12 }
  0x71   :  { %7683 = vmatprep.subr.bf16.mxu1 %v7682_v4  ;;  %v7688_v25 = vpack.c.bf16 %v142_v24, %v138_v23  ;;  %v173_v36 = vld [vmem:[#allocation3 + $0xe8] sm:$0xff]  ;;  %v168_v40 = vld [vmem:[#allocation3 + $0xc0] sm:$0xff]  ;;  %7699 = vmatprep.subr.bf16.mxu0 %v10831_v29  ;;  %v10853_v49 = vpack.c.bf16 %v159_v44, %v155_v43  ;;  %v154_v50 = vld [vmem:[#allocation3 + $0x50] sm:$0xff] }
  0x72   :  { %7685 = vmatpush1.bf16.msra.mxu1 %v7684_v9  ;;  %v10844_v41 = vpack.c.bf16 %v173_v36, %v169_v35  ;;  %v172_v42 = vld [vmem:[#allocation3 + $0xe0] sm:$0xff]  ;;  %v177_v45 = vld [vmem:[#allocation3 + $0x108] sm:$0xff]  ;;  %v158_v51 = vld [vmem:[#allocation3 + $0x70] sm:$0xff] }
  0x73   :  { %7687 = vmatprep.subr.bf16.mxu1 %v7686_v22  ;;  %v181_v46 = vld [vmem:[#allocation3 + $0x128] sm:$0xff]  ;;  %v10851_v48 = vpack.c.bf16 %v172_v42, %v168_v40  ;;  %v176_v52 = vld [vmem:[#allocation3 + $0x100] sm:$0xff]  ;;  %v163_v55 = vld [vmem:[#allocation3 + $0x98] sm:$0xff]  ;;  %v10860_v59 = vpack.c.bf16 %v158_v51, %v154_v50 }
  0x74   :  { %7701 = vmatpush1.bf16.msra.mxu0 %v10840_v37  ;;  %v10856_v53 = vpack.c.bf16 %v181_v46, %v177_v45  ;;  %v180_v54 = vld [vmem:[#allocation3 + $0x120] sm:$0xff]  ;;  %v167_v56 = vld [vmem:[#allocation3 + $0xb8] sm:$0xff]  ;;  %v185_v57 = vld [vmem:[#allocation3 + $0x148] sm:$0xff] }
  0x75   :  { %7415 = vmatmul.mubr.msk.f32.vlgmr.msra.gmra.mrb[0].mxu1 %vm230_vm0, %v134_v12  ;;  %7703 = vmatprep.subr.bf16.mxu0 %v10844_v41  ;;  %v189_v58 = vld [vmem:[#allocation3 + $0x168] sm:$0xff]  ;;  %v10865_v60 = vpack.c.bf16 %v180_v54, %v176_v52  ;;  %v10867_v61 = vpack.c.bf16 %v167_v56, %v163_v55  ;;  %v162_v62 = vld [vmem:[#allocation3 + $0x90] sm:$0xff]  ;;  %v184_v1 = vld [vmem:[#allocation3 + $0x140] sm:$0xff] }
  0x76   :  { %307 = vmatprep.mubr.f32.mxu1 %v12921_v0  ;;  %7689 = vmatpush1.bf16.msra.mxu1 %v7688_v25  ;;  %v166_v63 = vld [vmem:[#allocation3 + $0xb0] sm:$0xff]  ;;  %v10870_v2 = vpack.c.bf16 %v189_v58, %v185_v57  ;;  %v188_v3 = vld [vmem:[#allocation3 + $0x160] sm:$0xff]  ;;  %v171_v4 = vld [vmem:[#allocation3 + $0xd8] sm:$0xff] }
  0x77   :  { %7723 = vmatprep.subr.bf16.mxu1 %v10837_v34  ;;  %v175_v5 = vld [vmem:[#allocation3 + $0xf8] sm:$0xff]  ;;  %v193_v6 = vld [vmem:[#allocation3 + $0x188] sm:$0xff]  ;;  %v10874_v9 = vpack.c.bf16 %v166_v63, %v162_v62  ;;  %v10879_v10 = vpack.c.bf16 %v188_v3, %v184_v1  ;;  %v174_v14 = vld [vmem:[#allocation3 + $0xf0] sm:$0xff]  ;;  %v210_v63 = vlaneseq }
  0x78   :  { %7705 = vmatpush1.bf16.msra.mxu0 %v10851_v48  ;;  %v197_v7 = vld [vmem:[#allocation3 + $0x1a8] sm:$0xff]  ;;  %v10881_v11 = vpack.c.bf16 %v175_v5, %v171_v4  ;;  %v192_v15 = vld [vmem:[#allocation3 + $0x180] sm:$0xff]  ;;  %v179_v19 = vld [vmem:[#allocation3 + $0x118] sm:$0xff] }
  0x79   :  { %7416 = vmatmul.mubr.msk.f32.gmra.mrb[2].mxu1 %vm230_vm0, %v135_v33  ;;  %7707 = vmatprep.subr.bf16.mxu0 %v10856_v53  ;;  %v10884_v16 = vpack.c.bf16 %v197_v7, %v193_v6  ;;  %v196_v18 = vld [vmem:[#allocation3 + $0x1a0] sm:$0xff]  ;;  %v183_v20 = vld [vmem:[#allocation3 + $0x138] sm:$0xff]  ;;  %v201_v22 = vld [vmem:[#allocation3 + $0x1c8] sm:$0xff]  ;;  %v211_v1 = vshrl.u32 %v210_v63, 7 }
  0x7a   :  { %378 = vmatprep.mubr.f32.mxu1 %v12921_v0  ;;  %v205_v23 = vld [vmem:[#allocation3 + $0x1e8] sm:$0xff]  ;;  %v10891_v25 = vpack.c.bf16 %v196_v18, %v192_v15  ;;  %v10893_v26 = vpack.c.bf16 %v183_v20, %v179_v19  ;;  %v178_v27 = vld [vmem:[#allocation3 + $0x110] sm:$0xff]  ;;  %v200_v30 = vld [vmem:[#allocation3 + $0x1c0] sm:$0xff] }
  0x7b   :  { %v182_v28 = vld [vmem:[#allocation3 + $0x130] sm:$0xff]  ;;  %v10896_v31 = vpack.c.bf16 %v205_v23, %v201_v22  ;;  %v204_v32 = vld [vmem:[#allocation3 + $0x1e0] sm:$0xff]  ;;  %v191_v35 = vld [vmem:[#allocation3 + $0x178] sm:$0xff]  ;;  %v10964_v3 = vsub.s32 0, %v211_v1  ;;  %v10969_v6 = vsub.s32 1, %v211_v1  ;;  %v10977_v22 = vsub.s32 2, %v211_v1 }
  0x7c   :  { %7709 = vmatpush1.bf16.msra.mxu0 %v10865_v60  ;;  %v10899_v36 = vpack.c.bf16 %v182_v28, %v178_v27  ;;  %v10903_v38 = vpack.c.bf16 %v204_v32, %v200_v30  ;;  %v186_v40 = vld [vmem:[#allocation3 + $0x150] sm:$0xff]  ;;  %v195_v43 = vld [vmem:[#allocation3 + $0x198] sm:$0xff]  ;;  %v10979_v27 = vsub.s32 3, %v211_v1 }
  0x7d   :  { %7417 = vmatmul.mubr.msk.f32.vlgmr.msra.gmra.mrb[4].mxu1 %vm230_vm0, %v134_v12  ;;  %v170_v12 = vld [vmem:[#allocation3 + $0xd0] sm:$0xff]  ;;  %7711 = vmatprep.subr.bf16.mxu0 %v10870_v2  ;;  %v199_v44 = vld [vmem:[#allocation3 + $0x1b8] sm:$0xff]  ;;  %12935 = vst [vmem:[#allocation20_spill] sm:$0xff] %v10964_v3  ;;  %12937 = vst [vmem:[#allocation21_spill] sm:$0xff] %v10969_v6 }
  0x7e   :  { %7725 = vmatpush1.bf16.msra.mxu1 %v10848_v47  ;;  %384 = vmatprep.mubr.f32.mxu1 %v12921_v0  ;;  %v10887_v24 = vpack.c.bf16 %v174_v14, %v170_v12  ;;  %v190_v42 = vld [vmem:[#allocation3 + $0x170] sm:$0xff]  ;;  %v10913_v46 = vpack.c.bf16 %v199_v44, %v195_v43  ;;  %v203_v52 = vld [vmem:[#allocation3 + $0x1d8] sm:$0xff]  ;;  %12938 = vst [vmem:[#allocation22_spill] sm:$0xff] %v10979_v27 }
  0x7f   :  { %7727 = vmatprep.subr.bf16.mxu1 %v10853_v49  ;;  %v10909_v45 = vpack.c.bf16 %v190_v42, %v186_v40  ;;  %v194_v50 = vld [vmem:[#allocation3 + $0x190] sm:$0xff]  ;;  %v207_v54 = vld [vmem:[#allocation3 + $0x1f8] sm:$0xff] }
  0x80   :  { %7713 = vmatpush1.bf16.msra.mxu0 %v10879_v10  ;;  %v198_v51 = vld [vmem:[#allocation3 + $0x1b0] sm:$0xff]  ;;  %v10921_v56 = vpack.c.bf16 %v207_v54, %v203_v52 }
  0x81   :  { %7418 = vmatmul.mubr.msk.f32.gmra.mrb[6].mxu1 %vm230_vm0, %v135_v33  ;;  %7715 = vmatprep.subr.bf16.mxu0 %v10884_v16  ;;  %v187_v33 = vld [vmem:[#allocation3 + $0x158] sm:$0xff]  ;;  %v10918_v55 = vpack.c.bf16 %v198_v51, %v194_v50  ;;  %v202_v57 = vld [vmem:[#allocation3 + $0x1d0] sm:$0xff] }
  0x82   :  { %7729 = vmatpush1.bf16.msra.mxu1 %v10860_v59  ;;  %526 = vmatprep.mubr.f32.mxu1 %v12921_v0  ;;  %v10905_v39 = vpack.c.bf16 %v191_v35, %v187_v33  ;;  %v206_v58 = vld [vmem:[#allocation3 + $0x1f0] sm:$0xff] }
  0x83   :  { %7731 = vmatprep.subr.bf16.mxu1 %v10867_v61  ;;  %v10927_v62 = vpack.c.bf16 %v206_v58, %v202_v57  ;;  %v208_v4 = vld [vmem:[%s12936_s3] sm:$0xf] }
  0x84   :  { %7717 = vmatpush1.bf16.msra.mxu0 %v10891_v25  ;;  %v213_v12 = vrot.slane %v208_v4, %v10964_v3  ;;  %v217_v14 = vrot.slane %v208_v4, %v10969_v6  ;;  %v221_v30 = vrot.slane %v208_v4, %v10977_v22  ;;  %v225_v32 = vrot.slane %v208_v4, %v10979_v27 }
  0x85   :  { %7719 = vmatprep.subr.bf16.mxu0 %v10896_v31 }
  0x86   :  { %7733 = vmatpush1.bf16.msra.mxu1 %v10874_v9 }
  0x87   :  { %7735 = vmatprep.subr.bf16.mxu1 %v10881_v11 }
  0x88   :  { %7721 = vmatpush1.bf16.msra.mxu0 %v10903_v38 }
  0x89   :  { %7755 = vmatprep.subr.bf16.mxu0 %v10804_v8 }
  0x8a   :  { %7737 = vmatpush1.bf16.msra.mxu1 %v10887_v24 }
  0x8b   :  { %7739 = vmatprep.subr.bf16.mxu1 %v10893_v26  ;;  %456 = vmatmul.mubr.f32.vlgmr.msra.gmra.mrb[0].mxu0 %v12921_v0 }
  0x8c   :  { %7757 = vmatpush1.bf16.msra.mxu0 %v10809_v13  ;;  %625 = vmatprep.mubr.f32.mxu0 %v12921_v0 }
  0x8d   :  { %7759 = vmatprep.subr.bf16.mxu0 %v10812_v17 }
  0x8e   :  { %7741 = vmatpush1.bf16.msra.mxu1 %v10899_v36 }
  0x8f   :  { %7743 = vmatprep.subr.bf16.mxu1 %v10905_v39 }
  0x90   :  { %7761 = vmatpush1.bf16.msra.mxu0 %v10821_v21 }
  0x91   :  { %7763 = vmatprep.subr.bf16.mxu0 %v10831_v29 }
  0x92   :  { %7745 = vmatpush1.bf16.msra.mxu1 %v10909_v45 }
  0x93   :  { %7747 = vmatprep.subr.bf16.mxu1 %v10913_v46 }
  0x94   :  { %7765 = vmatpush1.bf16.msra.mxu0 %v10840_v37 }
  0x95   :  { %7767 = vmatprep.subr.bf16.mxu0 %v10844_v41 }
  0x96   :  { %7749 = vmatpush1.bf16.msra.mxu1 %v10918_v55 }
  0x97   :  { %7751 = vmatprep.subr.bf16.mxu1 %v10921_v56 }
  0x98   :  { %7769 = vmatpush1.bf16.msra.mxu0 %v10851_v48 }
  0x99   :  { %7771 = vmatprep.subr.bf16.mxu0 %v10856_v53 }
  0x9a   :  { %7753 = vmatpush1.bf16.msra.mxu1 %v10927_v62 }
  0x9b   :  { %7787 = vmatprep.subr.bf16.mxu1 %v10837_v34 }
  0x9c   :  { %7773 = vmatpush1.bf16.msra.mxu0 %v10865_v60 }
  0x9d   :  { %527 = vmatmul.mubr.f32.vlgmr.msra.gmra.mrb[8].mxu1 %v12921_v0  ;;  %7775 = vmatprep.subr.bf16.mxu0 %v10870_v2 }
  0x9e   :  { %7789 = vmatpush1.bf16.msra.mxu1 %v10848_v47  ;;  %696 = vmatprep.mubr.f32.mxu1 %v12921_v0 }
  0x9f   :  { %7791 = vmatprep.subr.bf16.mxu1 %v10853_v49 }
  0xa0   :  { %7777 = vmatpush1.bf16.msra.mxu0 %v10879_v10 }
  0xa1   :  { %7779 = vmatprep.subr.bf16.mxu0 %v10884_v16 }
  0xa2   :  { %7793 = vmatpush1.bf16.msra.mxu1 %v10860_v59 }
  0xa3   :  { %7795 = vmatprep.subr.bf16.mxu1 %v10867_v61 }
  0xa4   :  { %7781 = vmatpush1.bf16.msra.mxu0 %v10891_v25 }
  0xa5   :  { %7783 = vmatprep.subr.bf16.mxu0 %v10896_v31 }
  0xa6   :  { %7797 = vmatpush1.bf16.msra.mxu1 %v10874_v9 }
  0xa7   :  { %7799 = vmatprep.subr.bf16.mxu1 %v10881_v11 }
  0xa8   :  { %7785 = vmatpush1.bf16.msra.mxu0 %v10903_v38 }
  0xa9   :  { %7819 = vmatprep.subr.bf16.mxu0 %v10804_v8 }
  0xaa   :  { %7801 = vmatpush1.bf16.msra.mxu1 %v10887_v24 }
  0xab   :  { %7803 = vmatprep.subr.bf16.mxu1 %v10893_v26 }
  0xae   :  { %7805 = vmatpush1.bf16.msra.mxu1 %v10899_v36 }
  0xaf   :  { %7807 = vmatprep.subr.bf16.mxu1 %v10905_v39 }
  0xb2   :  { %7809 = vmatpush1.bf16.msra.mxu1 %v10909_v45 }
  0xb3   :  { %7811 = vmatprep.subr.bf16.mxu1 %v10913_v46 }
  0xb6   :  { %7813 = vmatpush1.bf16.msra.mxu1 %v10918_v55 }
  0xb7   :  { %7815 = vmatprep.subr.bf16.mxu1 %v10921_v56 }
  0xba   :  { %7817 = vmatpush1.bf16.msra.mxu1 %v10927_v62 }
  0xbb   :  { %7851 = vmatprep.subr.bf16.mxu1 %v10837_v34 }
 0x148   :  { %v303_v5 = vpop.f32.mrb[0].mxu1 }
 0x149   :  { %v305_v7 = vpop.f32.mrb[1].mxu1  ;;  %v10987_v43 = vadd.f32 %v303_v5, %v213_v12 }
 0x14a   :  { %v10989_v44 = vadd.f32 %v305_v7, %v217_v14 }
 0x14c   :  { %v309_v15 = vpop.f32.mrb[2].mxu1 }
 0x14d   :  { %v10973_v18 = vadd.f32 %v309_v15, %v213_v12  ;;  %v311_v19 = vpop.f32.mrb[3].mxu1 }
 0x14e   :  { %v10975_v20 = vadd.f32 %v311_v19, %v217_v14 }
 0x150   :  { %v380_v23 = vpop.f32.mrb[4].mxu1 }
 0x151   :  { %v382_v28 = vpop.f32.mrb[5].mxu1  ;;  %v10993_v63 = vadd.f32 %v380_v23, %v221_v30 }
 0x152   :  { %v10995_v1 = vadd.f32 %v382_v28, %v225_v32 }
 0x154   :  { %v386_v33 = vpop.f32.mrb[6].mxu1 }
 0x155   :  { %v10983_v35 = vadd.f32 %v386_v33, %v221_v30  ;;  %v388_v40 = vpop.f32.mrb[7].mxu1 }
 0x156   :  { %v10985_v42 = vadd.f32 %v388_v40, %v225_v32 }
 0x15e   :  { %v457_v50 = vpop.f32.mrb[0].mxu0 }
 0x15f   :  { %v533_v51 = vadd.f32 %v457_v50, %v10987_v43  ;;  %v459_v52 = vpop.f32.mrb[1].mxu0 }
 0x160   :  { %v534_v54 = vadd.f32 %v459_v52, %v10989_v44 }
 0x161   :  { %v7419_v57 = vmul.f32 -1.442695, %v533_v51 }
 0x162   :  { %v7420_v58 = vmul.f32 -1.442695, %v534_v54 }
 0x163   :  { %9902 = vpow2.f32 %v7419_v57 }
 0x164   :  { %9904 = vpow2.f32 %v7420_v58 }
 0x16d   :  { %v9903_v14 = vpop.eup %9902 }
 0x16e   :  { %v9905_v19 = vpop.eup %9904  ;;  %v540_v33 = vadd.f32 1.0, %v9903_v14 }
 0x16f   :  { %v546_v40 = vadd.f32 1.0, %v9905_v19 }
 0x170   :  { %v528_v4 = vpop.f32.mrb[8].mxu1 }
 0x171   :  { %v535_v5 = vadd.f32 %v528_v4, %v10993_v63  ;;  %v530_v12 = vpop.f32.mrb[9].mxu1 }
 0x172   :  { %v536_v7 = vadd.f32 %v530_v12, %v10995_v1 }
 0x173   :  { %9906 = vtanh.f32 %v535_v5 }
 0x174   :  { %v7421_v15 = vmul.f32 -1.442695, %v536_v7 }
 0x176   :  { %9908 = vpow2.f32 %v7421_v15 }
 0x177   :  { %9910 = vrcp.f32 %v540_v33 }
 0x178   :  { %9912 = vrcp.f32 %v546_v40 }
 0x17d   :  { %v9907_v50 = vpop.eup %9906 }
 0x180   :  { %v9909_v23 = vpop.eup %9908 }
 0x181   :  { %v9911_v30 = vpop.eup %9910  ;;  %v553_v51 = vadd.f32 1.0, %v9909_v23 }
 0x182   :  { %v9913_v28 = vpop.eup %9912  ;;  %v557_v32 = vmul.f32 %v9911_v30, %v9907_v50 }
 0x183   :  { %v556_v52 = vmul.f32 0.0, %v9913_v28  ;;  %9914 = vrcp.f32 %v553_v51 }
 0x185   :  { %v10999_v54 = vadd.f32 %v557_v32, %v556_v52 }
 0x187   :  { %9916 = vtanh.f32 %v10999_v54 }
 0x18d   :  { %v9915_v57 = vpop.eup %9914 }
 0x191   :  { %v9917_v58 = vpop.eup %9916 }
 0x192   :  { %v560_v4 = vmul.f32 %v9917_v58, %v9915_v57 }
 0x194   :  { %626 = vmatmul.mubr.f32.vlgmr.msra.gmra.mrb[2].mxu0 %v560_v4  ;;  %697 = vmatmul.mubr.f32.vlgmr.msra.gmra.mrb[10].mxu1 %v560_v4 }
 0x195   :  { %7821 = vmatpush1.bf16.msra.mxu0 %v10809_v13  ;;  %7853 = vmatpush1.bf16.msra.mxu1 %v10848_v47 }
 0x196   :  { %7823 = vmatprep.subr.bf16.mxu0 %v10812_v17  ;;  %7855 = vmatprep.subr.bf16.mxu1 %v10853_v49 }
 0x197   :  { %813 = vmatprep.mubr.f32.mxu0 %v12921_v0  ;;  %884 = vmatprep.mubr.f32.mxu1 %v12921_v0 }
 0x199   :  { %7825 = vmatpush1.bf16.msra.mxu0 %v10821_v21  ;;  %7857 = vmatpush1.bf16.msra.mxu1 %v10860_v59 }
 0x19a   :  { %7827 = vmatprep.subr.bf16.mxu0 %v10831_v29  ;;  %7859 = vmatprep.subr.bf16.mxu1 %v10867_v61 }
 0x19d   :  { %7829 = vmatpush1.bf16.msra.mxu0 %v10840_v37  ;;  %7861 = vmatpush1.bf16.msra.mxu1 %v10874_v9 }
 0x19e   :  { %7831 = vmatprep.subr.bf16.mxu0 %v10844_v41  ;;  %7863 = vmatprep.subr.bf16.mxu1 %v10881_v11 }
 0x1a1   :  { %7833 = vmatpush1.bf16.msra.mxu0 %v10851_v48  ;;  %7865 = vmatpush1.bf16.msra.mxu1 %v10887_v24 }
 0x1a2   :  { %7835 = vmatprep.subr.bf16.mxu0 %v10856_v53  ;;  %7867 = vmatprep.subr.bf16.mxu1 %v10893_v26 }
 0x1a5   :  { %7837 = vmatpush1.bf16.msra.mxu0 %v10865_v60  ;;  %7869 = vmatpush1.bf16.msra.mxu1 %v10899_v36 }
 0x1a6   :  { %7839 = vmatprep.subr.bf16.mxu0 %v10870_v2  ;;  %7871 = vmatprep.subr.bf16.mxu1 %v10905_v39 }
 0x1a9   :  { %7841 = vmatpush1.bf16.msra.mxu0 %v10879_v10  ;;  %7873 = vmatpush1.bf16.msra.mxu1 %v10909_v45 }
 0x1aa   :  { %7843 = vmatprep.subr.bf16.mxu0 %v10884_v16  ;;  %7875 = vmatprep.subr.bf16.mxu1 %v10913_v46 }
 0x1ad   :  { %7845 = vmatpush1.bf16.msra.mxu0 %v10891_v25  ;;  %7877 = vmatpush1.bf16.msra.mxu1 %v10918_v55 }
 0x1ae   :  { %7847 = vmatprep.subr.bf16.mxu0 %v10896_v31  ;;  %7879 = vmatprep.subr.bf16.mxu1 %v10921_v56 }
 0x1b1   :  { %7849 = vmatpush1.bf16.msra.mxu0 %v10903_v38  ;;  %7881 = vmatpush1.bf16.msra.mxu1 %v10927_v62 }
 0x1b2   :  { %7883 = vmatprep.subr.bf16.mxu0 %v10804_v8  ;;  %7915 = vmatprep.subr.bf16.mxu1 %v10837_v34 }
 0x267   :  { %v627_v5 = vpop.f32.mrb[2].mxu0  ;;  %v698_v12 = vpop.f32.mrb[10].mxu1 }
 0x268   :  { %v707_v7 = vrot.slane %v627_v5, 6  ;;  %v629_v14 = vpop.f32.mrb[3].mxu0  ;;  %v700_v15 = vpop.f32.mrb[11].mxu1  ;;  %v709_v32 = vrot.slane %v698_v12, 6 }
 0x269   :  { %v708_v19 = vrot.slane %v629_v14, 6  ;;  %v710_v30 = vrot.slane %v700_v15, 6  ;;  %v739_v15 = vrot.slane %v10999_v54, 6 }
 0x26a   :  { %v715_v33 = vadd.f32 %v707_v7, %v10987_v43  ;;  %v717_v52 = vadd.f32 %v709_v32, %v10993_v63 }
 0x26b   :  { %v716_v40 = vadd.f32 %v708_v19, %v10989_v44  ;;  %v718_v28 = vadd.f32 %v710_v30, %v10995_v1 }
 0x26c   :  { %v7422_v50 = vmul.f32 -1.442695, %v715_v33 }
 0x26d   :  { %v7423_v23 = vmul.f32 -1.442695, %v716_v40  ;;  %v7424_v51 = vmul.f32 -1.442695, %v718_v28 }
 0x26e   :  { %9918 = vpow2.f32 %v7422_v50 }
 0x26f   :  { %9920 = vpow2.f32 %v7423_v23 }
 0x270   :  { %9922 = vpow2.f32 %v7424_v51 }
 0x271   :  { %9924 = vtanh.f32 %v717_v52 }
 0x278   :  { %v9919_v57 = vpop.eup %9918 }
 0x279   :  { %v9921_v58 = vpop.eup %9920  ;;  %v722_v4 = vadd.f32 1.0, %v9919_v57 }
 0x27a   :  { %v728_v5 = vadd.f32 1.0, %v9921_v58  ;;  %v9923_v7 = vpop.eup %9922 }
 0x27b   :  { %9926 = vrcp.f32 %v722_v4  ;;  %v9925_v14 = vpop.eup %9924  ;;  %v735_v50 = vadd.f32 1.0, %v9923_v7 }
 0x27c   :  { %9928 = vrcp.f32 %v728_v5 }
 0x27d   :  { %9930 = vrcp.f32 %v735_v50 }
 0x285   :  { %v9927_v19 = vpop.eup %9926 }
 0x286   :  { %v9929_v33 = vpop.eup %9928  ;;  %v742_v40 = vmul.f32 %v9927_v19, %v9925_v14 }
 0x287   :  { %v741_v12 = vmul.f32 %v9929_v33, %v739_v15  ;;  %v9931_v30 = vpop.eup %9930 }
 0x289   :  { %v11041_v23 = vadd.f32 %v742_v40, %v741_v12 }
 0x28b   :  { %9932 = vtanh.f32 %v11041_v23 }
 0x295   :  { %v9933_v28 = vpop.eup %9932 }
 0x296   :  { %v745_v32 = vmul.f32 %v9933_v28, %v9931_v30 }
 0x298   :  { %v747_v51 = vrot.slane %v745_v32, 2 }
 0x29a   :  { %814 = vmatmul.mubr.f32.vlgmr.msra.gmra.mrb[4].mxu0 %v747_v51  ;;  %885 = vmatmul.mubr.f32.vlgmr.msra.gmra.mrb[12].mxu1 %v747_v51 }
 0x29b   :  { %7885 = vmatpush1.bf16.msra.mxu0 %v10809_v13  ;;  %7917 = vmatpush1.bf16.msra.mxu1 %v10848_v47 }
 0x29c   :  { %7887 = vmatprep.subr.bf16.mxu0 %v10812_v17  ;;  %7919 = vmatprep.subr.bf16.mxu1 %v10853_v49 }
 0x29d   :  { %1001 = vmatprep.mubr.f32.mxu0 %v12921_v0  ;;  %1072 = vmatprep.mubr.f32.mxu1 %v12921_v0 }
 0x29f   :  { %7889 = vmatpush1.bf16.msra.mxu0 %v10821_v21  ;;  %7921 = vmatpush1.bf16.msra.mxu1 %v10860_v59 }
 0x2a0   :  { %7891 = vmatprep.subr.bf16.mxu0 %v10831_v29  ;;  %7923 = vmatprep.subr.bf16.mxu1 %v10867_v61 }
 0x2a3   :  { %7893 = vmatpush1.bf16.msra.mxu0 %v10840_v37  ;;  %7925 = vmatpush1.bf16.msra.mxu1 %v10874_v9 }
 0x2a4   :  { %7895 = vmatprep.subr.bf16.mxu0 %v10844_v41  ;;  %7927 = vmatprep.subr.bf16.mxu1 %v10881_v11 }
 0x2a7   :  { %7897 = vmatpush1.bf16.msra.mxu0 %v10851_v48  ;;  %7929 = vmatpush1.bf16.msra.mxu1 %v10887_v24 }
 0x2a8   :  { %7899 = vmatprep.subr.bf16.mxu0 %v10856_v53  ;;  %7931 = vmatprep.subr.bf16.mxu1 %v10893_v26 }
 0x2ab   :  { %7901 = vmatpush1.bf16.msra.mxu0 %v10865_v60  ;;  %7933 = vmatpush1.bf16.msra.mxu1 %v10899_v36 }
 0x2ac   :  { %7903 = vmatprep.subr.bf16.mxu0 %v10870_v2  ;;  %7935 = vmatprep.subr.bf16.mxu1 %v10905_v39 }
 0x2af   :  { %7905 = vmatpush1.bf16.msra.mxu0 %v10879_v10  ;;  %7937 = vmatpush1.bf16.msra.mxu1 %v10909_v45 }
 0x2b0   :  { %7907 = vmatprep.subr.bf16.mxu0 %v10884_v16  ;;  %7939 = vmatprep.subr.bf16.mxu1 %v10913_v46 }
 0x2b3   :  { %7909 = vmatpush1.bf16.msra.mxu0 %v10891_v25  ;;  %7941 = vmatpush1.bf16.msra.mxu1 %v10918_v55 }
 0x2b4   :  { %7911 = vmatprep.subr.bf16.mxu0 %v10896_v31  ;;  %7943 = vmatprep.subr.bf16.mxu1 %v10921_v56 }
 0x2b7   :  { %7913 = vmatpush1.bf16.msra.mxu0 %v10903_v38  ;;  %7945 = vmatpush1.bf16.msra.mxu1 %v10927_v62 }
 0x2b8   :  { %7947 = vmatprep.subr.bf16.mxu0 %v10804_v8  ;;  %7979 = vmatprep.subr.bf16.mxu1 %v10837_v34 }
 0x36d   :  { %v815_v54 = vpop.f32.mrb[4].mxu0  ;;  %v886_v52 = vpop.f32.mrb[12].mxu1 }
 0x36e   :  { %v895_v57 = vrot.slane %v815_v54, 4  ;;  %v817_v58 = vpop.f32.mrb[5].mxu0  ;;  %v888_v4 = vpop.f32.mrb[13].mxu1  ;;  %v897_v50 = vrot.slane %v886_v52, 4 }
 0x36f   :  { %v896_v5 = vrot.slane %v817_v58, 4  ;;  %v898_v33 = vrot.slane %v888_v4, 4  ;;  %v927_v4 = vrot.slane %v11041_v23, 6 }
 0x370   :  { %v903_v7 = vadd.f32 %v895_v57, %v10987_v43  ;;  %v905_v30 = vadd.f32 %v897_v50, %v10993_v63 }
 0x371   :  { %v904_v14 = vadd.f32 %v896_v5, %v10989_v44  ;;  %v906_v40 = vadd.f32 %v898_v33, %v10995_v1 }
 0x372   :  { %v7425_v19 = vmul.f32 -1.442695, %v903_v7 }
 0x373   :  { %v7426_v15 = vmul.f32 -1.442695, %v904_v14  ;;  %v7427_v12 = vmul.f32 -1.442695, %v906_v40 }
 0x374   :  { %9934 = vpow2.f32 %v7425_v19 }
 0x375   :  { %9936 = vpow2.f32 %v7426_v15 }
 0x376   :  { %9938 = vpow2.f32 %v7427_v12 }
 0x377   :  { %9940 = vtanh.f32 %v905_v30 }
 0x37e   :  { %v9935_v28 = vpop.eup %9934 }
 0x37f   :  { %v9937_v32 = vpop.eup %9936  ;;  %v910_v51 = vadd.f32 1.0, %v9935_v28 }
 0x380   :  { %v916_v54 = vadd.f32 1.0, %v9937_v32  ;;  %v9939_v57 = vpop.eup %9938 }
 0x381   :  { %9942 = vrcp.f32 %v910_v51  ;;  %v9941_v58 = vpop.eup %9940  ;;  %v923_v19 = vadd.f32 1.0, %v9939_v57 }
 0x382   :  { %9944 = vrcp.f32 %v916_v54 }
 0x383   :  { %9946 = vrcp.f32 %v923_v19 }
 0x38b   :  { %v9943_v5 = vpop.eup %9942 }
 0x38c   :  { %v9945_v7 = vpop.eup %9944  ;;  %v930_v14 = vmul.f32 %v9943_v5, %v9941_v58 }
 0x38d   :  { %v929_v52 = vmul.f32 %v9945_v7, %v927_v4  ;;  %v9947_v33 = vpop.eup %9946 }
 0x38f   :  { %v11083_v15 = vadd.f32 %v930_v14, %v929_v52 }
 0x391   :  { %9948 = vtanh.f32 %v11083_v15 }
 0x39b   :  { %v9949_v40 = vpop.eup %9948 }
 0x39c   :  { %v933_v50 = vmul.f32 %v9949_v40, %v9947_v33 }
 0x39e   :  { %v935_v12 = vrot.slane %v933_v50, 4 }
 0x3a0   :  { %1002 = vmatmul.mubr.f32.vlgmr.msra.gmra.mrb[6].mxu0 %v935_v12  ;;  %1073 = vmatmul.mubr.f32.vlgmr.msra.gmra.mrb[14].mxu1 %v935_v12 }
 0x3a1   :  { %7949 = vmatpush1.bf16.msra.mxu0 %v10809_v13  ;;  %7981 = vmatpush1.bf16.msra.mxu1 %v10848_v47 }
 0x3a2   :  { %7951 = vmatprep.subr.bf16.mxu0 %v10812_v17  ;;  %7983 = vmatprep.subr.bf16.mxu1 %v10853_v49 }
 0x3a3   :  { %1189 = vmatprep.mubr.f32.mxu0 %v12921_v0  ;;  %1260 = vmatprep.mubr.f32.mxu1 %v12921_v0 }
 0x3a5   :  { %7953 = vmatpush1.bf16.msra.mxu0 %v10821_v21  ;;  %7985 = vmatpush1.bf16.msra.mxu1 %v10860_v59 }
 0x3a6   :  { %7955 = vmatprep.subr.bf16.mxu0 %v10831_v29  ;;  %7987 = vmatprep.subr.bf16.mxu1 %v10867_v61 }
 0x3a9   :  { %7957 = vmatpush1.bf16.msra.mxu0 %v10840_v37  ;;  %7989 = vmatpush1.bf16.msra.mxu1 %v10874_v9 }
 0x3aa   :  { %7959 = vmatprep.subr.bf16.mxu0 %v10844_v41  ;;  %7991 = vmatprep.subr.bf16.mxu1 %v10881_v11 }
 0x3ad   :  { %7961 = vmatpush1.bf16.msra.mxu0 %v10851_v48  ;;  %7993 = vmatpush1.bf16.msra.mxu1 %v10887_v24 }
 0x3ae   :  { %7963 = vmatprep.subr.bf16.mxu0 %v10856_v53  ;;  %7995 = vmatprep.subr.bf16.mxu1 %v10893_v26 }
 0x3b1   :  { %7965 = vmatpush1.bf16.msra.mxu0 %v10865_v60  ;;  %7997 = vmatpush1.bf16.msra.mxu1 %v10899_v36 }
 0x3b2   :  { %7967 = vmatprep.subr.bf16.mxu0 %v10870_v2  ;;  %7999 = vmatprep.subr.bf16.mxu1 %v10905_v39 }
 0x3b5   :  { %7969 = vmatpush1.bf16.msra.mxu0 %v10879_v10  ;;  %8001 = vmatpush1.bf16.msra.mxu1 %v10909_v45 }
 0x3b6   :  { %7971 = vmatprep.subr.bf16.mxu0 %v10884_v16  ;;  %8003 = vmatprep.subr.bf16.mxu1 %v10913_v46 }
 0x3b9   :  { %7973 = vmatpush1.bf16.msra.mxu0 %v10891_v25  ;;  %8005 = vmatpush1.bf16.msra.mxu1 %v10918_v55 }
 0x3ba   :  { %7975 = vmatprep.subr.bf16.mxu0 %v10896_v31  ;;  %8007 = vmatprep.subr.bf16.mxu1 %v10921_v56 }
 0x3bd   :  { %7977 = vmatpush1.bf16.msra.mxu0 %v10903_v38  ;;  %8009 = vmatpush1.bf16.msra.mxu1 %v10927_v62 }
 0x3be   :  { %8011 = vmatprep.subr.bf16.mxu0 %v10804_v8  ;;  %8043 = vmatprep.subr.bf16.mxu1 %v10837_v34 }
 0x473   :  { %v1003_v23 = vpop.f32.mrb[6].mxu0  ;;  %v1074_v30 = vpop.f32.mrb[14].mxu1 }
 0x474   :  { %v1083_v28 = vrot.slane %v1003_v23, 2  ;;  %v1005_v32 = vpop.f32.mrb[7].mxu0  ;;  %v1076_v51 = vpop.f32.mrb[15].mxu1  ;;  %v1085_v19 = vrot.slane %v1074_v30, 2 }
 0x475   :  { %v1084_v54 = vrot.slane %v1005_v32, 2  ;;  %v1086_v7 = vrot.slane %v1076_v51, 2  ;;  %v1115_v32 = vrot.slane %v11083_v15, 6 }
 0x476   :  { %v1091_v57 = vadd.f32 %v1083_v28, %v10987_v43  ;;  %v1093_v33 = vadd.f32 %v1085_v19, %v10993_v63 }
 0x477   :  { %v1092_v58 = vadd.f32 %v1084_v54, %v10989_v44  ;;  %v1094_v14 = vadd.f32 %v1086_v7, %v10995_v1 }
 0x478   :  { %v7428_v5 = vmul.f32 -1.442695, %v1091_v57 }
 0x479   :  { %v7429_v4 = vmul.f32 -1.442695, %v1092_v58  ;;  %v7430_v52 = vmul.f32 -1.442695, %v1094_v14 }
 0x47a   :  { %9950 = vpow2.f32 %v7428_v5 }
 0x47b   :  { %9952 = vpow2.f32 %v7429_v4 }
 0x47c   :  { %9954 = vpow2.f32 %v7430_v52 }
 0x47d   :  { %9956 = vtanh.f32 %v1093_v33 }
 0x484   :  { %v9951_v40 = vpop.eup %9950 }
 0x485   :  { %v9953_v50 = vpop.eup %9952  ;;  %v1098_v12 = vadd.f32 1.0, %v9951_v40 }
 0x486   :  { %v1104_v23 = vadd.f32 1.0, %v9953_v50  ;;  %v9955_v43 = vpop.eup %9954 }
 0x487   :  { %9958 = vrcp.f32 %v1098_v12  ;;  %v9957_v44 = vpop.eup %9956  ;;  %v1111_v1 = vadd.f32 1.0, %v9955_v43 }
 0x488   :  { %9960 = vrcp.f32 %v1104_v23 }
 0x489   :  { %9962 = vrcp.f32 %v1111_v1 }
 0x491   :  { %v9959_v28 = vpop.eup %9958 }
 0x492   :  { %v9961_v51 = vpop.eup %9960  ;;  %v1118_v54 = vmul.f32 %v9959_v28, %v9957_v44 }
 0x493   :  { %v1117_v30 = vmul.f32 %v9961_v51, %v1115_v32  ;;  %v9963_v63 = vpop.eup %9962 }
 0x495   :  { %v11125_v57 = vadd.f32 %v1118_v54, %v1117_v30 }
 0x497   :  { %9964 = vtanh.f32 %v11125_v57 }
 0x4a1   :  { %v9965_v58 = vpop.eup %9964 }
 0x4a2   :  { %v1121_v5 = vmul.f32 %v9965_v58, %v9963_v63  ;;  %v1291_v63 = vrot.slane %v11125_v57, 6 }
 0x4a4   :  { %v1123_v4 = vrot.slane %v1121_v5, 6 }
 0x4a6   :  { %1190 = vmatmul.mubr.f32.vlgmr.msra.gmra.mrb[8].mxu0 %v1123_v4  ;;  %1261 = vmatmul.mubr.f32.vlgmr.msra.gmra.mrb[16].mxu1 %v1123_v4 }
 0x4a7   :  { %8013 = vmatpush1.bf16.msra.mxu0 %v10809_v13  ;;  %8045 = vmatpush1.bf16.msra.mxu1 %v10848_v47 }
 0x4a8   :  { %8015 = vmatprep.subr.bf16.mxu0 %v10812_v17  ;;  %8047 = vmatprep.subr.bf16.mxu1 %v10853_v49 }
 0x4a9   :  { %1362 = vmatprep.mubr.f32.mxu0 %v12921_v0  ;;  %1433 = vmatprep.mubr.f32.mxu1 %v12921_v0 }
 0x4ab   :  { %8017 = vmatpush1.bf16.msra.mxu0 %v10821_v21  ;;  %8049 = vmatpush1.bf16.msra.mxu1 %v10860_v59 }
 0x4ac   :  { %8019 = vmatprep.subr.bf16.mxu0 %v10831_v29  ;;  %8051 = vmatprep.subr.bf16.mxu1 %v10867_v61 }
 0x4af   :  { %8021 = vmatpush1.bf16.msra.mxu0 %v10840_v37  ;;  %8053 = vmatpush1.bf16.msra.mxu1 %v10874_v9 }
 0x4b0   :  { %8023 = vmatprep.subr.bf16.mxu0 %v10844_v41  ;;  %8055 = vmatprep.subr.bf16.mxu1 %v10881_v11 }
 0x4b3   :  { %8025 = vmatpush1.bf16.msra.mxu0 %v10851_v48  ;;  %8057 = vmatpush1.bf16.msra.mxu1 %v10887_v24 }
 0x4b4   :  { %8027 = vmatprep.subr.bf16.mxu0 %v10856_v53  ;;  %8059 = vmatprep.subr.bf16.mxu1 %v10893_v26 }
 0x4b7   :  { %8029 = vmatpush1.bf16.msra.mxu0 %v10865_v60  ;;  %8061 = vmatpush1.bf16.msra.mxu1 %v10899_v36 }
 0x4b8   :  { %8031 = vmatprep.subr.bf16.mxu0 %v10870_v2  ;;  %8063 = vmatprep.subr.bf16.mxu1 %v10905_v39 }
 0x4bb   :  { %8033 = vmatpush1.bf16.msra.mxu0 %v10879_v10  ;;  %8065 = vmatpush1.bf16.msra.mxu1 %v10909_v45 }
 0x4bc   :  { %8035 = vmatprep.subr.bf16.mxu0 %v10884_v16  ;;  %8067 = vmatprep.subr.bf16.mxu1 %v10913_v46 }
 0x4bf   :  { %8037 = vmatpush1.bf16.msra.mxu0 %v10891_v25  ;;  %8069 = vmatpush1.bf16.msra.mxu1 %v10918_v55 }
 0x4c0   :  { %8039 = vmatprep.subr.bf16.mxu0 %v10896_v31  ;;  %8071 = vmatprep.subr.bf16.mxu1 %v10921_v56 }
 0x4c3   :  { %8041 = vmatpush1.bf16.msra.mxu0 %v10903_v38  ;;  %8073 = vmatpush1.bf16.msra.mxu1 %v10927_v62 }
 0x4c4   :  { %8075 = vmatprep.subr.bf16.mxu0 %v10804_v8  ;;  %8107 = vmatprep.subr.bf16.mxu1 %v10837_v34 }
 0x579   :  { %v1191_v15 = vpop.f32.mrb[8].mxu0  ;;  %v1262_v7 = vpop.f32.mrb[16].mxu1 }
 0x57a   :  { %v1267_v14 = vadd.f32 %v1191_v15, %v10973_v18  ;;  %v1193_v19 = vpop.f32.mrb[9].mxu0  ;;  %v1264_v52 = vpop.f32.mrb[17].mxu1  ;;  %v1269_v43 = vadd.f32 %v1262_v7, %v10983_v35 }
 0x57b   :  { %v1268_v33 = vadd.f32 %v1193_v19, %v10975_v20  ;;  %v1270_v12 = vadd.f32 %v1264_v52, %v10985_v42 }
 0x57c   :  { %v7431_v40 = vmul.f32 -1.442695, %v1267_v14 }
 0x57d   :  { %v7432_v50 = vmul.f32 -1.442695, %v1268_v33  ;;  %v7433_v23 = vmul.f32 -1.442695, %v1270_v12 }
 0x57e   :  { %9966 = vpow2.f32 %v7431_v40 }
 0x57f   :  { %9968 = vpow2.f32 %v7432_v50 }
 0x580   :  { %9970 = vpow2.f32 %v7433_v23 }
 0x581   :  { %9972 = vtanh.f32 %v1269_v43 }
 0x588   :  { %v9967_v44 = vpop.eup %9966 }
 0x589   :  { %v9969_v28 = vpop.eup %9968  ;;  %v1274_v32 = vadd.f32 1.0, %v9967_v44 }
 0x58a   :  { %v1280_v51 = vadd.f32 1.0, %v9969_v28  ;;  %v9971_v54 = vpop.eup %9970 }
 0x58b   :  { %9974 = vrcp.f32 %v1274_v32  ;;  %v9973_v1 = vpop.eup %9972  ;;  %v1287_v4 = vadd.f32 1.0, %v9971_v54 }
 0x58c   :  { %9976 = vrcp.f32 %v1280_v51 }
 0x58d   :  { %9978 = vrcp.f32 %v1287_v4 }
 0x595   :  { %v9975_v30 = vpop.eup %9974 }
 0x596   :  { %v9977_v58 = vpop.eup %9976  ;;  %v1294_v5 = vmul.f32 %v9975_v30, %v9973_v1 }
 0x597   :  { %v1293_v15 = vmul.f32 %v9977_v58, %v1291_v63  ;;  %v9979_v7 = vpop.eup %9978 }
 0x599   :  { %v11167_v14 = vadd.f32 %v1294_v5, %v1293_v15 }
 0x59b   :  { %9980 = vtanh.f32 %v11167_v14 }
 0x5a5   :  { %v9981_v19 = vpop.eup %9980 }
 0x5a6   :  { %v1297_v52 = vmul.f32 %v9981_v19, %v9979_v7  ;;  %v1476_v19 = vrot.slane %v11167_v14, 6 }
 0x5a8   :  { %1363 = vmatmul.mubr.f32.vlgmr.msra.gmra.mrb[10].mxu0 %v1297_v52  ;;  %1434 = vmatmul.mubr.f32.vlgmr.msra.gmra.mrb[18].mxu1 %v1297_v52 }
 0x5a9   :  { %8077 = vmatpush1.bf16.msra.mxu0 %v10809_v13  ;;  %8109 = vmatpush1.bf16.msra.mxu1 %v10848_v47 }
 0x5aa   :  { %8079 = vmatprep.subr.bf16.mxu0 %v10812_v17  ;;  %8111 = vmatprep.subr.bf16.mxu1 %v10853_v49 }
 0x5ab   :  { %1550 = vmatprep.mubr.f32.mxu0 %v12921_v0  ;;  %1621 = vmatprep.mubr.f32.mxu1 %v12921_v0 }
 0x5ad   :  { %8081 = vmatpush1.bf16.msra.mxu0 %v10821_v21  ;;  %8113 = vmatpush1.bf16.msra.mxu1 %v10860_v59 }
 0x5ae   :  { %8083 = vmatprep.subr.bf16.mxu0 %v10831_v29  ;;  %8115 = vmatprep.subr.bf16.mxu1 %v10867_v61 }
 0x5b1   :  { %8085 = vmatpush1.bf16.msra.mxu0 %v10840_v37  ;;  %8117 = vmatpush1.bf16.msra.mxu1 %v10874_v9 }
 0x5b2   :  { %8087 = vmatprep.subr.bf16.mxu0 %v10844_v41  ;;  %8119 = vmatprep.subr.bf16.mxu1 %v10881_v11 }
 0x5b5   :  { %8089 = vmatpush1.bf16.msra.mxu0 %v10851_v48  ;;  %8121 = vmatpush1.bf16.msra.mxu1 %v10887_v24 }
 0x5b6   :  { %8091 = vmatprep.subr.bf16.mxu0 %v10856_v53  ;;  %8123 = vmatprep.subr.bf16.mxu1 %v10893_v26 }
 0x5b9   :  { %8093 = vmatpush1.bf16.msra.mxu0 %v10865_v60  ;;  %8125 = vmatpush1.bf16.msra.mxu1 %v10899_v36 }
 0x5ba   :  { %8095 = vmatprep.subr.bf16.mxu0 %v10870_v2  ;;  %8127 = vmatprep.subr.bf16.mxu1 %v10905_v39 }
 0x5bd   :  { %8097 = vmatpush1.bf16.msra.mxu0 %v10879_v10  ;;  %8129 = vmatpush1.bf16.msra.mxu1 %v10909_v45 }
 0x5be   :  { %8099 = vmatprep.subr.bf16.mxu0 %v10884_v16  ;;  %8131 = vmatprep.subr.bf16.mxu1 %v10913_v46 }
 0x5c1   :  { %8101 = vmatpush1.bf16.msra.mxu0 %v10891_v25  ;;  %8133 = vmatpush1.bf16.msra.mxu1 %v10918_v55 }
 0x5c2   :  { %8103 = vmatprep.subr.bf16.mxu0 %v10896_v31  ;;  %8135 = vmatprep.subr.bf16.mxu1 %v10921_v56 }
 0x5c5   :  { %8105 = vmatpush1.bf16.msra.mxu0 %v10903_v38  ;;  %8137 = vmatpush1.bf16.msra.mxu1 %v10927_v62 }
 0x5c6   :  { %8139 = vmatprep.subr.bf16.mxu0 %v10804_v8  ;;  %8171 = vmatprep.subr.bf16.mxu1 %v10837_v34 }
 0x67b   :  { %v1364_v57 = vpop.f32.mrb[10].mxu0  ;;  %v1435_v33 = vpop.f32.mrb[18].mxu1 }
 0x67c   :  { %v1444_v40 = vrot.slane %v1364_v57, 6  ;;  %v1366_v50 = vpop.f32.mrb[11].mxu0  ;;  %v1437_v12 = vpop.f32.mrb[19].mxu1  ;;  %v1446_v8 = vrot.slane %v1435_v33, 6 }
 0x67d   :  { %v1445_v23 = vrot.slane %v1366_v50, 6  ;;  %v1447_v51 = vrot.slane %v1437_v12, 6 }
 0x67e   :  { %v1452_v43 = vadd.f32 %v1444_v40, %v10973_v18  ;;  %v1454_v34 = vadd.f32 %v1446_v8, %v10983_v35  ;;  %v1958_v8 = vld [vmem:[%s12899_s6 + $0x18] sm:$0xff] }
 0x67f   :  { %v1453_v44 = vadd.f32 %v1445_v23, %v10975_v20  ;;  %v1455_v54 = vadd.f32 %v1447_v51, %v10985_v42  ;;  %v1959_v51 = vld [vmem:[%s12899_s6 + $0x20] sm:$0xff] }
 0x680   :  { %v7434_v28 = vmul.f32 -1.442695, %v1452_v43 }
 0x681   :  { %v7435_v32 = vmul.f32 -1.442695, %v1453_v44  ;;  %v7436_v1 = vmul.f32 -1.442695, %v1455_v54 }
 0x682   :  { %9982 = vpow2.f32 %v7434_v28 }
 0x683   :  { %9984 = vpow2.f32 %v7435_v32  ;;  %v1955_v32 = vld [vmem:[%s12899_s6] sm:$0xff] }
 0x684   :  { %9986 = vpow2.f32 %v7436_v1  ;;  %v1962_v1 = vld [vmem:[%s12899_s6 + $0x38] sm:$0xff] }
 0x685   :  { %9988 = vtanh.f32 %v1454_v34 }
 0x68c   :  { %v9983_v30 = vpop.eup %9982 }
 0x68d   :  { %v9985_v63 = vpop.eup %9984  ;;  %v1459_v58 = vadd.f32 1.0, %v9983_v30  ;;  %v8228_v30 = vpack.c.bf16 %v1959_v51, %v1955_v32  ;;  %v2012_v32 = vld [vmem:[#allocation6 + $0x188] sm:$0xff] }
 0x68e   :  { %v1465_v5 = vadd.f32 1.0, %v9985_v63  ;;  %v9987_v4 = vpop.eup %9986  ;;  %v2016_v51 = vld [vmem:[#allocation6 + $0x1a8] sm:$0xff] }
 0x68f   :  { %9990 = vrcp.f32 %v1459_v58  ;;  %v9989_v15 = vpop.eup %9988  ;;  %v1472_v40 = vadd.f32 1.0, %v9987_v4  ;;  %v8230_v58 = vpack.c.bf16 %v1962_v1, %v1958_v8  ;;  %v1961_v4 = vld [vmem:[%s12899_s6 + $0x30] sm:$0xff] }
 0x690   :  { %9992 = vrcp.f32 %v1465_v5  ;;  %v1957_v5 = vld [vmem:[%s12899_s6 + $0x10] sm:$0xff] }
 0x691   :  { %9994 = vrcp.f32 %v1472_v40  ;;  %v1963_v40 = vld [vmem:[#allocation6] sm:$0xff] }
 0x692   :  { %v2011_v8 = vld [vmem:[#allocation6 + $0x180] sm:$0xff] }
 0x693   :  { %v2015_v1 = vld [vmem:[#allocation6 + $0x1a0] sm:$0xff] }
 0x699   :  { %v9991_v7 = vpop.eup %9990 }
 0x69a   :  { %v9993_v52 = vpop.eup %9992  ;;  %v1479_v57 = vmul.f32 %v9991_v7, %v9989_v15  ;;  %v1964_v15 = vld [vmem:[#allocation6 + $0x8] sm:$0xff] }
 0x69b   :  { %v1478_v33 = vmul.f32 %v9993_v52, %v1476_v19  ;;  %v9995_v12 = vpop.eup %9994  ;;  %v1968_v7 = vld [vmem:[#allocation6 + $0x28] sm:$0xff]  ;;  %v8232_v19 = vpack.c.bf16 %v1961_v4, %v1957_v5 }
 0x69c   :  { %v11277_v52 = vpack.c.bf16 %v1968_v7, %v1964_v15  ;;  %v2020_v5 = vld [vmem:[#allocation6 + $0x1c8] sm:$0xff]  ;;  %v2019_v7 = vld [vmem:[#allocation6 + $0x1c0] sm:$0xff] }
 0x69d   :  { %v11209_v50 = vadd.f32 %v1479_v57, %v1478_v33  ;;  %v10416_v57 = vld [vmem:[%s12934_s24] sm:$0xff]  ;;  %v1967_v33 = vld [vmem:[#allocation6 + $0x20] sm:$0xff]  ;;  %v2024_v4 = vld [vmem:[#allocation6 + $0x1e8] sm:$0xff] }
 0x69e   :  { %v11347_v15 = vpack.c.bf16 %v2024_v4, %v2020_v5 }
 0x69f   :  { %9996 = vtanh.f32 %v11209_v50 }
 0x6a9   :  { %v9997_v23 = vpop.eup %9996 }
 0x6aa   :  { %v1482_v43 = vmul.f32 %v9997_v23, %v9995_v12  ;;  %v11290_v12 = vpack.c.bf16 %v1967_v33, %v1963_v40  ;;  %v1972_v23 = vld [vmem:[#allocation6 + $0x48] sm:$0xff]  ;;  %v1863_v40 = vld [vmem:[%s12939_s0 + $0x20] sm:$0xff]  ;;  %v1864_v33 = vld [vmem:[%s12939_s0 + $0x28] sm:$0xff] }
 0x6ac   :  { %v1484_v44 = vrot.slane %v1482_v43, 2  ;;  %v1976_v43 = vld [vmem:[#allocation6 + $0x68] sm:$0xff] }
 0x6ae   :  { %1551 = vmatmul.mubr.f32.vlgmr.msra.gmra.mrb[12].mxu0 %v1484_v44  ;;  %1622 = vmatmul.mubr.f32.vlgmr.msra.gmra.mrb[20].mxu1 %v1484_v44  ;;  %v11297_v44 = vpack.c.bf16 %v1976_v43, %v1972_v23  ;;  %v1865_v23 = vld [vmem:[%s12939_s0 + $0x30] sm:$0xff]  ;;  %v1866_v43 = vld [vmem:[%s12939_s0 + $0x38] sm:$0xff] }
 0x6af   :  { %8141 = vmatpush1.bf16.msra.mxu0 %v10809_v13  ;;  %8173 = vmatpush1.bf16.msra.mxu1 %v10848_v47  ;;  %v1956_v13 = vld [vmem:[%s12899_s6 + $0x8] sm:$0xff] }
 0x6b0   :  { %8143 = vmatprep.subr.bf16.mxu0 %v10812_v17  ;;  %8175 = vmatprep.subr.bf16.mxu1 %v10853_v49  ;;  %v1960_v17 = vld [vmem:[%s12899_s6 + $0x28] sm:$0xff] }
 0x6b1   :  { %1738 = vmatprep.mubr.f32.mxu0 %v12921_v0  ;;  %1809 = vmatprep.mubr.f32.mxu1 %v12921_v0 }
 0x6b3   :  { %8145 = vmatpush1.bf16.msra.mxu0 %v10821_v21  ;;  %8177 = vmatpush1.bf16.msra.mxu1 %v10860_v59  ;;  %v8226_v21 = vpack.c.bf16 %v1960_v17, %v1956_v13  ;;  %v1971_v13 = vld [vmem:[#allocation6 + $0x40] sm:$0xff] }
 0x6b4   :  { %8147 = vmatprep.subr.bf16.mxu0 %v10831_v29  ;;  %8179 = vmatprep.subr.bf16.mxu1 %v10867_v61  ;;  %v1975_v17 = vld [vmem:[#allocation6 + $0x60] sm:$0xff] }
 0x6b7   :  { %8149 = vmatpush1.bf16.msra.mxu0 %v10840_v37  ;;  %8181 = vmatpush1.bf16.msra.mxu1 %v10874_v9 }
 0x6b8   :  { %8151 = vmatprep.subr.bf16.mxu0 %v10844_v41  ;;  %8183 = vmatprep.subr.bf16.mxu1 %v10881_v11 }
 0x6bb   :  { %8153 = vmatpush1.bf16.msra.mxu0 %v10851_v48  ;;  %8185 = vmatpush1.bf16.msra.mxu1 %v10887_v24 }
 0x6bc   :  { %8155 = vmatprep.subr.bf16.mxu0 %v10856_v53  ;;  %8187 = vmatprep.subr.bf16.mxu1 %v10893_v26 }
 0x6bf   :  { %8157 = vmatpush1.bf16.msra.mxu0 %v10865_v60  ;;  %8189 = vmatpush1.bf16.msra.mxu1 %v10899_v36 }
 0x6c0   :  { %8159 = vmatprep.subr.bf16.mxu0 %v10870_v2  ;;  %8191 = vmatprep.subr.bf16.mxu1 %v10905_v39 }
 0x6c3   :  { %8161 = vmatpush1.bf16.msra.mxu0 %v10879_v10  ;;  %8193 = vmatpush1.bf16.msra.mxu1 %v10909_v45  ;;  %v1664_v45 = vrot.slane %v11209_v50, 6  ;;  %v10417_v50 = vld [vmem:[%s12934_s24 + $0x8] sm:$0xff] }
 0x6c4   :  { %8163 = vmatprep.subr.bf16.mxu0 %v10884_v16  ;;  %8195 = vmatprep.subr.bf16.mxu1 %v10913_v46 }
 0x6c7   :  { %8165 = vmatpush1.bf16.msra.mxu0 %v10891_v25  ;;  %8197 = vmatpush1.bf16.msra.mxu1 %v10918_v55 }
 0x6c8   :  { %8167 = vmatprep.subr.bf16.mxu0 %v10896_v31  ;;  %8199 = vmatprep.subr.bf16.mxu1 %v10921_v56 }
 0x6cb   :  { %8169 = vmatpush1.bf16.msra.mxu0 %v10903_v38  ;;  %8201 = vmatpush1.bf16.msra.mxu1 %v10927_v62 }
 0x6cc   :  { %8227 = vmatprep.subr.bf16.mxu1 %v8226_v21  ;;  %v11299_v21 = vpack.c.bf16 %v1975_v17, %v1971_v13  ;;  %v8212_v13 = vpack.c.bf16 %v1866_v43, %v1865_v23  ;;  %v1867_v17 = vld [vmem:[%s12939_s0 + $0x40] sm:$0xff] }
 0x781   :  { %v1552_v29 = vpop.f32.mrb[12].mxu0  ;;  %v1623_v37 = vpop.f32.mrb[20].mxu1 }
 0x782   :  { %v1632_v41 = vrot.slane %v1552_v29, 4  ;;  %v1554_v47 = vpop.f32.mrb[13].mxu0  ;;  %v1625_v48 = vpop.f32.mrb[21].mxu1  ;;  %v1634_v10 = vrot.slane %v1623_v37, 4  ;;  %v1980_v29 = vld [vmem:[#allocation6 + $0x88] sm:$0xff] }
 0x783   :  { %v1633_v49 = vrot.slane %v1554_v47, 4  ;;  %v1635_v2 = vrot.slane %v1625_v48, 4  ;;  %v1984_v37 = vld [vmem:[#allocation6 + $0xa8] sm:$0xff]  ;;  %v1979_v47 = vld [vmem:[#allocation6 + $0x80] sm:$0xff] }
 0x784   :  { %v1640_v53 = vadd.f32 %v1632_v41, %v10973_v18  ;;  %v1642_v16 = vadd.f32 %v1634_v10, %v10983_v35  ;;  %v11303_v41 = vpack.c.bf16 %v1984_v37, %v1980_v29  ;;  %v1983_v48 = vld [vmem:[#allocation6 + $0xa0] sm:$0xff]  ;;  %v1996_v10 = vld [vmem:[#allocation6 + $0x108] sm:$0xff]  ;;  %v1868_v29 = vld [vmem:[%s12939_s0 + $0x48] sm:$0xff] }
 0x785   :  { %v1641_v59 = vadd.f32 %v1633_v49, %v10975_v20  ;;  %v1643_v9 = vadd.f32 %v1635_v2, %v10985_v42  ;;  %v11305_v49 = vpack.c.bf16 %v1983_v48, %v1979_v47  ;;  %v1991_v2 = vld [vmem:[#allocation6 + $0xe0] sm:$0xff]  ;;  %v8215_v37 = vpack.c.bf16 %v1868_v29, %v1867_v17  ;;  %v1870_v48 = vld [vmem:[%s12939_s0 + $0x58] sm:$0xff] }
 0x786   :  { %v7437_v60 = vmul.f32 -1.442695, %v1640_v53  ;;  %v1988_v53 = vld [vmem:[#allocation6 + $0xc8] sm:$0xff]  ;;  %v1869_v47 = vld [vmem:[%s12939_s0 + $0x50] sm:$0xff] }
 0x787   :  { %v7438_v61 = vmul.f32 -1.442695, %v1641_v59  ;;  %v7439_v11 = vmul.f32 -1.442695, %v1643_v9  ;;  %v1992_v59 = vld [vmem:[#allocation6 + $0xe8] sm:$0xff] }
 0x788   :  { %9998 = vpow2.f32 %v7437_v60  ;;  %v11309_v60 = vpack.c.bf16 %v1992_v59, %v1988_v53  ;;  %v8218_v53 = vpack.c.bf16 %v1870_v48, %v1869_v47  ;;  %v1871_v59 = vld [vmem:[%s12939_s0 + $0x60] sm:$0xff] }
 0x789   :  { %10000 = vpow2.f32 %v7438_v61  ;;  %v1987_v61 = vld [vmem:[#allocation6 + $0xc0] sm:$0xff] }
 0x78a   :  { %10002 = vpow2.f32 %v7439_v11  ;;  %v11311_v9 = vpack.c.bf16 %v1991_v2, %v1987_v61  ;;  %v2000_v11 = vld [vmem:[#allocation6 + $0x128] sm:$0xff]  ;;  %v1872_v61 = vld [vmem:[%s12939_s0 + $0x68] sm:$0xff] }
 0x78b   :  { %10004 = vtanh.f32 %v1642_v16  ;;  %v11315_v16 = vpack.c.bf16 %v2000_v11, %v1996_v10  ;;  %v8221_v2 = vpack.c.bf16 %v1872_v61, %v1871_v59  ;;  %v1873_v10 = vld [vmem:[%s12939_s0 + $0x70] sm:$0xff]  ;;  %v1874_v11 = vld [vmem:[%s12939_s0 + $0x78] sm:$0xff] }
 0x792   :  { %v9999_v24 = vpop.eup %9998 }
 0x793   :  { %v10001_v25 = vpop.eup %10000  ;;  %v1647_v26 = vadd.f32 1.0, %v9999_v24  ;;  %v1995_v24 = vld [vmem:[#allocation6 + $0x100] sm:$0xff] }
 0x794   :  { %v1653_v31 = vadd.f32 1.0, %v10001_v25  ;;  %v10003_v36 = vpop.eup %10002  ;;  %v1999_v25 = vld [vmem:[#allocation6 + $0x120] sm:$0xff] }
 0x795   :  { %10006 = vrcp.f32 %v1647_v26  ;;  %v10005_v38 = vpop.eup %10004  ;;  %v1660_v56 = vadd.f32 1.0, %v10003_v36  ;;  %v11317_v26 = vpack.c.bf16 %v1999_v25, %v1995_v24  ;;  %v2008_v36 = vld [vmem:[#allocation6 + $0x168] sm:$0xff]  ;;  %v1966_v24 = vld [vmem:[#allocation6 + $0x18] sm:$0xff] }
 0x796   :  { %10008 = vrcp.f32 %v1653_v31  ;;  %v2004_v31 = vld [vmem:[#allocation6 + $0x148] sm:$0xff]  ;;  %v1970_v25 = vld [vmem:[#allocation6 + $0x38] sm:$0xff] }
 0x797   :  { %10010 = vrcp.f32 %v1660_v56  ;;  %v1860_v56 = vld [vmem:[%s12939_s0 + $0x8] sm:$0xff] }
 0x79f   :  { %v10007_v39 = vpop.eup %10006 }
 0x7a0   :  { %v10009_v46 = vpop.eup %10008  ;;  %v1667_v55 = vmul.f32 %v10007_v39, %v10005_v38  ;;  %v11321_v38 = vpack.c.bf16 %v2008_v36, %v2004_v31  ;;  %v2003_v39 = vld [vmem:[#allocation6 + $0x140] sm:$0xff]  ;;  %v8224_v31 = vpack.c.bf16 %v1874_v11, %v1873_v10  ;;  %v11408_v36 = vpack.c.bf16 %v1970_v25, %v1966_v24 }
 0x7a1   :  { %v1666_v62 = vmul.f32 %v10009_v46, %v1664_v45  ;;  %v10011_v28 = vpop.eup %10010  ;;  %v2007_v45 = vld [vmem:[#allocation6 + $0x160] sm:$0xff] }
 0x7a2   :  { %v11323_v46 = vpack.c.bf16 %v2007_v45, %v2003_v39 }
 0x7a3   :  { %v11255_v14 = vadd.f32 %v1667_v55, %v1666_v62  ;;  %v1859_v55 = vld [vmem:[%s12939_s0] sm:$0xff] }
 0x7a4   :  { %v8203_v62 = vpack.c.bf16 %v1860_v56, %v1859_v55 }
 0x7a5   :  { %10012 = vtanh.f32 %v11255_v14 }
 0x7af   :  { %v10013_v54 = vpop.eup %10012 }
 0x7b0   :  { %v1670_v34 = vmul.f32 %v10013_v54, %v10011_v28  ;;  %v12919_v28 = vmov 0.0|0.0   ;;  %v11334_v54 = vpack.c.bf16 %v2016_v51, %v2012_v32 }
 0x7b1   :  { %8202 = vmatprep.subr.bf16.mxu0 %v12919_v28 }
 0x7b2   :  { %v1672_v63 = vrot.slane %v1670_v34, 4  ;;  %v11337_v34 = vpack.c.bf16 %v2015_v1, %v2011_v8  ;;  %v2027_v1 = vld [vmem:[%s12901_s8] sm:$0xf] }
 0x7b3   :  { %v11450_v47 = vrot.slane %v2027_v1, %v10979_v27 }
 0x7b4   :  { %1739 = vmatmul.mubr.f32.vlgmr.msra.gmra.mrb[14].mxu0 %v1672_v63  ;;  %1810 = vmatmul.mubr.f32.vlgmr.msra.gmra.mrb[22].mxu1 %v1672_v63  ;;  %v1862_v63 = vld [vmem:[%s12939_s0 + $0x18] sm:$0xff] }
 0x7b5   :  { %8229 = vmatpush1.bf16.msra.mxu1 %v8228_v30  ;;  %2113 = vmatprep.mubr.f32.mxu1 %v12921_v0  ;;  %v1861_v30 = vld [vmem:[%s12939_s0 + $0x10] sm:$0xff] }
 0x7b6   :  { %8231 = vmatprep.subr.bf16.mxu1 %v8230_v58  ;;  %8204 = vmatpush3.bf16.msra.mxu0 %v8203_v62  ;;  %v8206_v58 = vpack.c.bf16 %v1862_v63, %v1861_v30 }
 0x7b7   :  { %8205 = vmatprep.subr.bf16.mxu0 %v12919_v28  ;;  %7609 = vmatprep.mubr.msk.f32.mxu0 %vm10593_vm1, %v12921_v0 }
 0x7b8   :  { %7444 = vmatmul.mubr.msk.f32.vlgmr.msra.gmra.mrb[24].mxu1 %vm230_vm0, %v10416_v57 }
 0x7b9   :  { %2119 = vmatprep.mubr.f32.mxu1 %v12921_v0  ;;  %8233 = vmatpush1.bf16.msra.mxu1 %v8232_v19  ;;  %v2023_v19 = vld [vmem:[#allocation6 + $0x1e0] sm:$0xff] }
 0x7ba   :  { %8235 = vmatprep.subr.bf16.mxu1 %v11277_v52  ;;  %8207 = vmatpush3.bf16.msra.mxu0 %v8206_v58 }
 0x7bb   :  { %8208 = vmatprep.subr.bf16.mxu0 %v12919_v28 }
 0x7bc   :  { %7445 = vmatmul.mubr.msk.f32.gmra.mrb[26].mxu1 %vm230_vm0, %v10417_v50 }
 0x7bd   :  { %2190 = vmatprep.mubr.f32.mxu1 %v12921_v0 }
 0x7c0   :  { %7446 = vmatmul.mubr.msk.f32.vlgmr.msra.gmra.mrb[28].mxu1 %vm230_vm0, %v10416_v57  ;;  %v11350_v57 = vpack.c.bf16 %v2023_v19, %v2019_v7  ;;  %v11429_v7 = vrot.slane %v2027_v1, %v10964_v3 }
 0x7c1   :  { %8237 = vmatpush1.bf16.msra.mxu1 %v11290_v12  ;;  %2196 = vmatprep.mubr.f32.mxu1 %v12921_v0 }
 0x7c2   :  { %8239 = vmatprep.subr.bf16.mxu1 %v11297_v44 }
 0x7c4   :  { %7447 = vmatmul.mubr.msk.f32.gmra.mrb[30].mxu1 %vm230_vm0, %v10417_v50  ;;  %v8209_v50 = vpack.c.bf16 %v1864_v33, %v1863_v40 }
 0x7c5   :  { %2267 = vmatprep.mubr.f32.mxu1 %v12921_v0  ;;  %8241 = vmatpush1.bf16.msra.mxu1 %v11299_v21 }
 0x7c6   :  { %8243 = vmatprep.subr.bf16.mxu1 %v11303_v41  ;;  %8210 = vmatpush3.bf16.msra.mxu0 %v8209_v50 }
 0x7c7   :  { %8211 = vmatprep.subr.bf16.mxu0 %v12919_v28 }
 0x7c9   :  { %8245 = vmatpush1.bf16.msra.mxu1 %v11305_v49 }
 0x7ca   :  { %8247 = vmatprep.subr.bf16.mxu1 %v11309_v60  ;;  %8213 = vmatpush3.bf16.msra.mxu0 %v8212_v13 }
 0x7cb   :  { %8214 = vmatprep.subr.bf16.mxu0 %v12919_v28 }
 0x7cd   :  { %8249 = vmatpush1.bf16.msra.mxu1 %v11311_v9 }
 0x7ce   :  { %8251 = vmatprep.subr.bf16.mxu1 %v11315_v16  ;;  %8216 = vmatpush3.bf16.msra.mxu0 %v8215_v37  ;;  %v11447_v37 = vrot.slane %v2027_v1, %v10977_v22 }
 0x7cf   :  { %8217 = vmatprep.subr.bf16.mxu0 %v12919_v28 }
 0x7d1   :  { %8253 = vmatpush1.bf16.msra.mxu1 %v11317_v26 }
 0x7d2   :  { %8255 = vmatprep.subr.bf16.mxu1 %v11321_v38  ;;  %8219 = vmatpush3.bf16.msra.mxu0 %v8218_v53 }
 0x7d3   :  { %8220 = vmatprep.subr.bf16.mxu0 %v12919_v28 }
 0x7d5   :  { %8257 = vmatpush1.bf16.msra.mxu1 %v11323_v46 }
 0x7d6   :  { %8259 = vmatprep.subr.bf16.mxu1 %v11334_v54  ;;  %8222 = vmatpush3.bf16.msra.mxu0 %v8221_v2 }
 0x7d7   :  { %8223 = vmatprep.subr.bf16.mxu0 %v12919_v28 }
 0x7d9   :  { %8261 = vmatpush1.bf16.msra.mxu1 %v11337_v34 }
 0x7da   :  { %8263 = vmatprep.subr.bf16.mxu1 %v11347_v15  ;;  %8225 = vmatpush3.bf16.msra.mxu0 %v8224_v31  ;;  %v1852_v31 = vrot.slane %v11255_v14, 6  ;;  %v1973_v14 = vld [vmem:[#allocation6 + $0x50] sm:$0xff] }
 0x7db   :  { %8267 = vmatprep.subr.bf16.mxu0 %v11408_v36 }
 0x7dd   :  { %8265 = vmatpush1.bf16.msra.mxu1 %v11350_v57 }
 0x7de   :  { %8299 = vmatprep.subr.bf16.mxu1 %v11277_v52 }
 0x7e0   :  { %2268 = vmatmul.mubr.f32.vlgmr.msra.gmra.mrb[32].mxu1 %v12921_v0 }
 0x7e1   :  { %8301 = vmatpush1.bf16.msra.mxu1 %v11290_v12  ;;  %2438 = vmatprep.mubr.f32.mxu1 %v12921_v0 }
 0x7e2   :  { %8303 = vmatprep.subr.bf16.mxu1 %v11297_v44 }
 0x7e5   :  { %8305 = vmatpush1.bf16.msra.mxu1 %v11299_v21 }
 0x7e6   :  { %8307 = vmatprep.subr.bf16.mxu1 %v11303_v41 }
 0x7e9   :  { %8309 = vmatpush1.bf16.msra.mxu1 %v11305_v49 }
 0x7ea   :  { %8311 = vmatprep.subr.bf16.mxu1 %v11309_v60 }
 0x7ed   :  { %8313 = vmatpush1.bf16.msra.mxu1 %v11311_v9 }
 0x7ee   :  { %8315 = vmatprep.subr.bf16.mxu1 %v11315_v16 }
 0x7f1   :  { %8317 = vmatpush1.bf16.msra.mxu1 %v11317_v26 }
 0x7f2   :  { %8319 = vmatprep.subr.bf16.mxu1 %v11321_v38 }
 0x7f5   :  { %8321 = vmatpush1.bf16.msra.mxu1 %v11323_v46 }
 0x7f6   :  { %8323 = vmatprep.subr.bf16.mxu1 %v11334_v54 }
 0x7f9   :  { %8325 = vmatpush1.bf16.msra.mxu1 %v11337_v34 }
 0x7fa   :  { %8327 = vmatprep.subr.bf16.mxu1 %v11347_v15 }
 0x7fd   :  { %8329 = vmatpush1.bf16.msra.mxu1 %v11350_v57 }
 0x7fe   :  { %8363 = vmatprep.subr.bf16.mxu1 %v11277_v52 }
 0x887   :  { %v1740_v39 = vpop.f32.mrb[14].mxu0  ;;  %v1811_v45 = vpop.f32.mrb[22].mxu1 }
 0x888   :  { %v1820_v55 = vrot.slane %v1740_v39, 2  ;;  %v1742_v56 = vpop.f32.mrb[15].mxu0  ;;  %v1813_v62 = vpop.f32.mrb[23].mxu1  ;;  %v1822_v23 = vrot.slane %v1811_v45, 2 }
 0x889   :  { %v1821_v32 = vrot.slane %v1742_v56, 2  ;;  %v1823_v4 = vrot.slane %v1813_v62, 2 }
 0x88a   :  { %v1828_v51 = vadd.f32 %v1820_v55, %v10973_v18  ;;  %v11432_v18 = vrot.slane %v2027_v1, %v10969_v6  ;;  %v1830_v29 = vadd.f32 %v1822_v23, %v10983_v35  ;;  %v1977_v23 = vld [vmem:[#allocation6 + $0x70] sm:$0xff] }
 0x88b   :  { %v1829_v8 = vadd.f32 %v1821_v32, %v10975_v20  ;;  %v11424_v30 = vpop.f32.mrb[24].mxu1  ;;  %v1831_v33 = vadd.f32 %v1823_v4, %v10985_v42 }
 0x88c   :  { %v7440_v63 = vmul.f32 -1.442695, %v1828_v51  ;;  %v11426_v58 = vpop.f32.mrb[25].mxu1  ;;  %v1965_v51 = vld [vmem:[#allocation6 + $0x10] sm:$0xff] }
 0x88d   :  { %v7441_v5 = vmul.f32 -1.442695, %v1829_v8  ;;  %v7442_v17 = vmul.f32 -1.442695, %v1831_v33  ;;  %v1969_v8 = vld [vmem:[#allocation6 + $0x30] sm:$0xff] }
 0x88e   :  { %10014 = vpow2.f32 %v7440_v63  ;;  %v1974_v63 = vld [vmem:[#allocation6 + $0x58] sm:$0xff] }
 0x88f   :  { %10016 = vpow2.f32 %v7441_v5  ;;  %v2121_v20 = vpop.f32.mrb[26].mxu1  ;;  %v1978_v5 = vld [vmem:[#allocation6 + $0x78] sm:$0xff] }
 0x890   :  { %v11435_v19 = vadd.f32 %v2121_v20, %v11429_v7  ;;  %v2123_v40 = vpop.f32.mrb[27].mxu1  ;;  %10018 = vpow2.f32 %v7442_v17  ;;  %v11459_v20 = vpack.c.bf16 %v1969_v8, %v1965_v51  ;;  %v11461_v33 = vpack.c.bf16 %v1978_v5, %v1974_v63  ;;  %v1982_v17 = vld [vmem:[#allocation6 + $0x98] sm:$0xff]  ;;  %v2005_v5 = vld [vmem:[#allocation6 + $0x150] sm:$0xff] }
 0x891   :  { %v11439_v50 = vadd.f32 %v2123_v40, %v11432_v18  ;;  %10020 = vtanh.f32 %v1830_v29  ;;  %v1986_v29 = vld [vmem:[#allocation6 + $0xb8] sm:$0xff] }
 0x892   :  { %v2006_v51 = vld [vmem:[#allocation6 + $0x158] sm:$0xff] }
 0x893   :  { %v11441_v43 = vpop.f32.mrb[28].mxu1  ;;  %v2010_v8 = vld [vmem:[#allocation6 + $0x178] sm:$0xff] }
 0x894   :  { %v11443_v13 = vpop.f32.mrb[29].mxu1  ;;  %v11486_v63 = vpack.c.bf16 %v2010_v8, %v2006_v51 }
 0x897   :  { %v2198_v48 = vpop.f32.mrb[30].mxu1 }
 0x898   :  { %v10015_v53 = vpop.eup %10014  ;;  %v11453_v42 = vadd.f32 %v2198_v48, %v11447_v37  ;;  %v2200_v59 = vpop.f32.mrb[31].mxu1  ;;  %v11464_v48 = vpack.c.bf16 %v1977_v23, %v1973_v14  ;;  %v2018_v14 = vld [vmem:[#allocation6 + $0x1b8] sm:$0xff] }
 0x899   :  { %v10017_v61 = vpop.eup %10016  ;;  %v1835_v2 = vadd.f32 1.0, %v10015_v53  ;;  %v11456_v10 = vadd.f32 %v2200_v59, %v11450_v47  ;;  %v11468_v53 = vpack.c.bf16 %v1986_v29, %v1982_v17  ;;  %v1981_v59 = vld [vmem:[#allocation6 + $0x90] sm:$0xff] }
 0x89a   :  { %v1841_v35 = vadd.f32 1.0, %v10017_v61  ;;  %v10019_v11 = vpop.eup %10018  ;;  %v1985_v61 = vld [vmem:[#allocation6 + $0xb0] sm:$0xff] }
 0x89b   :  { %10022 = vrcp.f32 %v1835_v2  ;;  %v10021_v24 = vpop.eup %10020  ;;  %v1848_v55 = vadd.f32 1.0, %v10019_v11  ;;  %v1990_v2 = vld [vmem:[#allocation6 + $0xd8] sm:$0xff]  ;;  %v11471_v11 = vpack.c.bf16 %v1985_v61, %v1981_v59  ;;  %v2013_v29 = vld [vmem:[#allocation6 + $0x190] sm:$0xff] }
 0x89c   :  { %10024 = vrcp.f32 %v1841_v35  ;;  %v1994_v35 = vld [vmem:[#allocation6 + $0xf8] sm:$0xff]  ;;  %v2017_v59 = vld [vmem:[#allocation6 + $0x1b0] sm:$0xff] }
 0x89d   :  { %10026 = vrcp.f32 %v1848_v55  ;;  %v2022_v61 = vld [vmem:[#allocation6 + $0x1d8] sm:$0xff] }
 0x8a5   :  { %v10023_v25 = vpop.eup %10022 }
 0x8a6   :  { %v10025_v39 = vpop.eup %10024  ;;  %v1855_v45 = vmul.f32 %v10023_v25, %v10021_v24  ;;  %v11474_v24 = vpack.c.bf16 %v1994_v35, %v1990_v2  ;;  %v1989_v25 = vld [vmem:[#allocation6 + $0xd0] sm:$0xff]  ;;  %v2026_v2 = vld [vmem:[#allocation6 + $0x1f8] sm:$0xff]  ;;  %v11495_v35 = vpack.c.bf16 %v2017_v59, %v2013_v29 }
 0x8a7   :  { %v1854_v56 = vmul.f32 %v10025_v39, %v1852_v31  ;;  %v10027_v32 = vpop.eup %10026  ;;  %v1993_v31 = vld [vmem:[#allocation6 + $0xf0] sm:$0xff]  ;;  %v1998_v39 = vld [vmem:[#allocation6 + $0x118] sm:$0xff] }
 0x8a8   :  { %v11477_v55 = vpack.c.bf16 %v1993_v31, %v1989_v25  ;;  %v11498_v25 = vpack.c.bf16 %v2026_v2, %v2022_v61  ;;  %v2021_v31 = vld [vmem:[#allocation6 + $0x1d0] sm:$0xff] }
 0x8a9   :  { %v1856_v62 = vadd.f32 %v1855_v45, %v1854_v56  ;;  %v2002_v45 = vld [vmem:[#allocation6 + $0x138] sm:$0xff] }
 0x8aa   :  { %v11480_v56 = vpack.c.bf16 %v2002_v45, %v1998_v39  ;;  %v2025_v39 = vld [vmem:[#allocation6 + $0x1f0] sm:$0xff] }
 0x8ab   :  { %10028 = vtanh.f32 %v1856_v62  ;;  %v1997_v62 = vld [vmem:[#allocation6 + $0x110] sm:$0xff]  ;;  %v11501_v45 = vpack.c.bf16 %v2025_v39, %v2021_v31 }
 0x8b5   :  { %v10029_v1 = vpop.eup %10028 }
 0x8b6   :  { %v1858_v4 = vmul.f32 %v10029_v1, %v10027_v32  ;;  %v2001_v32 = vld [vmem:[#allocation6 + $0x130] sm:$0xff] }
 0x8b7   :  { %v11483_v1 = vpack.c.bf16 %v2001_v32, %v1997_v62  ;;  %v2269_v62 = vpop.f32.mrb[32].mxu1 }
 0x8b8   :  { %v1883_v40 = vrot.slane %v1858_v4, 6  ;;  %v2009_v4 = vld [vmem:[#allocation6 + $0x170] sm:$0xff]  ;;  %v2271_v32 = vpop.f32.mrb[33].mxu1 }
 0x8b9   :  { %v11489_v23 = vpack.c.bf16 %v2009_v4, %v2005_v5  ;;  %v11528_v5 = vadd.f32 %v11426_v58, %v11432_v18  ;;  %v11532_v4 = vadd.f32 %v11424_v30, %v11429_v7  ;;  %v11538_v58 = vadd.f32 %v11441_v43, %v11447_v37 }
 0x8ba   :  { %7610 = vmatmul.mubr.f32.vlgmr.msra.gmra.mrb[16].mxu0 %v1883_v40  ;;  %v2014_v40 = vld [vmem:[#allocation6 + $0x198] sm:$0xff]  ;;  %v11542_v30 = vadd.f32 %v11443_v13, %v11450_v47 }
 0x8bb   :  { %8269 = vmatpush1.bf16.msra.mxu0 %v11459_v20  ;;  %2338 = vmatprep.mubr.f32.mxu0 %v12921_v0  ;;  %v11492_v17 = vpack.c.bf16 %v2018_v14, %v2014_v40  ;;  %v2346_v40 = vadd.f32 %v2271_v32, %v11528_v5  ;;  %v2345_v14 = vadd.f32 %v2269_v62, %v11532_v4 }
 0x8bc   :  { %8271 = vmatprep.subr.bf16.mxu0 %v11461_v33 }
 0x8bd   :  { %v7449_v29 = vmul.f32 -1.442695, %v2346_v40  ;;  %v7448_v59 = vmul.f32 -1.442695, %v2345_v14 }
 0x8bf   :  { %8273 = vmatpush1.bf16.msra.mxu0 %v11464_v48  ;;  %10030 = vpow2.f32 %v7449_v29 }
 0x8c0   :  { %8275 = vmatprep.subr.bf16.mxu0 %v11468_v53  ;;  %10032 = vpow2.f32 %v7448_v59 }
 0x8c3   :  { %8277 = vmatpush1.bf16.msra.mxu0 %v11471_v11 }
 0x8c4   :  { %8279 = vmatprep.subr.bf16.mxu0 %v11474_v24 }
 0x8c7   :  { %8281 = vmatpush1.bf16.msra.mxu0 %v11477_v55 }
 0x8c8   :  { %8283 = vmatprep.subr.bf16.mxu0 %v11480_v56 }
 0x8c9   :  { %v10031_v61 = vpop.eup %10030 }
 0x8ca   :  { %v10033_v2 = vpop.eup %10032  ;;  %v2358_v31 = vadd.f32 1.0, %v10031_v61 }
 0x8cb   :  { %8285 = vmatpush1.bf16.msra.mxu0 %v11483_v1  ;;  %v2352_v39 = vadd.f32 1.0, %v10033_v2 }
 0x8cc   :  { %8287 = vmatprep.subr.bf16.mxu0 %v11486_v63  ;;  %10034 = vrcp.f32 %v2358_v31 }
 0x8cd   :  { %10036 = vrcp.f32 %v2352_v39 }
 0x8cf   :  { %8289 = vmatpush1.bf16.msra.mxu0 %v11489_v23 }
 0x8d0   :  { %8291 = vmatprep.subr.bf16.mxu0 %v11492_v17 }
 0x8d3   :  { %8293 = vmatpush1.bf16.msra.mxu0 %v11495_v35 }
 0x8d4   :  { %8295 = vmatprep.subr.bf16.mxu0 %v11498_v25 }
 0x8d6   :  { %v10035_v40 = vpop.eup %10034 }
 0x8d7   :  { %8297 = vmatpush1.bf16.msra.mxu0 %v11501_v45  ;;  %v10037_v14 = vpop.eup %10036  ;;  %v2368_v43 = vmul.f32 0.0, %v10035_v40 }
 0x8d8   :  { %8331 = vmatprep.subr.bf16.mxu0 %v11408_v36 }
 0x8da   :  { %2339 = vmatmul.mubr.f32.vlgmr.msra.gmra.mrb[18].mxu0 %v12921_v0 }
 0x8db   :  { %8333 = vmatpush1.bf16.msra.mxu0 %v11459_v20  ;;  %2509 = vmatprep.mubr.f32.mxu0 %v12921_v0 }
 0x8dc   :  { %8335 = vmatprep.subr.bf16.mxu0 %v11461_v33 }
 0x8df   :  { %8337 = vmatpush1.bf16.msra.mxu0 %v11464_v48 }
 0x8e0   :  { %8339 = vmatprep.subr.bf16.mxu0 %v11468_v53 }
 0x8e3   :  { %8341 = vmatpush1.bf16.msra.mxu0 %v11471_v11 }
 0x8e4   :  { %8343 = vmatprep.subr.bf16.mxu0 %v11474_v24 }
 0x8e7   :  { %8345 = vmatpush1.bf16.msra.mxu0 %v11477_v55 }
 0x8e8   :  { %8347 = vmatprep.subr.bf16.mxu0 %v11480_v56 }
 0x8eb   :  { %8349 = vmatpush1.bf16.msra.mxu0 %v11483_v1 }
 0x8ec   :  { %8351 = vmatprep.subr.bf16.mxu0 %v11486_v63 }
 0x8ef   :  { %8353 = vmatpush1.bf16.msra.mxu0 %v11489_v23 }
 0x8f0   :  { %8355 = vmatprep.subr.bf16.mxu0 %v11492_v17 }
 0x8f3   :  { %8357 = vmatpush1.bf16.msra.mxu0 %v11495_v35 }
 0x8f4   :  { %8359 = vmatprep.subr.bf16.mxu0 %v11498_v25 }
 0x8f7   :  { %8361 = vmatpush1.bf16.msra.mxu0 %v11501_v45 }
 0x8f8   :  { %8395 = vmatprep.subr.bf16.mxu0 %v11408_v36 }
 0x98d   :  { %v11524_v51 = vpop.f32.mrb[16].mxu0 }
 0x98e   :  { %12940 = vst [vmem:[#allocation23_spill] sm:$0xff] %v11524_v51  ;;  %v7611_v8 = vpop.f32.mrb[17].mxu0 }
 0x9ad   :  { %v2340_v7 = vpop.f32.mrb[18].mxu0 }
 0x9ae   :  { %v2347_v18 = vadd.f32 %v2340_v7, %v11538_v58  ;;  %v2342_v62 = vpop.f32.mrb[19].mxu0 }
 0x9af   :  { %v2348_v32 = vadd.f32 %v2342_v62, %v11542_v30 }
 0x9b0   :  { %10038 = vtanh.f32 %v2347_v18 }
 0x9b1   :  { %v7450_v8 = vmul.f32 -1.442695, %v2348_v32 }
 0x9b3   :  { %10040 = vpow2.f32 %v7450_v8 }
 0x9ba   :  { %v10039_v29 = vpop.eup %10038 }
 0x9bb   :  { %v2369_v37 = vmul.f32 %v10039_v29, %v10037_v14 }
 0x9bd   :  { %v10041_v59 = vpop.eup %10040  ;;  %v11546_v61 = vadd.f32 %v2369_v37, %v2368_v43 }
 0x9be   :  { %v2365_v13 = vadd.f32 1.0, %v10041_v59 }
 0x9bf   :  { %10042 = vtanh.f32 %v11546_v61 }
 0x9c0   :  { %10044 = vrcp.f32 %v2365_v13 }
 0x9c9   :  { %v10043_v47 = vpop.eup %10042 }
 0x9ca   :  { %v10045_v2 = vpop.eup %10044 }
 0x9cb   :  { %v2372_v31 = vmul.f32 %v10045_v2, %v10043_v47 }
 0x9cd   :  { %2373 = vst [vmem:[#allocation2] sm:$0x3] %v2372_v31  ;;  %2439 = vmatmul.mubr.f32.vlgmr.msra.gmra.mrb[34].mxu1 %v2372_v31  ;;  %2510 = vmatmul.mubr.f32.vlgmr.msra.gmra.mrb[20].mxu0 %v2372_v31 }
 0x9ce   :  { %8365 = vmatpush1.bf16.msra.mxu1 %v11290_v12  ;;  %8397 = vmatpush1.bf16.msra.mxu0 %v11459_v20 }
 0x9cf   :  { %8367 = vmatprep.subr.bf16.mxu1 %v11297_v44  ;;  %8399 = vmatprep.subr.bf16.mxu0 %v11461_v33 }
 0x9d0   :  { %2627 = vmatprep.mubr.f32.mxu1 %v12921_v0  ;;  %2698 = vmatprep.mubr.f32.mxu0 %v12921_v0 }
 0x9d2   :  { %8369 = vmatpush1.bf16.msra.mxu1 %v11299_v21  ;;  %8401 = vmatpush1.bf16.msra.mxu0 %v11464_v48 }
 0x9d3   :  { %8371 = vmatprep.subr.bf16.mxu1 %v11303_v41  ;;  %8403 = vmatprep.subr.bf16.mxu0 %v11468_v53 }
 0x9d6   :  { %8373 = vmatpush1.bf16.msra.mxu1 %v11305_v49  ;;  %8405 = vmatpush1.bf16.msra.mxu0 %v11471_v11 }
 0x9d7   :  { %8375 = vmatprep.subr.bf16.mxu1 %v11309_v60  ;;  %8407 = vmatprep.subr.bf16.mxu0 %v11474_v24 }
 0x9da   :  { %8377 = vmatpush1.bf16.msra.mxu1 %v11311_v9  ;;  %8409 = vmatpush1.bf16.msra.mxu0 %v11477_v55 }
 0x9db   :  { %8379 = vmatprep.subr.bf16.mxu1 %v11315_v16  ;;  %8411 = vmatprep.subr.bf16.mxu0 %v11480_v56 }
 0x9de   :  { %8381 = vmatpush1.bf16.msra.mxu1 %v11317_v26  ;;  %8413 = vmatpush1.bf16.msra.mxu0 %v11483_v1 }
 0x9df   :  { %8383 = vmatprep.subr.bf16.mxu1 %v11321_v38  ;;  %8415 = vmatprep.subr.bf16.mxu0 %v11486_v63 }
 0x9e2   :  { %8385 = vmatpush1.bf16.msra.mxu1 %v11323_v46  ;;  %8417 = vmatpush1.bf16.msra.mxu0 %v11489_v23 }
 0x9e3   :  { %8387 = vmatprep.subr.bf16.mxu1 %v11334_v54  ;;  %8419 = vmatprep.subr.bf16.mxu0 %v11492_v17 }
 0x9e6   :  { %8389 = vmatpush1.bf16.msra.mxu1 %v11337_v34  ;;  %8421 = vmatpush1.bf16.msra.mxu0 %v11495_v35 }
 0x9e7   :  { %8391 = vmatprep.subr.bf16.mxu1 %v11347_v15  ;;  %8423 = vmatprep.subr.bf16.mxu0 %v11498_v25 }
 0x9ea   :  { %8393 = vmatpush1.bf16.msra.mxu1 %v11350_v57  ;;  %8425 = vmatpush1.bf16.msra.mxu0 %v11501_v45 }
 0x9eb   :  { %8427 = vmatprep.subr.bf16.mxu1 %v11277_v52  ;;  %8459 = vmatprep.subr.bf16.mxu0 %v11408_v36 }
 0xaa0   :  { %v2440_v39 = vpop.f32.mrb[34].mxu1  ;;  %v2511_v7 = vpop.f32.mrb[20].mxu0 }
 0xaa1   :  { %v2520_v18 = vrot.slane %v2440_v39, 6  ;;  %v2442_v62 = vpop.f32.mrb[35].mxu1  ;;  %v2513_v32 = vpop.f32.mrb[21].mxu0  ;;  %v2522_v13 = vrot.slane %v2511_v7, 6 }
 0xaa2   :  { %v2521_v8 = vrot.slane %v2442_v62, 6  ;;  %v2523_v37 = vrot.slane %v2513_v32, 6  ;;  %v2552_v32 = vrot.slane %v11546_v61, 6 }
 0xaa3   :  { %v2528_v40 = vadd.f32 %v2520_v18, %v11532_v4  ;;  %v2530_v2 = vadd.f32 %v2522_v13, %v11538_v58 }
 0xaa4   :  { %v2529_v14 = vadd.f32 %v2521_v8, %v11528_v5  ;;  %v2531_v59 = vadd.f32 %v2523_v37, %v11542_v30 }
 0xaa5   :  { %v7451_v29 = vmul.f32 -1.442695, %v2528_v40 }
 0xaa6   :  { %v7452_v43 = vmul.f32 -1.442695, %v2529_v14  ;;  %v7453_v47 = vmul.f32 -1.442695, %v2531_v59 }
 0xaa7   :  { %10046 = vpow2.f32 %v7451_v29 }
 0xaa8   :  { %10048 = vpow2.f32 %v7452_v43 }
 0xaa9   :  { %10050 = vpow2.f32 %v7453_v47 }
 0xaaa   :  { %10052 = vtanh.f32 %v2530_v2 }
 0xab1   :  { %v10047_v31 = vpop.eup %10046 }
 0xab2   :  { %v10049_v39 = vpop.eup %10048  ;;  %v2535_v28 = vadd.f32 1.0, %v10047_v31 }
 0xab3   :  { %v2541_v62 = vadd.f32 1.0, %v10049_v39  ;;  %v10051_v18 = vpop.eup %10050 }
 0xab4   :  { %10054 = vrcp.f32 %v2535_v28  ;;  %v10053_v8 = vpop.eup %10052  ;;  %v2548_v43 = vadd.f32 1.0, %v10051_v18 }
 0xab5   :  { %10056 = vrcp.f32 %v2541_v62 }
 0xab6   :  { %10058 = vrcp.f32 %v2548_v43 }
 0xabe   :  { %v10055_v40 = vpop.eup %10054 }
 0xabf   :  { %v10057_v14 = vpop.eup %10056  ;;  %v2555_v29 = vmul.f32 %v10055_v40, %v10053_v8 }
 0xac0   :  { %v2554_v7 = vmul.f32 %v10057_v14, %v2552_v32  ;;  %v10059_v59 = vpop.eup %10058 }
 0xac2   :  { %v11588_v37 = vadd.f32 %v2555_v29, %v2554_v7 }
 0xac4   :  { %10060 = vtanh.f32 %v11588_v37 }
 0xace   :  { %v10061_v13 = vpop.eup %10060 }
 0xacf   :  { %v2558_v47 = vmul.f32 %v10061_v13, %v10059_v59 }
 0xad1   :  { %2559 = vst [vmem:[#allocation2] sm:$0xc] %v2558_v47  ;;  %v2561_v28 = vrot.slane %v2558_v47, 2 }
 0xad3   :  { %2628 = vmatmul.mubr.f32.vlgmr.msra.gmra.mrb[36].mxu1 %v2561_v28  ;;  %2699 = vmatmul.mubr.f32.vlgmr.msra.gmra.mrb[22].mxu0 %v2561_v28 }
 0xad4   :  { %8429 = vmatpush1.bf16.msra.mxu1 %v11290_v12  ;;  %8461 = vmatpush1.bf16.msra.mxu0 %v11459_v20 }
 0xad5   :  { %8431 = vmatprep.subr.bf16.mxu1 %v11297_v44  ;;  %8463 = vmatprep.subr.bf16.mxu0 %v11461_v33 }
 0xad6   :  { %2816 = vmatprep.mubr.f32.mxu1 %v12921_v0  ;;  %2887 = vmatprep.mubr.f32.mxu0 %v12921_v0 }
 0xad8   :  { %8433 = vmatpush1.bf16.msra.mxu1 %v11299_v21  ;;  %8465 = vmatpush1.bf16.msra.mxu0 %v11464_v48 }
 0xad9   :  { %8435 = vmatprep.subr.bf16.mxu1 %v11303_v41  ;;  %8467 = vmatprep.subr.bf16.mxu0 %v11468_v53 }
 0xadc   :  { %8437 = vmatpush1.bf16.msra.mxu1 %v11305_v49  ;;  %8469 = vmatpush1.bf16.msra.mxu0 %v11471_v11 }
 0xadd   :  { %8439 = vmatprep.subr.bf16.mxu1 %v11309_v60  ;;  %8471 = vmatprep.subr.bf16.mxu0 %v11474_v24 }
 0xae0   :  { %8441 = vmatpush1.bf16.msra.mxu1 %v11311_v9  ;;  %8473 = vmatpush1.bf16.msra.mxu0 %v11477_v55 }
 0xae1   :  { %8443 = vmatprep.subr.bf16.mxu1 %v11315_v16  ;;  %8475 = vmatprep.subr.bf16.mxu0 %v11480_v56 }
 0xae4   :  { %8445 = vmatpush1.bf16.msra.mxu1 %v11317_v26  ;;  %8477 = vmatpush1.bf16.msra.mxu0 %v11483_v1 }
 0xae5   :  { %8447 = vmatprep.subr.bf16.mxu1 %v11321_v38  ;;  %8479 = vmatprep.subr.bf16.mxu0 %v11486_v63 }
 0xae8   :  { %8449 = vmatpush1.bf16.msra.mxu1 %v11323_v46  ;;  %8481 = vmatpush1.bf16.msra.mxu0 %v11489_v23 }
 0xae9   :  { %8451 = vmatprep.subr.bf16.mxu1 %v11334_v54  ;;  %8483 = vmatprep.subr.bf16.mxu0 %v11492_v17 }
 0xaec   :  { %8453 = vmatpush1.bf16.msra.mxu1 %v11337_v34  ;;  %8485 = vmatpush1.bf16.msra.mxu0 %v11495_v35 }
 0xaed   :  { %8455 = vmatprep.subr.bf16.mxu1 %v11347_v15  ;;  %8487 = vmatprep.subr.bf16.mxu0 %v11498_v25 }
 0xaf0   :  { %8457 = vmatpush1.bf16.msra.mxu1 %v11350_v57  ;;  %8489 = vmatpush1.bf16.msra.mxu0 %v11501_v45 }
 0xaf1   :  { %8491 = vmatprep.subr.bf16.mxu1 %v11277_v52  ;;  %8523 = vmatprep.subr.bf16.mxu0 %v11408_v36 }
 0xba6   :  { %v2629_v61 = vpop.f32.mrb[36].mxu1  ;;  %v2700_v2 = vpop.f32.mrb[22].mxu0 }
 0xba7   :  { %v2709_v31 = vrot.slane %v2629_v61, 4  ;;  %v2631_v39 = vpop.f32.mrb[37].mxu1  ;;  %v2702_v62 = vpop.f32.mrb[23].mxu0  ;;  %v2711_v7 = vrot.slane %v2700_v2, 4 }
 0xba8   :  { %v2710_v18 = vrot.slane %v2631_v39, 4  ;;  %v2712_v29 = vrot.slane %v2702_v62, 4  ;;  %v2741_v62 = vrot.slane %v11588_v37, 6 }
 0xba9   :  { %v2717_v8 = vadd.f32 %v2709_v31, %v11532_v4  ;;  %v2719_v13 = vadd.f32 %v2711_v7, %v11538_v58 }
 0xbaa   :  { %v2718_v40 = vadd.f32 %v2710_v18, %v11528_v5  ;;  %v2720_v43 = vadd.f32 %v2712_v29, %v11542_v30 }
 0xbab   :  { %v7454_v32 = vmul.f32 -1.442695, %v2717_v8 }
 0xbac   :  { %v7455_v14 = vmul.f32 -1.442695, %v2718_v40  ;;  %v7456_v59 = vmul.f32 -1.442695, %v2720_v43 }
 0xbad   :  { %10062 = vpow2.f32 %v7454_v32 }
 0xbae   :  { %10064 = vpow2.f32 %v7455_v14 }
 0xbaf   :  { %10066 = vpow2.f32 %v7456_v59 }
 0xbb0   :  { %10068 = vtanh.f32 %v2719_v13 }
 0xbb7   :  { %v10063_v47 = vpop.eup %10062 }
 0xbb8   :  { %v10065_v28 = vpop.eup %10064  ;;  %v2724_v61 = vadd.f32 1.0, %v10063_v47 }
 0xbb9   :  { %v2730_v39 = vadd.f32 1.0, %v10065_v28  ;;  %v10067_v31 = vpop.eup %10066 }
 0xbba   :  { %10070 = vrcp.f32 %v2724_v61  ;;  %v10069_v18 = vpop.eup %10068  ;;  %v2737_v14 = vadd.f32 1.0, %v10067_v31 }
 0xbbb   :  { %10072 = vrcp.f32 %v2730_v39 }
 0xbbc   :  { %10074 = vrcp.f32 %v2737_v14 }
 0xbc4   :  { %v10071_v8 = vpop.eup %10070 }
 0xbc5   :  { %v10073_v40 = vpop.eup %10072  ;;  %v2744_v32 = vmul.f32 %v10071_v8, %v10069_v18 }
 0xbc6   :  { %v2743_v2 = vmul.f32 %v10073_v40, %v2741_v62  ;;  %v10075_v43 = vpop.eup %10074 }
 0xbc8   :  { %v11630_v29 = vadd.f32 %v2744_v32, %v2743_v2 }
 0xbca   :  { %10076 = vtanh.f32 %v11630_v29 }
 0xbd4   :  { %v10077_v7 = vpop.eup %10076 }
 0xbd5   :  { %v2747_v59 = vmul.f32 %v10077_v7, %v10075_v43 }
 0xbd7   :  { %2748 = vst [vmem:[#allocation2] sm:$0x30] %v2747_v59  ;;  %v2750_v13 = vrot.slane %v2747_v59, 4 }
 0xbd9   :  { %2817 = vmatmul.mubr.f32.vlgmr.msra.gmra.mrb[38].mxu1 %v2750_v13  ;;  %2888 = vmatmul.mubr.f32.vlgmr.msra.gmra.mrb[24].mxu0 %v2750_v13 }
 0xbda   :  { %8493 = vmatpush1.bf16.msra.mxu1 %v11290_v12  ;;  %8525 = vmatpush1.bf16.msra.mxu0 %v11459_v20 }
 0xbdb   :  { %8495 = vmatprep.subr.bf16.mxu1 %v11297_v44  ;;  %8527 = vmatprep.subr.bf16.mxu0 %v11461_v33 }
 0xbdc   :  { %3005 = vmatprep.mubr.f32.mxu1 %v12921_v0  ;;  %3076 = vmatprep.mubr.f32.mxu0 %v12921_v0 }
 0xbde   :  { %8497 = vmatpush1.bf16.msra.mxu1 %v11299_v21  ;;  %8529 = vmatpush1.bf16.msra.mxu0 %v11464_v48 }
 0xbdf   :  { %8499 = vmatprep.subr.bf16.mxu1 %v11303_v41  ;;  %8531 = vmatprep.subr.bf16.mxu0 %v11468_v53 }
 0xbe2   :  { %8501 = vmatpush1.bf16.msra.mxu1 %v11305_v49  ;;  %8533 = vmatpush1.bf16.msra.mxu0 %v11471_v11 }
 0xbe3   :  { %8503 = vmatprep.subr.bf16.mxu1 %v11309_v60  ;;  %8535 = vmatprep.subr.bf16.mxu0 %v11474_v24 }
 0xbe6   :  { %8505 = vmatpush1.bf16.msra.mxu1 %v11311_v9  ;;  %8537 = vmatpush1.bf16.msra.mxu0 %v11477_v55 }
 0xbe7   :  { %8507 = vmatprep.subr.bf16.mxu1 %v11315_v16  ;;  %8539 = vmatprep.subr.bf16.mxu0 %v11480_v56 }
 0xbea   :  { %8509 = vmatpush1.bf16.msra.mxu1 %v11317_v26  ;;  %8541 = vmatpush1.bf16.msra.mxu0 %v11483_v1 }
 0xbeb   :  { %8511 = vmatprep.subr.bf16.mxu1 %v11321_v38  ;;  %8543 = vmatprep.subr.bf16.mxu0 %v11486_v63 }
 0xbee   :  { %8513 = vmatpush1.bf16.msra.mxu1 %v11323_v46  ;;  %8545 = vmatpush1.bf16.msra.mxu0 %v11489_v23 }
 0xbef   :  { %8515 = vmatprep.subr.bf16.mxu1 %v11334_v54  ;;  %8547 = vmatprep.subr.bf16.mxu0 %v11492_v17 }
 0xbf2   :  { %8517 = vmatpush1.bf16.msra.mxu1 %v11337_v34  ;;  %8549 = vmatpush1.bf16.msra.mxu0 %v11495_v35 }
 0xbf3   :  { %8519 = vmatprep.subr.bf16.mxu1 %v11347_v15  ;;  %8551 = vmatprep.subr.bf16.mxu0 %v11498_v25 }
 0xbf6   :  { %8521 = vmatpush1.bf16.msra.mxu1 %v11350_v57  ;;  %8553 = vmatpush1.bf16.msra.mxu0 %v11501_v45 }
 0xbf7   :  { %8555 = vmatprep.subr.bf16.mxu1 %v11277_v52  ;;  %8587 = vmatprep.subr.bf16.mxu0 %v11408_v36 }
 0xcac   :  { %v2818_v37 = vpop.f32.mrb[38].mxu1  ;;  %v2889_v47 = vpop.f32.mrb[24].mxu0 }
 0xcad   :  { %v2898_v28 = vrot.slane %v2818_v37, 2  ;;  %v2820_v61 = vpop.f32.mrb[39].mxu1  ;;  %v2891_v39 = vpop.f32.mrb[25].mxu0  ;;  %v2900_v2 = vrot.slane %v2889_v47, 2 }
 0xcae   :  { %v2899_v31 = vrot.slane %v2820_v61, 2  ;;  %v2901_v32 = vrot.slane %v2891_v39, 2  ;;  %v2930_v39 = vrot.slane %v11630_v29, 6 }
 0xcaf   :  { %v2906_v18 = vadd.f32 %v2898_v28, %v11532_v4  ;;  %v2908_v7 = vadd.f32 %v2900_v2, %v11538_v58 }
 0xcb0   :  { %v2907_v8 = vadd.f32 %v2899_v31, %v11528_v5  ;;  %v2909_v14 = vadd.f32 %v2901_v32, %v11542_v30 }
 0xcb1   :  { %v7457_v62 = vmul.f32 -1.442695, %v2906_v18 }
 0xcb2   :  { %v7458_v40 = vmul.f32 -1.442695, %v2907_v8  ;;  %v7459_v43 = vmul.f32 -1.442695, %v2909_v14 }
 0xcb3   :  { %10078 = vpow2.f32 %v7457_v62 }
 0xcb4   :  { %10080 = vpow2.f32 %v7458_v40 }
 0xcb5   :  { %10082 = vpow2.f32 %v7459_v43 }
 0xcb6   :  { %10084 = vtanh.f32 %v2908_v7 }
 0xcbd   :  { %v10079_v59 = vpop.eup %10078 }
 0xcbe   :  { %v10081_v13 = vpop.eup %10080  ;;  %v2913_v37 = vadd.f32 1.0, %v10079_v59 }
 0xcbf   :  { %v2919_v61 = vadd.f32 1.0, %v10081_v13  ;;  %v10083_v5 = vpop.eup %10082 }
 0xcc0   :  { %10086 = vrcp.f32 %v2913_v37  ;;  %v10085_v4 = vpop.eup %10084  ;;  %v2926_v30 = vadd.f32 1.0, %v10083_v5 }
 0xcc1   :  { %10088 = vrcp.f32 %v2919_v61 }
 0xcc2   :  { %10090 = vrcp.f32 %v2926_v30 }
 0xcca   :  { %v10087_v28 = vpop.eup %10086 }
 0xccb   :  { %v10089_v31 = vpop.eup %10088  ;;  %v2933_v18 = vmul.f32 %v10087_v28, %v10085_v4 }
 0xccc   :  { %v2932_v47 = vmul.f32 %v10089_v31, %v2930_v39  ;;  %v10091_v58 = vpop.eup %10090 }
 0xcce   :  { %v11672_v8 = vadd.f32 %v2933_v18, %v2932_v47 }
 0xcd0   :  { %10092 = vtanh.f32 %v11672_v8 }
 0xcda   :  { %v10093_v62 = vpop.eup %10092 }
 0xcdb   :  { %v2936_v40 = vmul.f32 %v10093_v62, %v10091_v58  ;;  %v3107_v62 = vrot.slane %v11672_v8, 6 }
 0xcdd   :  { %2937 = vst [vmem:[#allocation2] sm:$0xc0] %v2936_v40  ;;  %v2939_v32 = vrot.slane %v2936_v40, 6 }
 0xcdf   :  { %3006 = vmatmul.mubr.f32.vlgmr.msra.gmra.mrb[40].mxu1 %v2939_v32  ;;  %3077 = vmatmul.mubr.f32.vlgmr.msra.gmra.mrb[26].mxu0 %v2939_v32 }
 0xce0   :  { %8557 = vmatpush1.bf16.msra.mxu1 %v11290_v12  ;;  %8589 = vmatpush1.bf16.msra.mxu0 %v11459_v20 }
 0xce1   :  { %8559 = vmatprep.subr.bf16.mxu1 %v11297_v44  ;;  %8591 = vmatprep.subr.bf16.mxu0 %v11461_v33 }
 0xce2   :  { %3179 = vmatprep.mubr.f32.mxu1 %v12921_v0  ;;  %3250 = vmatprep.mubr.f32.mxu0 %v12921_v0 }
 0xce4   :  { %8561 = vmatpush1.bf16.msra.mxu1 %v11299_v21  ;;  %8593 = vmatpush1.bf16.msra.mxu0 %v11464_v48 }
 0xce5   :  { %8563 = vmatprep.subr.bf16.mxu1 %v11303_v41  ;;  %8595 = vmatprep.subr.bf16.mxu0 %v11468_v53 }
 0xce8   :  { %8565 = vmatpush1.bf16.msra.mxu1 %v11305_v49  ;;  %8597 = vmatpush1.bf16.msra.mxu0 %v11471_v11 }
 0xce9   :  { %8567 = vmatprep.subr.bf16.mxu1 %v11309_v60  ;;  %8599 = vmatprep.subr.bf16.mxu0 %v11474_v24 }
 0xcec   :  { %8569 = vmatpush1.bf16.msra.mxu1 %v11311_v9  ;;  %8601 = vmatpush1.bf16.msra.mxu0 %v11477_v55 }
 0xced   :  { %8571 = vmatprep.subr.bf16.mxu1 %v11315_v16  ;;  %8603 = vmatprep.subr.bf16.mxu0 %v11480_v56 }
 0xcf0   :  { %8573 = vmatpush1.bf16.msra.mxu1 %v11317_v26  ;;  %8605 = vmatpush1.bf16.msra.mxu0 %v11483_v1 }
 0xcf1   :  { %8575 = vmatprep.subr.bf16.mxu1 %v11321_v38  ;;  %8607 = vmatprep.subr.bf16.mxu0 %v11486_v63 }
 0xcf4   :  { %8577 = vmatpush1.bf16.msra.mxu1 %v11323_v46  ;;  %8609 = vmatpush1.bf16.msra.mxu0 %v11489_v23 }
 0xcf5   :  { %8579 = vmatprep.subr.bf16.mxu1 %v11334_v54  ;;  %8611 = vmatprep.subr.bf16.mxu0 %v11492_v17 }
 0xcf8   :  { %8581 = vmatpush1.bf16.msra.mxu1 %v11337_v34  ;;  %8613 = vmatpush1.bf16.msra.mxu0 %v11495_v35 }
 0xcf9   :  { %8583 = vmatprep.subr.bf16.mxu1 %v11347_v15  ;;  %8615 = vmatprep.subr.bf16.mxu0 %v11498_v25 }
 0xcfc   :  { %8585 = vmatpush1.bf16.msra.mxu1 %v11350_v57  ;;  %8617 = vmatpush1.bf16.msra.mxu0 %v11501_v45 }
 0xcfd   :  { %8619 = vmatprep.subr.bf16.mxu1 %v11277_v52  ;;  %8651 = vmatprep.subr.bf16.mxu0 %v11408_v36 }
 0xdb2   :  { %v3007_v29 = vpop.f32.mrb[40].mxu1  ;;  %v3078_v14 = vpop.f32.mrb[26].mxu0 }
 0xdb3   :  { %v3083_v2 = vadd.f32 %v3007_v29, %v11435_v19  ;;  %v3009_v43 = vpop.f32.mrb[41].mxu1  ;;  %v3080_v7 = vpop.f32.mrb[27].mxu0  ;;  %v3085_v4 = vadd.f32 %v3078_v14, %v11453_v42 }
 0xdb4   :  { %v3084_v59 = vadd.f32 %v3009_v43, %v11439_v50  ;;  %v3086_v61 = vadd.f32 %v3080_v7, %v11456_v10 }
 0xdb5   :  { %v7460_v13 = vmul.f32 -1.442695, %v3083_v2 }
 0xdb6   :  { %v7461_v37 = vmul.f32 -1.442695, %v3084_v59  ;;  %v7462_v5 = vmul.f32 -1.442695, %v3086_v61 }
 0xdb7   :  { %10094 = vpow2.f32 %v7460_v13 }
 0xdb8   :  { %10096 = vpow2.f32 %v7461_v37 }
 0xdb9   :  { %10098 = vpow2.f32 %v7462_v5 }
 0xdba   :  { %10100 = vtanh.f32 %v3085_v4 }
 0xdc1   :  { %v10095_v28 = vpop.eup %10094 }
 0xdc2   :  { %v10097_v39 = vpop.eup %10096  ;;  %v3090_v31 = vadd.f32 1.0, %v10095_v28 }
 0xdc3   :  { %v3096_v18 = vadd.f32 1.0, %v10097_v39  ;;  %v10099_v30 = vpop.eup %10098 }
 0xdc4   :  { %10102 = vrcp.f32 %v3090_v31  ;;  %v10101_v47 = vpop.eup %10100  ;;  %v3103_v29 = vadd.f32 1.0, %v10099_v30 }
 0xdc5   :  { %10104 = vrcp.f32 %v3096_v18 }
 0xdc6   :  { %10106 = vrcp.f32 %v3103_v29 }
 0xdce   :  { %v10103_v58 = vpop.eup %10102 }
 0xdcf   :  { %v10105_v40 = vpop.eup %10104  ;;  %v3110_v32 = vmul.f32 %v10103_v58, %v10101_v47 }
 0xdd0   :  { %v3109_v2 = vmul.f32 %v10105_v40, %v3107_v62  ;;  %v10107_v14 = vpop.eup %10106 }
 0xdd2   :  { %v11714_v43 = vadd.f32 %v3110_v32, %v3109_v2 }
 0xdd4   :  { %10108 = vtanh.f32 %v11714_v43 }
 0xdde   :  { %v10109_v7 = vpop.eup %10108 }
 0xddf   :  { %v3113_v59 = vmul.f32 %v10109_v7, %v10107_v14 }
 0xde1   :  { %3114 = vst [vmem:[#allocation2 + $0x8] sm:$0x3] %v3113_v59  ;;  %3180 = vmatmul.mubr.f32.vlgmr.msra.gmra.mrb[42].mxu1 %v3113_v59  ;;  %3251 = vmatmul.mubr.f32.vlgmr.msra.gmra.mrb[28].mxu0 %v3113_v59  ;;  %v3293_v59 = vrot.slane %v11714_v43, 6 }
 0xde2   :  { %8621 = vmatpush1.bf16.msra.mxu1 %v11290_v12  ;;  %8653 = vmatpush1.bf16.msra.mxu0 %v11459_v20 }
 0xde3   :  { %8623 = vmatprep.subr.bf16.mxu1 %v11297_v44  ;;  %8655 = vmatprep.subr.bf16.mxu0 %v11461_v33 }
 0xde4   :  { %3368 = vmatprep.mubr.f32.mxu1 %v12921_v0  ;;  %3439 = vmatprep.mubr.f32.mxu0 %v12921_v0 }
 0xde6   :  { %8625 = vmatpush1.bf16.msra.mxu1 %v11299_v21  ;;  %8657 = vmatpush1.bf16.msra.mxu0 %v11464_v48 }
 0xde7   :  { %8627 = vmatprep.subr.bf16.mxu1 %v11303_v41  ;;  %8659 = vmatprep.subr.bf16.mxu0 %v11468_v53 }
 0xdea   :  { %8629 = vmatpush1.bf16.msra.mxu1 %v11305_v49  ;;  %8661 = vmatpush1.bf16.msra.mxu0 %v11471_v11 }
 0xdeb   :  { %8631 = vmatprep.subr.bf16.mxu1 %v11309_v60  ;;  %8663 = vmatprep.subr.bf16.mxu0 %v11474_v24 }
 0xdee   :  { %8633 = vmatpush1.bf16.msra.mxu1 %v11311_v9  ;;  %8665 = vmatpush1.bf16.msra.mxu0 %v11477_v55 }
 0xdef   :  { %8635 = vmatprep.subr.bf16.mxu1 %v11315_v16  ;;  %8667 = vmatprep.subr.bf16.mxu0 %v11480_v56 }
 0xdf2   :  { %8637 = vmatpush1.bf16.msra.mxu1 %v11317_v26  ;;  %8669 = vmatpush1.bf16.msra.mxu0 %v11483_v1 }
 0xdf3   :  { %8639 = vmatprep.subr.bf16.mxu1 %v11321_v38  ;;  %8671 = vmatprep.subr.bf16.mxu0 %v11486_v63 }
 0xdf6   :  { %8641 = vmatpush1.bf16.msra.mxu1 %v11323_v46  ;;  %8673 = vmatpush1.bf16.msra.mxu0 %v11489_v23 }
 0xdf7   :  { %8643 = vmatprep.subr.bf16.mxu1 %v11334_v54  ;;  %8675 = vmatprep.subr.bf16.mxu0 %v11492_v17 }
 0xdfa   :  { %8645 = vmatpush1.bf16.msra.mxu1 %v11337_v34  ;;  %8677 = vmatpush1.bf16.msra.mxu0 %v11495_v35 }
 0xdfb   :  { %8647 = vmatprep.subr.bf16.mxu1 %v11347_v15  ;;  %8679 = vmatprep.subr.bf16.mxu0 %v11498_v25 }
 0xdfe   :  { %8649 = vmatpush1.bf16.msra.mxu1 %v11350_v57  ;;  %8681 = vmatpush1.bf16.msra.mxu0 %v11501_v45 }
 0xdff   :  { %8683 = vmatprep.subr.bf16.mxu1 %v11277_v52  ;;  %8715 = vmatprep.subr.bf16.mxu0 %v11408_v36 }
 0xeb4   :  { %v3181_v8 = vpop.f32.mrb[42].mxu1  ;;  %v3252_v13 = vpop.f32.mrb[28].mxu0 }
 0xeb5   :  { %v3261_v37 = vrot.slane %v3181_v8, 6  ;;  %v3183_v61 = vpop.f32.mrb[43].mxu1  ;;  %v3254_v5 = vpop.f32.mrb[29].mxu0  ;;  %v3263_v52 = vrot.slane %v3252_v13, 6 }
 0xeb6   :  { %v3262_v4 = vrot.slane %v3183_v61, 6  ;;  %v3264_v30 = vrot.slane %v3254_v5, 6 }
 0xeb7   :  { %v3269_v28 = vadd.f32 %v3261_v37, %v11435_v19  ;;  %v3271_v36 = vadd.f32 %v3263_v52, %v11453_v42  ;;  %v3681_v52 = vld [vmem:[#allocation8] sm:$0xff] }
 0xeb8   :  { %v3270_v39 = vadd.f32 %v3262_v4, %v11439_v50  ;;  %v3272_v47 = vadd.f32 %v3264_v30, %v11456_v10 }
 0xeb9   :  { %v7463_v31 = vmul.f32 -1.442695, %v3269_v28 }
 0xeba   :  { %v7464_v18 = vmul.f32 -1.442695, %v3270_v39  ;;  %v7465_v58 = vmul.f32 -1.442695, %v3272_v47 }
 0xebb   :  { %10110 = vpow2.f32 %v7463_v31 }
 0xebc   :  { %10112 = vpow2.f32 %v7464_v18 }
 0xebd   :  { %10114 = vpow2.f32 %v7465_v58  ;;  %v3685_v58 = vld [vmem:[#allocation8 + $0x20] sm:$0xff] }
 0xebe   :  { %10116 = vtanh.f32 %v3271_v36 }
 0xec5   :  { %v10111_v62 = vpop.eup %10110 }
 0xec6   :  { %v10113_v40 = vpop.eup %10112  ;;  %v3276_v32 = vadd.f32 1.0, %v10111_v62  ;;  %v3683_v62 = vld [vmem:[#allocation8 + $0x10] sm:$0xff] }
 0xec7   :  { %v3282_v29 = vadd.f32 1.0, %v10113_v40  ;;  %v10115_v2 = vpop.eup %10114  ;;  %v3687_v40 = vld [vmem:[#allocation8 + $0x30] sm:$0xff] }
 0xec8   :  { %10118 = vrcp.f32 %v3276_v32  ;;  %v10117_v14 = vpop.eup %10116  ;;  %v3289_v61 = vadd.f32 1.0, %v10115_v2  ;;  %v3690_v32 = vld [vmem:[#allocation8 + $0x48] sm:$0xff] }
 0xec9   :  { %10120 = vrcp.f32 %v3282_v29  ;;  %v3694_v2 = vld [vmem:[#allocation8 + $0x68] sm:$0xff] }
 0xeca   :  { %10122 = vrcp.f32 %v3289_v61  ;;  %v3689_v61 = vld [vmem:[#allocation8 + $0x40] sm:$0xff] }
 0xed2   :  { %v10119_v7 = vpop.eup %10118 }
 0xed3   :  { %v10121_v8 = vpop.eup %10120  ;;  %v3296_v37 = vmul.f32 %v10119_v7, %v10117_v14  ;;  %v3692_v14 = vld [vmem:[#allocation8 + $0x58] sm:$0xff] }
 0xed4   :  { %v3295_v13 = vmul.f32 %v10121_v8, %v3293_v59  ;;  %v10123_v4 = vpop.eup %10122  ;;  %v3696_v7 = vld [vmem:[#allocation8 + $0x78] sm:$0xff]  ;;  %v8748_v8 = vpack.c.bf16 %v3685_v58, %v3681_v52  ;;  %v3715_v58 = vld [vmem:[#allocation8 + $0x110] sm:$0xff] }
 0xed6   :  { %v11756_v5 = vadd.f32 %v3296_v37, %v3295_v13  ;;  %v8780_v37 = vpack.c.bf16 %v3687_v40, %v3683_v62  ;;  %v3693_v13 = vld [vmem:[#allocation8 + $0x60] sm:$0xff]  ;;  %v3722_v62 = vld [vmem:[#allocation8 + $0x148] sm:$0xff] }
 0xed7   :  { %v3726_v40 = vld [vmem:[#allocation8 + $0x168] sm:$0xff] }
 0xed8   :  { %10124 = vtanh.f32 %v11756_v5 }
 0xee2   :  { %v10125_v28 = vpop.eup %10124 }
 0xee3   :  { %v3299_v39 = vmul.f32 %v10125_v28, %v10123_v4  ;;  %v8750_v4 = vpack.c.bf16 %v3694_v2, %v3690_v32  ;;  %v8782_v28 = vpack.c.bf16 %v3696_v7, %v3692_v14  ;;  %v3724_v32 = vld [vmem:[#allocation8 + $0x158] sm:$0xff]  ;;  %v3721_v7 = vld [vmem:[#allocation8 + $0x140] sm:$0xff] }
 0xee5   :  { %3300 = vst [vmem:[#allocation2 + $0x8] sm:$0xc] %v3299_v39  ;;  %v3302_v31 = vrot.slane %v3299_v39, 2  ;;  %v3691_v39 = vld [vmem:[#allocation8 + $0x50] sm:$0xff] }
 0xee7   :  { %3369 = vmatmul.mubr.f32.vlgmr.msra.gmra.mrb[44].mxu1 %v3302_v31  ;;  %3440 = vmatmul.mubr.f32.vlgmr.msra.gmra.mrb[30].mxu0 %v3302_v31  ;;  %v3695_v31 = vld [vmem:[#allocation8 + $0x70] sm:$0xff] }
 0xee8   :  { %8685 = vmatpush1.bf16.msra.mxu1 %v11290_v12  ;;  %8717 = vmatpush1.bf16.msra.mxu0 %v11459_v20  ;;  %v3682_v12 = vld [vmem:[#allocation8 + $0x8] sm:$0xff] }
 0xee9   :  { %8687 = vmatprep.subr.bf16.mxu1 %v11297_v44  ;;  %8719 = vmatprep.subr.bf16.mxu0 %v11461_v33  ;;  %v3686_v44 = vld [vmem:[#allocation8 + $0x28] sm:$0xff] }
 0xeea   :  { %3557 = vmatprep.mubr.f32.mxu1 %v12921_v0  ;;  %3628 = vmatprep.mubr.f32.mxu0 %v12921_v0 }
 0xeec   :  { %8689 = vmatpush1.bf16.msra.mxu1 %v11299_v21  ;;  %8721 = vmatpush1.bf16.msra.mxu0 %v11464_v48  ;;  %v3684_v21 = vld [vmem:[#allocation8 + $0x18] sm:$0xff] }
 0xeed   :  { %8691 = vmatprep.subr.bf16.mxu1 %v11303_v41  ;;  %8723 = vmatprep.subr.bf16.mxu0 %v11468_v53  ;;  %v8746_v41 = vpack.c.bf16 %v3686_v44, %v3682_v12  ;;  %v3698_v12 = vld [vmem:[#allocation8 + $0x88] sm:$0xff] }
 0xeee   :  { %v3702_v44 = vld [vmem:[#allocation8 + $0xa8] sm:$0xff] }
 0xef0   :  { %8693 = vmatpush1.bf16.msra.mxu1 %v11305_v49  ;;  %8725 = vmatpush1.bf16.msra.mxu0 %v11471_v11  ;;  %v3688_v49 = vld [vmem:[#allocation8 + $0x38] sm:$0xff] }
 0xef1   :  { %8695 = vmatprep.subr.bf16.mxu1 %v11309_v60  ;;  %8727 = vmatprep.subr.bf16.mxu0 %v11474_v24  ;;  %v8778_v60 = vpack.c.bf16 %v3688_v49, %v3684_v21  ;;  %v3700_v21 = vld [vmem:[#allocation8 + $0x98] sm:$0xff]  ;;  %v8752_v49 = vpack.c.bf16 %v3693_v13, %v3689_v61  ;;  %v3723_v61 = vld [vmem:[#allocation8 + $0x150] sm:$0xff] }
 0xef2   :  { %v3727_v13 = vld [vmem:[#allocation8 + $0x170] sm:$0xff] }
 0xef4   :  { %8697 = vmatpush1.bf16.msra.mxu1 %v11311_v9  ;;  %8729 = vmatpush1.bf16.msra.mxu0 %v11477_v55 }
 0xef5   :  { %8699 = vmatprep.subr.bf16.mxu1 %v11315_v16  ;;  %8731 = vmatprep.subr.bf16.mxu0 %v11480_v56 }
 0xef8   :  { %8701 = vmatpush1.bf16.msra.mxu1 %v11317_v26  ;;  %8733 = vmatpush1.bf16.msra.mxu0 %v11483_v1 }
 0xef9   :  { %8703 = vmatprep.subr.bf16.mxu1 %v11321_v38  ;;  %8735 = vmatprep.subr.bf16.mxu0 %v11486_v63 }
 0xefc   :  { %8705 = vmatpush1.bf16.msra.mxu1 %v11323_v46  ;;  %8737 = vmatpush1.bf16.msra.mxu0 %v11489_v23 }
 0xefd   :  { %8707 = vmatprep.subr.bf16.mxu1 %v11334_v54  ;;  %8739 = vmatprep.subr.bf16.mxu0 %v11492_v17 }
 0xf00   :  { %8709 = vmatpush1.bf16.msra.mxu1 %v11337_v34  ;;  %8741 = vmatpush1.bf16.msra.mxu0 %v11495_v35 }
 0xf01   :  { %8711 = vmatprep.subr.bf16.mxu1 %v11347_v15  ;;  %8743 = vmatprep.subr.bf16.mxu0 %v11498_v25  ;;  %v3482_v25 = vrot.slane %v11756_v5, 6 }
 0xf04   :  { %8713 = vmatpush1.bf16.msra.mxu1 %v11350_v57  ;;  %8745 = vmatpush1.bf16.msra.mxu0 %v11501_v45 }
 0xf05   :  { %8747 = vmatprep.subr.bf16.mxu1 %v8746_v41  ;;  %8779 = vmatprep.subr.bf16.mxu0 %v8778_v60  ;;  %v3704_v41 = vld [vmem:[#allocation8 + $0xb8] sm:$0xff]  ;;  %v8784_v60 = vpack.c.bf16 %v3695_v31, %v3691_v39 }
 0xf06   :  { %v3736_v39 = vld [vmem:[#allocation8 + $0x1b8] sm:$0xff] }
 0xfba   :  { %v3370_v9 = vpop.f32.mrb[44].mxu1  ;;  %v3441_v16 = vpop.f32.mrb[30].mxu0 }
 0xfbb   :  { %v3450_v26 = vrot.slane %v3370_v9, 4  ;;  %v3372_v38 = vpop.f32.mrb[45].mxu1  ;;  %v3443_v46 = vpop.f32.mrb[31].mxu0  ;;  %v3452_v53 = vrot.slane %v3441_v16, 4  ;;  %v3697_v9 = vld [vmem:[#allocation8 + $0x80] sm:$0xff] }
 0xfbc   :  { %v3451_v54 = vrot.slane %v3372_v38, 4  ;;  %v3453_v33 = vrot.slane %v3443_v46, 4  ;;  %v3701_v16 = vld [vmem:[#allocation8 + $0xa0] sm:$0xff]  ;;  %v8786_v38 = vpack.c.bf16 %v3704_v41, %v3700_v21  ;;  %v3699_v46 = vld [vmem:[#allocation8 + $0x90] sm:$0xff] }
 0xfbd   :  { %v3458_v34 = vadd.f32 %v3450_v26, %v11435_v19  ;;  %v3460_v24 = vadd.f32 %v3452_v53, %v11453_v42  ;;  %v8754_v26 = vpack.c.bf16 %v3702_v44, %v3698_v12  ;;  %v3705_v53 = vld [vmem:[#allocation8 + $0xc0] sm:$0xff]  ;;  %v8800_v12 = vpack.c.bf16 %v3727_v13, %v3723_v61  ;;  %v3762_v61 = vld [vmem:[#allocation9 + $0x88] sm:$0xff] }
 0xfbe   :  { %v3459_v15 = vadd.f32 %v3451_v54, %v11439_v50  ;;  %v3461_v48 = vadd.f32 %v3453_v33, %v11456_v10  ;;  %v3703_v54 = vld [vmem:[#allocation8 + $0xb0] sm:$0xff]  ;;  %v8756_v33 = vpack.c.bf16 %v3701_v16, %v3697_v9  ;;  %v3729_v44 = vld [vmem:[#allocation8 + $0x180] sm:$0xff]  ;;  %v3738_v16 = vld [vmem:[#allocation8 + $0x1c8] sm:$0xff] }
 0xfbf   :  { %v7466_v57 = vmul.f32 -1.442695, %v3458_v34  ;;  %v3706_v34 = vld [vmem:[#allocation8 + $0xc8] sm:$0xff]  ;;  %v3733_v21 = vld [vmem:[#allocation8 + $0x1a0] sm:$0xff]  ;;  %v3735_v9 = vld [vmem:[#allocation8 + $0x1b0] sm:$0xff] }
 0xfc0   :  { %v7467_v20 = vmul.f32 -1.442695, %v3459_v15  ;;  %v7468_v11 = vmul.f32 -1.442695, %v3461_v48  ;;  %v3710_v15 = vld [vmem:[#allocation8 + $0xe8] sm:$0xff]  ;;  %v8788_v48 = vpack.c.bf16 %v3703_v54, %v3699_v46  ;;  %v3744_v46 = vld [vmem:[#allocation8 + $0x1f8] sm:$0xff]  ;;  %v8772_v54 = vpack.c.bf16 %v3733_v21, %v3729_v44 }
 0xfc1   :  { %10126 = vpow2.f32 %v7466_v57  ;;  %v3708_v57 = vld [vmem:[#allocation8 + $0xd8] sm:$0xff]  ;;  %v3766_v13 = vld [vmem:[#allocation9 + $0xa8] sm:$0xff]  ;;  %v3763_v21 = vld [vmem:[#allocation9 + $0x90] sm:$0xff] }
 0xfc2   :  { %10128 = vpow2.f32 %v7467_v20  ;;  %v3712_v20 = vld [vmem:[#allocation8 + $0xf8] sm:$0xff] }
 0xfc3   :  { %10130 = vpow2.f32 %v7468_v11  ;;  %v3709_v11 = vld [vmem:[#allocation8 + $0xe0] sm:$0xff] }
 0xfc4   :  { %10132 = vtanh.f32 %v3460_v24  ;;  %v8758_v24 = vpack.c.bf16 %v3710_v15, %v3706_v34  ;;  %v3737_v15 = vld [vmem:[#allocation8 + $0x1c0] sm:$0xff] }
 0xfcb   :  { %v10127_v55 = vpop.eup %10126 }
 0xfcc   :  { %v10129_v56 = vpop.eup %10128  ;;  %v3465_v1 = vadd.f32 1.0, %v10127_v55  ;;  %v8790_v55 = vpack.c.bf16 %v3712_v20, %v3708_v57 }
 0xfcd   :  { %v3471_v63 = vadd.f32 1.0, %v10129_v56  ;;  %v10131_v23 = vpop.eup %10130  ;;  %v3707_v56 = vld [vmem:[#allocation8 + $0xd0] sm:$0xff] }
 0xfce   :  { %10134 = vrcp.f32 %v3465_v1  ;;  %v10133_v17 = vpop.eup %10132  ;;  %v3478_v18 = vadd.f32 1.0, %v10131_v23  ;;  %v3711_v1 = vld [vmem:[#allocation8 + $0xf0] sm:$0xff]  ;;  %v3718_v23 = vld [vmem:[#allocation8 + $0x128] sm:$0xff] }
 0xfcf   :  { %10136 = vrcp.f32 %v3471_v63  ;;  %v3714_v63 = vld [vmem:[#allocation8 + $0x108] sm:$0xff] }
 0xfd0   :  { %10138 = vrcp.f32 %v3478_v18  ;;  %v3717_v18 = vld [vmem:[#allocation8 + $0x120] sm:$0xff] }
 0xfd8   :  { %v10135_v35 = vpop.eup %10134 }
 0xfd9   :  { %v10137_v45 = vpop.eup %10136  ;;  %v3485_v43 = vmul.f32 %v10135_v35, %v10133_v17  ;;  %v3716_v17 = vld [vmem:[#allocation8 + $0x118] sm:$0xff] }
 0xfda   :  { %v3484_v30 = vmul.f32 %v10137_v45, %v3482_v25  ;;  %v10139_v36 = vpop.eup %10138  ;;  %v3720_v35 = vld [vmem:[#allocation8 + $0x138] sm:$0xff]  ;;  %v8760_v25 = vpack.c.bf16 %v3709_v11, %v3705_v53  ;;  %v8792_v45 = vpack.c.bf16 %v3711_v1, %v3707_v56  ;;  %v3743_v53 = vld [vmem:[#allocation8 + $0x1f0] sm:$0xff]  ;;  %v3746_v56 = vld [vmem:[#allocation9 + $0x8] sm:$0xff] }
 0xfdb   :  { %v8794_v52 = vpack.c.bf16 %v3720_v35, %v3716_v17  ;;  %v3750_v1 = vld [vmem:[#allocation9 + $0x28] sm:$0xff]  ;;  %v3752_v17 = vld [vmem:[#allocation9 + $0x38] sm:$0xff]  ;;  %v3745_v35 = vld [vmem:[#allocation9] sm:$0xff] }
 0xfdc   :  { %v11796_v47 = vadd.f32 %v3485_v43, %v3484_v30  ;;  %v3713_v43 = vld [vmem:[#allocation8 + $0x100] sm:$0xff]  ;;  %v8762_v30 = vpack.c.bf16 %v3718_v23, %v3714_v63  ;;  %v3748_v63 = vld [vmem:[#allocation9 + $0x18] sm:$0xff]  ;;  %v11803_v23 = vpack.c.bf16 %v3750_v1, %v3746_v56 }
 0xfdd   :  { %v8764_v2 = vpack.c.bf16 %v3717_v18, %v3713_v43  ;;  %v3747_v18 = vld [vmem:[#allocation9 + $0x10] sm:$0xff]  ;;  %v3777_v56 = vld [vmem:[#allocation9 + $0x100] sm:$0xff] }
 0xfde   :  { %10140 = vtanh.f32 %v11796_v47  ;;  %v3781_v1 = vld [vmem:[#allocation9 + $0x120] sm:$0xff] }
 0xfe8   :  { %v10141_v29 = vpop.eup %10140 }
 0xfe9   :  { %v3488_v59 = vmul.f32 %v10141_v29, %v10139_v36  ;;  %v3719_v36 = vld [vmem:[#allocation8 + $0x130] sm:$0xff]  ;;  %v3728_v29 = vld [vmem:[#allocation8 + $0x178] sm:$0xff] }
 0xfea   :  { %v8796_v14 = vpack.c.bf16 %v3719_v36, %v3715_v58  ;;  %v3754_v58 = vld [vmem:[#allocation9 + $0x48] sm:$0xff] }
 0xfeb   :  { %3489 = vst [vmem:[#allocation2 + $0x8] sm:$0x30] %v3488_v59  ;;  %v3491_v5 = vrot.slane %v3488_v59, 4  ;;  %v3725_v59 = vld [vmem:[#allocation8 + $0x160] sm:$0xff]  ;;  %v3758_v36 = vld [vmem:[#allocation9 + $0x68] sm:$0xff] }
 0xfec   :  { %v8768_v31 = vpack.c.bf16 %v3725_v59, %v3721_v7  ;;  %v3755_v59 = vld [vmem:[#allocation9 + $0x50] sm:$0xff] }
 0xfed   :  { %3558 = vmatmul.mubr.f32.vlgmr.msra.gmra.mrb[46].mxu1 %v3491_v5  ;;  %3629 = vmatmul.mubr.f32.vlgmr.msra.gmra.mrb[32].mxu0 %v3491_v5  ;;  %v3730_v5 = vld [vmem:[#allocation8 + $0x188] sm:$0xff] }
 0xfee   :  { %8749 = vmatpush1.bf16.msra.mxu1 %v8748_v8  ;;  %8781 = vmatpush1.bf16.msra.mxu0 %v8780_v37  ;;  %v8766_v8 = vpack.c.bf16 %v3726_v40, %v3722_v62  ;;  %v8798_v37 = vpack.c.bf16 %v3728_v29, %v3724_v32  ;;  %v3756_v62 = vld [vmem:[#allocation9 + $0x58] sm:$0xff]  ;;  %v11815_v40 = vpack.c.bf16 %v3758_v36, %v3754_v58  ;;  %v3753_v29 = vld [vmem:[#allocation9 + $0x40] sm:$0xff]  ;;  %v3790_v58 = vld [vmem:[#allocation9 + $0x168] sm:$0xff] }
 0xfef   :  { %8751 = vmatprep.subr.bf16.mxu1 %v8750_v4  ;;  %8783 = vmatprep.subr.bf16.mxu0 %v8782_v28  ;;  %v3734_v4 = vld [vmem:[#allocation8 + $0x1a8] sm:$0xff]  ;;  %v3732_v28 = vld [vmem:[#allocation8 + $0x198] sm:$0xff] }
 0xff0   :  { %3895 = vmatprep.mubr.f32.mxu1 %v12921_v0  ;;  %3972 = vmatprep.mubr.f32.mxu0 %v12921_v0  ;;  %v8770_v41 = vpack.c.bf16 %v3734_v4, %v3730_v5  ;;  %v3760_v32 = vld [vmem:[#allocation9 + $0x78] sm:$0xff]  ;;  %v11827_v4 = vpack.c.bf16 %v3766_v13, %v3762_v61  ;;  %v3787_v61 = vld [vmem:[#allocation9 + $0x150] sm:$0xff] }
 0xff1   :  { %v3764_v5 = vld [vmem:[#allocation9 + $0x98] sm:$0xff]  ;;  %v3791_v13 = vld [vmem:[#allocation9 + $0x170] sm:$0xff] }
 0xff2   :  { %8753 = vmatpush1.bf16.msra.mxu1 %v8752_v49  ;;  %8785 = vmatpush1.bf16.msra.mxu0 %v8784_v60  ;;  %v8802_v49 = vpack.c.bf16 %v3736_v39, %v3732_v28  ;;  %v3731_v60 = vld [vmem:[#allocation8 + $0x190] sm:$0xff]  ;;  %v3768_v28 = vld [vmem:[#allocation9 + $0xb8] sm:$0xff]  ;;  %v3761_v39 = vld [vmem:[#allocation9 + $0x80] sm:$0xff] }
 0xff3   :  { %8755 = vmatprep.subr.bf16.mxu1 %v8754_v26  ;;  %8787 = vmatprep.subr.bf16.mxu0 %v8786_v38  ;;  %v3742_v26 = vld [vmem:[#allocation8 + $0x1e8] sm:$0xff]  ;;  %v3740_v38 = vld [vmem:[#allocation8 + $0x1d8] sm:$0xff]  ;;  %v8804_v34 = vpack.c.bf16 %v3735_v9, %v3731_v60 }
 0xff4   :  { %v8774_v57 = vpack.c.bf16 %v3742_v26, %v3738_v16  ;;  %v8806_v20 = vpack.c.bf16 %v3744_v46, %v3740_v38  ;;  %v3770_v60 = vld [vmem:[#allocation9 + $0xc8] sm:$0xff]  ;;  %v3772_v16 = vld [vmem:[#allocation9 + $0xd8] sm:$0xff]  ;;  %v3769_v46 = vld [vmem:[#allocation9 + $0xc0] sm:$0xff] }
 0xff5   :  { %v3774_v9 = vld [vmem:[#allocation9 + $0xe8] sm:$0xff]  ;;  %v3776_v38 = vld [vmem:[#allocation9 + $0xf8] sm:$0xff] }
 0xff6   :  { %8757 = vmatpush1.bf16.msra.mxu1 %v8756_v33  ;;  %8789 = vmatpush1.bf16.msra.mxu0 %v8788_v48  ;;  %v3741_v33 = vld [vmem:[#allocation8 + $0x1e0] sm:$0xff]  ;;  %v3739_v48 = vld [vmem:[#allocation8 + $0x1d0] sm:$0xff]  ;;  %v11839_v26 = vpack.c.bf16 %v3774_v9, %v3770_v60  ;;  %v3788_v36 = vld [vmem:[#allocation9 + $0x158] sm:$0xff] }
 0xff7   :  { %8759 = vmatprep.subr.bf16.mxu1 %v8758_v24  ;;  %8791 = vmatprep.subr.bf16.mxu0 %v8790_v55  ;;  %v8776_v11 = vpack.c.bf16 %v3741_v33, %v3737_v15  ;;  %v8808_v24 = vpack.c.bf16 %v3743_v53, %v3739_v48  ;;  %v3679_v55 = vld [vmem:[#allocation2] sm:$0xff]  ;;  %v3778_v48 = vld [vmem:[#allocation9 + $0x108] sm:$0xff]  ;;  %v3793_v9 = vld [vmem:[#allocation9 + $0x180] sm:$0xff] }
 0xff8   :  { %v3782_v53 = vld [vmem:[#allocation9 + $0x128] sm:$0xff] }
 0xffa   :  { %8761 = vmatpush1.bf16.msra.mxu1 %v8760_v25  ;;  %8793 = vmatpush1.bf16.msra.mxu0 %v8792_v45  ;;  %v3749_v25 = vld [vmem:[#allocation9 + $0x20] sm:$0xff]  ;;  %v11805_v45 = vpack.c.bf16 %v3752_v17, %v3748_v63  ;;  %v11855_v17 = vpack.c.bf16 %v3781_v1, %v3777_v56 }
 0xffb   :  { %8763 = vmatprep.subr.bf16.mxu1 %v8762_v30  ;;  %8795 = vmatprep.subr.bf16.mxu0 %v8794_v52  ;;  %v11807_v43 = vpack.c.bf16 %v3749_v25, %v3745_v35  ;;  %v3751_v30 = vld [vmem:[#allocation9 + $0x30] sm:$0xff]  ;;  %v3801_v56 = vld [vmem:[#allocation9 + $0x1c0] sm:$0xff] }
 0xffc   :  { %v11810_v52 = vpack.c.bf16 %v3751_v30, %v3747_v18  ;;  %v3779_v35 = vld [vmem:[#allocation9 + $0x110] sm:$0xff]  ;;  %v3786_v30 = vld [vmem:[#allocation9 + $0x148] sm:$0xff]  ;;  %v3805_v1 = vld [vmem:[#allocation9 + $0x1e0] sm:$0xff] }
 0xffd   :  { %v3783_v25 = vld [vmem:[#allocation9 + $0x130] sm:$0xff] }
 0xffe   :  { %8765 = vmatpush1.bf16.msra.mxu1 %v8764_v2  ;;  %8797 = vmatpush1.bf16.msra.mxu0 %v8796_v14  ;;  %v3757_v2 = vld [vmem:[#allocation9 + $0x60] sm:$0xff]  ;;  %v11817_v14 = vpack.c.bf16 %v3760_v32, %v3756_v62  ;;  %v11858_v18 = vpack.c.bf16 %v3783_v25, %v3779_v35  ;;  %v11863_v62 = vpack.c.bf16 %v3790_v58, %v3786_v30  ;;  %v3792_v32 = vld [vmem:[#allocation9 + $0x178] sm:$0xff]  ;;  %v3803_v30 = vld [vmem:[#allocation9 + $0x1d0] sm:$0xff] }
 0xfff   :  { %8767 = vmatprep.subr.bf16.mxu1 %v8766_v8  ;;  %8799 = vmatprep.subr.bf16.mxu0 %v8798_v37  ;;  %v11819_v7 = vpack.c.bf16 %v3757_v2, %v3753_v29  ;;  %v3759_v8 = vld [vmem:[#allocation9 + $0x70] sm:$0xff]  ;;  %v3785_v29 = vld [vmem:[#allocation9 + $0x140] sm:$0xff]  ;;  %v11891_v25 = vpack.c.bf16 %v3805_v1, %v3801_v56 }
0x1000   :  { %v11822_v37 = vpack.c.bf16 %v3759_v8, %v3755_v59  ;;  %v3789_v2 = vld [vmem:[#allocation9 + $0x160] sm:$0xff]  ;;  %v11865_v59 = vpack.c.bf16 %v3792_v32, %v3788_v36  ;;  %v3807_v58 = vld [vmem:[#allocation9 + $0x1f0] sm:$0xff] }
0x1001   :  { %v11867_v8 = vpack.c.bf16 %v3789_v2, %v3785_v29  ;;  %v11894_v36 = vpack.c.bf16 %v3807_v58, %v3803_v30  ;;  %v3671_v58 = vrot.slane %v11796_v47, 6  ;;  %v3809_v47 = vld [vmem:[%s12904_s11] sm:$0xf] }
0x1002   :  { %8769 = vmatpush1.bf16.msra.mxu1 %v8768_v31  ;;  %8801 = vmatpush1.bf16.msra.mxu0 %v8800_v12  ;;  %v3765_v31 = vld [vmem:[#allocation9 + $0xa0] sm:$0xff]  ;;  %v11829_v12 = vpack.c.bf16 %v3768_v28, %v3764_v5  ;;  %v3794_v5 = vld [vmem:[#allocation9 + $0x188] sm:$0xff]  ;;  %v11870_v28 = vpack.c.bf16 %v3791_v13, %v3787_v61 }
0x1003   :  { %8771 = vmatprep.subr.bf16.mxu1 %v8770_v41  ;;  %8803 = vmatprep.subr.bf16.mxu0 %v8802_v49  ;;  %v11831_v44 = vpack.c.bf16 %v3765_v31, %v3761_v39  ;;  %v3767_v41 = vld [vmem:[#allocation9 + $0xb0] sm:$0xff]  ;;  %v3798_v39 = vld [vmem:[#allocation9 + $0x1a8] sm:$0xff]  ;;  %v3796_v31 = vld [vmem:[#allocation9 + $0x198] sm:$0xff] }
0x1004   :  { %v11834_v49 = vpack.c.bf16 %v3767_v41, %v3763_v21  ;;  %v3800_v21 = vld [vmem:[#allocation9 + $0x1b8] sm:$0xff]  ;;  %v11874_v41 = vpack.c.bf16 %v3798_v39, %v3794_v5 }
0x1005   :  { %v11876_v60 = vpack.c.bf16 %v3800_v21, %v3796_v31 }
0x1006   :  { %8773 = vmatpush1.bf16.msra.mxu1 %v8772_v54  ;;  %8805 = vmatpush1.bf16.msra.mxu0 %v8804_v34  ;;  %v3773_v54 = vld [vmem:[#allocation9 + $0xe0] sm:$0xff]  ;;  %v11841_v34 = vpack.c.bf16 %v3776_v38, %v3772_v16  ;;  %v3795_v38 = vld [vmem:[#allocation9 + $0x190] sm:$0xff] }
0x1007   :  { %8775 = vmatprep.subr.bf16.mxu1 %v8774_v57  ;;  %8807 = vmatprep.subr.bf16.mxu0 %v8806_v20  ;;  %v11843_v15 = vpack.c.bf16 %v3773_v54, %v3769_v46  ;;  %v3771_v57 = vld [vmem:[#allocation9 + $0xd0] sm:$0xff]  ;;  %v3797_v16 = vld [vmem:[#allocation9 + $0x1a0] sm:$0xff] }
0x1008   :  { %v3775_v20 = vld [vmem:[#allocation9 + $0xf0] sm:$0xff]  ;;  %v11879_v46 = vpack.c.bf16 %v3797_v16, %v3793_v9 }
0x1009   :  { %v11846_v33 = vpack.c.bf16 %v3775_v20, %v3771_v57  ;;  %v3799_v54 = vld [vmem:[#allocation9 + $0x1b0] sm:$0xff]  ;;  %v3802_v20 = vld [vmem:[#allocation9 + $0x1c8] sm:$0xff] }
0x100a   :  { %8777 = vmatpush1.bf16.msra.mxu1 %v8776_v11  ;;  %8809 = vmatpush1.bf16.msra.mxu0 %v8808_v24  ;;  %v3780_v11 = vld [vmem:[#allocation9 + $0x118] sm:$0xff]  ;;  %v11851_v24 = vpack.c.bf16 %v3782_v53, %v3778_v48  ;;  %v11883_v57 = vpack.c.bf16 %v3799_v54, %v3795_v38  ;;  %v3806_v48 = vld [vmem:[#allocation9 + $0x1e8] sm:$0xff] }
0x100b   :  { %8811 = vmatprep.subr.bf16.mxu1 %v11803_v23  ;;  %8843 = vmatprep.subr.bf16.mxu0 %v11805_v45  ;;  %v3804_v53 = vld [vmem:[#allocation9 + $0x1d8] sm:$0xff] }
0x100d   :  { %3896 = vmatmul.mubr.f32.vlgmr.msra.gmra.mrb[48].mxu1 %v3679_v55  ;;  %3973 = vmatmul.mubr.f32.vlgmr.msra.gmra.mrb[34].mxu0 %v3679_v55  ;;  %v3784_v55 = vld [vmem:[#allocation9 + $0x138] sm:$0xff] }
0x100e   :  { %3901 = vmatprep.mubr.f32.mxu1 %v12921_v0  ;;  %3978 = vmatprep.mubr.f32.mxu0 %v12921_v0  ;;  %v11853_v63 = vpack.c.bf16 %v3784_v55, %v3780_v11  ;;  %v11887_v11 = vpack.c.bf16 %v3806_v48, %v3802_v20  ;;  %v3808_v55 = vld [vmem:[#allocation9 + $0x1f8] sm:$0xff] }
0x100f   :  { %8813 = vmatpush1.bf16.msra.mxu1 %v11807_v43  ;;  %8845 = vmatpush1.bf16.msra.mxu0 %v11810_v52  ;;  %v11889_v35 = vpack.c.bf16 %v3808_v55, %v3804_v53 }
0x1010   :  { %8815 = vmatprep.subr.bf16.mxu1 %v11815_v40  ;;  %8847 = vmatprep.subr.bf16.mxu0 %v11817_v14 }
0x1013   :  { %8817 = vmatpush1.bf16.msra.mxu1 %v11819_v7  ;;  %8849 = vmatpush1.bf16.msra.mxu0 %v11822_v37 }
0x1014   :  { %8819 = vmatprep.subr.bf16.mxu1 %v11827_v4  ;;  %8851 = vmatprep.subr.bf16.mxu0 %v11829_v12 }
0x1017   :  { %8821 = vmatpush1.bf16.msra.mxu1 %v11831_v44  ;;  %8853 = vmatpush1.bf16.msra.mxu0 %v11834_v49 }
0x1018   :  { %8823 = vmatprep.subr.bf16.mxu1 %v11839_v26  ;;  %8855 = vmatprep.subr.bf16.mxu0 %v11841_v34 }
0x101b   :  { %8825 = vmatpush1.bf16.msra.mxu1 %v11843_v15  ;;  %8857 = vmatpush1.bf16.msra.mxu0 %v11846_v33 }
0x101c   :  { %8827 = vmatprep.subr.bf16.mxu1 %v11851_v24  ;;  %8859 = vmatprep.subr.bf16.mxu0 %v11853_v63 }
0x101f   :  { %8829 = vmatpush1.bf16.msra.mxu1 %v11855_v17  ;;  %8861 = vmatpush1.bf16.msra.mxu0 %v11858_v18 }
0x1020   :  { %8831 = vmatprep.subr.bf16.mxu1 %v11863_v62  ;;  %8863 = vmatprep.subr.bf16.mxu0 %v11865_v59 }
0x1023   :  { %8833 = vmatpush1.bf16.msra.mxu1 %v11867_v8  ;;  %8865 = vmatpush1.bf16.msra.mxu0 %v11870_v28 }
0x1024   :  { %8835 = vmatprep.subr.bf16.mxu1 %v11874_v41  ;;  %8867 = vmatprep.subr.bf16.mxu0 %v11876_v60 }
0x1027   :  { %8837 = vmatpush1.bf16.msra.mxu1 %v11879_v46  ;;  %8869 = vmatpush1.bf16.msra.mxu0 %v11883_v57 }
0x1028   :  { %8839 = vmatprep.subr.bf16.mxu1 %v11887_v11  ;;  %8871 = vmatprep.subr.bf16.mxu0 %v11889_v35 }
0x102b   :  { %8841 = vmatpush1.bf16.msra.mxu1 %v11891_v25  ;;  %8873 = vmatpush1.bf16.msra.mxu0 %v11894_v36 }
0x102c   :  { %8875 = vmatprep.subr.bf16.mxu1 %v11803_v23  ;;  %8907 = vmatprep.subr.bf16.mxu0 %v11805_v45 }
0x10c0   :  { %v3559_v32 = vpop.f32.mrb[46].mxu1  ;;  %v3630_v29 = vpop.f32.mrb[32].mxu0 }
0x10c1   :  { %v3639_v2 = vrot.slane %v3559_v32, 2  ;;  %v3561_v61 = vpop.f32.mrb[47].mxu1  ;;  %v3632_v13 = vpop.f32.mrb[33].mxu0  ;;  %v3641_v54 = vrot.slane %v3630_v29, 2 }
0x10c2   :  { %v3640_v5 = vrot.slane %v3561_v61, 2  ;;  %v3642_v16 = vrot.slane %v3632_v13, 2 }
0x10c3   :  { %v3647_v39 = vadd.f32 %v3639_v2, %v11435_v19  ;;  %v3649_v48 = vadd.f32 %v3641_v54, %v11453_v42  ;;  %v11955_v54 = vrot.slane %v3809_v47, %v10969_v6 }
0x10c4   :  { %v3648_v31 = vadd.f32 %v3640_v5, %v11439_v50  ;;  %v3650_v38 = vadd.f32 %v3642_v16, %v11456_v10 }
0x10c5   :  { %v7469_v21 = vmul.f32 -1.442695, %v3647_v39 }
0x10c6   :  { %v7470_v9 = vmul.f32 -1.442695, %v3648_v31  ;;  %v7471_v20 = vmul.f32 -1.442695, %v3650_v38  ;;  %v11952_v38 = vrot.slane %v3809_v47, %v10964_v3 }
0x10c7   :  { %10142 = vpow2.f32 %v7469_v21 }
0x10c8   :  { %10144 = vpow2.f32 %v7470_v9 }
0x10c9   :  { %10146 = vpow2.f32 %v7471_v20 }
0x10ca   :  { %10148 = vtanh.f32 %v3649_v48 }
0x10d1   :  { %v10143_v53 = vpop.eup %10142 }
0x10d2   :  { %v10145_v55 = vpop.eup %10144  ;;  %v3654_v56 = vadd.f32 1.0, %v10143_v53 }
0x10d3   :  { %v3660_v1 = vadd.f32 1.0, %v10145_v55  ;;  %v10147_v19 = vpop.eup %10146 }
0x10d4   :  { %10150 = vrcp.f32 %v3654_v56  ;;  %v10149_v50 = vpop.eup %10148  ;;  %v3667_v10 = vadd.f32 1.0, %v10147_v19 }
0x10d5   :  { %10152 = vrcp.f32 %v3660_v1 }
0x10d6   :  { %10154 = vrcp.f32 %v3667_v10 }
0x10de   :  { %v10151_v30 = vpop.eup %10150 }
0x10df   :  { %v10153_v32 = vpop.eup %10152  ;;  %v3674_v2 = vmul.f32 %v10151_v30, %v10149_v50 }
0x10e0   :  { %v3673_v29 = vmul.f32 %v10153_v32, %v3671_v58  ;;  %v3897_v61 = vpop.f32.mrb[48].mxu1  ;;  %v11906_v13 = vpop.f32.mrb[34].mxu0 }
0x10e1   :  { %v3899_v42 = vpop.f32.mrb[49].mxu1  ;;  %v11908_v5 = vpop.f32.mrb[35].mxu0  ;;  %v11966_v56 = vadd.f32 %v3897_v61, %v11952_v38 }
0x10e2   :  { %v3675_v39 = vadd.f32 %v3674_v2, %v3673_v29  ;;  %v10155_v31 = vpop.eup %10154  ;;  %v11969_v1 = vadd.f32 %v3899_v42, %v11955_v54  ;;  %v11973_v2 = vrot.slane %v3809_v47, %v10979_v27  ;;  %v11981_v42 = vrot.slane %v3809_v47, %v10977_v22 }
0x10e4   :  { %10156 = vtanh.f32 %v3675_v39  ;;  %v11978_v61 = vadd.f32 %v11908_v5, %v11973_v2 }
0x10ee   :  { %v10157_v21 = vpop.eup %10156 }
0x10ef   :  { %v3677_v9 = vmul.f32 %v10157_v21, %v10155_v31  ;;  %v11986_v21 = vadd.f32 %v11906_v13, %v11981_v42 }
0x10f1   :  { %3678 = vst [vmem:[#allocation2 + $0x8] sm:$0xc0] %v3677_v9 }
0x10f8   :  { %v3680_v16 = vld [vmem:[#allocation2 + $0x8] sm:$0xff] }
0x10f9   :  { %3902 = vmatmul.mubr.f32.gmra.mrb[50].mxu1 %v3680_v16  ;;  %3979 = vmatmul.mubr.f32.gmra.mrb[36].mxu0 %v3680_v16 }
0x10fa   :  { %4049 = vmatprep.mubr.f32.mxu1 %v12921_v0  ;;  %4120 = vmatprep.mubr.f32.mxu0 %v12921_v0 }
0x10fd   :  { %4050 = vmatmul.mubr.f32.vlgmr.msra.gmra.mrb[52].mxu1 %v12921_v0  ;;  %4121 = vmatmul.mubr.f32.vlgmr.msra.gmra.mrb[38].mxu0 %v12921_v0 }
0x10fe   :  { %8877 = vmatpush1.bf16.msra.mxu1 %v11807_v43  ;;  %8909 = vmatpush1.bf16.msra.mxu0 %v11810_v52 }
0x10ff   :  { %8879 = vmatprep.subr.bf16.mxu1 %v11815_v40  ;;  %8911 = vmatprep.subr.bf16.mxu0 %v11817_v14 }
0x1100   :  { %4219 = vmatprep.mubr.f32.mxu1 %v12921_v0  ;;  %4290 = vmatprep.mubr.f32.mxu0 %v12921_v0 }
0x1102   :  { %8881 = vmatpush1.bf16.msra.mxu1 %v11819_v7  ;;  %8913 = vmatpush1.bf16.msra.mxu0 %v11822_v37 }
0x1103   :  { %8883 = vmatprep.subr.bf16.mxu1 %v11827_v4  ;;  %8915 = vmatprep.subr.bf16.mxu0 %v11829_v12 }
0x1106   :  { %8885 = vmatpush1.bf16.msra.mxu1 %v11831_v44  ;;  %8917 = vmatpush1.bf16.msra.mxu0 %v11834_v49 }
0x1107   :  { %8887 = vmatprep.subr.bf16.mxu1 %v11839_v26  ;;  %8919 = vmatprep.subr.bf16.mxu0 %v11841_v34 }
0x110a   :  { %8889 = vmatpush1.bf16.msra.mxu1 %v11843_v15  ;;  %8921 = vmatpush1.bf16.msra.mxu0 %v11846_v33 }
0x110b   :  { %8891 = vmatprep.subr.bf16.mxu1 %v11851_v24  ;;  %8923 = vmatprep.subr.bf16.mxu0 %v11853_v63 }
0x110e   :  { %8893 = vmatpush1.bf16.msra.mxu1 %v11855_v17  ;;  %8925 = vmatpush1.bf16.msra.mxu0 %v11858_v18 }
0x110f   :  { %8895 = vmatprep.subr.bf16.mxu1 %v11863_v62  ;;  %8927 = vmatprep.subr.bf16.mxu0 %v11865_v59 }
0x1112   :  { %8897 = vmatpush1.bf16.msra.mxu1 %v11867_v8  ;;  %8929 = vmatpush1.bf16.msra.mxu0 %v11870_v28 }
0x1113   :  { %8899 = vmatprep.subr.bf16.mxu1 %v11874_v41  ;;  %8931 = vmatprep.subr.bf16.mxu0 %v11876_v60 }
0x1116   :  { %8901 = vmatpush1.bf16.msra.mxu1 %v11879_v46  ;;  %8933 = vmatpush1.bf16.msra.mxu0 %v11883_v57 }
0x1117   :  { %8903 = vmatprep.subr.bf16.mxu1 %v11887_v11  ;;  %8935 = vmatprep.subr.bf16.mxu0 %v11889_v35 }
0x111a   :  { %8905 = vmatpush1.bf16.msra.mxu1 %v11891_v25  ;;  %8937 = vmatpush1.bf16.msra.mxu0 %v11894_v36 }
0x111b   :  { %8939 = vmatprep.subr.bf16.mxu1 %v11803_v23  ;;  %8971 = vmatprep.subr.bf16.mxu0 %v11805_v45 }
0x11cc   :  { %v11957_v20 = vpop.f32.mrb[50].mxu1  ;;  %v11959_v48 = vpop.f32.mrb[36].mxu0 }
0x11cd   :  { %v11961_v53 = vpop.f32.mrb[51].mxu1  ;;  %v11963_v55 = vpop.f32.mrb[37].mxu0 }
0x11d0   :  { %v4051_v19 = vpop.f32.mrb[52].mxu1  ;;  %v4122_v50 = vpop.f32.mrb[38].mxu0 }
0x11d1   :  { %v4127_v30 = vadd.f32 %v4051_v19, %v11966_v56  ;;  %v4053_v58 = vpop.f32.mrb[53].mxu1  ;;  %v4124_v32 = vpop.f32.mrb[39].mxu0  ;;  %v4129_v16 = vadd.f32 %v4122_v50, %v11986_v21 }
0x11d2   :  { %v4128_v10 = vadd.f32 %v4053_v58, %v11969_v1  ;;  %v4130_v31 = vadd.f32 %v4124_v32, %v11978_v61 }
0x11d3   :  { %v7472_v29 = vmul.f32 -1.442695, %v4127_v30 }
0x11d4   :  { %v7473_v39 = vmul.f32 -1.442695, %v4128_v10  ;;  %v7474_v9 = vmul.f32 -1.442695, %v4130_v31 }
0x11d5   :  { %10158 = vpow2.f32 %v7472_v29 }
0x11d6   :  { %10160 = vpow2.f32 %v7473_v39 }
0x11d7   :  { %10162 = vpow2.f32 %v7474_v9  ;;  %v12941_v9 = vmov 0.0  }
0x11d8   :  { %10164 = vtanh.f32 %v4129_v16 }
0x11df   :  { %v10159_v19 = vpop.eup %10158 }
0x11e0   :  { %v10161_v30 = vpop.eup %10160  ;;  %v4134_v58 = vadd.f32 1.0, %v10159_v19 }
0x11e1   :  { %v4140_v5 = vadd.f32 1.0, %v10161_v30  ;;  %v10163_v10 = vpop.eup %10162 }
0x11e2   :  { %10166 = vrcp.f32 %v4134_v58  ;;  %v10165_v47 = vpop.eup %10164  ;;  %v4147_v0 = vadd.f32 1.0, %v10163_v10 }
0x11e3   :  { %10168 = vrcp.f32 %v4140_v5 }
0x11e4   :  { %10170 = vrcp.f32 %v4147_v0 }
0x11ec   :  { %v10167_v29 = vpop.eup %10166 }
0x11ed   :  { %v10169_v39 = vpop.eup %10168  ;;  %v4151_v32 = vmul.f32 %v10167_v29, %v10165_v47 }
0x11ee   :  { %v4150_v3 = vmul.f32 0.0, %v10169_v39  ;;  %v10171_v50 = vpop.eup %10170 }
0x11f0   :  { %v11989_v13 = vadd.f32 %v4151_v32, %v4150_v3 }
0x11f2   :  { %10172 = vtanh.f32 %v11989_v13 }
0x11fc   :  { %v10173_v31 = vpop.eup %10172 }
0x11fd   :  { %v4154_v19 = vmul.f32 %v10173_v31, %v10171_v50 }
0x11ff   :  { %4220 = vmatmul.mubr.f32.vlgmr.msra.gmra.mrb[54].mxu1 %v4154_v19  ;;  %4291 = vmatmul.mubr.f32.vlgmr.msra.gmra.mrb[40].mxu0 %v4154_v19 }
0x1200   :  { %8941 = vmatpush1.bf16.msra.mxu1 %v11807_v43  ;;  %8973 = vmatpush1.bf16.msra.mxu0 %v11810_v52 }
0x1201   :  { %8943 = vmatprep.subr.bf16.mxu1 %v11815_v40  ;;  %8975 = vmatprep.subr.bf16.mxu0 %v11817_v14 }
0x1202   :  { %4407 = vmatprep.mubr.f32.mxu1 %v12941_v9  ;;  %4478 = vmatprep.mubr.f32.mxu0 %v12941_v9 }
0x1204   :  { %8945 = vmatpush1.bf16.msra.mxu1 %v11819_v7  ;;  %8977 = vmatpush1.bf16.msra.mxu0 %v11822_v37 }
0x1205   :  { %8947 = vmatprep.subr.bf16.mxu1 %v11827_v4  ;;  %8979 = vmatprep.subr.bf16.mxu0 %v11829_v12 }
0x1208   :  { %8949 = vmatpush1.bf16.msra.mxu1 %v11831_v44  ;;  %8981 = vmatpush1.bf16.msra.mxu0 %v11834_v49 }
0x1209   :  { %8951 = vmatprep.subr.bf16.mxu1 %v11839_v26  ;;  %8983 = vmatprep.subr.bf16.mxu0 %v11841_v34 }
0x120c   :  { %8953 = vmatpush1.bf16.msra.mxu1 %v11843_v15  ;;  %8985 = vmatpush1.bf16.msra.mxu0 %v11846_v33 }
0x120d   :  { %8955 = vmatprep.subr.bf16.mxu1 %v11851_v24  ;;  %8987 = vmatprep.subr.bf16.mxu0 %v11853_v63 }
0x1210   :  { %8957 = vmatpush1.bf16.msra.mxu1 %v11855_v17  ;;  %8989 = vmatpush1.bf16.msra.mxu0 %v11858_v18 }
0x1211   :  { %8959 = vmatprep.subr.bf16.mxu1 %v11863_v62  ;;  %8991 = vmatprep.subr.bf16.mxu0 %v11865_v59 }
0x1214   :  { %8961 = vmatpush1.bf16.msra.mxu1 %v11867_v8  ;;  %8993 = vmatpush1.bf16.msra.mxu0 %v11870_v28 }
0x1215   :  { %8963 = vmatprep.subr.bf16.mxu1 %v11874_v41  ;;  %8995 = vmatprep.subr.bf16.mxu0 %v11876_v60 }
0x1218   :  { %8965 = vmatpush1.bf16.msra.mxu1 %v11879_v46  ;;  %8997 = vmatpush1.bf16.msra.mxu0 %v11883_v57 }
0x1219   :  { %8967 = vmatprep.subr.bf16.mxu1 %v11887_v11  ;;  %8999 = vmatprep.subr.bf16.mxu0 %v11889_v35 }
0x121c   :  { %8969 = vmatpush1.bf16.msra.mxu1 %v11891_v25  ;;  %9001 = vmatpush1.bf16.msra.mxu0 %v11894_v36 }
0x121d   :  { %9003 = vmatprep.subr.bf16.mxu1 %v11803_v23  ;;  %9035 = vmatprep.subr.bf16.mxu0 %v11805_v45 }
0x12d2   :  { %v4221_v0 = vpop.f32.mrb[54].mxu1  ;;  %v4292_v3 = vpop.f32.mrb[40].mxu0 }
0x12d3   :  { %v4301_v16 = vrot.slane %v4221_v0, 6  ;;  %v4223_v30 = vpop.f32.mrb[55].mxu1  ;;  %v4294_v58 = vpop.f32.mrb[41].mxu0  ;;  %v4303_v31 = vrot.slane %v4292_v3, 6 }
0x12d4   :  { %v4302_v5 = vrot.slane %v4223_v30, 6  ;;  %v4304_v32 = vrot.slane %v4294_v58, 6  ;;  %v4333_v58 = vrot.slane %v11989_v13, 6 }
0x12d5   :  { %v4309_v10 = vadd.f32 %v4301_v16, %v11966_v56  ;;  %v4311_v6 = vadd.f32 %v4303_v31, %v11986_v21 }
0x12d6   :  { %v4310_v47 = vadd.f32 %v4302_v5, %v11969_v1  ;;  %v4312_v50 = vadd.f32 %v4304_v32, %v11978_v61 }
0x12d7   :  { %v7475_v29 = vmul.f32 -1.442695, %v4309_v10 }
0x12d8   :  { %v7476_v39 = vmul.f32 -1.442695, %v4310_v47  ;;  %v7477_v19 = vmul.f32 -1.442695, %v4312_v50 }
0x12d9   :  { %10174 = vpow2.f32 %v7475_v29 }
0x12da   :  { %10176 = vpow2.f32 %v7476_v39 }
0x12db   :  { %10178 = vpow2.f32 %v7477_v19 }
0x12dc   :  { %10180 = vtanh.f32 %v4311_v6 }
0x12e3   :  { %v10175_v51 = vpop.eup %10174 }
0x12e4   :  { %v10177_v0 = vpop.eup %10176  ;;  %v4316_v27 = vadd.f32 1.0, %v10175_v51 }
0x12e5   :  { %v4322_v30 = vadd.f32 1.0, %v10177_v0  ;;  %v10179_v16 = vpop.eup %10178 }
0x12e6   :  { %10182 = vrcp.f32 %v4316_v27  ;;  %v10181_v5 = vpop.eup %10180  ;;  %v4329_v39 = vadd.f32 1.0, %v10179_v16 }
0x12e7   :  { %10184 = vrcp.f32 %v4322_v30 }
0x12e8   :  { %10186 = vrcp.f32 %v4329_v39 }
0x12f0   :  { %v10183_v10 = vpop.eup %10182 }
0x12f1   :  { %v10185_v47 = vpop.eup %10184  ;;  %v4336_v29 = vmul.f32 %v10183_v10, %v10181_v5 }
0x12f2   :  { %v4335_v3 = vmul.f32 %v10185_v47, %v4333_v58  ;;  %v10187_v51 = vpop.eup %10186 }
0x12f4   :  { %v12031_v32 = vadd.f32 %v4336_v29, %v4335_v3 }
0x12f6   :  { %10188 = vtanh.f32 %v12031_v32 }
0x1300   :  { %v10189_v50 = vpop.eup %10188 }
0x1301   :  { %v4339_v6 = vmul.f32 %v10189_v50, %v10187_v51 }
0x1303   :  { %v4341_v31 = vrot.slane %v4339_v6, 2 }
0x1305   :  { %4408 = vmatmul.mubr.f32.vlgmr.msra.gmra.mrb[56].mxu1 %v4341_v31  ;;  %4479 = vmatmul.mubr.f32.vlgmr.msra.gmra.mrb[42].mxu0 %v4341_v31 }
0x1306   :  { %9005 = vmatpush1.bf16.msra.mxu1 %v11807_v43  ;;  %9037 = vmatpush1.bf16.msra.mxu0 %v11810_v52 }
0x1307   :  { %9007 = vmatprep.subr.bf16.mxu1 %v11815_v40  ;;  %9039 = vmatprep.subr.bf16.mxu0 %v11817_v14 }
0x1308   :  { %4595 = vmatprep.mubr.f32.mxu1 %v12941_v9  ;;  %4666 = vmatprep.mubr.f32.mxu0 %v12941_v9 }
0x130a   :  { %9009 = vmatpush1.bf16.msra.mxu1 %v11819_v7  ;;  %9041 = vmatpush1.bf16.msra.mxu0 %v11822_v37 }
0x130b   :  { %9011 = vmatprep.subr.bf16.mxu1 %v11827_v4  ;;  %9043 = vmatprep.subr.bf16.mxu0 %v11829_v12 }
0x130e   :  { %9013 = vmatpush1.bf16.msra.mxu1 %v11831_v44  ;;  %9045 = vmatpush1.bf16.msra.mxu0 %v11834_v49 }
0x130f   :  { %9015 = vmatprep.subr.bf16.mxu1 %v11839_v26  ;;  %9047 = vmatprep.subr.bf16.mxu0 %v11841_v34 }
0x1312   :  { %9017 = vmatpush1.bf16.msra.mxu1 %v11843_v15  ;;  %9049 = vmatpush1.bf16.msra.mxu0 %v11846_v33 }
0x1313   :  { %9019 = vmatprep.subr.bf16.mxu1 %v11851_v24  ;;  %9051 = vmatprep.subr.bf16.mxu0 %v11853_v63 }
0x1316   :  { %9021 = vmatpush1.bf16.msra.mxu1 %v11855_v17  ;;  %9053 = vmatpush1.bf16.msra.mxu0 %v11858_v18 }
0x1317   :  { %9023 = vmatprep.subr.bf16.mxu1 %v11863_v62  ;;  %9055 = vmatprep.subr.bf16.mxu0 %v11865_v59 }
0x131a   :  { %9025 = vmatpush1.bf16.msra.mxu1 %v11867_v8  ;;  %9057 = vmatpush1.bf16.msra.mxu0 %v11870_v28 }
0x131b   :  { %9027 = vmatprep.subr.bf16.mxu1 %v11874_v41  ;;  %9059 = vmatprep.subr.bf16.mxu0 %v11876_v60 }
0x131e   :  { %9029 = vmatpush1.bf16.msra.mxu1 %v11879_v46  ;;  %9061 = vmatpush1.bf16.msra.mxu0 %v11883_v57 }
0x131f   :  { %9031 = vmatprep.subr.bf16.mxu1 %v11887_v11  ;;  %9063 = vmatprep.subr.bf16.mxu0 %v11889_v35 }
0x1322   :  { %9033 = vmatpush1.bf16.msra.mxu1 %v11891_v25  ;;  %9065 = vmatpush1.bf16.msra.mxu0 %v11894_v36 }
0x1323   :  { %9067 = vmatprep.subr.bf16.mxu1 %v11803_v23  ;;  %9099 = vmatprep.subr.bf16.mxu0 %v11805_v45 }
0x13d8   :  { %v4409_v27 = vpop.f32.mrb[56].mxu1  ;;  %v4480_v13 = vpop.f32.mrb[42].mxu0 }
0x13d9   :  { %v4489_v19 = vrot.slane %v4409_v27, 4  ;;  %v4411_v0 = vpop.f32.mrb[57].mxu1  ;;  %v4482_v30 = vpop.f32.mrb[43].mxu0  ;;  %v4491_v3 = vrot.slane %v4480_v13, 4 }
0x13da   :  { %v4490_v16 = vrot.slane %v4411_v0, 4  ;;  %v4492_v29 = vrot.slane %v4482_v30, 4  ;;  %v4521_v30 = vrot.slane %v12031_v32, 6 }
0x13db   :  { %v4497_v5 = vadd.f32 %v4489_v19, %v11966_v56  ;;  %v4499_v50 = vadd.f32 %v4491_v3, %v11986_v21 }
0x13dc   :  { %v4498_v10 = vadd.f32 %v4490_v16, %v11969_v1  ;;  %v4500_v39 = vadd.f32 %v4492_v29, %v11978_v61 }
0x13dd   :  { %v7478_v58 = vmul.f32 -1.442695, %v4497_v5 }
0x13de   :  { %v7479_v47 = vmul.f32 -1.442695, %v4498_v10  ;;  %v7480_v51 = vmul.f32 -1.442695, %v4500_v39 }
0x13df   :  { %10190 = vpow2.f32 %v7478_v58 }
0x13e0   :  { %10192 = vpow2.f32 %v7479_v47 }
0x13e1   :  { %10194 = vpow2.f32 %v7480_v51 }
0x13e2   :  { %10196 = vtanh.f32 %v4499_v50 }
0x13e9   :  { %v10191_v6 = vpop.eup %10190 }
0x13ea   :  { %v10193_v31 = vpop.eup %10192  ;;  %v4504_v27 = vadd.f32 1.0, %v10191_v6 }
0x13eb   :  { %v4510_v0 = vadd.f32 1.0, %v10193_v31  ;;  %v10195_v19 = vpop.eup %10194 }
0x13ec   :  { %10198 = vrcp.f32 %v4504_v27  ;;  %v10197_v16 = vpop.eup %10196  ;;  %v4517_v47 = vadd.f32 1.0, %v10195_v19 }
0x13ed   :  { %10200 = vrcp.f32 %v4510_v0 }
0x13ee   :  { %10202 = vrcp.f32 %v4517_v47 }
0x13f6   :  { %v10199_v5 = vpop.eup %10198 }
0x13f7   :  { %v10201_v10 = vpop.eup %10200  ;;  %v4524_v58 = vmul.f32 %v10199_v5, %v10197_v16 }
0x13f8   :  { %v4523_v13 = vmul.f32 %v10201_v10, %v4521_v30  ;;  %v10203_v39 = vpop.eup %10202 }
0x13fa   :  { %v12073_v29 = vadd.f32 %v4524_v58, %v4523_v13 }
0x13fc   :  { %10204 = vtanh.f32 %v12073_v29 }
0x1406   :  { %v10205_v3 = vpop.eup %10204 }
0x1407   :  { %v4527_v51 = vmul.f32 %v10205_v3, %v10203_v39 }
0x1409   :  { %v4529_v50 = vrot.slane %v4527_v51, 4 }
0x140b   :  { %4596 = vmatmul.mubr.f32.vlgmr.msra.gmra.mrb[58].mxu1 %v4529_v50  ;;  %4667 = vmatmul.mubr.f32.vlgmr.msra.gmra.mrb[44].mxu0 %v4529_v50 }
0x140c   :  { %9069 = vmatpush1.bf16.msra.mxu1 %v11807_v43  ;;  %9101 = vmatpush1.bf16.msra.mxu0 %v11810_v52 }
0x140d   :  { %9071 = vmatprep.subr.bf16.mxu1 %v11815_v40  ;;  %9103 = vmatprep.subr.bf16.mxu0 %v11817_v14 }
0x140e   :  { %4783 = vmatprep.mubr.f32.mxu1 %v12941_v9  ;;  %4854 = vmatprep.mubr.f32.mxu0 %v12941_v9 }
0x1410   :  { %9073 = vmatpush1.bf16.msra.mxu1 %v11819_v7  ;;  %9105 = vmatpush1.bf16.msra.mxu0 %v11822_v37 }
0x1411   :  { %9075 = vmatprep.subr.bf16.mxu1 %v11827_v4  ;;  %9107 = vmatprep.subr.bf16.mxu0 %v11829_v12 }
0x1414   :  { %9077 = vmatpush1.bf16.msra.mxu1 %v11831_v44  ;;  %9109 = vmatpush1.bf16.msra.mxu0 %v11834_v49 }
0x1415   :  { %9079 = vmatprep.subr.bf16.mxu1 %v11839_v26  ;;  %9111 = vmatprep.subr.bf16.mxu0 %v11841_v34 }
0x1418   :  { %9081 = vmatpush1.bf16.msra.mxu1 %v11843_v15  ;;  %9113 = vmatpush1.bf16.msra.mxu0 %v11846_v33 }
0x1419   :  { %9083 = vmatprep.subr.bf16.mxu1 %v11851_v24  ;;  %9115 = vmatprep.subr.bf16.mxu0 %v11853_v63 }
0x141c   :  { %9085 = vmatpush1.bf16.msra.mxu1 %v11855_v17  ;;  %9117 = vmatpush1.bf16.msra.mxu0 %v11858_v18 }
0x141d   :  { %9087 = vmatprep.subr.bf16.mxu1 %v11863_v62  ;;  %9119 = vmatprep.subr.bf16.mxu0 %v11865_v59 }
0x1420   :  { %9089 = vmatpush1.bf16.msra.mxu1 %v11867_v8  ;;  %9121 = vmatpush1.bf16.msra.mxu0 %v11870_v28 }
0x1421   :  { %9091 = vmatprep.subr.bf16.mxu1 %v11874_v41  ;;  %9123 = vmatprep.subr.bf16.mxu0 %v11876_v60 }
0x1424   :  { %9093 = vmatpush1.bf16.msra.mxu1 %v11879_v46  ;;  %9125 = vmatpush1.bf16.msra.mxu0 %v11883_v57 }
0x1425   :  { %9095 = vmatprep.subr.bf16.mxu1 %v11887_v11  ;;  %9127 = vmatprep.subr.bf16.mxu0 %v11889_v35 }
0x1428   :  { %9097 = vmatpush1.bf16.msra.mxu1 %v11891_v25  ;;  %9129 = vmatpush1.bf16.msra.mxu0 %v11894_v36 }
0x1429   :  { %9131 = vmatprep.subr.bf16.mxu1 %v11803_v23  ;;  %9163 = vmatprep.subr.bf16.mxu0 %v11805_v45 }
0x14de   :  { %v4597_v32 = vpop.f32.mrb[58].mxu1  ;;  %v4668_v6 = vpop.f32.mrb[44].mxu0 }
0x14df   :  { %v4677_v31 = vrot.slane %v4597_v32, 2  ;;  %v4599_v27 = vpop.f32.mrb[59].mxu1  ;;  %v4670_v0 = vpop.f32.mrb[45].mxu0  ;;  %v4679_v13 = vrot.slane %v4668_v6, 2 }
0x14e0   :  { %v4678_v19 = vrot.slane %v4599_v27, 2  ;;  %v4680_v58 = vrot.slane %v4670_v0, 2  ;;  %v4709_v0 = vrot.slane %v12073_v29, 6  ;;  %v12154_v29 = vadd.f32 %v11957_v20, %v11952_v38 }
0x14e1   :  { %v4685_v16 = vadd.f32 %v4677_v31, %v11966_v56  ;;  %v4687_v3 = vadd.f32 %v4679_v13, %v11986_v21 }
0x14e2   :  { %v4686_v5 = vadd.f32 %v4678_v19, %v11969_v1  ;;  %v4688_v47 = vadd.f32 %v4680_v58, %v11978_v61 }
0x14e3   :  { %v7481_v30 = vmul.f32 -1.442695, %v4685_v16 }
0x14e4   :  { %v7482_v10 = vmul.f32 -1.442695, %v4686_v5  ;;  %v7483_v39 = vmul.f32 -1.442695, %v4688_v47  ;;  %v12158_v47 = vadd.f32 %v11961_v53, %v11955_v54  ;;  %v12169_v54 = vadd.f32 %v11959_v48, %v11981_v42 }
0x14e5   :  { %10206 = vpow2.f32 %v7481_v30 }
0x14e6   :  { %10208 = vpow2.f32 %v7482_v10 }
0x14e7   :  { %10210 = vpow2.f32 %v7483_v39 }
0x14e8   :  { %10212 = vtanh.f32 %v4687_v3 }
0x14ef   :  { %v10207_v51 = vpop.eup %10206 }
0x14f0   :  { %v10209_v50 = vpop.eup %10208  ;;  %v4692_v32 = vadd.f32 1.0, %v10207_v51 }
0x14f1   :  { %v4698_v27 = vadd.f32 1.0, %v10209_v50  ;;  %v10211_v56 = vpop.eup %10210 }
0x14f2   :  { %10214 = vrcp.f32 %v4692_v32  ;;  %v10213_v1 = vpop.eup %10212  ;;  %v4705_v61 = vadd.f32 1.0, %v10211_v56 }
0x14f3   :  { %10216 = vrcp.f32 %v4698_v27 }
0x14f4   :  { %10218 = vrcp.f32 %v4705_v61 }
0x14fc   :  { %v10215_v31 = vpop.eup %10214 }
0x14fd   :  { %v10217_v19 = vpop.eup %10216  ;;  %v4712_v16 = vmul.f32 %v10215_v31, %v10213_v1  ;;  %v12164_v1 = vadd.f32 %v11963_v55, %v11973_v2 }
0x14fe   :  { %v4711_v6 = vmul.f32 %v10217_v19, %v4709_v0  ;;  %v10219_v21 = vpop.eup %10218 }
0x1500   :  { %v12115_v5 = vadd.f32 %v4712_v16, %v4711_v6 }
0x1502   :  { %10220 = vtanh.f32 %v12115_v5  ;;  %v4885_v6 = vrot.slane %v12115_v5, 6 }
0x150c   :  { %v10221_v30 = vpop.eup %10220 }
0x150d   :  { %v4715_v10 = vmul.f32 %v10221_v30, %v10219_v21 }
0x150f   :  { %v4717_v58 = vrot.slane %v4715_v10, 6 }
0x1511   :  { %4784 = vmatmul.mubr.f32.vlgmr.msra.gmra.mrb[60].mxu1 %v4717_v58  ;;  %4855 = vmatmul.mubr.f32.vlgmr.msra.gmra.mrb[46].mxu0 %v4717_v58 }
0x1512   :  { %9133 = vmatpush1.bf16.msra.mxu1 %v11807_v43  ;;  %9165 = vmatpush1.bf16.msra.mxu0 %v11810_v52 }
0x1513   :  { %9135 = vmatprep.subr.bf16.mxu1 %v11815_v40  ;;  %9167 = vmatprep.subr.bf16.mxu0 %v11817_v14 }
0x1514   :  { %4956 = vmatprep.mubr.f32.mxu1 %v12941_v9  ;;  %5027 = vmatprep.mubr.f32.mxu0 %v12941_v9 }
0x1516   :  { %9137 = vmatpush1.bf16.msra.mxu1 %v11819_v7  ;;  %9169 = vmatpush1.bf16.msra.mxu0 %v11822_v37 }
0x1517   :  { %9139 = vmatprep.subr.bf16.mxu1 %v11827_v4  ;;  %9171 = vmatprep.subr.bf16.mxu0 %v11829_v12 }
0x151a   :  { %9141 = vmatpush1.bf16.msra.mxu1 %v11831_v44  ;;  %9173 = vmatpush1.bf16.msra.mxu0 %v11834_v49 }
0x151b   :  { %9143 = vmatprep.subr.bf16.mxu1 %v11839_v26  ;;  %9175 = vmatprep.subr.bf16.mxu0 %v11841_v34 }
0x151e   :  { %9145 = vmatpush1.bf16.msra.mxu1 %v11843_v15  ;;  %9177 = vmatpush1.bf16.msra.mxu0 %v11846_v33 }
0x151f   :  { %9147 = vmatprep.subr.bf16.mxu1 %v11851_v24  ;;  %9179 = vmatprep.subr.bf16.mxu0 %v11853_v63 }
0x1522   :  { %9149 = vmatpush1.bf16.msra.mxu1 %v11855_v17  ;;  %9181 = vmatpush1.bf16.msra.mxu0 %v11858_v18 }
0x1523   :  { %9151 = vmatprep.subr.bf16.mxu1 %v11863_v62  ;;  %9183 = vmatprep.subr.bf16.mxu0 %v11865_v59 }
0x1526   :  { %9153 = vmatpush1.bf16.msra.mxu1 %v11867_v8  ;;  %9185 = vmatpush1.bf16.msra.mxu0 %v11870_v28 }
0x1527   :  { %9155 = vmatprep.subr.bf16.mxu1 %v11874_v41  ;;  %9187 = vmatprep.subr.bf16.mxu0 %v11876_v60 }
0x152a   :  { %9157 = vmatpush1.bf16.msra.mxu1 %v11879_v46  ;;  %9189 = vmatpush1.bf16.msra.mxu0 %v11883_v57 }
0x152b   :  { %9159 = vmatprep.subr.bf16.mxu1 %v11887_v11  ;;  %9191 = vmatprep.subr.bf16.mxu0 %v11889_v35 }
0x152e   :  { %9161 = vmatpush1.bf16.msra.mxu1 %v11891_v25  ;;  %9193 = vmatpush1.bf16.msra.mxu0 %v11894_v36 }
0x152f   :  { %9195 = vmatprep.subr.bf16.mxu1 %v11803_v23  ;;  %9227 = vmatprep.subr.bf16.mxu0 %v11805_v45 }
0x15e4   :  { %v4785_v13 = vpop.f32.mrb[60].mxu1  ;;  %v4856_v39 = vpop.f32.mrb[46].mxu0 }
0x15e5   :  { %v4861_v3 = vadd.f32 %v4785_v13, %v12154_v29  ;;  %v4787_v51 = vpop.f32.mrb[61].mxu1  ;;  %v4858_v50 = vpop.f32.mrb[47].mxu0  ;;  %v4863_v53 = vadd.f32 %v4856_v39, %v12169_v54 }
0x15e6   :  { %v4862_v32 = vadd.f32 %v4787_v51, %v12158_v47  ;;  %v4864_v38 = vadd.f32 %v4858_v50, %v12164_v1 }
0x15e7   :  { %v7484_v27 = vmul.f32 -1.442695, %v4861_v3 }
0x15e8   :  { %v7485_v56 = vmul.f32 -1.442695, %v4862_v32  ;;  %v7486_v20 = vmul.f32 -1.442695, %v4864_v38 }
0x15e9   :  { %10222 = vpow2.f32 %v7484_v27 }
0x15ea   :  { %10224 = vpow2.f32 %v7485_v56 }
0x15eb   :  { %10226 = vpow2.f32 %v7486_v20 }
0x15ec   :  { %10228 = vtanh.f32 %v4863_v53 }
0x15f3   :  { %v10223_v31 = vpop.eup %10222 }
0x15f4   :  { %v10225_v0 = vpop.eup %10224  ;;  %v4868_v19 = vadd.f32 1.0, %v10223_v31 }
0x15f5   :  { %v4874_v16 = vadd.f32 1.0, %v10225_v0  ;;  %v10227_v55 = vpop.eup %10226 }
0x15f6   :  { %10230 = vrcp.f32 %v4868_v19  ;;  %v10229_v2 = vpop.eup %10228  ;;  %v4881_v48 = vadd.f32 1.0, %v10227_v55 }
0x15f7   :  { %10232 = vrcp.f32 %v4874_v16 }
0x15f8   :  { %10234 = vrcp.f32 %v4881_v48 }
0x1600   :  { %v10231_v61 = vpop.eup %10230 }
0x1601   :  { %v10233_v21 = vpop.eup %10232  ;;  %v4888_v30 = vmul.f32 %v10231_v61, %v10229_v2 }
0x1602   :  { %v4887_v42 = vmul.f32 %v10233_v21, %v4885_v6  ;;  %v10235_v58 = vpop.eup %10234 }
0x1604   :  { %v12173_v10 = vadd.f32 %v4888_v30, %v4887_v42 }
0x1606   :  { %10236 = vtanh.f32 %v12173_v10  ;;  %v5070_v48 = vrot.slane %v12173_v10, 6 }
0x1610   :  { %v10237_v13 = vpop.eup %10236 }
0x1611   :  { %v4891_v39 = vmul.f32 %v10237_v13, %v10235_v58 }
0x1613   :  { %4957 = vmatmul.mubr.f32.vlgmr.msra.gmra.mrb[62].mxu1 %v4891_v39  ;;  %5028 = vmatmul.mubr.f32.vlgmr.msra.gmra.mrb[48].mxu0 %v4891_v39 }
0x1614   :  { %9197 = vmatpush1.bf16.msra.mxu1 %v11807_v43  ;;  %9229 = vmatpush1.bf16.msra.mxu0 %v11810_v52 }
0x1615   :  { %9199 = vmatprep.subr.bf16.mxu1 %v11815_v40  ;;  %9231 = vmatprep.subr.bf16.mxu0 %v11817_v14 }
0x1616   :  { %5144 = vmatprep.mubr.f32.mxu1 %v12941_v9  ;;  %5215 = vmatprep.mubr.f32.mxu0 %v12941_v9 }
0x1618   :  { %9201 = vmatpush1.bf16.msra.mxu1 %v11819_v7  ;;  %9233 = vmatpush1.bf16.msra.mxu0 %v11822_v37 }
0x1619   :  { %9203 = vmatprep.subr.bf16.mxu1 %v11827_v4  ;;  %9235 = vmatprep.subr.bf16.mxu0 %v11829_v12 }
0x161c   :  { %9205 = vmatpush1.bf16.msra.mxu1 %v11831_v44  ;;  %9237 = vmatpush1.bf16.msra.mxu0 %v11834_v49 }
0x161d   :  { %9207 = vmatprep.subr.bf16.mxu1 %v11839_v26  ;;  %9239 = vmatprep.subr.bf16.mxu0 %v11841_v34 }
0x1620   :  { %9209 = vmatpush1.bf16.msra.mxu1 %v11843_v15  ;;  %9241 = vmatpush1.bf16.msra.mxu0 %v11846_v33 }
0x1621   :  { %9211 = vmatprep.subr.bf16.mxu1 %v11851_v24  ;;  %9243 = vmatprep.subr.bf16.mxu0 %v11853_v63 }
0x1624   :  { %9213 = vmatpush1.bf16.msra.mxu1 %v11855_v17  ;;  %9245 = vmatpush1.bf16.msra.mxu0 %v11858_v18 }
0x1625   :  { %9215 = vmatprep.subr.bf16.mxu1 %v11863_v62  ;;  %9247 = vmatprep.subr.bf16.mxu0 %v11865_v59 }
0x1628   :  { %9217 = vmatpush1.bf16.msra.mxu1 %v11867_v8  ;;  %9249 = vmatpush1.bf16.msra.mxu0 %v11870_v28 }
0x1629   :  { %9219 = vmatprep.subr.bf16.mxu1 %v11874_v41  ;;  %9251 = vmatprep.subr.bf16.mxu0 %v11876_v60 }
0x162c   :  { %9221 = vmatpush1.bf16.msra.mxu1 %v11879_v46  ;;  %9253 = vmatpush1.bf16.msra.mxu0 %v11883_v57 }
0x162d   :  { %9223 = vmatprep.subr.bf16.mxu1 %v11887_v11  ;;  %9255 = vmatprep.subr.bf16.mxu0 %v11889_v35 }
0x1630   :  { %9225 = vmatpush1.bf16.msra.mxu1 %v11891_v25  ;;  %9257 = vmatpush1.bf16.msra.mxu0 %v11894_v36 }
0x1631   :  { %9259 = vmatprep.subr.bf16.mxu1 %v11803_v23  ;;  %9291 = vmatprep.subr.bf16.mxu0 %v11805_v45 }
0x16e6   :  { %v4958_v5 = vpop.f32.mrb[62].mxu1  ;;  %v5029_v3 = vpop.f32.mrb[48].mxu0 }
0x16e7   :  { %v5038_v51 = vrot.slane %v4958_v5, 6  ;;  %v4960_v50 = vpop.f32.mrb[63].mxu1  ;;  %v5031_v32 = vpop.f32.mrb[49].mxu0  ;;  %v5040_v23 = vrot.slane %v5029_v3, 6 }
0x16e8   :  { %v5039_v27 = vrot.slane %v4960_v50, 6  ;;  %v5041_v31 = vrot.slane %v5031_v32, 6 }
0x16e9   :  { %v5046_v56 = vadd.f32 %v5038_v51, %v12154_v29  ;;  %v5048_v45 = vadd.f32 %v5040_v23, %v12169_v54 }
0x16ea   :  { %v5047_v38 = vadd.f32 %v5039_v27, %v12158_v47  ;;  %v5049_v0 = vadd.f32 %v5041_v31, %v12164_v1  ;;  %v5552_v31 = vld [vmem:[%s12907_s14 + $0x18] sm:$0xff] }
0x16eb   :  { %v7487_v20 = vmul.f32 -1.442695, %v5046_v56 }
0x16ec   :  { %v7488_v53 = vmul.f32 -1.442695, %v5047_v38  ;;  %v7489_v19 = vmul.f32 -1.442695, %v5049_v0  ;;  %v5453_v38 = vld [vmem:[%s12905_s12] sm:$0xff]  ;;  %v5556_v0 = vld [vmem:[%s12907_s14 + $0x38] sm:$0xff] }
0x16ed   :  { %10238 = vpow2.f32 %v7487_v20  ;;  %v5454_v20 = vld [vmem:[%s12905_s12 + $0x8] sm:$0xff]  ;;  %v9350_v23 = vpack.c.bf16 %v5556_v0, %v5552_v31 }
0x16ee   :  { %10240 = vpow2.f32 %v7488_v53  ;;  %v9323_v53 = vpack.c.bf16 %v5454_v20, %v5453_v38  ;;  %v5466_v38 = vld [vmem:[%s12905_s12 + $0x68] sm:$0xff]  ;;  %v5598_v20 = vld [vmem:[#allocation11 + $0x148] sm:$0xff] }
0x16ef   :  { %10242 = vpow2.f32 %v7489_v19  ;;  %v5551_v19 = vld [vmem:[%s12907_s14 + $0x10] sm:$0xff] }
0x16f0   :  { %10244 = vtanh.f32 %v5048_v45  ;;  %v5555_v45 = vld [vmem:[%s12907_s14 + $0x30] sm:$0xff] }
0x16f7   :  { %v10239_v16 = vpop.eup %10238 }
0x16f8   :  { %v10241_v55 = vpop.eup %10240  ;;  %v5053_v2 = vadd.f32 1.0, %v10239_v16  ;;  %v9352_v16 = vpack.c.bf16 %v5555_v45, %v5551_v19  ;;  %v5597_v19 = vld [vmem:[#allocation11 + $0x140] sm:$0xff] }
0x16f9   :  { %v5059_v61 = vadd.f32 1.0, %v10241_v55  ;;  %v10243_v6 = vpop.eup %10242  ;;  %v5455_v55 = vld [vmem:[%s12905_s12 + $0x10] sm:$0xff] }
0x16fa   :  { %10246 = vrcp.f32 %v5053_v2  ;;  %v10245_v21 = vpop.eup %10244  ;;  %v5066_v13 = vadd.f32 1.0, %v10243_v6  ;;  %v5456_v2 = vld [vmem:[%s12905_s12 + $0x18] sm:$0xff]  ;;  %v5601_v45 = vld [vmem:[#allocation11 + $0x160] sm:$0xff] }
0x16fb   :  { %10248 = vrcp.f32 %v5059_v61  ;;  %v9326_v61 = vpack.c.bf16 %v5456_v2, %v5455_v55  ;;  %v5558_v6 = vld [vmem:[#allocation11 + $0x8] sm:$0xff] }
0x16fc   :  { %10250 = vrcp.f32 %v5066_v13  ;;  %v5457_v13 = vld [vmem:[%s12905_s12 + $0x20] sm:$0xff]  ;;  %v5468_v55 = vld [vmem:[%s12905_s12 + $0x78] sm:$0xff] }
0x16fd   :  { %v5606_v2 = vld [vmem:[#allocation11 + $0x188] sm:$0xff] }
0x1704   :  { %v10247_v30 = vpop.eup %10246 }
0x1705   :  { %v10249_v42 = vpop.eup %10248  ;;  %v5073_v58 = vmul.f32 %v10247_v30, %v10245_v21  ;;  %v5562_v21 = vld [vmem:[#allocation11 + $0x28] sm:$0xff] }
0x1706   :  { %v5072_v39 = vmul.f32 %v10249_v42, %v5070_v48  ;;  %v10251_v3 = vpop.eup %10250  ;;  %v12287_v30 = vpack.c.bf16 %v5562_v21, %v5558_v6  ;;  %v5557_v48 = vld [vmem:[#allocation11] sm:$0xff]  ;;  %v5550_v6 = vld [vmem:[%s12907_s14 + $0x8] sm:$0xff] }
0x1707   :  { %v5561_v42 = vld [vmem:[#allocation11 + $0x20] sm:$0xff]  ;;  %v5554_v21 = vld [vmem:[%s12907_s14 + $0x28] sm:$0xff] }
0x1708   :  { %v12215_v5 = vadd.f32 %v5073_v58, %v5072_v39  ;;  %v12290_v58 = vpack.c.bf16 %v5561_v42, %v5557_v48  ;;  %v5458_v39 = vld [vmem:[%s12905_s12 + $0x28] sm:$0xff]  ;;  %v12382_v48 = vpack.c.bf16 %v5601_v45, %v5597_v19 }
0x170a   :  { %10252 = vtanh.f32 %v12215_v5 }
0x1714   :  { %v10253_v51 = vpop.eup %10252 }
0x1715   :  { %v5076_v50 = vmul.f32 %v10253_v51, %v10251_v3  ;;  %v9329_v3 = vpack.c.bf16 %v5458_v39, %v5457_v13  ;;  %v5566_v51 = vld [vmem:[#allocation11 + $0x48] sm:$0xff]  ;;  %v5605_v39 = vld [vmem:[#allocation11 + $0x180] sm:$0xff] }
0x1717   :  { %v5078_v32 = vrot.slane %v5076_v50, 2  ;;  %v5570_v50 = vld [vmem:[#allocation11 + $0x68] sm:$0xff] }
0x1719   :  { %5145 = vmatmul.mubr.f32.vlgmr.msra.gmra.mrb[64].mxu1 %v5078_v32  ;;  %5216 = vmatmul.mubr.f32.vlgmr.msra.gmra.mrb[50].mxu0 %v5078_v32  ;;  %v12308_v32 = vpack.c.bf16 %v5570_v50, %v5566_v51  ;;  %v9346_v51 = vpack.c.bf16 %v5554_v21, %v5550_v6  ;;  %v5560_v6 = vld [vmem:[#allocation11 + $0x18] sm:$0xff] }
0x171a   :  { %9261 = vmatpush1.bf16.msra.mxu1 %v11807_v43  ;;  %9293 = vmatpush1.bf16.msra.mxu0 %v11810_v52  ;;  %v12942_v43 = vmov 0.0|0.0   ;;  %v5564_v21 = vld [vmem:[#allocation11 + $0x38] sm:$0xff] }
0x171b   :  { %9263 = vmatprep.subr.bf16.mxu1 %v11815_v40  ;;  %9295 = vmatprep.subr.bf16.mxu0 %v11817_v14 }
0x171c   :  { %5332 = vmatprep.mubr.f32.mxu1 %v12941_v9  ;;  %5403 = vmatprep.mubr.f32.mxu0 %v12941_v9 }
0x171e   :  { %9265 = vmatpush1.bf16.msra.mxu1 %v11819_v7  ;;  %9297 = vmatpush1.bf16.msra.mxu0 %v11822_v37 }
0x171f   :  { %9267 = vmatprep.subr.bf16.mxu1 %v11827_v4  ;;  %9299 = vmatprep.subr.bf16.mxu0 %v11829_v12 }
0x1722   :  { %9269 = vmatpush1.bf16.msra.mxu1 %v11831_v44  ;;  %9301 = vmatpush1.bf16.msra.mxu0 %v11834_v49 }
0x1723   :  { %9271 = vmatprep.subr.bf16.mxu1 %v11839_v26  ;;  %9303 = vmatprep.subr.bf16.mxu0 %v11841_v34 }
0x1726   :  { %9273 = vmatpush1.bf16.msra.mxu1 %v11843_v15  ;;  %9305 = vmatpush1.bf16.msra.mxu0 %v11846_v33 }
0x1727   :  { %9275 = vmatprep.subr.bf16.mxu1 %v11851_v24  ;;  %9307 = vmatprep.subr.bf16.mxu0 %v11853_v63 }
0x172a   :  { %9277 = vmatpush1.bf16.msra.mxu1 %v11855_v17  ;;  %9309 = vmatpush1.bf16.msra.mxu0 %v11858_v18 }
0x172b   :  { %9279 = vmatprep.subr.bf16.mxu1 %v11863_v62  ;;  %9311 = vmatprep.subr.bf16.mxu0 %v11865_v59 }
0x172e   :  { %9281 = vmatpush1.bf16.msra.mxu1 %v11867_v8  ;;  %9313 = vmatpush1.bf16.msra.mxu0 %v11870_v28 }
0x172f   :  { %9283 = vmatprep.subr.bf16.mxu1 %v11874_v41  ;;  %9315 = vmatprep.subr.bf16.mxu0 %v11876_v60  ;;  %v5258_v60 = vrot.slane %v12215_v5, 6  ;;  %v12302_v5 = vld [vmem:[%s12934_s24] sm:$0xff] }
0x1732   :  { %9285 = vmatpush1.bf16.msra.mxu1 %v11879_v46  ;;  %9317 = vmatpush1.bf16.msra.mxu0 %v11883_v57 }
0x1733   :  { %9287 = vmatprep.subr.bf16.mxu1 %v11887_v11  ;;  %9319 = vmatprep.subr.bf16.mxu0 %v11889_v35 }
0x1736   :  { %9289 = vmatpush1.bf16.msra.mxu1 %v11891_v25  ;;  %9321 = vmatpush1.bf16.msra.mxu0 %v11894_v36 }
0x1737   :  { %9322 = vmatprep.subr.bf16.mxu1 %v12942_v43  ;;  %9351 = vmatprep.subr.bf16.mxu0 %v9350_v23 }
0x17ec   :  { %v5146_v52 = vpop.f32.mrb[64].mxu1  ;;  %v5217_v40 = vpop.f32.mrb[50].mxu0 }
0x17ed   :  { %v5226_v14 = vrot.slane %v5146_v52, 4  ;;  %v5148_v7 = vpop.f32.mrb[65].mxu1  ;;  %v5219_v37 = vpop.f32.mrb[51].mxu0  ;;  %v5228_v33 = vrot.slane %v5217_v40, 4  ;;  %v5565_v52 = vld [vmem:[#allocation11 + $0x40] sm:$0xff] }
0x17ee   :  { %v5227_v4 = vrot.slane %v5148_v7, 4  ;;  %v5229_v34 = vrot.slane %v5219_v37, 4  ;;  %v5569_v40 = vld [vmem:[#allocation11 + $0x60] sm:$0xff]  ;;  %v5460_v37 = vld [vmem:[%s12905_s12 + $0x38] sm:$0xff] }
0x17ef   :  { %v5234_v12 = vadd.f32 %v5226_v14, %v12154_v29  ;;  %v5236_v63 = vadd.f32 %v5228_v33, %v12169_v54  ;;  %v12311_v14 = vpack.c.bf16 %v5569_v40, %v5565_v52  ;;  %v5459_v7 = vld [vmem:[%s12905_s12 + $0x30] sm:$0xff]  ;;  %v5461_v33 = vld [vmem:[%s12905_s12 + $0x40] sm:$0xff]  ;;  %v5614_v52 = vld [vmem:[#allocation11 + $0x1c8] sm:$0xff] }
0x17f0   :  { %v5235_v44 = vadd.f32 %v5227_v4, %v12158_v47  ;;  %v5237_v15 = vadd.f32 %v5229_v34, %v12164_v1  ;;  %v9332_v4 = vpack.c.bf16 %v5460_v37, %v5459_v7  ;;  %v5573_v34 = vld [vmem:[#allocation11 + $0x80] sm:$0xff]  ;;  %v5618_v40 = vld [vmem:[#allocation11 + $0x1e8] sm:$0xff] }
0x17f1   :  { %v7490_v49 = vmul.f32 -1.442695, %v5234_v12  ;;  %v12323_v12 = vld [vmem:[%s12934_s24 + $0x8] sm:$0xff]  ;;  %v12393_v7 = vpack.c.bf16 %v5618_v40, %v5614_v52  ;;  %v5613_v37 = vld [vmem:[#allocation11 + $0x1c0] sm:$0xff]  ;;  %v5563_v52 = vld [vmem:[#allocation11 + $0x30] sm:$0xff] }
0x17f2   :  { %v7491_v26 = vmul.f32 -1.442695, %v5235_v44  ;;  %v7492_v24 = vmul.f32 -1.442695, %v5237_v15  ;;  %v5574_v44 = vld [vmem:[#allocation11 + $0x88] sm:$0xff]  ;;  %v5577_v15 = vld [vmem:[#allocation11 + $0xa0] sm:$0xff] }
0x17f3   :  { %10254 = vpow2.f32 %v7490_v49  ;;  %v5578_v49 = vld [vmem:[#allocation11 + $0xa8] sm:$0xff]  ;;  %v5568_v40 = vld [vmem:[#allocation11 + $0x58] sm:$0xff] }
0x17f4   :  { %10256 = vpow2.f32 %v7491_v26  ;;  %v12329_v26 = vpack.c.bf16 %v5578_v49, %v5574_v44 }
0x17f5   :  { %10258 = vpow2.f32 %v7492_v24  ;;  %v12335_v24 = vpack.c.bf16 %v5577_v15, %v5573_v34 }
0x17f6   :  { %10260 = vtanh.f32 %v5236_v63  ;;  %v5462_v63 = vld [vmem:[%s12905_s12 + $0x48] sm:$0xff] }
0x17fd   :  { %v10255_v17 = vpop.eup %10254 }
0x17fe   :  { %v10257_v18 = vpop.eup %10256  ;;  %v5241_v62 = vadd.f32 1.0, %v10255_v17  ;;  %v5582_v17 = vld [vmem:[#allocation11 + $0xc8] sm:$0xff] }
0x17ff   :  { %v5247_v59 = vadd.f32 1.0, %v10257_v18  ;;  %v10259_v8 = vpop.eup %10258  ;;  %v5586_v18 = vld [vmem:[#allocation11 + $0xe8] sm:$0xff] }
0x1800   :  { %10262 = vrcp.f32 %v5241_v62  ;;  %v10261_v28 = vpop.eup %10260  ;;  %v5254_v11 = vadd.f32 1.0, %v10259_v8  ;;  %v9335_v62 = vpack.c.bf16 %v5462_v63, %v5461_v33  ;;  %v5581_v8 = vld [vmem:[#allocation11 + $0xc0] sm:$0xff] }
0x1801   :  { %10264 = vrcp.f32 %v5247_v59  ;;  %v12341_v59 = vpack.c.bf16 %v5586_v18, %v5582_v17 }
0x1802   :  { %10266 = vrcp.f32 %v5254_v11  ;;  %v5594_v11 = vld [vmem:[#allocation11 + $0x128] sm:$0xff] }
0x180a   :  { %v10263_v41 = vpop.eup %10262 }
0x180b   :  { %v10265_v46 = vpop.eup %10264  ;;  %v5261_v57 = vmul.f32 %v10263_v41, %v10261_v28  ;;  %v5585_v28 = vld [vmem:[#allocation11 + $0xe0] sm:$0xff] }
0x180c   :  { %v5260_v35 = vmul.f32 %v10265_v46, %v5258_v60  ;;  %v10267_v36 = vpop.eup %10266  ;;  %v5463_v41 = vld [vmem:[%s12905_s12 + $0x50] sm:$0xff]  ;;  %v12347_v60 = vpack.c.bf16 %v5585_v28, %v5581_v8  ;;  %v5464_v46 = vld [vmem:[%s12905_s12 + $0x58] sm:$0xff] }
0x180e   :  { %v12256_v25 = vadd.f32 %v5261_v57, %v5260_v35  ;;  %v5590_v57 = vld [vmem:[#allocation11 + $0x108] sm:$0xff]  ;;  %v9338_v35 = vpack.c.bf16 %v5464_v46, %v5463_v41 }
0x1810   :  { %10268 = vtanh.f32 %v12256_v25 }
0x181a   :  { %v10269_v10 = vpop.eup %10268 }
0x181b   :  { %v5264_v27 = vmul.f32 %v10269_v10, %v10267_v36  ;;  %v12353_v36 = vpack.c.bf16 %v5594_v11, %v5590_v57  ;;  %v5589_v10 = vld [vmem:[#allocation11 + $0x100] sm:$0xff] }
0x181d   :  { %v5266_v56 = vrot.slane %v5264_v27, 4  ;;  %v5593_v27 = vld [vmem:[#allocation11 + $0x120] sm:$0xff] }
0x181e   :  { %v12363_v31 = vpack.c.bf16 %v5593_v27, %v5589_v10 }
0x181f   :  { %5333 = vmatmul.mubr.f32.vlgmr.msra.gmra.mrb[66].mxu1 %v5266_v56  ;;  %5404 = vmatmul.mubr.f32.vlgmr.msra.gmra.mrb[52].mxu0 %v5266_v56  ;;  %v5465_v56 = vld [vmem:[%s12905_s12 + $0x60] sm:$0xff] }
0x1820   :  { %5784 = vmatprep.mubr.f32.mxu0 %v12941_v9  ;;  %7644 = vmatprep.mubr.msk.f32.mxu1 %vm10593_vm1, %v12941_v9  ;;  %v9341_v0 = vpack.c.bf16 %v5466_v38, %v5465_v56 }
0x1821   :  { %9324 = vmatpush3.bf16.msra.mxu1 %v9323_v53  ;;  %9353 = vmatpush1.bf16.msra.mxu0 %v9352_v16  ;;  %v5602_v53 = vld [vmem:[#allocation11 + $0x168] sm:$0xff]  ;;  %v5467_v16 = vld [vmem:[%s12905_s12 + $0x70] sm:$0xff] }
0x1822   :  { %9325 = vmatprep.subr.bf16.mxu1 %v12942_v43  ;;  %9355 = vmatprep.subr.bf16.mxu0 %v12287_v30  ;;  %v12366_v23 = vpack.c.bf16 %v5602_v53, %v5598_v20  ;;  %v9344_v42 = vpack.c.bf16 %v5468_v55, %v5467_v16  ;;  %v5446_v53 = vrot.slane %v12256_v25, 6  ;;  %v5549_v55 = vld [vmem:[%s12907_s14] sm:$0xff] }
0x1824   :  { %7499 = vmatmul.mubr.msk.f32.vlgmr.msra.gmra.mrb[54].mxu0 %vm230_vm0, %v12302_v5 }
0x1825   :  { %9327 = vmatpush3.bf16.msra.mxu1 %v9326_v61  ;;  %9357 = vmatpush1.bf16.msra.mxu0 %v12290_v58  ;;  %v5610_v61 = vld [vmem:[#allocation11 + $0x1a8] sm:$0xff] }
0x1826   :  { %9328 = vmatprep.subr.bf16.mxu1 %v12942_v43  ;;  %5790 = vmatprep.mubr.f32.mxu0 %v12941_v9  ;;  %v12385_v13 = vpack.c.bf16 %v5610_v61, %v5606_v2  ;;  %v5553_v2 = vld [vmem:[%s12907_s14 + $0x20] sm:$0xff] }
0x1827   :  { %9359 = vmatprep.subr.bf16.mxu0 %v12308_v32 }
0x1828   :  { %7500 = vmatmul.mubr.msk.f32.gmra.mrb[56].mxu0 %vm230_vm0, %v12323_v12 }
0x1829   :  { %9330 = vmatpush3.bf16.msra.mxu1 %v9329_v3  ;;  %9361 = vmatpush1.bf16.msra.mxu0 %v12311_v14  ;;  %v5609_v3 = vld [vmem:[#allocation11 + $0x1a0] sm:$0xff] }
0x182a   :  { %9331 = vmatprep.subr.bf16.mxu1 %v12942_v43  ;;  %5861 = vmatprep.mubr.f32.mxu0 %v12941_v9  ;;  %v12389_v50 = vpack.c.bf16 %v5609_v3, %v5605_v39  ;;  %v12429_v3 = vpack.c.bf16 %v5564_v21, %v5560_v6  ;;  %v5620_v6 = vld [vmem:[#allocation11 + $0x1f8] sm:$0xff] }
0x182b   :  { %9363 = vmatprep.subr.bf16.mxu0 %v12329_v26 }
0x182d   :  { %9333 = vmatpush3.bf16.msra.mxu1 %v9332_v4  ;;  %9365 = vmatpush1.bf16.msra.mxu0 %v12335_v24  ;;  %v5617_v4 = vld [vmem:[#allocation11 + $0x1e0] sm:$0xff] }
0x182e   :  { %9334 = vmatprep.subr.bf16.mxu1 %v12942_v43  ;;  %9367 = vmatprep.subr.bf16.mxu0 %v12341_v59  ;;  %v12395_v44 = vpack.c.bf16 %v5617_v4, %v5613_v37  ;;  %v5572_v37 = vld [vmem:[#allocation11 + $0x78] sm:$0xff] }
0x1831   :  { %9336 = vmatpush3.bf16.msra.mxu1 %v9335_v62  ;;  %9369 = vmatpush1.bf16.msra.mxu0 %v12347_v60 }
0x1832   :  { %9337 = vmatprep.subr.bf16.mxu1 %v12942_v43  ;;  %9371 = vmatprep.subr.bf16.mxu0 %v12353_v36 }
0x1835   :  { %9339 = vmatpush3.bf16.msra.mxu1 %v9338_v35  ;;  %9373 = vmatpush1.bf16.msra.mxu0 %v12363_v31 }
0x1836   :  { %9340 = vmatprep.subr.bf16.mxu1 %v12942_v43  ;;  %9375 = vmatprep.subr.bf16.mxu0 %v12366_v23 }
0x1839   :  { %9342 = vmatpush3.bf16.msra.mxu1 %v9341_v0  ;;  %9377 = vmatpush1.bf16.msra.mxu0 %v12382_v48 }
0x183a   :  { %9343 = vmatprep.subr.bf16.mxu1 %v12942_v43  ;;  %9379 = vmatprep.subr.bf16.mxu0 %v12385_v13 }
0x183d   :  { %9345 = vmatpush3.bf16.msra.mxu1 %v9344_v42  ;;  %9381 = vmatpush1.bf16.msra.mxu0 %v12389_v50  ;;  %v9348_v42 = vpack.c.bf16 %v5553_v2, %v5549_v55  ;;  %v5607_v55 = vld [vmem:[#allocation11 + $0x190] sm:$0xff] }
0x183e   :  { %9347 = vmatprep.subr.bf16.mxu1 %v9346_v51  ;;  %9383 = vmatprep.subr.bf16.mxu0 %v12393_v7  ;;  %v5559_v51 = vld [vmem:[#allocation11 + $0x10] sm:$0xff] }
0x183f   :  { %v12432_v4 = vpack.c.bf16 %v5563_v52, %v5559_v51  ;;  %v5611_v2 = vld [vmem:[#allocation11 + $0x1b0] sm:$0xff] }
0x1840   :  { %v12474_v21 = vpack.c.bf16 %v5611_v2, %v5607_v55 }
0x1841   :  { %9385 = vmatpush1.bf16.msra.mxu0 %v12395_v44 }
0x1842   :  { %9419 = vmatprep.subr.bf16.mxu0 %v12287_v30 }
0x1844   :  { %5862 = vmatmul.mubr.f32.vlgmr.msra.gmra.mrb[58].mxu0 %v12941_v9 }
0x1845   :  { %9421 = vmatpush1.bf16.msra.mxu0 %v12290_v58  ;;  %6031 = vmatprep.mubr.f32.mxu0 %v12941_v9 }
0x1846   :  { %9423 = vmatprep.subr.bf16.mxu0 %v12308_v32 }
0x1849   :  { %9425 = vmatpush1.bf16.msra.mxu0 %v12311_v14 }
0x184a   :  { %9427 = vmatprep.subr.bf16.mxu0 %v12329_v26 }
0x184d   :  { %9429 = vmatpush1.bf16.msra.mxu0 %v12335_v24 }
0x184e   :  { %9431 = vmatprep.subr.bf16.mxu0 %v12341_v59 }
0x1851   :  { %9433 = vmatpush1.bf16.msra.mxu0 %v12347_v60 }
0x1852   :  { %9435 = vmatprep.subr.bf16.mxu0 %v12353_v36 }
0x1855   :  { %9437 = vmatpush1.bf16.msra.mxu0 %v12363_v31 }
0x1856   :  { %9439 = vmatprep.subr.bf16.mxu0 %v12366_v23 }
0x1859   :  { %9441 = vmatpush1.bf16.msra.mxu0 %v12382_v48 }
0x185a   :  { %9443 = vmatprep.subr.bf16.mxu0 %v12385_v13 }
0x185d   :  { %9445 = vmatpush1.bf16.msra.mxu0 %v12389_v50 }
0x185e   :  { %9447 = vmatprep.subr.bf16.mxu0 %v12393_v7 }
0x1861   :  { %9449 = vmatpush1.bf16.msra.mxu0 %v12395_v44 }
0x1862   :  { %9483 = vmatprep.subr.bf16.mxu0 %v12287_v30 }
0x18f2   :  { %v5334_v49 = vpop.f32.mrb[66].mxu1  ;;  %v5405_v34 = vpop.f32.mrb[52].mxu0 }
0x18f3   :  { %v5414_v15 = vrot.slane %v5334_v49, 2  ;;  %v5336_v33 = vpop.f32.mrb[67].mxu1  ;;  %v5407_v63 = vpop.f32.mrb[53].mxu0  ;;  %v5416_v57 = vrot.slane %v5405_v34, 2  ;;  %v12435_v49 = vpack.c.bf16 %v5572_v37, %v5568_v40  ;;  %v5567_v34 = vld [vmem:[#allocation11 + $0x50] sm:$0xff] }
0x18f4   :  { %v5415_v17 = vrot.slane %v5336_v33, 2  ;;  %v5417_v41 = vrot.slane %v5407_v63, 2  ;;  %v5576_v33 = vld [vmem:[#allocation11 + $0x98] sm:$0xff]  ;;  %v5621_v37 = vld [vmem:[%s12909_s16] sm:$0xf] }
0x18f5   :  { %v5422_v18 = vadd.f32 %v5414_v15, %v12154_v29  ;;  %v5424_v35 = vadd.f32 %v5416_v57, %v12169_v54  ;;  %v5571_v15 = vld [vmem:[#allocation11 + $0x70] sm:$0xff]  ;;  %v5580_v63 = vld [vmem:[#allocation11 + $0xb8] sm:$0xff] }
0x18f6   :  { %v5423_v62 = vadd.f32 %v5415_v17, %v12158_v47  ;;  %v5425_v46 = vadd.f32 %v5417_v41, %v12164_v1  ;;  %v12440_v17 = vpack.c.bf16 %v5571_v15, %v5567_v34  ;;  %v5588_v41 = vld [vmem:[#allocation11 + $0xf8] sm:$0xff]  ;;  %v5583_v57 = vld [vmem:[#allocation11 + $0xd0] sm:$0xff]  ;;  %v5634_v34 = vrot.slane %v5621_v37, %v10977_v22 }
0x18f7   :  { %v7493_v8 = vmul.f32 -1.442695, %v5422_v18  ;;  %v12444_v18 = vpack.c.bf16 %v5580_v63, %v5576_v33  ;;  %v5786_v52 = vpop.f32.mrb[54].mxu0  ;;  %v12943_v15 = vld [vmem:[#allocation22_spill] sm:$0xff]  ;;  %v12944_v22 = vld [vmem:[#allocation23_spill] sm:$0xff] }
0x18f8   :  { %v7494_v28 = vmul.f32 -1.442695, %v5423_v62  ;;  %v7495_v11 = vmul.f32 -1.442695, %v5425_v46  ;;  %v5575_v62 = vld [vmem:[#allocation11 + $0x90] sm:$0xff]  ;;  %v5788_v40 = vpop.f32.mrb[55].mxu0  ;;  %v5638_v33 = vrot.slane %v5621_v37, %v12943_v15 }
0x18f9   :  { %10270 = vpow2.f32 %v7493_v8  ;;  %v5579_v8 = vld [vmem:[#allocation11 + $0xb0] sm:$0xff] }
0x18fa   :  { %10272 = vpow2.f32 %v7494_v28  ;;  %v5584_v28 = vld [vmem:[#allocation11 + $0xd8] sm:$0xff] }
0x18fb   :  { %10274 = vpow2.f32 %v7495_v11  ;;  %v12453_v46 = vpack.c.bf16 %v5588_v41, %v5584_v28  ;;  %v5587_v11 = vld [vmem:[#allocation11 + $0xf0] sm:$0xff]  ;;  %v5792_v63 = vpop.f32.mrb[56].mxu0 }
0x18fc   :  { %10276 = vtanh.f32 %v5424_v35  ;;  %v5592_v35 = vld [vmem:[#allocation11 + $0x118] sm:$0xff] }
0x1903   :  { %v10271_v10 = vpop.eup %10270 }
0x1904   :  { %v10273_v27 = vpop.eup %10272  ;;  %v5429_v56 = vadd.f32 1.0, %v10271_v10  ;;  %v5596_v10 = vld [vmem:[#allocation11 + $0x138] sm:$0xff] }
0x1905   :  { %v5435_v38 = vadd.f32 1.0, %v10273_v27  ;;  %v10275_v29 = vpop.eup %10274  ;;  %v12456_v27 = vpack.c.bf16 %v5587_v11, %v5583_v57  ;;  %v7443_v11 = vld [vmem:[%s12898_s5] ss:$0 sm:$0xff] }
0x1906   :  { %10278 = vrcp.f32 %v5429_v56  ;;  %v10277_v47 = vpop.eup %10276  ;;  %v5442_v1 = vadd.f32 1.0, %v10275_v29  ;;  %v5591_v56 = vld [vmem:[#allocation11 + $0x110] sm:$0xff]  ;;  %v5600_v29 = vld [vmem:[#allocation11 + $0x158] sm:$0xff] }
0x1907   :  { %10280 = vrcp.f32 %v5435_v38  ;;  %v5595_v38 = vld [vmem:[#allocation11 + $0x130] sm:$0xff] }
0x1908   :  { %10282 = vrcp.f32 %v5442_v1  ;;  %v5608_v1 = vld [vmem:[#allocation11 + $0x198] sm:$0xff] }
0x1910   :  { %v10279_v20 = vpop.eup %10278 }
0x1911   :  { %v10281_v0 = vpop.eup %10280  ;;  %v5449_v19 = vmul.f32 %v10279_v20, %v10277_v47  ;;  %v5604_v47 = vld [vmem:[#allocation11 + $0x178] sm:$0xff]  ;;  %v12462_v20 = vpack.c.bf16 %v5595_v38, %v5591_v56  ;;  %v12519_v56 = vadd.f32 %v7443_v11, %v12944_v22 }
0x1912   :  { %v5448_v45 = vmul.f32 %v10281_v0, %v5446_v53  ;;  %v10283_v54 = vpop.eup %10282  ;;  %v12465_v53 = vpack.c.bf16 %v5604_v47, %v5600_v29  ;;  %v5599_v0 = vld [vmem:[#allocation11 + $0x150] sm:$0xff] }
0x1914   :  { %v5450_v16 = vadd.f32 %v5449_v19, %v5448_v45  ;;  %v5603_v19 = vld [vmem:[#allocation11 + $0x170] sm:$0xff]  ;;  %v5612_v45 = vld [vmem:[#allocation11 + $0x1b8] sm:$0xff] }
0x1916   :  { %10284 = vtanh.f32 %v5450_v16  ;;  %v12468_v16 = vpack.c.bf16 %v5603_v19, %v5599_v0  ;;  %v12945_v19 = vld [vmem:[#allocation21_spill] sm:$0xff] }
0x1920   :  { %v10285_v61 = vpop.eup %10284 }
0x1921   :  { %v5452_v25 = vmul.f32 %v10285_v61, %v10283_v54  ;;  %v12471_v54 = vpack.c.bf16 %v5612_v45, %v5608_v1  ;;  %v5616_v61 = vld [vmem:[#allocation11 + $0x1d8] sm:$0xff]  ;;  %v5630_v1 = vrot.slane %v5621_v37, %v12945_v19  ;;  %v12946_v45 = vld [vmem:[#allocation20_spill] sm:$0xff] }
0x1922   :  { %v5626_v55 = vrot.slane %v5621_v37, %v12946_v45  ;;  %v12539_v45 = vadd.f32 %v5786_v52, %v5634_v34 }
0x1923   :  { %v5477_v39 = vrot.slane %v5452_v25, 6  ;;  %v12477_v25 = vpack.c.bf16 %v5620_v6, %v5616_v61 }
0x1925   :  { %7645 = vmatmul.mubr.f32.vlgmr.msra.gmra.mrb[68].mxu1 %v5477_v39  ;;  %v5619_v39 = vld [vmem:[#allocation11 + $0x1f0] sm:$0xff] }
0x1926   :  { %9349 = vmatpush1.bf16.msra.mxu1 %v9348_v42  ;;  %5707 = vmatprep.mubr.f32.mxu1 %v12941_v9  ;;  %v5615_v42 = vld [vmem:[#allocation11 + $0x1d0] sm:$0xff] }
0x1927   :  { %9387 = vmatprep.subr.bf16.mxu1 %v12429_v3  ;;  %v12480_v51 = vpack.c.bf16 %v5619_v39, %v5615_v42 }
0x1929   :  { %7497 = vmatmul.mubr.msk.f32.vlgmr.msra.gmra.mrb[70].mxu1 %vm230_vm0, %v12302_v5  ;;  %v12449_v5 = vpack.c.bf16 %v5579_v8, %v5575_v62  ;;  %v12508_v62 = vadd.f32 %v5792_v63, %v5634_v34  ;;  %v5794_v8 = vpop.f32.mrb[57].mxu0 }
0x192a   :  { %9389 = vmatpush1.bf16.msra.mxu1 %v12432_v4  ;;  %5713 = vmatprep.mubr.f32.mxu1 %v12941_v9  ;;  %v12510_v28 = vadd.f32 %v5794_v8, %v5638_v33  ;;  %v5863_v41 = vpop.f32.mrb[58].mxu0 }
0x192b   :  { %9391 = vmatprep.subr.bf16.mxu1 %v12435_v49  ;;  %v5865_v57 = vpop.f32.mrb[59].mxu0 }
0x192d   :  { %7498 = vmatmul.mubr.msk.f32.gmra.mrb[72].mxu1 %vm230_vm0, %v12323_v12  ;;  %v12459_v12 = vpack.c.bf16 %v5596_v10, %v5592_v35  ;;  %v7496_v35 = vld [vmem:[%s12906_s13] ss:$0 sm:$0xff] }
0x192e   :  { %9393 = vmatpush1.bf16.msra.mxu1 %v12440_v17  ;;  %5932 = vmatprep.mubr.f32.mxu1 %v12941_v9 }
0x192f   :  { %9395 = vmatprep.subr.bf16.mxu1 %v12444_v18 }
0x1932   :  { %9397 = vmatpush1.bf16.msra.mxu1 %v12449_v5 }
0x1933   :  { %9399 = vmatprep.subr.bf16.mxu1 %v12453_v46 }
0x1936   :  { %9401 = vmatpush1.bf16.msra.mxu1 %v12456_v27 }
0x1937   :  { %9403 = vmatprep.subr.bf16.mxu1 %v12459_v12 }
0x193a   :  { %9405 = vmatpush1.bf16.msra.mxu1 %v12462_v20 }
0x193b   :  { %9407 = vmatprep.subr.bf16.mxu1 %v12465_v53 }
0x193e   :  { %9409 = vmatpush1.bf16.msra.mxu1 %v12468_v16 }
0x193f   :  { %9411 = vmatprep.subr.bf16.mxu1 %v12471_v54 }
0x1942   :  { %9413 = vmatpush1.bf16.msra.mxu1 %v12474_v21 }
0x1943   :  { %9415 = vmatprep.subr.bf16.mxu1 %v12477_v25 }
0x1946   :  { %9417 = vmatpush1.bf16.msra.mxu1 %v12480_v51 }
0x1947   :  { %9451 = vmatprep.subr.bf16.mxu1 %v12429_v3 }
0x1949   :  { %5933 = vmatmul.mubr.f32.vlgmr.msra.gmra.mrb[74].mxu1 %v12941_v9 }
0x194a   :  { %9453 = vmatpush1.bf16.msra.mxu1 %v12432_v4  ;;  %6102 = vmatprep.mubr.f32.mxu1 %v12941_v9 }
0x194b   :  { %9455 = vmatprep.subr.bf16.mxu1 %v12435_v49 }
0x194e   :  { %9457 = vmatpush1.bf16.msra.mxu1 %v12440_v17 }
0x194f   :  { %9459 = vmatprep.subr.bf16.mxu1 %v12444_v18 }
0x1952   :  { %9461 = vmatpush1.bf16.msra.mxu1 %v12449_v5 }
0x1953   :  { %9463 = vmatprep.subr.bf16.mxu1 %v12453_v46 }
0x1956   :  { %9465 = vmatpush1.bf16.msra.mxu1 %v12456_v27 }
0x1957   :  { %9467 = vmatprep.subr.bf16.mxu1 %v12459_v12 }
0x195a   :  { %9469 = vmatpush1.bf16.msra.mxu1 %v12462_v20 }
0x195b   :  { %9471 = vmatprep.subr.bf16.mxu1 %v12465_v53 }
0x195e   :  { %9473 = vmatpush1.bf16.msra.mxu1 %v12468_v16 }
0x195f   :  { %9475 = vmatprep.subr.bf16.mxu1 %v12471_v54 }
0x1962   :  { %9477 = vmatpush1.bf16.msra.mxu1 %v12474_v21 }
0x1963   :  { %9479 = vmatprep.subr.bf16.mxu1 %v12477_v25 }
0x1966   :  { %9481 = vmatpush1.bf16.msra.mxu1 %v12480_v51 }
0x1967   :  { %9515 = vmatprep.subr.bf16.mxu1 %v12429_v3 }
0x19f8   :  { %v5545_v10 = vpop.f32.mrb[68].mxu1 }
0x19f9   :  { %v12521_v38 = vadd.f32 %v7496_v35, %v5545_v10  ;;  %v7646_v29 = vpop.f32.mrb[69].mxu1 }
0x19fb   :  { %v12525_v47 = vadd.f32 %v12521_v38, %v12519_v56 }
0x19fc   :  { %v5709_v0 = vpop.f32.mrb[70].mxu1 }
0x19fd   :  { %v5711_v2 = vpop.f32.mrb[71].mxu1  ;;  %v12531_v42 = vadd.f32 %v5709_v0, %v5626_v55  ;;  %v12541_v0 = vadd.f32 %v5788_v40, %v5638_v33 }
0x19fe   :  { %v12529_v61 = vadd.f32 %v5711_v2, %v5630_v1 }
0x19ff   :  { %v5939_v11 = vadd.f32 %v5863_v41, %v12531_v42 }
0x1a00   :  { %v5715_v6 = vpop.f32.mrb[72].mxu1  ;;  %v5940_v8 = vadd.f32 %v5865_v57, %v12529_v61 }
0x1a01   :  { %v12533_v39 = vadd.f32 %v5715_v6, %v5626_v55  ;;  %v5717_v15 = vpop.f32.mrb[73].mxu1  ;;  %v7501_v10 = vmul.f32 -1.442695, %v5939_v11 }
0x1a02   :  { %v12535_v63 = vadd.f32 %v5717_v15, %v5630_v1  ;;  %v7502_v35 = vmul.f32 -1.442695, %v5940_v8 }
0x1a04   :  { %10286 = vpow2.f32 %v7502_v35 }
0x1a05   :  { %10288 = vpow2.f32 %v7501_v10 }
0x1a0e   :  { %v10287_v37 = vpop.eup %10286 }
0x1a0f   :  { %v10289_v22 = vpop.eup %10288  ;;  %v5952_v29 = vadd.f32 1.0, %v10287_v37 }
0x1a10   :  { %v5946_v19 = vadd.f32 1.0, %v10289_v22 }
0x1a11   :  { %10290 = vrcp.f32 %v5952_v29 }
0x1a12   :  { %10292 = vrcp.f32 %v5946_v19 }
0x1a1b   :  { %v10291_v6 = vpop.eup %10290 }
0x1a1c   :  { %v5934_v55 = vpop.f32.mrb[74].mxu1  ;;  %v10293_v15 = vpop.eup %10292  ;;  %v5962_v11 = vmul.f32 0.0, %v10291_v6 }
0x1a1d   :  { %v5941_v1 = vadd.f32 %v5934_v55, %v12539_v45  ;;  %v5936_v2 = vpop.f32.mrb[75].mxu1 }
0x1a1e   :  { %v5942_v41 = vadd.f32 %v5936_v2, %v12541_v0 }
0x1a1f   :  { %10294 = vtanh.f32 %v5941_v1 }
0x1a20   :  { %v7503_v57 = vmul.f32 -1.442695, %v5942_v41 }
0x1a22   :  { %10296 = vpow2.f32 %v7503_v57 }
0x1a29   :  { %v10295_v8 = vpop.eup %10294 }
0x1a2a   :  { %v5963_v35 = vmul.f32 %v10295_v8, %v10293_v15 }
0x1a2c   :  { %v10297_v52 = vpop.eup %10296  ;;  %v12545_v34 = vadd.f32 %v5963_v35, %v5962_v11 }
0x1a2d   :  { %v5959_v40 = vadd.f32 1.0, %v10297_v52 }
0x1a2e   :  { %10298 = vtanh.f32 %v12545_v34 }
0x1a2f   :  { %10300 = vrcp.f32 %v5959_v40 }
0x1a38   :  { %v10299_v33 = vpop.eup %10298 }
0x1a39   :  { %v10301_v10 = vpop.eup %10300 }
0x1a3a   :  { %v5966_v37 = vmul.f32 %v10301_v10, %v10299_v33 }
0x1a3c   :  { %6032 = vmatmul.mubr.f32.vlgmr.msra.gmra.mrb[60].mxu0 %v5966_v37  ;;  %6103 = vmatmul.mubr.f32.vlgmr.msra.gmra.mrb[76].mxu1 %v5966_v37 }
0x1a3d   :  { %9485 = vmatpush1.bf16.msra.mxu0 %v12290_v58  ;;  %9517 = vmatpush1.bf16.msra.mxu1 %v12432_v4 }
0x1a3e   :  { %9487 = vmatprep.subr.bf16.mxu0 %v12308_v32  ;;  %9519 = vmatprep.subr.bf16.mxu1 %v12435_v49 }
0x1a3f   :  { %6219 = vmatprep.mubr.f32.mxu0 %v12941_v9  ;;  %6290 = vmatprep.mubr.f32.mxu1 %v12941_v9 }
0x1a41   :  { %9489 = vmatpush1.bf16.msra.mxu0 %v12311_v14  ;;  %9521 = vmatpush1.bf16.msra.mxu1 %v12440_v17 }
0x1a42   :  { %9491 = vmatprep.subr.bf16.mxu0 %v12329_v26  ;;  %9523 = vmatprep.subr.bf16.mxu1 %v12444_v18 }
0x1a45   :  { %9493 = vmatpush1.bf16.msra.mxu0 %v12335_v24  ;;  %9525 = vmatpush1.bf16.msra.mxu1 %v12449_v5 }
0x1a46   :  { %9495 = vmatprep.subr.bf16.mxu0 %v12341_v59  ;;  %9527 = vmatprep.subr.bf16.mxu1 %v12453_v46 }
0x1a49   :  { %9497 = vmatpush1.bf16.msra.mxu0 %v12347_v60  ;;  %9529 = vmatpush1.bf16.msra.mxu1 %v12456_v27 }
0x1a4a   :  { %9499 = vmatprep.subr.bf16.mxu0 %v12353_v36  ;;  %9531 = vmatprep.subr.bf16.mxu1 %v12459_v12 }
0x1a4d   :  { %9501 = vmatpush1.bf16.msra.mxu0 %v12363_v31  ;;  %9533 = vmatpush1.bf16.msra.mxu1 %v12462_v20 }
0x1a4e   :  { %9503 = vmatprep.subr.bf16.mxu0 %v12366_v23  ;;  %9535 = vmatprep.subr.bf16.mxu1 %v12465_v53 }
0x1a51   :  { %9505 = vmatpush1.bf16.msra.mxu0 %v12382_v48  ;;  %9537 = vmatpush1.bf16.msra.mxu1 %v12468_v16 }
0x1a52   :  { %9507 = vmatprep.subr.bf16.mxu0 %v12385_v13  ;;  %9539 = vmatprep.subr.bf16.mxu1 %v12471_v54 }
0x1a55   :  { %9509 = vmatpush1.bf16.msra.mxu0 %v12389_v50  ;;  %9541 = vmatpush1.bf16.msra.mxu1 %v12474_v21 }
0x1a56   :  { %9511 = vmatprep.subr.bf16.mxu0 %v12393_v7  ;;  %9543 = vmatprep.subr.bf16.mxu1 %v12477_v25 }
0x1a59   :  { %9513 = vmatpush1.bf16.msra.mxu0 %v12395_v44  ;;  %9545 = vmatpush1.bf16.msra.mxu1 %v12480_v51 }
0x1a5a   :  { %9547 = vmatprep.subr.bf16.mxu0 %v12287_v30  ;;  %9579 = vmatprep.subr.bf16.mxu1 %v12429_v3 }
0x1b0f   :  { %v6033_v22 = vpop.f32.mrb[60].mxu0  ;;  %v6104_v29 = vpop.f32.mrb[76].mxu1 }
0x1b10   :  { %v6113_v19 = vrot.slane %v6033_v22, 6  ;;  %v6035_v55 = vpop.f32.mrb[61].mxu0  ;;  %v6106_v1 = vpop.f32.mrb[77].mxu1  ;;  %v6115_v35 = vrot.slane %v6104_v29, 6 }
0x1b11   :  { %v6114_v2 = vrot.slane %v6035_v55, 6  ;;  %v6116_v8 = vrot.slane %v6106_v1, 6  ;;  %v6145_v1 = vrot.slane %v12545_v34, 6 }
0x1b12   :  { %v6121_v41 = vadd.f32 %v6113_v19, %v12531_v42  ;;  %v6123_v40 = vadd.f32 %v6115_v35, %v12539_v45 }
0x1b13   :  { %v6122_v57 = vadd.f32 %v6114_v2, %v12529_v61  ;;  %v6124_v11 = vadd.f32 %v6116_v8, %v12541_v0 }
0x1b14   :  { %v7504_v6 = vmul.f32 -1.442695, %v6121_v41 }
0x1b15   :  { %v7505_v15 = vmul.f32 -1.442695, %v6122_v57  ;;  %v7506_v52 = vmul.f32 -1.442695, %v6124_v11 }
0x1b16   :  { %10302 = vpow2.f32 %v7504_v6 }
0x1b17   :  { %10304 = vpow2.f32 %v7505_v15 }
0x1b18   :  { %10306 = vpow2.f32 %v7506_v52 }
0x1b19   :  { %10308 = vtanh.f32 %v6123_v40 }
0x1b20   :  { %v10303_v33 = vpop.eup %10302 }
0x1b21   :  { %v10305_v10 = vpop.eup %10304  ;;  %v6128_v37 = vadd.f32 1.0, %v10303_v33 }
0x1b22   :  { %v6134_v22 = vadd.f32 1.0, %v10305_v10  ;;  %v10307_v19 = vpop.eup %10306 }
0x1b23   :  { %10310 = vrcp.f32 %v6128_v37  ;;  %v10309_v55 = vpop.eup %10308  ;;  %v6141_v6 = vadd.f32 1.0, %v10307_v19 }
0x1b24   :  { %10312 = vrcp.f32 %v6134_v22 }
0x1b25   :  { %10314 = vrcp.f32 %v6141_v6 }
0x1b2d   :  { %v10311_v2 = vpop.eup %10310 }
0x1b2e   :  { %v10313_v41 = vpop.eup %10312  ;;  %v6148_v57 = vmul.f32 %v10311_v2, %v10309_v55 }
0x1b2f   :  { %v6147_v29 = vmul.f32 %v10313_v41, %v6145_v1  ;;  %v10315_v8 = vpop.eup %10314 }
0x1b31   :  { %v12587_v15 = vadd.f32 %v6148_v57, %v6147_v29 }
0x1b33   :  { %10316 = vtanh.f32 %v12587_v15 }
0x1b3d   :  { %v10317_v11 = vpop.eup %10316 }
0x1b3e   :  { %v6151_v35 = vmul.f32 %v10317_v11, %v10315_v8 }
0x1b40   :  { %v6153_v52 = vrot.slane %v6151_v35, 2 }
0x1b42   :  { %6220 = vmatmul.mubr.f32.vlgmr.msra.gmra.mrb[62].mxu0 %v6153_v52  ;;  %6291 = vmatmul.mubr.f32.vlgmr.msra.gmra.mrb[78].mxu1 %v6153_v52 }
0x1b43   :  { %9549 = vmatpush1.bf16.msra.mxu0 %v12290_v58  ;;  %9581 = vmatpush1.bf16.msra.mxu1 %v12432_v4 }
0x1b44   :  { %9551 = vmatprep.subr.bf16.mxu0 %v12308_v32  ;;  %9583 = vmatprep.subr.bf16.mxu1 %v12435_v49 }
0x1b45   :  { %6407 = vmatprep.mubr.f32.mxu0 %v12941_v9  ;;  %6478 = vmatprep.mubr.f32.mxu1 %v12941_v9 }
0x1b47   :  { %9553 = vmatpush1.bf16.msra.mxu0 %v12311_v14  ;;  %9585 = vmatpush1.bf16.msra.mxu1 %v12440_v17 }
0x1b48   :  { %9555 = vmatprep.subr.bf16.mxu0 %v12329_v26  ;;  %9587 = vmatprep.subr.bf16.mxu1 %v12444_v18 }
0x1b4b   :  { %9557 = vmatpush1.bf16.msra.mxu0 %v12335_v24  ;;  %9589 = vmatpush1.bf16.msra.mxu1 %v12449_v5 }
0x1b4c   :  { %9559 = vmatprep.subr.bf16.mxu0 %v12341_v59  ;;  %9591 = vmatprep.subr.bf16.mxu1 %v12453_v46 }
0x1b4f   :  { %9561 = vmatpush1.bf16.msra.mxu0 %v12347_v60  ;;  %9593 = vmatpush1.bf16.msra.mxu1 %v12456_v27 }
0x1b50   :  { %9563 = vmatprep.subr.bf16.mxu0 %v12353_v36  ;;  %9595 = vmatprep.subr.bf16.mxu1 %v12459_v12 }
0x1b53   :  { %9565 = vmatpush1.bf16.msra.mxu0 %v12363_v31  ;;  %9597 = vmatpush1.bf16.msra.mxu1 %v12462_v20 }
0x1b54   :  { %9567 = vmatprep.subr.bf16.mxu0 %v12366_v23  ;;  %9599 = vmatprep.subr.bf16.mxu1 %v12465_v53 }
0x1b57   :  { %9569 = vmatpush1.bf16.msra.mxu0 %v12382_v48  ;;  %9601 = vmatpush1.bf16.msra.mxu1 %v12468_v16 }
0x1b58   :  { %9571 = vmatprep.subr.bf16.mxu0 %v12385_v13  ;;  %9603 = vmatprep.subr.bf16.mxu1 %v12471_v54 }
0x1b5b   :  { %9573 = vmatpush1.bf16.msra.mxu0 %v12389_v50  ;;  %9605 = vmatpush1.bf16.msra.mxu1 %v12474_v21 }
0x1b5c   :  { %9575 = vmatprep.subr.bf16.mxu0 %v12393_v7  ;;  %9607 = vmatprep.subr.bf16.mxu1 %v12477_v25 }
0x1b5f   :  { %9577 = vmatpush1.bf16.msra.mxu0 %v12395_v44  ;;  %9609 = vmatpush1.bf16.msra.mxu1 %v12480_v51 }
0x1b60   :  { %9611 = vmatprep.subr.bf16.mxu0 %v12287_v30  ;;  %9643 = vmatprep.subr.bf16.mxu1 %v12429_v3 }
0x1c15   :  { %v6221_v34 = vpop.f32.mrb[62].mxu0  ;;  %v6292_v40 = vpop.f32.mrb[78].mxu1 }
0x1c16   :  { %v6301_v33 = vrot.slane %v6221_v34, 4  ;;  %v6223_v10 = vpop.f32.mrb[63].mxu0  ;;  %v6294_v37 = vpop.f32.mrb[79].mxu1  ;;  %v6303_v6 = vrot.slane %v6292_v40, 4 }
0x1c17   :  { %v6302_v22 = vrot.slane %v6223_v10, 4  ;;  %v6304_v41 = vrot.slane %v6294_v37, 4  ;;  %v6333_v37 = vrot.slane %v12587_v15, 6 }
0x1c18   :  { %v6309_v19 = vadd.f32 %v6301_v33, %v12531_v42  ;;  %v6311_v8 = vadd.f32 %v6303_v6, %v12539_v45 }
0x1c19   :  { %v6310_v55 = vadd.f32 %v6302_v22, %v12529_v61  ;;  %v6312_v57 = vadd.f32 %v6304_v41, %v12541_v0 }
0x1c1a   :  { %v7507_v2 = vmul.f32 -1.442695, %v6309_v19 }
0x1c1b   :  { %v7508_v1 = vmul.f32 -1.442695, %v6310_v55  ;;  %v7509_v29 = vmul.f32 -1.442695, %v6312_v57 }
0x1c1c   :  { %10318 = vpow2.f32 %v7507_v2 }
0x1c1d   :  { %10320 = vpow2.f32 %v7508_v1 }
0x1c1e   :  { %10322 = vpow2.f32 %v7509_v29 }
0x1c1f   :  { %10324 = vtanh.f32 %v6311_v8 }
0x1c26   :  { %v10319_v11 = vpop.eup %10318 }
0x1c27   :  { %v10321_v35 = vpop.eup %10320  ;;  %v6316_v52 = vadd.f32 1.0, %v10319_v11 }
0x1c28   :  { %v6322_v34 = vadd.f32 1.0, %v10321_v35  ;;  %v10323_v33 = vpop.eup %10322 }
0x1c29   :  { %10326 = vrcp.f32 %v6316_v52  ;;  %v10325_v10 = vpop.eup %10324  ;;  %v6329_v2 = vadd.f32 1.0, %v10323_v33 }
0x1c2a   :  { %10328 = vrcp.f32 %v6322_v34 }
0x1c2b   :  { %10330 = vrcp.f32 %v6329_v2 }
0x1c33   :  { %v10327_v22 = vpop.eup %10326 }
0x1c34   :  { %v10329_v19 = vpop.eup %10328  ;;  %v6336_v55 = vmul.f32 %v10327_v22, %v10325_v10 }
0x1c35   :  { %v6335_v40 = vmul.f32 %v10329_v19, %v6333_v37  ;;  %v10331_v41 = vpop.eup %10330 }
0x1c37   :  { %v12629_v1 = vadd.f32 %v6336_v55, %v6335_v40 }
0x1c39   :  { %10332 = vtanh.f32 %v12629_v1 }
0x1c43   :  { %v10333_v57 = vpop.eup %10332 }
0x1c44   :  { %v6339_v6 = vmul.f32 %v10333_v57, %v10331_v41 }
0x1c46   :  { %v6341_v29 = vrot.slane %v6339_v6, 4 }
0x1c48   :  { %6408 = vmatmul.mubr.f32.vlgmr.msra.gmra.mrb[64].mxu0 %v6341_v29  ;;  %6479 = vmatmul.mubr.f32.vlgmr.msra.gmra.mrb[80].mxu1 %v6341_v29 }
0x1c49   :  { %9613 = vmatpush1.bf16.msra.mxu0 %v12290_v58  ;;  %9645 = vmatpush1.bf16.msra.mxu1 %v12432_v4 }
0x1c4a   :  { %9615 = vmatprep.subr.bf16.mxu0 %v12308_v32  ;;  %9647 = vmatprep.subr.bf16.mxu1 %v12435_v49 }
0x1c4b   :  { %6595 = vmatprep.mubr.f32.mxu0 %v12941_v9  ;;  %6666 = vmatprep.mubr.f32.mxu1 %v12941_v9 }
0x1c4d   :  { %9617 = vmatpush1.bf16.msra.mxu0 %v12311_v14  ;;  %9649 = vmatpush1.bf16.msra.mxu1 %v12440_v17 }
0x1c4e   :  { %9619 = vmatprep.subr.bf16.mxu0 %v12329_v26  ;;  %9651 = vmatprep.subr.bf16.mxu1 %v12444_v18 }
0x1c51   :  { %9621 = vmatpush1.bf16.msra.mxu0 %v12335_v24  ;;  %9653 = vmatpush1.bf16.msra.mxu1 %v12449_v5 }
0x1c52   :  { %9623 = vmatprep.subr.bf16.mxu0 %v12341_v59  ;;  %9655 = vmatprep.subr.bf16.mxu1 %v12453_v46 }
0x1c55   :  { %9625 = vmatpush1.bf16.msra.mxu0 %v12347_v60  ;;  %9657 = vmatpush1.bf16.msra.mxu1 %v12456_v27 }
0x1c56   :  { %9627 = vmatprep.subr.bf16.mxu0 %v12353_v36  ;;  %9659 = vmatprep.subr.bf16.mxu1 %v12459_v12 }
0x1c59   :  { %9629 = vmatpush1.bf16.msra.mxu0 %v12363_v31  ;;  %9661 = vmatpush1.bf16.msra.mxu1 %v12462_v20 }
0x1c5a   :  { %9631 = vmatprep.subr.bf16.mxu0 %v12366_v23  ;;  %9663 = vmatprep.subr.bf16.mxu1 %v12465_v53 }
0x1c5d   :  { %9633 = vmatpush1.bf16.msra.mxu0 %v12382_v48  ;;  %9665 = vmatpush1.bf16.msra.mxu1 %v12468_v16 }
0x1c5e   :  { %9635 = vmatprep.subr.bf16.mxu0 %v12385_v13  ;;  %9667 = vmatprep.subr.bf16.mxu1 %v12471_v54 }
0x1c61   :  { %9637 = vmatpush1.bf16.msra.mxu0 %v12389_v50  ;;  %9669 = vmatpush1.bf16.msra.mxu1 %v12474_v21 }
0x1c62   :  { %9639 = vmatprep.subr.bf16.mxu0 %v12393_v7  ;;  %9671 = vmatprep.subr.bf16.mxu1 %v12477_v25 }
0x1c65   :  { %9641 = vmatpush1.bf16.msra.mxu0 %v12395_v44  ;;  %9673 = vmatpush1.bf16.msra.mxu1 %v12480_v51 }
0x1c66   :  { %9675 = vmatprep.subr.bf16.mxu0 %v12287_v30  ;;  %9707 = vmatprep.subr.bf16.mxu1 %v12429_v3 }
0x1d1b   :  { %v6409_v15 = vpop.f32.mrb[64].mxu0  ;;  %v6480_v8 = vpop.f32.mrb[80].mxu1 }
0x1d1c   :  { %v6489_v11 = vrot.slane %v6409_v15, 2  ;;  %v6411_v35 = vpop.f32.mrb[65].mxu0  ;;  %v6482_v52 = vpop.f32.mrb[81].mxu1  ;;  %v6491_v2 = vrot.slane %v6480_v8, 2 }
0x1d1d   :  { %v6490_v34 = vrot.slane %v6411_v35, 2  ;;  %v6492_v19 = vrot.slane %v6482_v52, 2  ;;  %v6521_v35 = vrot.slane %v12629_v1, 6 }
0x1d1e   :  { %v6497_v33 = vadd.f32 %v6489_v11, %v12531_v42  ;;  %v6499_v41 = vadd.f32 %v6491_v2, %v12539_v45 }
0x1d1f   :  { %v6498_v10 = vadd.f32 %v6490_v34, %v12529_v61  ;;  %v6500_v55 = vadd.f32 %v6492_v19, %v12541_v0 }
0x1d20   :  { %v7510_v22 = vmul.f32 -1.442695, %v6497_v33 }
0x1d21   :  { %v7511_v37 = vmul.f32 -1.442695, %v6498_v10  ;;  %v7512_v40 = vmul.f32 -1.442695, %v6500_v55 }
0x1d22   :  { %10334 = vpow2.f32 %v7510_v22 }
0x1d23   :  { %10336 = vpow2.f32 %v7511_v37 }
0x1d24   :  { %10338 = vpow2.f32 %v7512_v40 }
0x1d25   :  { %10340 = vtanh.f32 %v6499_v41 }
0x1d2c   :  { %v10335_v57 = vpop.eup %10334 }
0x1d2d   :  { %v10337_v6 = vpop.eup %10336  ;;  %v6504_v29 = vadd.f32 1.0, %v10335_v57 }
0x1d2e   :  { %v6510_v15 = vadd.f32 1.0, %v10337_v6  ;;  %v10339_v61 = vpop.eup %10338 }
0x1d2f   :  { %10342 = vrcp.f32 %v6504_v29  ;;  %v10341_v42 = vpop.eup %10340  ;;  %v6517_v0 = vadd.f32 1.0, %v10339_v61 }
0x1d30   :  { %10344 = vrcp.f32 %v6510_v15 }
0x1d31   :  { %10346 = vrcp.f32 %v6517_v0 }
0x1d39   :  { %v10343_v11 = vpop.eup %10342 }
0x1d3a   :  { %v10345_v52 = vpop.eup %10344  ;;  %v6524_v34 = vmul.f32 %v10343_v11, %v10341_v42 }
0x1d3b   :  { %v6523_v8 = vmul.f32 %v10345_v52, %v6521_v35  ;;  %v10347_v45 = vpop.eup %10346 }
0x1d3d   :  { %v12671_v33 = vadd.f32 %v6524_v34, %v6523_v8 }
0x1d3f   :  { %10348 = vtanh.f32 %v12671_v33 }
0x1d49   :  { %v10349_v10 = vpop.eup %10348 }
0x1d4a   :  { %v6527_v22 = vmul.f32 %v10349_v10, %v10347_v45  ;;  %v6697_v45 = vrot.slane %v12671_v33, 6 }
0x1d4c   :  { %v6529_v37 = vrot.slane %v6527_v22, 6 }
0x1d4e   :  { %6596 = vmatmul.mubr.f32.vlgmr.msra.gmra.mrb[66].mxu0 %v6529_v37  ;;  %6667 = vmatmul.mubr.f32.vlgmr.msra.gmra.mrb[82].mxu1 %v6529_v37 }
0x1d4f   :  { %9677 = vmatpush1.bf16.msra.mxu0 %v12290_v58  ;;  %9709 = vmatpush1.bf16.msra.mxu1 %v12432_v4 }
0x1d50   :  { %9679 = vmatprep.subr.bf16.mxu0 %v12308_v32  ;;  %9711 = vmatprep.subr.bf16.mxu1 %v12435_v49 }
0x1d51   :  { %6768 = vmatprep.mubr.f32.mxu0 %v12941_v9  ;;  %6839 = vmatprep.mubr.f32.mxu1 %v12941_v9 }
0x1d53   :  { %9681 = vmatpush1.bf16.msra.mxu0 %v12311_v14  ;;  %9713 = vmatpush1.bf16.msra.mxu1 %v12440_v17 }
0x1d54   :  { %9683 = vmatprep.subr.bf16.mxu0 %v12329_v26  ;;  %9715 = vmatprep.subr.bf16.mxu1 %v12444_v18 }
0x1d57   :  { %9685 = vmatpush1.bf16.msra.mxu0 %v12335_v24  ;;  %9717 = vmatpush1.bf16.msra.mxu1 %v12449_v5 }
0x1d58   :  { %9687 = vmatprep.subr.bf16.mxu0 %v12341_v59  ;;  %9719 = vmatprep.subr.bf16.mxu1 %v12453_v46 }
0x1d5b   :  { %9689 = vmatpush1.bf16.msra.mxu0 %v12347_v60  ;;  %9721 = vmatpush1.bf16.msra.mxu1 %v12456_v27 }
0x1d5c   :  { %9691 = vmatprep.subr.bf16.mxu0 %v12353_v36  ;;  %9723 = vmatprep.subr.bf16.mxu1 %v12459_v12 }
0x1d5f   :  { %9693 = vmatpush1.bf16.msra.mxu0 %v12363_v31  ;;  %9725 = vmatpush1.bf16.msra.mxu1 %v12462_v20 }
0x1d60   :  { %9695 = vmatprep.subr.bf16.mxu0 %v12366_v23  ;;  %9727 = vmatprep.subr.bf16.mxu1 %v12465_v53 }
0x1d63   :  { %9697 = vmatpush1.bf16.msra.mxu0 %v12382_v48  ;;  %9729 = vmatpush1.bf16.msra.mxu1 %v12468_v16 }
0x1d64   :  { %9699 = vmatprep.subr.bf16.mxu0 %v12385_v13  ;;  %9731 = vmatprep.subr.bf16.mxu1 %v12471_v54 }
0x1d67   :  { %9701 = vmatpush1.bf16.msra.mxu0 %v12389_v50  ;;  %9733 = vmatpush1.bf16.msra.mxu1 %v12474_v21 }
0x1d68   :  { %9703 = vmatprep.subr.bf16.mxu0 %v12393_v7  ;;  %9735 = vmatprep.subr.bf16.mxu1 %v12477_v25 }
0x1d6b   :  { %9705 = vmatpush1.bf16.msra.mxu0 %v12395_v44  ;;  %9737 = vmatpush1.bf16.msra.mxu1 %v12480_v51 }
0x1d6c   :  { %9739 = vmatprep.subr.bf16.mxu0 %v12287_v30  ;;  %9771 = vmatprep.subr.bf16.mxu1 %v12429_v3 }
0x1e21   :  { %v6597_v1 = vpop.f32.mrb[66].mxu0  ;;  %v6668_v19 = vpop.f32.mrb[82].mxu1 }
0x1e22   :  { %v6673_v55 = vadd.f32 %v6597_v1, %v12533_v39  ;;  %v6599_v2 = vpop.f32.mrb[67].mxu0  ;;  %v6670_v40 = vpop.f32.mrb[83].mxu1  ;;  %v6675_v61 = vadd.f32 %v6668_v19, %v12508_v62 }
0x1e23   :  { %v6674_v41 = vadd.f32 %v6599_v2, %v12535_v63  ;;  %v6676_v29 = vadd.f32 %v6670_v40, %v12510_v28 }
0x1e24   :  { %v7513_v57 = vmul.f32 -1.442695, %v6673_v55 }
0x1e25   :  { %v7514_v6 = vmul.f32 -1.442695, %v6674_v41  ;;  %v7515_v15 = vmul.f32 -1.442695, %v6676_v29 }
0x1e26   :  { %10350 = vpow2.f32 %v7513_v57 }
0x1e27   :  { %10352 = vpow2.f32 %v7514_v6 }
0x1e28   :  { %10354 = vpow2.f32 %v7515_v15 }
0x1e29   :  { %10356 = vtanh.f32 %v6675_v61 }
0x1e30   :  { %v10351_v42 = vpop.eup %10350 }
0x1e31   :  { %v10353_v11 = vpop.eup %10352  ;;  %v6680_v35 = vadd.f32 1.0, %v10351_v42 }
0x1e32   :  { %v6686_v52 = vadd.f32 1.0, %v10353_v11  ;;  %v10355_v34 = vpop.eup %10354 }
0x1e33   :  { %10358 = vrcp.f32 %v6680_v35  ;;  %v10357_v0 = vpop.eup %10356  ;;  %v6693_v37 = vadd.f32 1.0, %v10355_v34 }
0x1e34   :  { %10360 = vrcp.f32 %v6686_v52 }
0x1e35   :  { %10362 = vrcp.f32 %v6693_v37 }
0x1e3d   :  { %v10359_v8 = vpop.eup %10358 }
0x1e3e   :  { %v10361_v10 = vpop.eup %10360  ;;  %v6700_v22 = vmul.f32 %v10359_v8, %v10357_v0 }
0x1e3f   :  { %v6699_v1 = vmul.f32 %v10361_v10, %v6697_v45  ;;  %v10363_v19 = vpop.eup %10362 }
0x1e41   :  { %v12713_v55 = vadd.f32 %v6700_v22, %v6699_v1 }
0x1e43   :  { %10364 = vtanh.f32 %v12713_v55 }
0x1e4d   :  { %v10365_v2 = vpop.eup %10364 }
0x1e4e   :  { %v6703_v40 = vmul.f32 %v10365_v2, %v10363_v19  ;;  %v6882_v2 = vrot.slane %v12713_v55, 6 }
0x1e50   :  { %6769 = vmatmul.mubr.f32.vlgmr.msra.gmra.mrb[68].mxu0 %v6703_v40  ;;  %6840 = vmatmul.mubr.f32.vlgmr.msra.gmra.mrb[84].mxu1 %v6703_v40 }
0x1e51   :  { %9741 = vmatpush1.bf16.msra.mxu0 %v12290_v58  ;;  %9773 = vmatpush1.bf16.msra.mxu1 %v12432_v4 }
0x1e52   :  { %9743 = vmatprep.subr.bf16.mxu0 %v12308_v32  ;;  %9775 = vmatprep.subr.bf16.mxu1 %v12435_v49 }
0x1e53   :  { %6956 = vmatprep.mubr.f32.mxu0 %v12941_v9  ;;  %7027 = vmatprep.mubr.f32.mxu1 %v12941_v9 }
0x1e55   :  { %9745 = vmatpush1.bf16.msra.mxu0 %v12311_v14  ;;  %9777 = vmatpush1.bf16.msra.mxu1 %v12440_v17 }
0x1e56   :  { %9747 = vmatprep.subr.bf16.mxu0 %v12329_v26  ;;  %9779 = vmatprep.subr.bf16.mxu1 %v12444_v18 }
0x1e59   :  { %9749 = vmatpush1.bf16.msra.mxu0 %v12335_v24  ;;  %9781 = vmatpush1.bf16.msra.mxu1 %v12449_v5 }
0x1e5a   :  { %9751 = vmatprep.subr.bf16.mxu0 %v12341_v59  ;;  %9783 = vmatprep.subr.bf16.mxu1 %v12453_v46 }
0x1e5d   :  { %9753 = vmatpush1.bf16.msra.mxu0 %v12347_v60  ;;  %9785 = vmatpush1.bf16.msra.mxu1 %v12456_v27 }
0x1e5e   :  { %9755 = vmatprep.subr.bf16.mxu0 %v12353_v36  ;;  %9787 = vmatprep.subr.bf16.mxu1 %v12459_v12 }
0x1e61   :  { %9757 = vmatpush1.bf16.msra.mxu0 %v12363_v31  ;;  %9789 = vmatpush1.bf16.msra.mxu1 %v12462_v20 }
0x1e62   :  { %9759 = vmatprep.subr.bf16.mxu0 %v12366_v23  ;;  %9791 = vmatprep.subr.bf16.mxu1 %v12465_v53 }
0x1e65   :  { %9761 = vmatpush1.bf16.msra.mxu0 %v12382_v48  ;;  %9793 = vmatpush1.bf16.msra.mxu1 %v12468_v16 }
0x1e66   :  { %9763 = vmatprep.subr.bf16.mxu0 %v12385_v13  ;;  %9795 = vmatprep.subr.bf16.mxu1 %v12471_v54 }
0x1e69   :  { %9765 = vmatpush1.bf16.msra.mxu0 %v12389_v50  ;;  %9797 = vmatpush1.bf16.msra.mxu1 %v12474_v21 }
0x1e6a   :  { %9767 = vmatprep.subr.bf16.mxu0 %v12393_v7  ;;  %9799 = vmatprep.subr.bf16.mxu1 %v12477_v25 }
0x1e6d   :  { %9769 = vmatpush1.bf16.msra.mxu0 %v12395_v44  ;;  %9801 = vmatpush1.bf16.msra.mxu1 %v12480_v51 }
0x1e6e   :  { %9803 = vmatprep.subr.bf16.mxu0 %v12287_v30  ;;  %9835 = vmatprep.subr.bf16.mxu1 %v12429_v3 }
0x1f23   :  { %v6770_v33 = vpop.f32.mrb[68].mxu0  ;;  %v6841_v41 = vpop.f32.mrb[84].mxu1 }
0x1f24   :  { %v6850_v57 = vrot.slane %v6770_v33, 6  ;;  %v6772_v6 = vpop.f32.mrb[69].mxu0  ;;  %v6843_v29 = vpop.f32.mrb[85].mxu1  ;;  %v6852_v30 = vrot.slane %v6841_v41, 6 }
0x1f25   :  { %v6851_v15 = vrot.slane %v6772_v6, 6  ;;  %v6853_v52 = vrot.slane %v6843_v29, 6 }
0x1f26   :  { %v6858_v61 = vadd.f32 %v6850_v57, %v12533_v39  ;;  %v6860_v3 = vadd.f32 %v6852_v30, %v12508_v62  ;;  %v7267_v30 = vld [vmem:[%s12910_s17 + $0x10] sm:$0xff] }
0x1f27   :  { %v6859_v42 = vadd.f32 %v6851_v15, %v12535_v63  ;;  %v6861_v34 = vadd.f32 %v6853_v52, %v12510_v28  ;;  %v7266_v52 = vld [vmem:[%s12910_s17 + $0x8] sm:$0xff] }
0x1f28   :  { %v7516_v11 = vmul.f32 -1.442695, %v6858_v61 }
0x1f29   :  { %v7517_v35 = vmul.f32 -1.442695, %v6859_v42  ;;  %v7518_v0 = vmul.f32 -1.442695, %v6861_v34 }
0x1f2a   :  { %10366 = vpow2.f32 %v7516_v11 }
0x1f2b   :  { %10368 = vpow2.f32 %v7517_v35  ;;  %v7265_v35 = vld [vmem:[%s12910_s17] sm:$0xff] }
0x1f2c   :  { %10370 = vpow2.f32 %v7518_v0  ;;  %v9867_v34 = vpack.c.bf16 %v7266_v52, %v7265_v35 }
0x1f2d   :  { %10372 = vtanh.f32 %v6860_v3  ;;  %v7269_v3 = vld [vmem:[%s12910_s17 + $0x20] sm:$0xff] }
0x1f34   :  { %v10367_v8 = vpop.eup %10366 }
0x1f35   :  { %v10369_v45 = vpop.eup %10368  ;;  %v6865_v10 = vadd.f32 1.0, %v10367_v8  ;;  %v7270_v8 = vld [vmem:[%s12910_s17 + $0x28] sm:$0xff] }
0x1f36   :  { %v6871_v22 = vadd.f32 1.0, %v10369_v45  ;;  %v10371_v37 = vpop.eup %10370  ;;  %v9873_v45 = vpack.c.bf16 %v7270_v8, %v7269_v3 }
0x1f37   :  { %10374 = vrcp.f32 %v6865_v10  ;;  %v10373_v1 = vpop.eup %10372  ;;  %v6878_v57 = vadd.f32 1.0, %v10371_v37  ;;  %v7271_v10 = vld [vmem:[%s12910_s17 + $0x30] sm:$0xff] }
0x1f38   :  { %10376 = vrcp.f32 %v6871_v22  ;;  %v7272_v22 = vld [vmem:[%s12910_s17 + $0x38] sm:$0xff] }
0x1f39   :  { %10378 = vrcp.f32 %v6878_v57  ;;  %v9876_v37 = vpack.c.bf16 %v7272_v22, %v7271_v10 }
0x1f41   :  { %v10375_v19 = vpop.eup %10374 }
0x1f42   :  { %v10377_v40 = vpop.eup %10376  ;;  %v6885_v33 = vmul.f32 %v10375_v19, %v10373_v1  ;;  %v7273_v1 = vld [vmem:[%s12910_s17 + $0x40] sm:$0xff]  ;;  %v7274_v19 = vld [vmem:[%s12910_s17 + $0x48] sm:$0xff] }
0x1f43   :  { %v6884_v41 = vmul.f32 %v10377_v40, %v6882_v2  ;;  %v10379_v29 = vpop.eup %10378  ;;  %v9879_v2 = vpack.c.bf16 %v7274_v19, %v7273_v1  ;;  %v7275_v40 = vld [vmem:[%s12910_s17 + $0x50] sm:$0xff] }
0x1f45   :  { %v12755_v6 = vadd.f32 %v6885_v33, %v6884_v41  ;;  %v7276_v33 = vld [vmem:[%s12910_s17 + $0x58] sm:$0xff]  ;;  %v7277_v41 = vld [vmem:[%s12910_s17 + $0x60] sm:$0xff] }
0x1f46   :  { %v9882_v57 = vpack.c.bf16 %v7276_v33, %v7275_v40 }
0x1f47   :  { %10380 = vtanh.f32 %v12755_v6 }
0x1f51   :  { %v10381_v15 = vpop.eup %10380 }
0x1f52   :  { %v6888_v61 = vmul.f32 %v10381_v15, %v10379_v29  ;;  %v7279_v15 = vld [vmem:[%s12910_s17 + $0x70] sm:$0xff] }
0x1f54   :  { %v6890_v42 = vrot.slane %v6888_v61, 2  ;;  %v7280_v61 = vld [vmem:[%s12910_s17 + $0x78] sm:$0xff] }
0x1f56   :  { %6957 = vmatmul.mubr.f32.vlgmr.msra.gmra.mrb[70].mxu0 %v6890_v42  ;;  %7028 = vmatmul.mubr.f32.vlgmr.msra.gmra.mrb[86].mxu1 %v6890_v42  ;;  %v9888_v42 = vpack.c.bf16 %v7280_v61, %v7279_v15 }
0x1f57   :  { %9805 = vmatpush1.bf16.msra.mxu0 %v12290_v58  ;;  %9837 = vmatpush1.bf16.msra.mxu1 %v12432_v4 }
0x1f58   :  { %9807 = vmatprep.subr.bf16.mxu0 %v12308_v32  ;;  %9839 = vmatprep.subr.bf16.mxu1 %v12435_v49 }
0x1f59   :  { %7144 = vmatprep.mubr.f32.mxu0 %v12941_v9  ;;  %7215 = vmatprep.mubr.f32.mxu1 %v12941_v9 }
0x1f5b   :  { %9809 = vmatpush1.bf16.msra.mxu0 %v12311_v14  ;;  %9841 = vmatpush1.bf16.msra.mxu1 %v12440_v17 }
0x1f5c   :  { %9811 = vmatprep.subr.bf16.mxu0 %v12329_v26  ;;  %9843 = vmatprep.subr.bf16.mxu1 %v12444_v18 }
0x1f5f   :  { %9813 = vmatpush1.bf16.msra.mxu0 %v12335_v24  ;;  %9845 = vmatpush1.bf16.msra.mxu1 %v12449_v5 }
0x1f60   :  { %9815 = vmatprep.subr.bf16.mxu0 %v12341_v59  ;;  %9847 = vmatprep.subr.bf16.mxu1 %v12453_v46 }
0x1f63   :  { %9817 = vmatpush1.bf16.msra.mxu0 %v12347_v60  ;;  %9849 = vmatpush1.bf16.msra.mxu1 %v12456_v27 }
0x1f64   :  { %9819 = vmatprep.subr.bf16.mxu0 %v12353_v36  ;;  %9851 = vmatprep.subr.bf16.mxu1 %v12459_v12  ;;  %v7070_v12 = vrot.slane %v12755_v6, 6  ;;  %v7278_v6 = vld [vmem:[%s12910_s17 + $0x68] sm:$0xff] }
0x1f65   :  { %v9885_v29 = vpack.c.bf16 %v7278_v6, %v7277_v41 }
0x1f67   :  { %9821 = vmatpush1.bf16.msra.mxu0 %v12363_v31  ;;  %9853 = vmatpush1.bf16.msra.mxu1 %v12462_v20 }
0x1f68   :  { %9823 = vmatprep.subr.bf16.mxu0 %v12366_v23  ;;  %9855 = vmatprep.subr.bf16.mxu1 %v12465_v53 }
0x1f6b   :  { %9825 = vmatpush1.bf16.msra.mxu0 %v12382_v48  ;;  %9857 = vmatpush1.bf16.msra.mxu1 %v12468_v16 }
0x1f6c   :  { %9827 = vmatprep.subr.bf16.mxu0 %v12385_v13  ;;  %9859 = vmatprep.subr.bf16.mxu1 %v12471_v54 }
0x1f6f   :  { %9829 = vmatpush1.bf16.msra.mxu0 %v12389_v50  ;;  %9861 = vmatpush1.bf16.msra.mxu1 %v12474_v21 }
0x1f70   :  { %9831 = vmatprep.subr.bf16.mxu0 %v12393_v7  ;;  %9863 = vmatprep.subr.bf16.mxu1 %v12477_v25 }
0x1f73   :  { %9833 = vmatpush1.bf16.msra.mxu0 %v12395_v44  ;;  %9865 = vmatpush1.bf16.msra.mxu1 %v12480_v51 }
0x1f74   :  { %9866 = vmatprep.subr.bf16.mxu0 %v12942_v43 }
0x2029   :  { %v6958_v58 = vpop.f32.mrb[70].mxu0  ;;  %v7029_v32 = vpop.f32.mrb[86].mxu1 }
0x202a   :  { %v7038_v14 = vrot.slane %v6958_v58, 4  ;;  %v6960_v26 = vpop.f32.mrb[71].mxu0  ;;  %v7031_v24 = vpop.f32.mrb[87].mxu1  ;;  %v7040_v50 = vrot.slane %v7029_v32, 4 }
0x202b   :  { %v7039_v59 = vrot.slane %v6960_v26, 4  ;;  %v7041_v48 = vrot.slane %v7031_v24, 4 }
0x202c   :  { %v7046_v60 = vadd.f32 %v7038_v14, %v12533_v39  ;;  %v7048_v44 = vadd.f32 %v7040_v50, %v12508_v62 }
0x202d   :  { %v7047_v36 = vadd.f32 %v7039_v59, %v12535_v63  ;;  %v7049_v13 = vadd.f32 %v7041_v48, %v12510_v28 }
0x202e   :  { %v7519_v31 = vmul.f32 -1.442695, %v7046_v60 }
0x202f   :  { %v7520_v23 = vmul.f32 -1.442695, %v7047_v36  ;;  %v7521_v7 = vmul.f32 -1.442695, %v7049_v13 }
0x2030   :  { %10382 = vpow2.f32 %v7519_v31 }
0x2031   :  { %10384 = vpow2.f32 %v7520_v23 }
0x2032   :  { %10386 = vpow2.f32 %v7521_v7 }
0x2033   :  { %10388 = vtanh.f32 %v7048_v44 }
0x203a   :  { %v10383_v4 = vpop.eup %10382 }
0x203b   :  { %v10385_v49 = vpop.eup %10384  ;;  %v7053_v17 = vadd.f32 1.0, %v10383_v4 }
0x203c   :  { %v7059_v18 = vadd.f32 1.0, %v10385_v49  ;;  %v10387_v5 = vpop.eup %10386 }
0x203d   :  { %10390 = vrcp.f32 %v7053_v17  ;;  %v10389_v46 = vpop.eup %10388  ;;  %v7066_v16 = vadd.f32 1.0, %v10387_v5 }
0x203e   :  { %10392 = vrcp.f32 %v7059_v18 }
0x203f   :  { %10394 = vrcp.f32 %v7066_v16 }
0x2047   :  { %v10391_v27 = vpop.eup %10390 }
0x2048   :  { %v10393_v20 = vpop.eup %10392  ;;  %v7073_v53 = vmul.f32 %v10391_v27, %v10389_v46 }
0x2049   :  { %v7072_v54 = vmul.f32 %v10393_v20, %v7070_v12  ;;  %v10395_v25 = vpop.eup %10394 }
0x204b   :  { %v12796_v21 = vadd.f32 %v7073_v53, %v7072_v54 }
0x204d   :  { %10396 = vtanh.f32 %v12796_v21  ;;  %v7258_v5 = vrot.slane %v12796_v21, 6 }
0x2057   :  { %v10397_v51 = vpop.eup %10396 }
0x2058   :  { %v7076_v55 = vmul.f32 %v10397_v51, %v10395_v25  ;;  %v7525_v25 = vld [vmem:[%s12911_s18] ss:$0 sm:$0xff] }
0x205a   :  { %v7078_v11 = vrot.slane %v7076_v55, 4 }
0x205c   :  { %7145 = vmatmul.mubr.f32.vlgmr.msra.gmra.mrb[72].mxu0 %v7078_v11  ;;  %7216 = vmatmul.mubr.f32.vlgmr.msra.gmra.mrb[88].mxu1 %v7078_v11 }
0x205d   :  { %7679 = vmatprep.mubr.msk.f32.mxu0 %vm10593_vm1, %v12941_v9  ;;  %9868 = vmatpush3.bf16.msra.mxu0 %v9867_v34  ;;  %v7268_v9 = vld [vmem:[%s12910_s17 + $0x18] sm:$0xff] }
0x205e   :  { %9869 = vmatprep.subr.bf16.mxu0 %v12942_v43  ;;  %v9870_v0 = vpack.c.bf16 %v7268_v9, %v7267_v30 }
0x2061   :  { %9871 = vmatpush3.bf16.msra.mxu0 %v9870_v0 }
0x2062   :  { %9872 = vmatprep.subr.bf16.mxu0 %v12942_v43 }
0x2065   :  { %9874 = vmatpush3.bf16.msra.mxu0 %v9873_v45 }
0x2066   :  { %9875 = vmatprep.subr.bf16.mxu0 %v12942_v43 }
0x2069   :  { %9877 = vmatpush3.bf16.msra.mxu0 %v9876_v37 }
0x206a   :  { %9878 = vmatprep.subr.bf16.mxu0 %v12942_v43 }
0x206d   :  { %9880 = vmatpush3.bf16.msra.mxu0 %v9879_v2 }
0x206e   :  { %9881 = vmatprep.subr.bf16.mxu0 %v12942_v43 }
0x2071   :  { %9883 = vmatpush3.bf16.msra.mxu0 %v9882_v57 }
0x2072   :  { %9884 = vmatprep.subr.bf16.mxu0 %v12942_v43 }
0x2075   :  { %9886 = vmatpush3.bf16.msra.mxu0 %v9885_v29 }
0x2076   :  { %9887 = vmatprep.subr.bf16.mxu0 %v12942_v43 }
0x2079   :  { %9889 = vmatpush3.bf16.msra.mxu0 %v9888_v42 }
0x212f   :  { %v7146_v58 = vpop.f32.mrb[72].mxu0  ;;  %v7217_v32 = vpop.f32.mrb[88].mxu1 }
0x2130   :  { %v7226_v14 = vrot.slane %v7146_v58, 2  ;;  %v7148_v26 = vpop.f32.mrb[73].mxu0  ;;  %v7219_v24 = vpop.f32.mrb[89].mxu1  ;;  %v7228_v50 = vrot.slane %v7217_v32, 2 }
0x2131   :  { %v7227_v59 = vrot.slane %v7148_v26, 2  ;;  %v7229_v48 = vrot.slane %v7219_v24, 2 }
0x2132   :  { %v7234_v60 = vadd.f32 %v7226_v14, %v12533_v39  ;;  %v7236_v7 = vadd.f32 %v7228_v50, %v12508_v62 }
0x2133   :  { %v7235_v36 = vadd.f32 %v7227_v59, %v12535_v63  ;;  %v7237_v13 = vadd.f32 %v7229_v48, %v12510_v28 }
0x2134   :  { %v7522_v31 = vmul.f32 -1.442695, %v7234_v60 }
0x2135   :  { %v7523_v23 = vmul.f32 -1.442695, %v7235_v36  ;;  %v7524_v43 = vmul.f32 -1.442695, %v7237_v13 }
0x2136   :  { %10398 = vpow2.f32 %v7522_v31 }
0x2137   :  { %10400 = vpow2.f32 %v7523_v23 }
0x2138   :  { %10402 = vpow2.f32 %v7524_v43 }
0x2139   :  { %10404 = vtanh.f32 %v7236_v7 }
0x2140   :  { %v10399_v44 = vpop.eup %10398 }
0x2141   :  { %v10401_v4 = vpop.eup %10400  ;;  %v7241_v49 = vadd.f32 1.0, %v10399_v44 }
0x2142   :  { %v7247_v17 = vadd.f32 1.0, %v10401_v4  ;;  %v10403_v39 = vpop.eup %10402 }
0x2143   :  { %10406 = vrcp.f32 %v7241_v49  ;;  %v10405_v63 = vpop.eup %10404  ;;  %v7254_v28 = vadd.f32 1.0, %v10403_v39 }
0x2144   :  { %10408 = vrcp.f32 %v7247_v17 }
0x2145   :  { %10410 = vrcp.f32 %v7254_v28 }
0x214d   :  { %v10407_v18 = vpop.eup %10406 }
0x214e   :  { %v10409_v46 = vpop.eup %10408  ;;  %v7261_v27 = vmul.f32 %v10407_v18, %v10405_v63 }
0x214f   :  { %v7260_v12 = vmul.f32 %v10409_v46, %v7258_v5  ;;  %v10411_v62 = vpop.eup %10410 }
0x2151   :  { %v7262_v20 = vadd.f32 %v7261_v27, %v7260_v12 }
0x2153   :  { %10412 = vtanh.f32 %v7262_v20 }
0x215d   :  { %v10413_v53 = vpop.eup %10412 }
0x215e   :  { %v7264_v16 = vmul.f32 %v10413_v53, %v10411_v62 }
0x2160   :  { %v7289_v54 = vrot.slane %v7264_v16, 6 }
0x2162   :  { %7680 = vmatmul.mubr.f32.vlgmr.msra.gmra.mrb[74].mxu0 %v7289_v54 }
0x2235   :  { %v7357_v51 = vpop.f32.mrb[74].mxu0 }
0x2236   :  { %v7358_v55 = vadd.f32 %v7525_v25, %v7357_v51  ;;  %v7681_v11 = vpop.f32.mrb[75].mxu0 }
0x2238   :  { %v7362_v21 = vadd.f32 %v12525_v47, %v7358_v55 }
0x223a   :  { %v7363_v35 = vmul.f32 0.33333334, %v7362_v21 }
0x223c   :  { %v7366_v52 = vsub.f32 %v12519_v56, %v7363_v35  ;;  %v7369_v34 = vsub.f32 %v12521_v38, %v7363_v35  ;;  %v7372_v30 = vsub.f32 %v7358_v55, %v7363_v35  ;;  %7365 = vst.msk [vmem:[#allocation12] sm:$0x3] %vm7364_vm2, %v7363_v35 }
0x223d   :  { %10541 = shalt.err (!%p10538_p2)
}
0x223e   :  { %s10542_s9 = scalar_lea.hbm %s12912_s19, 32 }
0x223f   :  { %p10543_p3 = scmp.ne.s32.totalorder %s12912_s19, %s10542_s9  ;;  %p10546_p4 = scmp.lt.u32.totalorder %s10542_s9, %s12912_s19 }
0x2241   :  { %p10548_p5 = pnand %p10546_p4, %p10543_p3 }
0x2243   :  { %10551 = shalt.err (!%p10548_p5)
}
0x2244   :  { %7393 = dma.vmem_to_hbm [thread:$0]  %s7391_s20, 32, %s12912_s19, [#allocation5]   ;;  %v7367_v56 = vmul.f32 %v7366_v52, %v7366_v52  ;;  %v7370_v38 = vmul.f32 %v7369_v34, %v7369_v34  ;;  %v7373_v9 = vmul.f32 %v7372_v30, %v7372_v30 }
0x2245   :  { %s10595_s27 = smov [#allocation13]  }
0x2246   :  { %v7371_v47 = vadd.f32 %v7370_v38, %v7367_v56  ;;  %s7400_s21 = sshll.u32 %s10595_s27, 4  ;;  %s7401_s21 = int_to_ptr.vmem [resolvable:$true] %s7400_s21 }
0x2247   :  { %s10552_s19 = scalar_lea.vmem %s7401_s21, 32  ;;  %p10557_p7 = scmp.lt.s32.totalorder %s7401_s21, %s7401_s21 }
0x2248   :  { %v7374_v0 = vadd.f32 %v7373_v9, %v7371_v47  ;;  %p10553_p6 = scmp.ne.s32.totalorder %s7401_s21, %s10552_s19  ;;  %p10558_p8 = scmp.lt.s32.totalorder %s10552_s19, %s10552_s19 }
0x224a   :  { %v7375_v3 = vmul.f32 0.5, %v7374_v0  ;;  %p10559_p9 = por %p10558_p8, %p10557_p7 }
0x224c   :  { %10414 = vrsqrt.f32 %v7375_v3  ;;  %vm7378_vm3 = vcmp.eq.f32.partialorder %v7375_v3, inf  ;;  %v7381_v10 = vand.u32 2147483648, %v7375_v3  ;;  %vm7380_vm4 = vcmp.eq.f32.partialorder %v7375_v3, 0.0  ;;  %p10560_p10 = pnand %p10559_p9, %p10553_p6 }
0x2256   :  { %v10415_v8 = vpop.eup %10414 }
0x2257   :  { %v7377_v45 = vmul.f32 %v10415_v8, %v7375_v3 }
0x2259   :  { %v7379_v22 = vsel %vm7378_vm3, %v7375_v3, %v7377_v45 }
0x225a   :  { %v7382_v37 = vsel %vm7380_vm4, %v7381_v10, %v7379_v22 }
0x225b   :  { %7383 = vst.msk [vmem:[#allocation13] sm:$0x3] %vm7364_vm2, %v7382_v37 }
0x225c   :  { %10563 = shalt.err (!%p10560_p10)
}
0x225d   :  { %s12947_s3 = sld [smem:[#allocation29_spill]] }
0x2263   :  { %s10564_s15 = scalar_lea.hbm %s12947_s3, 32 }
0x2264   :  { %p10565_p11 = scmp.ne.s32.totalorder %s12947_s3, %s10564_s15  ;;  %p10568_p12 = scmp.lt.u32.totalorder %s10564_s15, %s12947_s3 }
0x2266   :  { %p10570_p13 = pnand %p10568_p12, %p10565_p11 }
0x2268   :  { %10573 = shalt.err (!%p10570_p13)
}
0x2269   :  { %7403 = dma.vmem_to_hbm [thread:$0]  %s7401_s21, 32, %s12947_s3, [#allocation14]  }
0x226a   :  { %10580 = dma.done.wait [#allocation5], 32  }
0x226b   :  { %10581 = vsyncadd [#allocation5], 4294967264 }
0x226c   :  { %10582 = dma.done.wait [#allocation14], 32  }
0x226d   :  { %10583 = vsyncadd [#allocation14], 4294967264 }
0x226e   :  { %7410 = vsyncpa [#allocation4], 1 }
0x226f   :  { %7411 = vsyncpa [#allocation7], 1 }
0x2270   :  { %7412 = vsyncpa [#allocation10], 1 }
0x2271   :  { %7413 = vsyncpa [#allocation5], 1 }
0x2272   :  { %7414 = vsyncpa [#allocation14], 1 }

</bundles_post_ra>
